<compile_context>
chip_gen: v6e
topology: v6e:2x2x1
jax: 0.10.0
libtpu: 0.0.40
codegen_flags: <defaults>
</compile_context>

<pallas_src>
import math

import jax
import jax.numpy as jnp
from jax.experimental import pallas as pl
from jax.experimental.pallas import tpu as pltpu

GPT2_EMBED_DIM = 768
NUM_HEADS = 8
HEAD_DIM = GPT2_EMBED_DIM // NUM_HEADS   # 96
NUM_BLOCKS = 3
LN_EPS = 1e-5
NEG_INF = -1e30


# ---------------------------------------------------------------------------
# Kernel: one grid step == one (attention + residual + LayerNorm) block.
# ---------------------------------------------------------------------------
def _adapter_kernel(x_ref, mask_ref, wqkv_ref, wo_ref, vec_ref, o_ref):
    l = pl.program_id(0)
    e = wo_ref.shape[1]
    dh = e // NUM_HEADS

    # Load the input activation into the carried (constant-index) output block.
    @pl.when(l == 0)
    def _():
        o_ref[...] = x_ref[...]

    x = o_ref[...].astype(jnp.float32)           # (N, E) carried activation, f32
    xb = x.astype(jnp.bfloat16)                  # bf16 LHS for the MXU

    vecs = vec_ref[0]                            # (6, E) f32 small-vector slab
    bq, bk, bv = vecs[0:1], vecs[1:2], vecs[2:3]
    bo, gamma, beta = vecs[3:4], vecs[4:5], vecs[5:6]

    # Fused QKV projection: one bf16 MXU matmul, f32 accumulate.
    qkv = jnp.dot(xb, wqkv_ref[0], preferred_element_type=jnp.float32)   # (N, 3E)
    q = qkv[:, 0:e] + bq                         # 1/sqrt(Dh) folded into Wq / bq
    k = qkv[:, e:2 * e] + bk
    v = qkv[:, 2 * e:3 * e] + bv

    mask = mask_ref[...]                         # (N, N) additive f32 mask

    # Per-head attention; contexts concatenated, then ONE out-projection matmul.
    ctx_parts = []
    for h in range(NUM_HEADS):
        c0 = h * dh
        qh = q[:, c0:c0 + dh].astype(jnp.bfloat16)
        kh = k[:, c0:c0 + dh].astype(jnp.bfloat16)
        vh = v[:, c0:c0 + dh].astype(jnp.bfloat16)

        s = jax.lax.dot_general(qh, kh, (((1,), (1,)), ((), ())),
                                preferred_element_type=jnp.float32)      # (N, N)
        s = s + mask                              # mask applied in f32
        s = s - jnp.max(s, axis=-1, keepdims=True)
        p = jnp.exp(s)
        p = p / jnp.sum(p, axis=-1, keepdims=True)        # exact denominator
        ctx_parts.append(jnp.dot(p.astype(jnp.bfloat16), vh,
                                 preferred_element_type=jnp.float32))    # (N, dh)
    ctx = jnp.concatenate(ctx_parts, axis=-1)    # (N, E) f32, head-major layout

    attn = jnp.dot(ctx.astype(jnp.bfloat16), wo_ref[0],
                   preferred_element_type=jnp.float32) + bo

    # Residual (dropout == identity in eval mode) + LayerNorm, all in f32.
    y = x + attn
    mu = jnp.mean(y, axis=-1, keepdims=True)
    var = jnp.mean((y - mu) ** 2, axis=-1, keepdims=True)
    out = (y - mu) * jax.lax.rsqrt(var + LN_EPS) * gamma + beta

    o_ref[...] = out.astype(o_ref.dtype)         # carry; HBM writeback at grid end


# ---------------------------------------------------------------------------
# Wrapper: one pallas_call for all three blocks.
# ---------------------------------------------------------------------------
@jax.jit
def attention_adapter_pallas(video_features, kparams):
    B, S, E = video_features.shape
    N = B * S
    assert N % 8 == 0, "B*S must be a multiple of 8 (sublane alignment)"
    assert E % 128 == 0

    x2d = video_features.reshape(N, E)
    # Block-diagonal additive mask: attention only within the same batch element.
    row_b = jnp.arange(N, dtype=jnp.int32) // S
    mask = jnp.where(row_b[:, None] == row_b[None, :], 0.0, NEG_INF)
    mask = mask.astype(jnp.float32)

    out2d = pl.pallas_call(
        _adapter_kernel,
        out_shape=jax.ShapeDtypeStruct((N, E), video_features.dtype),
        grid_spec=pltpu.PrefetchScalarGridSpec(
            num_scalar_prefetch=0,
            grid=(NUM_BLOCKS,),
            in_specs=[
                pl.BlockSpec((N, E), lambda l: (0, 0)),            # x (DMA'd once)
                pl.BlockSpec((N, N), lambda l: (0, 0)),            # additive mask
                pl.BlockSpec((1, E, 3 * E), lambda l: (l, 0, 0)),  # wqkv (bf16)
                pl.BlockSpec((1, E, E), lambda l: (l, 0, 0)),      # wo   (bf16)
                pl.BlockSpec((1, 6, E), lambda l: (l, 0, 0)),      # bias/LN slab
            ],
            out_specs=pl.BlockSpec((N, E), lambda l: (0, 0)),      # resident carry
        ),
        compiler_params=pltpu.CompilerParams(
            dimension_semantics=("arbitrary",),
            vmem_limit_bytes=32 * 1024 * 1024,
        ),
    )(x2d, mask, kparams["wqkv"], kparams["wo"], kparams["vecs"])
    return out2d.reshape(B, S, E)


# ---------------------------------------------------------------------------
# Parameter construction / packing (glue, outside the kernel).
# ---------------------------------------------------------------------------
def make_block_params(key, embed_dim=GPT2_EMBED_DIM):
    """Synthetic params for one nn.MultiheadAttention + LayerNorm (PyTorch layout)."""
    k1, k2, k3, k4 = jax.random.split(key, 4)
    std = 0.02
    return dict(
        w_in=jax.random.normal(k1, (3 * embed_dim, embed_dim), jnp.float32) * std,
        b_in=jax.random.normal(k2, (3 * embed_dim,), jnp.float32) * std,
        w_out=jax.random.normal(k3, (embed_dim, embed_dim), jnp.float32) * std,
        b_out=jax.random.normal(k4, (embed_dim,), jnp.float32) * std,
        gamma=jnp.ones((embed_dim,), jnp.float32),
        beta=jnp.zeros((embed_dim,), jnp.float32),
    )


def pack_adapter_params(blocks):
    """Pack 3 PyTorch-layout blocks into stacked, un-padded, bf16 kernel params."""
    E = GPT2_EMBED_DIM
    scale = 1.0 / math.sqrt(HEAD_DIM)
    wqkv_l, wo_l, vec_l = [], [], []
    for p in blocks:
        w_in, b_in = p["w_in"], p["b_in"]        # (3E, E), (3E,)  y = x @ w_in.T + b
        wqkv = w_in.T                            # (E, 3E), columns ordered q | k | v
        wqkv = wqkv.at[:, 0:E].multiply(scale)   # fold 1/sqrt(Dh) into Wq
        bqkv = b_in.at[0:E].multiply(scale)      # ... and into bq
        wqkv_l.append(wqkv.astype(jnp.bfloat16))
        wo_l.append(p["w_out"].T.astype(jnp.bfloat16))   # (E, E), ctx @ wo
        vec_l.append(jnp.stack([bqkv[0:E], bqkv[E:2 * E], bqkv[2 * E:3 * E],
                                p["b_out"], p["gamma"], p["beta"]], axis=0))
    return dict(
        wqkv=jnp.stack(wqkv_l, axis=0),                      # (3, E, 3E) bf16
        wo=jnp.stack(wo_l, axis=0),                          # (3, E, E)  bf16
        vecs=jnp.stack(vec_l, axis=0).astype(jnp.float32),   # (3, 6, E)  f32
    )


# ---------------------------------------------------------------------------
# Pure-JAX reference (f32, PyTorch semantics, eval mode) for validation.
# ---------------------------------------------------------------------------
def _mha_ref(x, w_in, b_in, w_out, b_out):
    B, S, E = x.shape
    qkv = jnp.einsum('bse,fe->bsf', x, w_in) + b_in
    q, k, v = jnp.split(qkv, 3, axis=-1)
    def heads(t):
        return t.reshape(B, S, NUM_HEADS, HEAD_DIM).transpose(0, 2, 1, 3)
    q, k, v = heads(q), heads(k), heads(v)
    s = jnp.einsum('bhqd,bhkd->bhqk', q, k) / math.sqrt(HEAD_DIM)
    p = jax.nn.softmax(s, axis=-1)
    ctx = jnp.einsum('bhqk,bhkd->bhqd', p, v)
    ctx = ctx.transpose(0, 2, 1, 3).reshape(B, S, E)
    return jnp.einsum('bse,fe->bsf', ctx, w_out) + b_out


def attention_adapter_ref(x, blocks):
    for p in blocks:
        a = _mha_ref(x, p["w_in"], p["b_in"], p["w_out"], p["b_out"])
        y = x + a
        mu = jnp.mean(y, axis=-1, keepdims=True)
        var = jnp.mean((y - mu) ** 2, axis=-1, keepdims=True)
        x = (y - mu) * jax.lax.rsqrt(var + LN_EPS) * p["gamma"] + p["beta"]
    return x


if __name__ == "__main__":
    key = jax.random.PRNGKey(0)
    k_x, k_m, k_s, k_c = jax.random.split(key, 4)

    B, S, E = 2, 8, GPT2_EMBED_DIM
    video_features = jax.random.normal(k_x, (B, S, E), jnp.float32)

    blocks = [
        make_block_params(k_m, E),   # multihead_attn / norm1
        make_block_params(k_s, E),   # self_attn      / norm2
        make_block_params(k_c, E),   # cross_attn     / norm3
    ]
    kparams = pack_adapter_params(blocks)

    out = attention_adapter_pallas(video_features, kparams)
    out = jax.block_until_ready(out)

    assert out.shape == (B, S, E)
    assert bool(jnp.all(jnp.isfinite(out)))

    # Validate against the pure-f32 reference (bf16 weights / bf16 MXU inputs
    # introduce small, bounded error).
    ref = attention_adapter_ref(video_features, blocks)
    max_err = float(jnp.max(jnp.abs(out - ref)))
    assert max_err < 5e-2, f"max abs error {max_err}"

    print("KERNEL_OK")
</pallas_src>

<mosaic_0001>
module attributes {stable_mosaic.version = 11 : i64} {
  func.func @_adapter_kernel(%arg0: i32, %arg1: memref<16x768xf32, #tpu.memory_space<vmem>>, %arg2: memref<16x16xf32, #tpu.memory_space<vmem>>, %arg3: memref<1x768x2304xbf16, #tpu.memory_space<vmem>>, %arg4: memref<1x768x768xbf16, #tpu.memory_space<vmem>>, %arg5: memref<1x6x768xf32, #tpu.memory_space<vmem>>, %arg6: memref<16x768xf32, #tpu.memory_space<vmem>>) attributes {dimension_semantics = [#tpu.dimension_semantics<arbitrary>], iteration_bounds = array<i64: 3>, scalar_prefetch = 0 : i64, scratch_operands = 0 : i64, tpu.core_type = #tpu.core_type<tc>, window_params = [{pipeline_mode = #tpu.pipeline_mode<synchronous>, transform_indices = @transform_0, window_bounds = array<i64: 16, 768>}, {pipeline_mode = #tpu.pipeline_mode<synchronous>, transform_indices = @transform_1, window_bounds = array<i64: 16, 16>}, {transform_indices = @transform_2, window_bounds = array<i64: 1, 768, 2304>}, {transform_indices = @transform_3, window_bounds = array<i64: 1, 768, 768>}, {transform_indices = @transform_4, window_bounds = array<i64: 1, 6, 768>}, {pipeline_mode = #tpu.pipeline_mode<synchronous>, transform_indices = @transform_5, window_bounds = array<i64: 16, 768>}]} {
    %c0_i32 = arith.constant 0 : i32
    %0 = arith.cmpi eq, %arg0, %c0_i32 : i32
    %1 = arith.extui %0 : i1 to i32
    %c0_i32_0 = arith.constant 0 : i32
    %2 = arith.cmpi ne, %1, %c0_i32_0 : i32
    scf.if %2 {
      %c0_53 = arith.constant 0 : index
      %c0_54 = arith.constant 0 : index
      %209 = vector.load %arg1[%c0_53, %c0_54] : memref<16x768xf32, #tpu.memory_space<vmem>>, vector<16x768xf32>
      %c0_55 = arith.constant 0 : index
      %c0_56 = arith.constant 0 : index
      %210 = vector.load %arg6[%c0_55, %c0_56] : memref<16x768xf32, #tpu.memory_space<vmem>>, vector<16x768xf32>
      tpu.vector_store %arg6[%c0_55, %c0_56], %209 {strides = array<i32>} : memref<16x768xf32, #tpu.memory_space<vmem>>, vector<16x768xf32>,
    } else {
    }
    %c0 = arith.constant 0 : index
    %c0_1 = arith.constant 0 : index
    %3 = vector.load %arg6[%c0, %c0_1] : memref<16x768xf32, #tpu.memory_space<vmem>>, vector<16x768xf32>
    %4 = arith.truncf %3 : vector<16x768xf32> to vector<16x768xbf16>
    %c0_2 = arith.constant 0 : index
    %c0_3 = arith.constant 0 : index
    %c0_4 = arith.constant 0 : index
    %5 = vector.load %arg5[%c0_2, %c0_3, %c0_4] : memref<1x6x768xf32, #tpu.memory_space<vmem>>, vector<1x6x768xf32>
    %6 = vector.shape_cast %5 : vector<1x6x768xf32> to vector<6x768xf32>
    %7 = vector.extract_strided_slice %6 {offsets = [0, 0], sizes = [1, 768], strides = [1, 1]} : vector<6x768xf32> to vector<1x768xf32>
    %8 = vector.extract_strided_slice %6 {offsets = [1, 0], sizes = [1, 768], strides = [1, 1]} : vector<6x768xf32> to vector<1x768xf32>
    %9 = vector.extract_strided_slice %6 {offsets = [2, 0], sizes = [1, 768], strides = [1, 1]} : vector<6x768xf32> to vector<1x768xf32>
    %10 = vector.extract_strided_slice %6 {offsets = [3, 0], sizes = [1, 768], strides = [1, 1]} : vector<6x768xf32> to vector<1x768xf32>
    %11 = vector.extract_strided_slice %6 {offsets = [4, 0], sizes = [1, 768], strides = [1, 1]} : vector<6x768xf32> to vector<1x768xf32>
    %12 = vector.extract_strided_slice %6 {offsets = [5, 0], sizes = [1, 768], strides = [1, 1]} : vector<6x768xf32> to vector<1x768xf32>
    %c0_5 = arith.constant 0 : index
    %c0_6 = arith.constant 0 : index
    %c0_7 = arith.constant 0 : index
    %13 = vector.load %arg3[%c0_5, %c0_6, %c0_7] : memref<1x768x2304xbf16, #tpu.memory_space<vmem>>, vector<1x768x2304xbf16>
    %14 = vector.shape_cast %13 : vector<1x768x2304xbf16> to vector<768x2304xbf16>
    %cst = arith.constant dense<0.000000e+00> : vector<16x2304xf32>
    %15 = tpu.matmul %4, %14, %cst {dimension_numbers = #tpu.dot_dimension_numbers<[1], [0], [0], [1], [0, 0, 1, 1], [], []>} : vector<16x768xbf16>, vector<768x2304xbf16>, vector<16x2304xf32> -> vector<16x2304xf32>
    %16 = vector.extract_strided_slice %15 {offsets = [0, 0], sizes = [16, 768], strides = [1, 1]} : vector<16x2304xf32> to vector<16x768xf32>
    %17 = vector.broadcast %7 : vector<1x768xf32> to vector<16x768xf32>
    %18 = arith.addf %16, %17 : vector<16x768xf32>
    %19 = vector.extract_strided_slice %15 {offsets = [0, 768], sizes = [16, 768], strides = [1, 1]} : vector<16x2304xf32> to vector<16x768xf32>
    %20 = vector.broadcast %8 : vector<1x768xf32> to vector<16x768xf32>
    %21 = arith.addf %19, %20 : vector<16x768xf32>
    %22 = vector.extract_strided_slice %15 {offsets = [0, 1536], sizes = [16, 768], strides = [1, 1]} : vector<16x2304xf32> to vector<16x768xf32>
    %23 = vector.broadcast %9 : vector<1x768xf32> to vector<16x768xf32>
    %24 = arith.addf %22, %23 : vector<16x768xf32>
    %c0_8 = arith.constant 0 : index
    %c0_9 = arith.constant 0 : index
    %25 = vector.load %arg2[%c0_8, %c0_9] : memref<16x16xf32, #tpu.memory_space<vmem>>, vector<16x16xf32>
    %26 = vector.extract_strided_slice %18 {offsets = [0, 0], sizes = [16, 96], strides = [1, 1]} : vector<16x768xf32> to vector<16x96xf32>
    %27 = arith.truncf %26 : vector<16x96xf32> to vector<16x96xbf16>
    %28 = vector.extract_strided_slice %21 {offsets = [0, 0], sizes = [16, 96], strides = [1, 1]} : vector<16x768xf32> to vector<16x96xf32>
    %29 = arith.truncf %28 : vector<16x96xf32> to vector<16x96xbf16>
    %30 = vector.extract_strided_slice %24 {offsets = [0, 0], sizes = [16, 96], strides = [1, 1]} : vector<16x768xf32> to vector<16x96xf32>
    %31 = arith.truncf %30 : vector<16x96xf32> to vector<16x96xbf16>
    %cst_10 = arith.constant dense<0.000000e+00> : vector<16x16xf32>
    %32 = tpu.matmul %27, %29, %cst_10 {dimension_numbers = #tpu.dot_dimension_numbers<[1], [1], [0], [0], [0, 0, 1, 0], [], []>} : vector<16x96xbf16>, vector<16x96xbf16>, vector<16x16xf32> -> vector<16x16xf32>
    %33 = arith.addf %32, %25 : vector<16x16xf32>
    %cst_11 = arith.constant dense<0xFF800000> : vector<16xf32>
    %34 = vector.multi_reduction <maximumf>, %33, %cst_11 [1] : vector<16x16xf32> to vector<16xf32>
    %35 = vector.shape_cast %34 : vector<16xf32> to vector<16x1xf32>
    %36 = vector.broadcast %35 : vector<16x1xf32> to vector<16x16xf32>
    %37 = arith.subf %33, %36 : vector<16x16xf32>
    %38 = math.exp %37 : vector<16x16xf32>
    %cst_12 = arith.constant dense<0.000000e+00> : vector<16xf32>
    %39 = vector.multi_reduction <add>, %38, %cst_12 [1] : vector<16x16xf32> to vector<16xf32>
    %40 = vector.shape_cast %39 : vector<16xf32> to vector<16x1xf32>
    %41 = vector.broadcast %40 : vector<16x1xf32> to vector<16x16xf32>
    %42 = arith.divf %38, %41 : vector<16x16xf32>
    %43 = arith.truncf %42 : vector<16x16xf32> to vector<16x16xbf16>
    %cst_13 = arith.constant dense<0.000000e+00> : vector<16x96xf32>
    %44 = tpu.matmul %43, %31, %cst_13 {dimension_numbers = #tpu.dot_dimension_numbers<[1], [0], [0], [1], [0, 0, 1, 1], [], []>} : vector<16x16xbf16>, vector<16x96xbf16>, vector<16x96xf32> -> vector<16x96xf32>
    %45 = vector.extract_strided_slice %18 {offsets = [0, 96], sizes = [16, 96], strides = [1, 1]} : vector<16x768xf32> to vector<16x96xf32>
    %46 = arith.truncf %45 : vector<16x96xf32> to vector<16x96xbf16>
    %47 = vector.extract_strided_slice %21 {offsets = [0, 96], sizes = [16, 96], strides = [1, 1]} : vector<16x768xf32> to vector<16x96xf32>
    %48 = arith.truncf %47 : vector<16x96xf32> to vector<16x96xbf16>
    %49 = vector.extract_strided_slice %24 {offsets = [0, 96], sizes = [16, 96], strides = [1, 1]} : vector<16x768xf32> to vector<16x96xf32>
    %50 = arith.truncf %49 : vector<16x96xf32> to vector<16x96xbf16>
    %cst_14 = arith.constant dense<0.000000e+00> : vector<16x16xf32>
    %51 = tpu.matmul %46, %48, %cst_14 {dimension_numbers = #tpu.dot_dimension_numbers<[1], [1], [0], [0], [0, 0, 1, 0], [], []>} : vector<16x96xbf16>, vector<16x96xbf16>, vector<16x16xf32> -> vector<16x16xf32>
    %52 = arith.addf %51, %25 : vector<16x16xf32>
    %cst_15 = arith.constant dense<0xFF800000> : vector<16xf32>
    %53 = vector.multi_reduction <maximumf>, %52, %cst_15 [1] : vector<16x16xf32> to vector<16xf32>
    %54 = vector.shape_cast %53 : vector<16xf32> to vector<16x1xf32>
    %55 = vector.broadcast %54 : vector<16x1xf32> to vector<16x16xf32>
    %56 = arith.subf %52, %55 : vector<16x16xf32>
    %57 = math.exp %56 : vector<16x16xf32>
    %cst_16 = arith.constant dense<0.000000e+00> : vector<16xf32>
    %58 = vector.multi_reduction <add>, %57, %cst_16 [1] : vector<16x16xf32> to vector<16xf32>
    %59 = vector.shape_cast %58 : vector<16xf32> to vector<16x1xf32>
    %60 = vector.broadcast %59 : vector<16x1xf32> to vector<16x16xf32>
    %61 = arith.divf %57, %60 : vector<16x16xf32>
    %62 = arith.truncf %61 : vector<16x16xf32> to vector<16x16xbf16>
    %cst_17 = arith.constant dense<0.000000e+00> : vector<16x96xf32>
    %63 = tpu.matmul %62, %50, %cst_17 {dimension_numbers = #tpu.dot_dimension_numbers<[1], [0], [0], [1], [0, 0, 1, 1], [], []>} : vector<16x16xbf16>, vector<16x96xbf16>, vector<16x96xf32> -> vector<16x96xf32>
    %64 = vector.extract_strided_slice %18 {offsets = [0, 192], sizes = [16, 96], strides = [1, 1]} : vector<16x768xf32> to vector<16x96xf32>
    %65 = arith.truncf %64 : vector<16x96xf32> to vector<16x96xbf16>
    %66 = vector.extract_strided_slice %21 {offsets = [0, 192], sizes = [16, 96], strides = [1, 1]} : vector<16x768xf32> to vector<16x96xf32>
    %67 = arith.truncf %66 : vector<16x96xf32> to vector<16x96xbf16>
    %68 = vector.extract_strided_slice %24 {offsets = [0, 192], sizes = [16, 96], strides = [1, 1]} : vector<16x768xf32> to vector<16x96xf32>
    %69 = arith.truncf %68 : vector<16x96xf32> to vector<16x96xbf16>
    %cst_18 = arith.constant dense<0.000000e+00> : vector<16x16xf32>
    %70 = tpu.matmul %65, %67, %cst_18 {dimension_numbers = #tpu.dot_dimension_numbers<[1], [1], [0], [0], [0, 0, 1, 0], [], []>} : vector<16x96xbf16>, vector<16x96xbf16>, vector<16x16xf32> -> vector<16x16xf32>
    %71 = arith.addf %70, %25 : vector<16x16xf32>
    %cst_19 = arith.constant dense<0xFF800000> : vector<16xf32>
    %72 = vector.multi_reduction <maximumf>, %71, %cst_19 [1] : vector<16x16xf32> to vector<16xf32>
    %73 = vector.shape_cast %72 : vector<16xf32> to vector<16x1xf32>
    %74 = vector.broadcast %73 : vector<16x1xf32> to vector<16x16xf32>
    %75 = arith.subf %71, %74 : vector<16x16xf32>
    %76 = math.exp %75 : vector<16x16xf32>
    %cst_20 = arith.constant dense<0.000000e+00> : vector<16xf32>
    %77 = vector.multi_reduction <add>, %76, %cst_20 [1] : vector<16x16xf32> to vector<16xf32>
    %78 = vector.shape_cast %77 : vector<16xf32> to vector<16x1xf32>
    %79 = vector.broadcast %78 : vector<16x1xf32> to vector<16x16xf32>
    %80 = arith.divf %76, %79 : vector<16x16xf32>
    %81 = arith.truncf %80 : vector<16x16xf32> to vector<16x16xbf16>
    %cst_21 = arith.constant dense<0.000000e+00> : vector<16x96xf32>
    %82 = tpu.matmul %81, %69, %cst_21 {dimension_numbers = #tpu.dot_dimension_numbers<[1], [0], [0], [1], [0, 0, 1, 1], [], []>} : vector<16x16xbf16>, vector<16x96xbf16>, vector<16x96xf32> -> vector<16x96xf32>
    %83 = vector.extract_strided_slice %18 {offsets = [0, 288], sizes = [16, 96], strides = [1, 1]} : vector<16x768xf32> to vector<16x96xf32>
    %84 = arith.truncf %83 : vector<16x96xf32> to vector<16x96xbf16>
    %85 = vector.extract_strided_slice %21 {offsets = [0, 288], sizes = [16, 96], strides = [1, 1]} : vector<16x768xf32> to vector<16x96xf32>
    %86 = arith.truncf %85 : vector<16x96xf32> to vector<16x96xbf16>
    %87 = vector.extract_strided_slice %24 {offsets = [0, 288], sizes = [16, 96], strides = [1, 1]} : vector<16x768xf32> to vector<16x96xf32>
    %88 = arith.truncf %87 : vector<16x96xf32> to vector<16x96xbf16>
    %cst_22 = arith.constant dense<0.000000e+00> : vector<16x16xf32>
    %89 = tpu.matmul %84, %86, %cst_22 {dimension_numbers = #tpu.dot_dimension_numbers<[1], [1], [0], [0], [0, 0, 1, 0], [], []>} : vector<16x96xbf16>, vector<16x96xbf16>, vector<16x16xf32> -> vector<16x16xf32>
    %90 = arith.addf %89, %25 : vector<16x16xf32>
    %cst_23 = arith.constant dense<0xFF800000> : vector<16xf32>
    %91 = vector.multi_reduction <maximumf>, %90, %cst_23 [1] : vector<16x16xf32> to vector<16xf32>
    %92 = vector.shape_cast %91 : vector<16xf32> to vector<16x1xf32>
    %93 = vector.broadcast %92 : vector<16x1xf32> to vector<16x16xf32>
    %94 = arith.subf %90, %93 : vector<16x16xf32>
    %95 = math.exp %94 : vector<16x16xf32>
    %cst_24 = arith.constant dense<0.000000e+00> : vector<16xf32>
    %96 = vector.multi_reduction <add>, %95, %cst_24 [1] : vector<16x16xf32> to vector<16xf32>
    %97 = vector.shape_cast %96 : vector<16xf32> to vector<16x1xf32>
    %98 = vector.broadcast %97 : vector<16x1xf32> to vector<16x16xf32>
    %99 = arith.divf %95, %98 : vector<16x16xf32>
    %100 = arith.truncf %99 : vector<16x16xf32> to vector<16x16xbf16>
    %cst_25 = arith.constant dense<0.000000e+00> : vector<16x96xf32>
    %101 = tpu.matmul %100, %88, %cst_25 {dimension_numbers = #tpu.dot_dimension_numbers<[1], [0], [0], [1], [0, 0, 1, 1], [], []>} : vector<16x16xbf16>, vector<16x96xbf16>, vector<16x96xf32> -> vector<16x96xf32>
    %102 = vector.extract_strided_slice %18 {offsets = [0, 384], sizes = [16, 96], strides = [1, 1]} : vector<16x768xf32> to vector<16x96xf32>
    %103 = arith.truncf %102 : vector<16x96xf32> to vector<16x96xbf16>
    %104 = vector.extract_strided_slice %21 {offsets = [0, 384], sizes = [16, 96], strides = [1, 1]} : vector<16x768xf32> to vector<16x96xf32>
    %105 = arith.truncf %104 : vector<16x96xf32> to vector<16x96xbf16>
    %106 = vector.extract_strided_slice %24 {offsets = [0, 384], sizes = [16, 96], strides = [1, 1]} : vector<16x768xf32> to vector<16x96xf32>
    %107 = arith.truncf %106 : vector<16x96xf32> to vector<16x96xbf16>
    %cst_26 = arith.constant dense<0.000000e+00> : vector<16x16xf32>
    %108 = tpu.matmul %103, %105, %cst_26 {dimension_numbers = #tpu.dot_dimension_numbers<[1], [1], [0], [0], [0, 0, 1, 0], [], []>} : vector<16x96xbf16>, vector<16x96xbf16>, vector<16x16xf32> -> vector<16x16xf32>
    %109 = arith.addf %108, %25 : vector<16x16xf32>
    %cst_27 = arith.constant dense<0xFF800000> : vector<16xf32>
    %110 = vector.multi_reduction <maximumf>, %109, %cst_27 [1] : vector<16x16xf32> to vector<16xf32>
    %111 = vector.shape_cast %110 : vector<16xf32> to vector<16x1xf32>
    %112 = vector.broadcast %111 : vector<16x1xf32> to vector<16x16xf32>
    %113 = arith.subf %109, %112 : vector<16x16xf32>
    %114 = math.exp %113 : vector<16x16xf32>
    %cst_28 = arith.constant dense<0.000000e+00> : vector<16xf32>
    %115 = vector.multi_reduction <add>, %114, %cst_28 [1] : vector<16x16xf32> to vector<16xf32>
    %116 = vector.shape_cast %115 : vector<16xf32> to vector<16x1xf32>
    %117 = vector.broadcast %116 : vector<16x1xf32> to vector<16x16xf32>
    %118 = arith.divf %114, %117 : vector<16x16xf32>
    %119 = arith.truncf %118 : vector<16x16xf32> to vector<16x16xbf16>
    %cst_29 = arith.constant dense<0.000000e+00> : vector<16x96xf32>
    %120 = tpu.matmul %119, %107, %cst_29 {dimension_numbers = #tpu.dot_dimension_numbers<[1], [0], [0], [1], [0, 0, 1, 1], [], []>} : vector<16x16xbf16>, vector<16x96xbf16>, vector<16x96xf32> -> vector<16x96xf32>
    %121 = vector.extract_strided_slice %18 {offsets = [0, 480], sizes = [16, 96], strides = [1, 1]} : vector<16x768xf32> to vector<16x96xf32>
    %122 = arith.truncf %121 : vector<16x96xf32> to vector<16x96xbf16>
    %123 = vector.extract_strided_slice %21 {offsets = [0, 480], sizes = [16, 96], strides = [1, 1]} : vector<16x768xf32> to vector<16x96xf32>
    %124 = arith.truncf %123 : vector<16x96xf32> to vector<16x96xbf16>
    %125 = vector.extract_strided_slice %24 {offsets = [0, 480], sizes = [16, 96], strides = [1, 1]} : vector<16x768xf32> to vector<16x96xf32>
    %126 = arith.truncf %125 : vector<16x96xf32> to vector<16x96xbf16>
    %cst_30 = arith.constant dense<0.000000e+00> : vector<16x16xf32>
    %127 = tpu.matmul %122, %124, %cst_30 {dimension_numbers = #tpu.dot_dimension_numbers<[1], [1], [0], [0], [0, 0, 1, 0], [], []>} : vector<16x96xbf16>, vector<16x96xbf16>, vector<16x16xf32> -> vector<16x16xf32>
    %128 = arith.addf %127, %25 : vector<16x16xf32>
    %cst_31 = arith.constant dense<0xFF800000> : vector<16xf32>
    %129 = vector.multi_reduction <maximumf>, %128, %cst_31 [1] : vector<16x16xf32> to vector<16xf32>
    %130 = vector.shape_cast %129 : vector<16xf32> to vector<16x1xf32>
    %131 = vector.broadcast %130 : vector<16x1xf32> to vector<16x16xf32>
    %132 = arith.subf %128, %131 : vector<16x16xf32>
    %133 = math.exp %132 : vector<16x16xf32>
    %cst_32 = arith.constant dense<0.000000e+00> : vector<16xf32>
    %134 = vector.multi_reduction <add>, %133, %cst_32 [1] : vector<16x16xf32> to vector<16xf32>
    %135 = vector.shape_cast %134 : vector<16xf32> to vector<16x1xf32>
    %136 = vector.broadcast %135 : vector<16x1xf32> to vector<16x16xf32>
    %137 = arith.divf %133, %136 : vector<16x16xf32>
    %138 = arith.truncf %137 : vector<16x16xf32> to vector<16x16xbf16>
    %cst_33 = arith.constant dense<0.000000e+00> : vector<16x96xf32>
    %139 = tpu.matmul %138, %126, %cst_33 {dimension_numbers = #tpu.dot_dimension_numbers<[1], [0], [0], [1], [0, 0, 1, 1], [], []>} : vector<16x16xbf16>, vector<16x96xbf16>, vector<16x96xf32> -> vector<16x96xf32>
    %140 = vector.extract_strided_slice %18 {offsets = [0, 576], sizes = [16, 96], strides = [1, 1]} : vector<16x768xf32> to vector<16x96xf32>
    %141 = arith.truncf %140 : vector<16x96xf32> to vector<16x96xbf16>
    %142 = vector.extract_strided_slice %21 {offsets = [0, 576], sizes = [16, 96], strides = [1, 1]} : vector<16x768xf32> to vector<16x96xf32>
    %143 = arith.truncf %142 : vector<16x96xf32> to vector<16x96xbf16>
    %144 = vector.extract_strided_slice %24 {offsets = [0, 576], sizes = [16, 96], strides = [1, 1]} : vector<16x768xf32> to vector<16x96xf32>
    %145 = arith.truncf %144 : vector<16x96xf32> to vector<16x96xbf16>
    %cst_34 = arith.constant dense<0.000000e+00> : vector<16x16xf32>
    %146 = tpu.matmul %141, %143, %cst_34 {dimension_numbers = #tpu.dot_dimension_numbers<[1], [1], [0], [0], [0, 0, 1, 0], [], []>} : vector<16x96xbf16>, vector<16x96xbf16>, vector<16x16xf32> -> vector<16x16xf32>
    %147 = arith.addf %146, %25 : vector<16x16xf32>
    %cst_35 = arith.constant dense<0xFF800000> : vector<16xf32>
    %148 = vector.multi_reduction <maximumf>, %147, %cst_35 [1] : vector<16x16xf32> to vector<16xf32>
    %149 = vector.shape_cast %148 : vector<16xf32> to vector<16x1xf32>
    %150 = vector.broadcast %149 : vector<16x1xf32> to vector<16x16xf32>
    %151 = arith.subf %147, %150 : vector<16x16xf32>
    %152 = math.exp %151 : vector<16x16xf32>
    %cst_36 = arith.constant dense<0.000000e+00> : vector<16xf32>
    %153 = vector.multi_reduction <add>, %152, %cst_36 [1] : vector<16x16xf32> to vector<16xf32>
    %154 = vector.shape_cast %153 : vector<16xf32> to vector<16x1xf32>
    %155 = vector.broadcast %154 : vector<16x1xf32> to vector<16x16xf32>
    %156 = arith.divf %152, %155 : vector<16x16xf32>
    %157 = arith.truncf %156 : vector<16x16xf32> to vector<16x16xbf16>
    %cst_37 = arith.constant dense<0.000000e+00> : vector<16x96xf32>
    %158 = tpu.matmul %157, %145, %cst_37 {dimension_numbers = #tpu.dot_dimension_numbers<[1], [0], [0], [1], [0, 0, 1, 1], [], []>} : vector<16x16xbf16>, vector<16x96xbf16>, vector<16x96xf32> -> vector<16x96xf32>
    %159 = vector.extract_strided_slice %18 {offsets = [0, 672], sizes = [16, 96], strides = [1, 1]} : vector<16x768xf32> to vector<16x96xf32>
    %160 = arith.truncf %159 : vector<16x96xf32> to vector<16x96xbf16>
    %161 = vector.extract_strided_slice %21 {offsets = [0, 672], sizes = [16, 96], strides = [1, 1]} : vector<16x768xf32> to vector<16x96xf32>
    %162 = arith.truncf %161 : vector<16x96xf32> to vector<16x96xbf16>
    %163 = vector.extract_strided_slice %24 {offsets = [0, 672], sizes = [16, 96], strides = [1, 1]} : vector<16x768xf32> to vector<16x96xf32>
    %164 = arith.truncf %163 : vector<16x96xf32> to vector<16x96xbf16>
    %cst_38 = arith.constant dense<0.000000e+00> : vector<16x16xf32>
    %165 = tpu.matmul %160, %162, %cst_38 {dimension_numbers = #tpu.dot_dimension_numbers<[1], [1], [0], [0], [0, 0, 1, 0], [], []>} : vector<16x96xbf16>, vector<16x96xbf16>, vector<16x16xf32> -> vector<16x16xf32>
    %166 = arith.addf %165, %25 : vector<16x16xf32>
    %cst_39 = arith.constant dense<0xFF800000> : vector<16xf32>
    %167 = vector.multi_reduction <maximumf>, %166, %cst_39 [1] : vector<16x16xf32> to vector<16xf32>
    %168 = vector.shape_cast %167 : vector<16xf32> to vector<16x1xf32>
    %169 = vector.broadcast %168 : vector<16x1xf32> to vector<16x16xf32>
    %170 = arith.subf %166, %169 : vector<16x16xf32>
    %171 = math.exp %170 : vector<16x16xf32>
    %cst_40 = arith.constant dense<0.000000e+00> : vector<16xf32>
    %172 = vector.multi_reduction <add>, %171, %cst_40 [1] : vector<16x16xf32> to vector<16xf32>
    %173 = vector.shape_cast %172 : vector<16xf32> to vector<16x1xf32>
    %174 = vector.broadcast %173 : vector<16x1xf32> to vector<16x16xf32>
    %175 = arith.divf %171, %174 : vector<16x16xf32>
    %176 = arith.truncf %175 : vector<16x16xf32> to vector<16x16xbf16>
    %cst_41 = arith.constant dense<0.000000e+00> : vector<16x96xf32>
    %177 = tpu.matmul %176, %164, %cst_41 {dimension_numbers = #tpu.dot_dimension_numbers<[1], [0], [0], [1], [0, 0, 1, 1], [], []>} : vector<16x16xbf16>, vector<16x96xbf16>, vector<16x96xf32> -> vector<16x96xf32>
    %178 = tpu.concatenate %44, %63, %82, %101, %120, %139, %158, %177 in 1 : vector<16x96xf32>, vector<16x96xf32>, vector<16x96xf32>, vector<16x96xf32>, vector<16x96xf32>, vector<16x96xf32>, vector<16x96xf32>, vector<16x96xf32> -> vector<16x768xf32>
    %179 = arith.truncf %178 : vector<16x768xf32> to vector<16x768xbf16>
    %c0_42 = arith.constant 0 : index
    %c0_43 = arith.constant 0 : index
    %c0_44 = arith.constant 0 : index
    %180 = vector.load %arg4[%c0_42, %c0_43, %c0_44] : memref<1x768x768xbf16, #tpu.memory_space<vmem>>, vector<1x768x768xbf16>
    %181 = vector.shape_cast %180 : vector<1x768x768xbf16> to vector<768x768xbf16>
    %cst_45 = arith.constant dense<0.000000e+00> : vector<16x768xf32>
    %182 = tpu.matmul %179, %181, %cst_45 {dimension_numbers = #tpu.dot_dimension_numbers<[1], [0], [0], [1], [0, 0, 1, 1], [], []>} : vector<16x768xbf16>, vector<768x768xbf16>, vector<16x768xf32> -> vector<16x768xf32>
    %183 = vector.broadcast %10 : vector<1x768xf32> to vector<16x768xf32>
    %184 = arith.addf %182, %183 : vector<16x768xf32>
    %185 = arith.addf %3, %184 : vector<16x768xf32>
    %cst_46 = arith.constant dense<0.000000e+00> : vector<16xf32>
    %186 = vector.multi_reduction <add>, %185, %cst_46 [1] : vector<16x768xf32> to vector<16xf32>
    %187 = vector.shape_cast %186 : vector<16xf32> to vector<16x1xf32>
    %cst_47 = arith.constant 7.680000e+02 : f32
    %188 = vector.broadcast %cst_47 : f32 to vector<16x1xf32>
    %189 = arith.divf %187, %188 : vector<16x1xf32>
    %190 = vector.broadcast %189 : vector<16x1xf32> to vector<16x768xf32>
    %191 = arith.subf %185, %190 : vector<16x768xf32>
    %192 = arith.mulf %191, %191 : vector<16x768xf32>
    %cst_48 = arith.constant dense<0.000000e+00> : vector<16xf32>
    %193 = vector.multi_reduction <add>, %192, %cst_48 [1] : vector<16x768xf32> to vector<16xf32>
    %194 = vector.shape_cast %193 : vector<16xf32> to vector<16x1xf32>
    %cst_49 = arith.constant 7.680000e+02 : f32
    %195 = vector.broadcast %cst_49 : f32 to vector<16x1xf32>
    %196 = arith.divf %194, %195 : vector<16x1xf32>
    %197 = vector.broadcast %189 : vector<16x1xf32> to vector<16x768xf32>
    %198 = arith.subf %185, %197 : vector<16x768xf32>
    %cst_50 = arith.constant 9.99999974E-6 : f32
    %199 = vector.broadcast %cst_50 : f32 to vector<16x1xf32>
    %200 = arith.addf %196, %199 : vector<16x1xf32>
    %201 = math.rsqrt %200 : vector<16x1xf32>
    %202 = vector.broadcast %201 : vector<16x1xf32> to vector<16x768xf32>
    %203 = arith.mulf %198, %202 : vector<16x768xf32>
    %204 = vector.broadcast %11 : vector<1x768xf32> to vector<16x768xf32>
    %205 = arith.mulf %203, %204 : vector<16x768xf32>
    %206 = vector.broadcast %12 : vector<1x768xf32> to vector<16x768xf32>
    %207 = arith.addf %205, %206 : vector<16x768xf32>
    %c0_51 = arith.constant 0 : index
    %c0_52 = arith.constant 0 : index
    %208 = vector.load %arg6[%c0_51, %c0_52] : memref<16x768xf32, #tpu.memory_space<vmem>>, vector<16x768xf32>
    tpu.vector_store %arg6[%c0_51, %c0_52], %207 {strides = array<i32>} : memref<16x768xf32, #tpu.memory_space<vmem>>, vector<16x768xf32>,
    return
  }
  func.func @transform_0(%arg0: i32) -> (i32, i32) {
    %c0_i32 = arith.constant 0 : i32
    %c0_i32_0 = arith.constant 0 : i32
    %c0_i32_1 = arith.constant 0 : i32
    return %c0_i32, %c0_i32_0 : i32, i32
  }
  func.func @transform_1(%arg0: i32) -> (i32, i32) {
    %c0_i32 = arith.constant 0 : i32
    %c0_i32_0 = arith.constant 0 : i32
    %c0_i32_1 = arith.constant 0 : i32
    return %c0_i32, %c0_i32_0 : i32, i32
  }
  func.func @transform_2(%arg0: i32) -> (i32, i32, i32) {
    %c0_i32 = arith.constant 0 : i32
    %c0_i32_0 = arith.constant 0 : i32
    %c0_i32_1 = arith.constant 0 : i32
    return %arg0, %c0_i32, %c0_i32_0 : i32, i32, i32
  }
  func.func @transform_3(%arg0: i32) -> (i32, i32, i32) {
    %c0_i32 = arith.constant 0 : i32
    %c0_i32_0 = arith.constant 0 : i32
    %c0_i32_1 = arith.constant 0 : i32
    return %arg0, %c0_i32, %c0_i32_0 : i32, i32, i32
  }
  func.func @transform_4(%arg0: i32) -> (i32, i32, i32) {
    %c0_i32 = arith.constant 0 : i32
    %c0_i32_0 = arith.constant 0 : i32
    %c0_i32_1 = arith.constant 0 : i32
    return %arg0, %c0_i32, %c0_i32_0 : i32, i32, i32
  }
  func.func @transform_5(%arg0: i32) -> (i32, i32) {
    %c0_i32 = arith.constant 0 : i32
    %c0_i32_0 = arith.constant 0 : i32
    %c0_i32_1 = arith.constant 0 : i32
    return %c0_i32, %c0_i32_0 : i32, i32
  }
}

</mosaic_0001>

<bundles_post_ra>
// kernel: attention_adapter_pallas.1
= control target key start
LH: loop header
LB: loop body
LE: loop exit
PB: predicated region body
PF: predicated region fallthrough
CT: control target
= control target key end

     0   :  { %s15810_s0 = inlined_call_operand.hbm [shape: f32[16,768], index: 0, kind: input, shape index: {}]   ;;  %s15811_s1 = inlined_call_operand.vmem [shape: f32[16,16], index: 1, kind: input, shape index: {}]   ;;  %s15812_s2 = inlined_call_operand.hbm [shape: bf16[3,768,2304], index: 2, kind: input, shape index: {}]   ;;  %s15813_s3 = inlined_call_operand.hbm [shape: bf16[3,768,768], index: 3, kind: input, shape index: {}]   ;;  %s15814_s4 = inlined_call_operand.hbm [shape: f32[3,6,768], index: 4, kind: input, shape index: {}]   ;;  %s15815_s5 = inlined_call_operand.hbm [shape: f32[16,768], index: 5, kind: output, shape index: {}]  }
   0x1   :  { %15820 = sst [smem:[#allocation17_spill]] %s15812_s2 }
   0x2   :  { %10 = vsyncpa [#allocation3], 0 }
   0x3   :  { %11 = vsyncpa [#allocation6], 0 }
   0x4   :  { %13 = vsyncpa [#allocation6 + $0x1], 0 }
   0x5   :  { %14 = vsyncpa [#allocation9], 0 }
   0x6   :  { %16 = vsyncpa [#allocation9 + $0x1], 0 }
   0x7   :  { %17 = vsyncpa [#allocation4], 0  ;;  %s13830_s18 = smov 0   ;;  %s13832_s19 = smov 0  }
   0x8   :  { %s13834_s20 = smov 0   ;;  %s13836_s21 = smov 0  }
   0x9 LB: > { %15821 = sst [smem:[#allocation15_spill]] %s13776_s20  ;;  %s13851_s22 = sadd.s32 1, %s13780_s21   ;;  %s13780_s21 = sphi %s13836_s21, %s15839_s21   ;;  %s13776_s20 = sphi %s13834_s20, %s15838_s20   ;;  %s13772_s19 = sphi %s13832_s19, %s15837_s19   ;;  %s13768_s18 = sphi %s13830_s18, %s15836_s18  }
   0xa   : > { %s72_s23 = sadd.s32 1, %s13776_s20  ;;  %s69_s24 = ssub.s32 %s13780_s21, %s13851_s22 }
   0xb   : > { %p79_p0 = scmp.ne.s32.totalorder %s13776_s20, %s13772_s19  ;;  %p70_p1 = scmp.eq.s32.totalorder %s69_s24, 0 }
   0xc   : > { %p80_p2 = scmp.eq.s32.totalorder %s13780_s21, 0  ;;  %p11697_p3 = scmp.lt.s32.totalorder %s13780_s21, 3 }
   0xd   : > { %s13861_s25 = scalar_select %p70_p1, %s13776_s20, %s72_s23  }
   0xe   : > { %p81_p4 = por %p80_p2, %p79_p0  ;;  %s198_s26 = sand.u32 1, %s13780_s21  }
   0xf   : > { %15822 = sst [smem:[#allocation16_spill]] %s13861_s25  ;;  %s13865_s27 = sand.u32 1, %s13776_s20  }
  0x10   : > { %s11659_s28 = smul.u32 6912, %s13865_s27  ;;  %p13868_p5 = pnand %p11697_p3, %p81_p4 }
  0x11   : > { %s11660_s30 = smul.u32 110592, %s13780_s21  ;;  %s15824_s2 = sld [smem:[#allocation17_spill]] }
  0x12   : > { %s202_s9 = scalar_lea.vmem [#allocation5], %s11659_s28  ;;  %s13880_s11 = scalar_lea.sflag [#allocation6], %s198_s26 }
  0x13   : > { %s209_s10 = sshll.u32 %s202_s9, 4  ;;  %p13886_p7 = pneg %p13868_p5  ;;  %s13878_s10 = int_to_ptr.vmem [resolvable:$true] %s209_s10 }
  0x17   : > { %s13876_s8 = scalar_lea.hbm %s15824_s2, %s11660_s30  ;;  %s13605_s16 = scalar_lea.hbm %s15824_s2, 331776 }
  0x18   : > { %s13600_s12 = scalar_lea.hbm %s13876_s8, 110592  ;;  %p13606_p10 = scmp.lt.s32.totalorder %s13876_s8, %s15824_s2 }
  0x19   : > { %p13601_p6 = scmp.ne.s32.totalorder %s13876_s8, %s13600_s12  ;;  %p13607_p11 = scmp.lt.s32.totalorder %s13605_s16, %s13600_s12 }
  0x1b   : > { %p13603_p8 = pnand %p13886_p7, %p13601_p6  ;;  %p13608_p12 = por %p13607_p11, %p13606_p10 }
  0x1d   : > { %p13604_p9 = pneg %p13603_p8 }
  0x1f   : > { %p13609_p13 = pnand %p13608_p12, %p13604_p9 }
  0x21   : > { %13612 = shalt.err (!%p13609_p13)
}
  0x22   : > { %s13613_s24 = scalar_lea.vmem %s13878_s10, 110592  ;;  %s13782_s26 = smov [#allocation5]  }
  0x23   : > { %p13614_p0 = scmp.ne.s32.totalorder %s13878_s10, %s13613_s24  ;;  %s13618_s28 = sshll.u32 %s13782_s26, 4  ;;  %s13619_s28 = int_to_ptr.vmem [resolvable:$false] %s13618_s28 }
  0x24   : > { %s13620_s30 = scalar_lea.vmem %s13619_s28, 221184  ;;  %p13621_p3 = scmp.lt.s32.totalorder %s13878_s10, %s13619_s28 }
  0x25   : > { %p13616_p1 = pnand %p13614_p0, %p13886_p7  ;;  %p13622_p4 = scmp.lt.s32.totalorder %s13620_s30, %s13613_s24 }
  0x27   : > { %p13617_p2 = pneg %p13616_p1  ;;  %p13623_p6 = por %p13622_p4, %p13621_p3 }
  0x29   : > { %p13624_p8 = pnand %p13623_p6, %p13617_p2 }
  0x2b   : > { %13627 = shalt.err (!%p13624_p8)
}
  0x2c   : > { %s13783_s6 = smov 1152   ;;  %s13784_s7 = smov 72  }
  0x2d   : > { %11689 = dma.hbm_to_vmem [thread:$0]  (!%p13868_p5), %s13876_s8, 110592, %s13878_s10, %s13880_s11, %s13783_s6, %s13783_s6, %s13784_s7  }
  0x2e   : > { %s13910_s9 = sadd.s32 4294967295, %s13780_s21   ;;  %p85_p10 = scmp.ne.s32.totalorder %s13772_s19, %s13768_s18 }
  0x2f   : > { %p15817_p9 = scmp.eq.s32.totalorder %s13910_s9, 0  ;;  %p10350_p11 = scmp.ge.s32.totalorder %s13780_s21, 1 }
  0x30   : > { %p169_p12 = scmp.lt.s32.totalorder %s13780_s21, 4  ;;  %s13785_s8 = smov [#allocation2]  }
  0x31   : > { %p13920_p0 = por %p15817_p9, %p85_p10  ;;  %s181_s10 = sshll.u32 %s13785_s8, 4  ;;  %s182_s10 = int_to_ptr.vmem [resolvable:$true] %s181_s10 }
  0x32   : > { %p13924_p1 = pnand %p10350_p11, %p169_p12  ;;  %s11661_s15 = smul.u32 2304, %s13865_s27 }
  0x33   : > { %s15826_s12 = scalar_select %p13920_p0, 1, 0 }
  0x34   : > { %s15827_s14 = scalar_select %p13924_p1, 1, 0 }
  0x35   : > { %p11682_p2 = pneg %p13924_p1  ;;  %s11662_s16 = smul.u32 36864, %s13780_s21 }
  0x36   : > { %s13639_s26 = scalar_lea.vmem %s182_s10, 1536  ;;  %p13647_p11 = scmp.lt.s32.totalorder %s182_s10, %s182_s10 }
  0x37   : > { %p13933_p3 = pnand %p11682_p2, %p15817_p9  ;;  %s13941_s24 = scalar_lea.hbm %s15813_s3, %s11662_s16 }
  0x38   : > { %p13640_p6 = scmp.ne.s32.totalorder %s182_s10, %s13639_s26  ;;  %p13648_p12 = scmp.lt.s32.totalorder %s13639_s26, %s13639_s26 }
  0x39   : > { %p13630_p4 = pneg %p13933_p3 }
  0x3a   : > { %p13649_p13 = por %p13648_p12, %p13647_p11 }
  0x3b   : > { %p13642_p8 = pnand %p13640_p6, %p13630_p4 }
  0x3d   : > { %p13643_p10 = pneg %p13642_p8 }
  0x3f   : > { %p13650_p2 = pnand %p13649_p13, %p13643_p10 }
  0x41   : > { %13653 = shalt.err (!%p13650_p2)
}
  0x42   : > { %s13786_s28 = smov 768   ;;  %s13787_s30 = smov 48  }
  0x43   : > { %11685 = dma.hbm_to_vmem [thread:$0]  (!%p13933_p3), %s15810_s0, 1536, %s182_s10, [#allocation3], %s13786_s28, %s13786_s28, %s13787_s30  }
  0x44   : > { %s223_s8 = scalar_lea.vmem [#allocation7], %s11661_s15  ;;  %s11663_s17 = smul.u32 48, %s13865_s27 }
  0x45   : > { %s230_s16 = sshll.u32 %s223_s8, 4  ;;  %s13654_s23 = scalar_lea.hbm %s13941_s24, 36864  ;;  %s13950_s16 = int_to_ptr.vmem [resolvable:$true] %s230_s16 }
  0x46   : > { %p13655_p13 = scmp.ne.s32.totalorder %s13941_s24, %s13654_s23  ;;  %s13659_s25 = scalar_lea.hbm %s15813_s3, 110592 }
  0x47   : > { %p13660_p8 = scmp.lt.s32.totalorder %s13941_s24, %s15813_s3  ;;  %p13661_p10 = scmp.lt.s32.totalorder %s13659_s25, %s13654_s23 }
  0x48   : > { %p13657_p4 = pnand %p13655_p13, %p13886_p7 }
  0x49   : > { %p13662_p3 = por %p13661_p10, %p13660_p8 }
  0x4a   : > { %p13658_p6 = pneg %p13657_p4 }
  0x4c   : > { %p13663_p11 = pnand %p13662_p3, %p13658_p6 }
  0x4e   : > { %13666 = shalt.err (!%p13663_p11)
}
  0x4f   : > { %s13667_s10 = scalar_lea.vmem %s13950_s16, 36864  ;;  %s13788_s15 = smov [#allocation7]  }
  0x50   : > { %p13668_p12 = scmp.ne.s32.totalorder %s13950_s16, %s13667_s10  ;;  %s13672_s2 = sshll.u32 %s13788_s15, 4  ;;  %s13673_s2 = int_to_ptr.vmem [resolvable:$false] %s13672_s2 }
  0x51   : > { %s13674_s28 = scalar_lea.vmem %s13673_s2, 73728  ;;  %p13675_p4 = scmp.lt.s32.totalorder %s13950_s16, %s13673_s2 }
  0x52   : > { %p13670_p2 = pnand %p13668_p12, %p13886_p7  ;;  %p13676_p9 = scmp.lt.s32.totalorder %s13674_s28, %s13667_s10 }
  0x54   : > { %p13671_p13 = pneg %p13670_p2  ;;  %p13677_p0 = por %p13676_p9, %p13675_p4 }
  0x56   : > { %p13678_p1 = pnand %p13677_p0, %p13671_p13 }
  0x58   : > { %13681 = shalt.err (!%p13678_p1)
}
  0x59   : > { %s13789_s20 = smov 384   ;;  %s13790_s25 = smov 24  }
  0x5a   : > { %11692 = dma.hbm_to_vmem [thread:$0]  (!%p13868_p5), %s13941_s24, 36864, %s13950_s16, %s13880_s11, %s13789_s20, %s13789_s20, %s13790_s25  }
  0x5b   : > { %s11664_s30 = smul.u32 768, %s13780_s21  ;;  %s244_s6 = scalar_lea.vmem [#allocation8], %s11663_s17 }
  0x5c   : > { %s252_s7 = sshll.u32 %s244_s6, 4  ;;  %s241_s18 = scalar_lea.sflag [#allocation9], %s13865_s27  ;;  %s253_s7 = int_to_ptr.vmem [resolvable:$true] %s252_s7 }
  0x5d   : > { %s250_s26 = scalar_lea.hbm %s15814_s4, %s11664_s30  ;;  %s13687_s28 = scalar_lea.hbm %s15814_s4, 2304 }
  0x5e   : > { %s13682_s10 = scalar_lea.hbm %s250_s26, 768  ;;  %p13688_p6 = scmp.lt.s32.totalorder %s250_s26, %s15814_s4 }
  0x5f   : > { %p13683_p9 = scmp.ne.s32.totalorder %s250_s26, %s13682_s10  ;;  %p13689_p8 = scmp.lt.s32.totalorder %s13687_s28, %s13682_s10 }
  0x61   : > { %p13685_p0 = pnand %p13683_p9, %p13886_p7  ;;  %p13690_p10 = por %p13689_p8, %p13688_p6 }
  0x63   : > { %p13686_p1 = pneg %p13685_p0 }
  0x65   : > { %p13691_p3 = pnand %p13690_p10, %p13686_p1 }
  0x67   : > { %13694 = shalt.err (!%p13691_p3)
}
  0x68   : > { %s13695_s24 = scalar_lea.vmem %s253_s7, 768  ;;  %s13791_s27 = smov [#allocation8]  }
  0x69   : > { %p13696_p11 = scmp.ne.s32.totalorder %s253_s7, %s13695_s24  ;;  %s13700_s16 = sshll.u32 %s13791_s27, 4  ;;  %s13701_s16 = int_to_ptr.vmem [resolvable:$false] %s13700_s16 }
  0x6a   : > { %s13702_s17 = scalar_lea.vmem %s13701_s16, 1536  ;;  %p13703_p13 = scmp.lt.s32.totalorder %s253_s7, %s13701_s16 }
  0x6b   : > { %p13698_p12 = pnand %p13696_p11, %p13886_p7  ;;  %p13704_p4 = scmp.lt.s32.totalorder %s13702_s17, %s13695_s24 }
  0x6d   : > { %p13699_p2 = pneg %p13698_p12  ;;  %p13705_p9 = por %p13704_p4, %p13703_p13 }
  0x6f   : > { %p13706_p0 = pnand %p13705_p9, %p13699_p2 }
  0x71   : > { %13709 = shalt.err (!%p13706_p0)
}
  0x72   : > { %11695 = dma.hbm_to_vmem [thread:$0]  (!%p13868_p5), %s250_s26, 768, %s253_s7, %s241_s18  }
  0x73   : > { %p15829_p1 = scmp.ne.s32.totalorder %s15827_s14, 0 }
  0x74   : > { %p15830_p6 = scmp.eq.s32.totalorder (!%p15829_p1), %s13910_s9, 0 }
  0x75   : > { %261 = sbr.rel (%p15829_p1) target bundleno = 6192 (0x1830), region = 40 }
  0x7a   : > { %13751 = dma.done.wait (%p15830_p6), [#allocation3], 1536   ;;  %p15831_p7 = pmov %p15830_p6 }
  0x7b   : > { %s267_s13 = sand.u32 1, %s13910_s9   ;;  %s269_s20 = sand.u32 1, %s13772_s19  }
  0x7c   : > { %13753 = vsyncadd (%p15831_p7), [#allocation3], 4294965760  ;;  %s11665_s25 = smul.u32 6912, %s269_s20  ;;  %s268_s30 = scalar_lea.sflag [#allocation6], %s267_s13 }
  0x7d   : > { %p15832_p8 = scmp.ne.s32.totalorder %s15826_s12, 0 }
  0x7e   : > { %s14001_s6 = scalar_lea.vmem [#allocation5], %s11665_s25 }
  0x7f   : > { %13755 = dma.done.wait (%p15832_p8), %s268_s30, 147456  }
  0x80   : > { %13757 = vsyncadd (%p15832_p8), %s268_s30, 4294819840  ;;  %s11666_s29 = smul.u32 2304, %s269_s20  ;;  %s286_s8 = scalar_lea.sflag [#allocation9], %s269_s20 }
  0x81   : > { %s11667_s14 = smul.u32 48, %s269_s20 }
  0x82   : > { %s14007_s7 = scalar_lea.vmem [#allocation7], %s11666_s29 }
  0x83   : > { %s14009_s23 = scalar_lea.vmem [#allocation8], %s11667_s14 }
  0x84   : > { %13759 = dma.done.wait (%p15832_p8), %s286_s8, 768  }
  0x85   : > { %13761 = vsyncadd (%p15832_p8), %s286_s8, 4294966528  ;;  %p15833_p5 = scmp.ne.s32.totalorder %s13910_s9, 0 }
  0x87   : > { %325 = sbr.rel (%p15833_p5) target bundleno = 147 (0x93), region = 60 }
  0x8c   : > { %v326_v0 = vld [vmem:[#allocation2] sm:$0xff]  ;;  %v327_v1 = vld [vmem:[#allocation2 + $0x8] sm:$0xff]  ;;  %v328_v2 = vld [vmem:[#allocation2 + $0x10] sm:$0xff] }
  0x8d   : > { %338 = vst [vmem:[#allocation10] sm:$0xff] %v326_v0  ;;  %339 = vst [vmem:[#allocation10 + $0x8] sm:$0xff] %v327_v1  ;;  %v329_v3 = vld [vmem:[#allocation2 + $0x18] sm:$0xff]  ;;  %v330_v4 = vld [vmem:[#allocation2 + $0x20] sm:$0xff] }
  0x8e   : > { %340 = vst [vmem:[#allocation10 + $0x10] sm:$0xff] %v328_v2  ;;  %v331_v5 = vld [vmem:[#allocation2 + $0x28] sm:$0xff]  ;;  %341 = vst [vmem:[#allocation10 + $0x18] sm:$0xff] %v329_v3  ;;  %v332_v6 = vld [vmem:[#allocation2 + $0x30] sm:$0xff] }
  0x8f   : > { %342 = vst [vmem:[#allocation10 + $0x20] sm:$0xff] %v330_v4  ;;  %343 = vst [vmem:[#allocation10 + $0x28] sm:$0xff] %v331_v5  ;;  %v333_v7 = vld [vmem:[#allocation2 + $0x38] sm:$0xff]  ;;  %v334_v8 = vld [vmem:[#allocation2 + $0x40] sm:$0xff] }
  0x90   : > { %344 = vst [vmem:[#allocation10 + $0x30] sm:$0xff] %v332_v6  ;;  %345 = vst [vmem:[#allocation10 + $0x38] sm:$0xff] %v333_v7  ;;  %v335_v9 = vld [vmem:[#allocation2 + $0x48] sm:$0xff]  ;;  %v336_v10 = vld [vmem:[#allocation2 + $0x50] sm:$0xff] }
  0x91   : > { %346 = vst [vmem:[#allocation10 + $0x40] sm:$0xff] %v334_v8  ;;  %v337_v11 = vld [vmem:[#allocation2 + $0x58] sm:$0xff]  ;;  %347 = vst [vmem:[#allocation10 + $0x48] sm:$0xff] %v335_v9 }
  0x92   : > { %348 = vst [vmem:[#allocation10 + $0x50] sm:$0xff] %v336_v10  ;;  %349 = vst [vmem:[#allocation10 + $0x58] sm:$0xff] %v337_v11 }
  0x93 PF: > { %v11778_v12 = vld [vmem:[%s14001_s6 + $0x3f4] ss:$72 sps:$4 sm:$0xff]   ;;  %v11782_v14 = vld [vmem:[%s14001_s6 + $0x3f0] ss:$72 sps:$4 sm:$0xff]   ;;  %v11784_v16 = vld [vmem:[%s14001_s6 + $0x364] ss:$72 sps:$4 sm:$0xff]  }
  0x94   : > { %v11780_v13 = vld [vmem:[%s14001_s6 + $0xcf4] ss:$72 sps:$4 sm:$0xff]   ;;  %5558 = vmatprep.subr.bf16.mxu0 %v11778_v12  ;;  %v11783_v15 = vld [vmem:[%s14001_s6 + $0xcf0] ss:$72 sps:$4 sm:$0xff]   ;;  %v11786_v17 = vld [vmem:[%s14001_s6 + $0xc64] ss:$72 sps:$4 sm:$0xff]  }
  0x95   : > { %5601 = vmatprep.subr.bf16.mxu1 %v11780_v13  ;;  %5559 = vmatpush1.bf16.msra.mxu0 %v11782_v14  ;;  %v11788_v18 = vld [vmem:[%s14001_s6 + $0x360] ss:$72 sps:$4 sm:$0xff]   ;;  %v11790_v20 = vld [vmem:[%s14001_s6 + $0x2d4] ss:$72 sps:$4 sm:$0xff]   ;;  %v11794_v22 = vld [vmem:[%s14001_s6 + $0x2d0] ss:$72 sps:$4 sm:$0xff]  }
  0x96   : > { %5602 = vmatpush1.bf16.msra.mxu1 %v11783_v15  ;;  %5560 = vmatprep.subr.bf16.mxu0 %v11784_v16  ;;  %v11789_v19 = vld [vmem:[%s14001_s6 + $0xc60] ss:$72 sps:$4 sm:$0xff]   ;;  %v11792_v21 = vld [vmem:[%s14001_s6 + $0xbd4] ss:$72 sps:$4 sm:$0xff]   ;;  %v11795_v23 = vld [vmem:[%s14001_s6 + $0xbd0] ss:$72 sps:$4 sm:$0xff]  }
  0x97   : > { %5603 = vmatprep.subr.bf16.mxu1 %v11786_v17  ;;  %v11796_v24 = vld [vmem:[%s14001_s6 + $0x244] ss:$72 sps:$4 sm:$0xff]   ;;  %v11800_v26 = vld [vmem:[%s14001_s6 + $0x240] ss:$72 sps:$4 sm:$0xff]   ;;  %v11802_v28 = vld [vmem:[%s14001_s6 + $0x1b4] ss:$72 sps:$4 sm:$0xff]  }
  0x98   : > { %v11798_v25 = vld [vmem:[%s14001_s6 + $0xb44] ss:$72 sps:$4 sm:$0xff]   ;;  %v11801_v27 = vld [vmem:[%s14001_s6 + $0xb40] ss:$72 sps:$4 sm:$0xff]   ;;  %v11804_v29 = vld [vmem:[%s14001_s6 + $0xab4] ss:$72 sps:$4 sm:$0xff]  }
  0x99   : > { %5561 = vmatpush1.bf16.msra.mxu0 %v11788_v18  ;;  %v11806_v30 = vld [vmem:[%s14001_s6 + $0x1b0] ss:$72 sps:$4 sm:$0xff]   ;;  %v11808_v32 = vld [vmem:[%s14001_s6 + $0x124] ss:$72 sps:$4 sm:$0xff]   ;;  %v11812_v34 = vld [vmem:[%s14001_s6 + $0x120] ss:$72 sps:$4 sm:$0xff]  }
  0x9a   : > { %5604 = vmatpush1.bf16.msra.mxu1 %v11789_v19  ;;  %5562 = vmatprep.subr.bf16.mxu0 %v11790_v20  ;;  %v11807_v31 = vld [vmem:[%s14001_s6 + $0xab0] ss:$72 sps:$4 sm:$0xff]   ;;  %v11810_v33 = vld [vmem:[%s14001_s6 + $0xa24] ss:$72 sps:$4 sm:$0xff]   ;;  %v11813_v35 = vld [vmem:[%s14001_s6 + $0xa20] ss:$72 sps:$4 sm:$0xff]  }
  0x9b   : > { %5605 = vmatprep.subr.bf16.mxu1 %v11792_v21  ;;  %v11814_v36 = vld [vmem:[%s14001_s6 + $0x94] ss:$72 sps:$4 sm:$0xff]   ;;  %v11818_v38 = vld [vmem:[%s14001_s6 + $0x90] ss:$72 sps:$4 sm:$0xff]   ;;  %v11820_v40 = vld [vmem:[%s14001_s6 + $0x4] ss:$72 sps:$4 sm:$0xff]  }
  0x9c   : > { %v11816_v37 = vld [vmem:[%s14001_s6 + $0x994] ss:$72 sps:$4 sm:$0xff]   ;;  %v11819_v39 = vld [vmem:[%s14001_s6 + $0x990] ss:$72 sps:$4 sm:$0xff]   ;;  %v11822_v41 = vld [vmem:[%s14001_s6 + $0x904] ss:$72 sps:$4 sm:$0xff]  }
  0x9d   : > { %5563 = vmatpush1.bf16.msra.mxu0 %v11794_v22  ;;  %v11824_v42 = vld [vmem:[%s14001_s6] ss:$72 sps:$4 sm:$0xff]   ;;  %v11826_v44 = vld [vmem:[%s14001_s6 + $0x874] ss:$72 sps:$4 sm:$0xff]   ;;  %v11830_v46 = vld [vmem:[%s14001_s6 + $0x870] ss:$72 sps:$4 sm:$0xff]  }
  0x9e   : > { %5606 = vmatpush1.bf16.msra.mxu1 %v11795_v23  ;;  %5564 = vmatprep.subr.bf16.mxu0 %v11796_v24  ;;  %v11825_v43 = vld [vmem:[%s14001_s6 + $0x900] ss:$72 sps:$4 sm:$0xff]   ;;  %v11828_v45 = vld [vmem:[%s14001_s6 + $0x1174] ss:$72 sps:$4 sm:$0xff]   ;;  %v11831_v47 = vld [vmem:[%s14001_s6 + $0x1170] ss:$72 sps:$4 sm:$0xff]  }
  0x9f   : > { %5607 = vmatprep.subr.bf16.mxu1 %v11798_v25  ;;  %v11832_v48 = vld [vmem:[%s14001_s6 + $0x7e4] ss:$72 sps:$4 sm:$0xff]   ;;  %v11836_v50 = vld [vmem:[%s14001_s6 + $0x7e0] ss:$72 sps:$4 sm:$0xff]   ;;  %v11838_v52 = vld [vmem:[%s14001_s6 + $0x754] ss:$72 sps:$4 sm:$0xff]  }
  0xa0   : > { %v11834_v49 = vld [vmem:[%s14001_s6 + $0x10e4] ss:$72 sps:$4 sm:$0xff]   ;;  %v11837_v51 = vld [vmem:[%s14001_s6 + $0x10e0] ss:$72 sps:$4 sm:$0xff]   ;;  %v11840_v53 = vld [vmem:[%s14001_s6 + $0x1054] ss:$72 sps:$4 sm:$0xff]  }
  0xa1   : > { %5565 = vmatpush1.bf16.msra.mxu0 %v11800_v26  ;;  %v11842_v54 = vld [vmem:[%s14001_s6 + $0x750] ss:$72 sps:$4 sm:$0xff]   ;;  %v11844_v56 = vld [vmem:[%s14001_s6 + $0x6c4] ss:$72 sps:$4 sm:$0xff]   ;;  %v11848_v62 = vld [vmem:[%s14001_s6 + $0x6c0] ss:$72 sps:$4 sm:$0xff]  }
  0xa2   : > { %5608 = vmatpush1.bf16.msra.mxu1 %v11801_v27  ;;  %5566 = vmatprep.subr.bf16.mxu0 %v11802_v28  ;;  %v11843_v55 = vld [vmem:[%s14001_s6 + $0x1050] ss:$72 sps:$4 sm:$0xff]   ;;  %v11846_v57 = vld [vmem:[%s14001_s6 + $0xfc4] ss:$72 sps:$4 sm:$0xff]   ;;  %v11849_v63 = vld [vmem:[%s14001_s6 + $0xfc0] ss:$72 sps:$4 sm:$0xff]  }
  0xa3   : > { %5609 = vmatprep.subr.bf16.mxu1 %v11804_v29  ;;  %v351_v58 = vld [vmem:[#allocation10 + $0x8] sm:$0xff]  ;;  %v357_v59 = vld [vmem:[#allocation10 + $0x38] sm:$0xff]  ;;  %v350_v18 = vld [vmem:[#allocation10] sm:$0xff]  ;;  %s13792_s12 = smov 32   ;;  %vm6832_vm0 = vcmask 785408   ;;  %vm13794_vm1 = vmmov 0  }
  0xa4   : > { %v353_v60 = vld [vmem:[#allocation10 + $0x18] sm:$0xff]  ;;  %v359_v61 = vld [vmem:[#allocation10 + $0x48] sm:$0xff]  ;;  %v14066_v1 = vpack.c.bf16 %v357_v59, %v351_v58  ;;  %v356_v19 = vld [vmem:[#allocation10 + $0x30] sm:$0xff]  ;;  %vm6880_vm2 = vcmask 130048   ;;  %vm6957_vm3 = vcmask 261120   ;;  %s13795_s2 = smov 64  }
  0xa5   : > { %5567 = vmatpush1.bf16.msra.mxu0 %v11806_v30  ;;  %v11850_v0 = vld [vmem:[%s14001_s6 + $0x634] ss:$72 sps:$4 sm:$0xff]   ;;  %v14068_v2 = vpack.c.bf16 %v359_v61, %v353_v60  ;;  %v11854_v4 = vld [vmem:[%s14001_s6 + $0x630] ss:$72 sps:$4 sm:$0xff]   ;;  %v11856_v6 = vld [vmem:[%s14001_s6 + $0x5a4] ss:$72 sps:$4 sm:$0xff]   ;;  %v14089_v24 = vpack.c.bf16 %v356_v19, %v350_v18 }
  0xa6   : > { %5610 = vmatpush1.bf16.msra.mxu1 %v11807_v31  ;;  %5568 = vmatprep.subr.bf16.mxu0 %v11808_v32  ;;  %v11852_v3 = vld [vmem:[%s14001_s6 + $0xf34] ss:$72 sps:$4 sm:$0xff]   ;;  %v11855_v5 = vld [vmem:[%s14001_s6 + $0xf30] ss:$72 sps:$4 sm:$0xff]   ;;  %v11858_v7 = vld [vmem:[%s14001_s6 + $0xea4] ss:$72 sps:$4 sm:$0xff]  }
  0xa7   : > { %5611 = vmatprep.subr.bf16.mxu1 %v11810_v33  ;;  %5590 = vmatprep.mubr.bf16.mxu0 %v14066_v1  ;;  %v11860_v8 = vld [vmem:[%s14001_s6 + $0x5a0] ss:$72 sps:$4 sm:$0xff]   ;;  %v11862_v10 = vld [vmem:[%s14001_s6 + $0x514] ss:$72 sps:$4 sm:$0xff]   ;;  %v11866_v12 = vld [vmem:[%s14001_s6 + $0x510] ss:$72 sps:$4 sm:$0xff]  }
  0xa8   : > { %5633 = vmatprep.mubr.bf16.mxu1 %v14068_v2  ;;  %v11861_v9 = vld [vmem:[%s14001_s6 + $0xea0] ss:$72 sps:$4 sm:$0xff]   ;;  %v11864_v11 = vld [vmem:[%s14001_s6 + $0xe14] ss:$72 sps:$4 sm:$0xff]   ;;  %v11867_v13 = vld [vmem:[%s14001_s6 + $0xe10] ss:$72 sps:$4 sm:$0xff]  }
  0xa9   : > { %5569 = vmatpush1.bf16.msra.mxu0 %v11812_v34  ;;  %v11868_v14 = vld [vmem:[%s14001_s6 + $0x484] ss:$72 sps:$4 sm:$0xff]   ;;  %v11872_v16 = vld [vmem:[%s14001_s6 + $0x480] ss:$72 sps:$4 sm:$0xff]   ;;  %v352_v20 = vld [vmem:[#allocation10 + $0x10] sm:$0xff]  ;;  %vm7096_vm4 = vcmask 523264  }
  0xaa   : > { %5612 = vmatpush1.bf16.msra.mxu1 %v11813_v35  ;;  %5570 = vmatprep.subr.bf16.mxu0 %v11814_v36  ;;  %v11870_v15 = vld [vmem:[%s14001_s6 + $0xd84] ss:$72 sps:$4 sm:$0xff]   ;;  %v11873_v17 = vld [vmem:[%s14001_s6 + $0xd80] ss:$72 sps:$4 sm:$0xff]   ;;  %v11876_v22 = vld [vmem:[%s14001_s6 + $0x15f4] ss:$72 sps:$4 sm:$0xff]  }
  0xab   : > { %5613 = vmatprep.subr.bf16.mxu1 %v11816_v37  ;;  %v358_v21 = vld [vmem:[#allocation10 + $0x40] sm:$0xff]  ;;  %v11874_v26 = vld [vmem:[%s14001_s6 + $0x15f0] ss:$72 sps:$4 sm:$0xff]   ;;  %v11885_v29 = vld [vmem:[%s14001_s6 + $0x36c] ss:$72 sps:$4 sm:$0xff]   ;;  %s13796_s28 = smov 96  }
  0xac   : > { %v11879_v23 = vld [vmem:[%s14001_s6 + $0x3fc] ss:$72 sps:$4 sm:$0xff]   ;;  %v14091_v25 = vpack.c.bf16 %v358_v21, %v352_v20  ;;  %v11877_v27 = vld [vmem:[%s14001_s6 + $0x3f8] ss:$72 sps:$4 sm:$0xff]   ;;  %v11883_v31 = vld [vmem:[%s14001_s6 + $0x368] ss:$72 sps:$4 sm:$0xff]  }
  0xad   : > { %5571 = vmatpush1.bf16.msra.mxu0 %v11818_v38  ;;  %v11882_v28 = vld [vmem:[%s14001_s6 + $0x1564] ss:$72 sps:$4 sm:$0xff]   ;;  %v11880_v30 = vld [vmem:[%s14001_s6 + $0x1560] ss:$72 sps:$4 sm:$0xff]   ;;  %v11888_v32 = vld [vmem:[%s14001_s6 + $0x14d4] ss:$72 sps:$4 sm:$0xff]  }
  0xae   : > { %5614 = vmatpush1.bf16.msra.mxu1 %v11819_v39  ;;  %5572 = vmatprep.subr.bf16.mxu0 %v11820_v40  ;;  %v11891_v33 = vld [vmem:[%s14001_s6 + $0x2dc] ss:$72 sps:$4 sm:$0xff]   ;;  %v11886_v34 = vld [vmem:[%s14001_s6 + $0x14d0] ss:$72 sps:$4 sm:$0xff]   ;;  %v11897_v37 = vld [vmem:[%s14001_s6 + $0x24c] ss:$72 sps:$4 sm:$0xff]  }
  0xaf   : > { %5615 = vmatprep.subr.bf16.mxu1 %v11822_v41  ;;  %v11889_v35 = vld [vmem:[%s14001_s6 + $0x2d8] ss:$72 sps:$4 sm:$0xff]   ;;  %v11894_v36 = vld [vmem:[%s14001_s6 + $0x1444] ss:$72 sps:$4 sm:$0xff]   ;;  %v11895_v39 = vld [vmem:[%s14001_s6 + $0x248] ss:$72 sps:$4 sm:$0xff]  }
  0xb0   : > { %v11892_v38 = vld [vmem:[%s14001_s6 + $0x1440] ss:$72 sps:$4 sm:$0xff]   ;;  %v11900_v40 = vld [vmem:[%s14001_s6 + $0x13b4] ss:$72 sps:$4 sm:$0xff]   ;;  %v11922_v61 = vld [vmem:[%s14001_s6 + $0x1a70] ss:$72 sps:$4 sm:$0xff]  }
  0xb1   : > { %5573 = vmatpush1.bf16.msra.mxu0 %v11824_v42  ;;  %v11903_v41 = vld [vmem:[%s14001_s6 + $0x1bc] ss:$72 sps:$4 sm:$0xff]   ;;  %v11898_v42 = vld [vmem:[%s14001_s6 + $0x13b0] ss:$72 sps:$4 sm:$0xff]   ;;  %v11957_v18 = vld [vmem:[%s14001_s6 + $0x5ac] ss:$72 sps:$4 sm:$0xff]  }
  0xb2   : > { %5616 = vmatpush1.bf16.msra.mxu1 %v11825_v43  ;;  %5574 = vmatprep.subr.bf16.mxu0 %v11826_v44  ;;  %v11901_v43 = vld [vmem:[%s14001_s6 + $0x1b8] ss:$72 sps:$4 sm:$0xff]   ;;  %v11906_v44 = vld [vmem:[%s14001_s6 + $0x1324] ss:$72 sps:$4 sm:$0xff]   ;;  %v11919_v58 = vld [vmem:[%s14001_s6 + $0x8] ss:$72 sps:$4 sm:$0xff]  }
  0xb3   : > { %5617 = vmatprep.subr.bf16.mxu1 %v11828_v45  ;;  %v11909_v45 = vld [vmem:[%s14001_s6 + $0x12c] ss:$72 sps:$4 sm:$0xff]   ;;  %v11927_v60 = vld [vmem:[%s14001_s6 + $0x87c] ss:$72 sps:$4 sm:$0xff]   ;;  %v11952_v19 = vld [vmem:[%s14001_s6 + $0x17a0] ss:$72 sps:$4 sm:$0xff]  }
  0xb4   : > { %v11924_v59 = vld [vmem:[%s14001_s6 + $0x1a74] ss:$72 sps:$4 sm:$0xff]   ;;  %v11955_v20 = vld [vmem:[%s14001_s6 + $0x5a8] ss:$72 sps:$4 sm:$0xff]   ;;  %s13797_s11 = smov [#allocation10]   ;;  %p11699_p10 = scmp.eq.s32.totalorder %s13910_s9, 2 }
  0xb5   : > { %5575 = vmatpush2.bf16.msra.mxu0 %v11830_v46  ;;  %v11904_v46 = vld [vmem:[%s14001_s6 + $0x1320] ss:$72 sps:$4 sm:$0xff]   ;;  %v11960_v21 = vld [vmem:[%s14001_s6 + $0x1714] ss:$72 sps:$4 sm:$0xff]   ;;  %s10241_s21 = sshll.u32 %s13797_s11, 4  ;;  %s10242_s21 = int_to_ptr.vmem [resolvable:$true] %s10241_s21 }
  0xb6   : > { %5618 = vmatpush2.bf16.msra.mxu1 %v11831_v47  ;;  %5576 = vmatprep.subr.bf16.mxu0 %v11832_v48  ;;  %v11907_v47 = vld [vmem:[%s14001_s6 + $0x128] ss:$72 sps:$4 sm:$0xff]   ;;  %v11912_v48 = vld [vmem:[%s14001_s6 + $0x1294] ss:$72 sps:$4 sm:$0xff]   ;;  %s13710_s24 = scalar_lea.vmem %s10242_s21, 1536  ;;  %p13717_p2 = scmp.lt.s32.totalorder %s10242_s21, %s10242_s21 }
  0xb7   : > { %5619 = vmatprep.subr.bf16.mxu1 %v11834_v49  ;;  %v11915_v49 = vld [vmem:[%s14001_s6 + $0x9c] ss:$72 sps:$4 sm:$0xff]   ;;  %p13711_p3 = scmp.ne.s32.totalorder %s10242_s21, %s13710_s24  ;;  %p13718_p13 = scmp.lt.s32.totalorder %s13710_s24, %s13710_s24 }
  0xb9   : > { %5577 = vmatpush2.bf16.msra.mxu0 %v11836_v50  ;;  %v11910_v50 = vld [vmem:[%s14001_s6 + $0x1290] ss:$72 sps:$4 sm:$0xff]   ;;  %p13712_p11 = pnand %p13711_p3, %p11699_p10  ;;  %p13719_p4 = por %p13718_p13, %p13717_p2 }
  0xba   : > { %5620 = vmatpush2.bf16.msra.mxu1 %v11837_v51  ;;  %5578 = vmatprep.subr.bf16.mxu0 %v11838_v52  ;;  %v11913_v51 = vld [vmem:[%s14001_s6 + $0x98] ss:$72 sps:$4 sm:$0xff]   ;;  %v11918_v52 = vld [vmem:[%s14001_s6 + $0x1204] ss:$72 sps:$4 sm:$0xff]  }
  0xbb   : > { %5621 = vmatprep.subr.bf16.mxu1 %v11840_v53  ;;  %v355_v53 = vld [vmem:[#allocation10 + $0x28] sm:$0xff]  ;;  %p13713_p12 = pneg %p13712_p11 }
  0xbd   : > { %5579 = vmatpush2.bf16.msra.mxu0 %v11842_v54  ;;  %v361_v54 = vld [vmem:[#allocation10 + $0x58] sm:$0xff]  ;;  %p13720_p9 = pnand %p13719_p4, %p13713_p12 }
  0xbe   : > { %5622 = vmatpush2.bf16.msra.mxu1 %v11843_v55  ;;  %5580 = vmatprep.subr.bf16.mxu0 %v11844_v56  ;;  %v11921_v55 = vld [vmem:[%s14001_s6 + $0xc] ss:$72 sps:$4 sm:$0xff]   ;;  %v14124_v56 = vpack.c.bf16 %v361_v54, %v355_v53  ;;  %v11997_v53 = vld [vmem:[%s14001_s6 + $0x13b8] ss:$72 sps:$4 sm:$0xff]  }
  0xbf   : > { %5623 = vmatprep.subr.bf16.mxu1 %v11846_v57  ;;  %v11916_v57 = vld [vmem:[%s14001_s6 + $0x1200] ss:$72 sps:$4 sm:$0xff]   ;;  %v12002_v54 = vld [vmem:[%s14001_s6 + $0xa2c] ss:$72 sps:$4 sm:$0xff]  }
  0xc1   : > { %5581 = vmatpush2.bf16.msra.mxu0 %v11848_v62  ;;  %v11925_v62 = vld [vmem:[%s14001_s6 + $0x878] ss:$72 sps:$4 sm:$0xff]  }
  0xc2   : > { %5624 = vmatpush2.bf16.msra.mxu1 %v11849_v63  ;;  %5582 = vmatprep.subr.bf16.mxu0 %v11850_v0  ;;  %v11930_v63 = vld [vmem:[%s14001_s6 + $0x19e4] ss:$72 sps:$4 sm:$0xff]  }
  0xc3   : > { %5625 = vmatprep.subr.bf16.mxu1 %v11852_v3  ;;  %v11933_v0 = vld [vmem:[%s14001_s6 + $0x7ec] ss:$72 sps:$4 sm:$0xff]   ;;  %v11928_v3 = vld [vmem:[%s14001_s6 + $0x19e0] ss:$72 sps:$4 sm:$0xff]  }
  0xc5   : > { %5583 = vmatpush2.bf16.msra.mxu0 %v11854_v4  ;;  %v11931_v4 = vld [vmem:[%s14001_s6 + $0x7e8] ss:$72 sps:$4 sm:$0xff]  }
  0xc6   : > { %5626 = vmatpush2.bf16.msra.mxu1 %v11855_v5  ;;  %5584 = vmatprep.subr.bf16.mxu0 %v11856_v6  ;;  %v11936_v5 = vld [vmem:[%s14001_s6 + $0x1954] ss:$72 sps:$4 sm:$0xff]  }
  0xc7   : > { %5627 = vmatprep.subr.bf16.mxu1 %v11858_v7  ;;  %v11939_v6 = vld [vmem:[%s14001_s6 + $0x75c] ss:$72 sps:$4 sm:$0xff]   ;;  %v11934_v7 = vld [vmem:[%s14001_s6 + $0x1950] ss:$72 sps:$4 sm:$0xff]  }
  0xc9   : > { %5585 = vmatpush2.bf16.msra.mxu0 %v11860_v8  ;;  %v11937_v8 = vld [vmem:[%s14001_s6 + $0x758] ss:$72 sps:$4 sm:$0xff]  }
  0xca   : > { %5628 = vmatpush2.bf16.msra.mxu1 %v11861_v9  ;;  %5586 = vmatprep.subr.bf16.mxu0 %v11862_v10  ;;  %v11942_v9 = vld [vmem:[%s14001_s6 + $0x18c4] ss:$72 sps:$4 sm:$0xff]  }
  0xcb   : > { %5629 = vmatprep.subr.bf16.mxu1 %v11864_v11  ;;  %v11945_v10 = vld [vmem:[%s14001_s6 + $0x6cc] ss:$72 sps:$4 sm:$0xff]   ;;  %v11940_v11 = vld [vmem:[%s14001_s6 + $0x18c0] ss:$72 sps:$4 sm:$0xff]  }
  0xcd   : > { %5587 = vmatpush2.bf16.msra.mxu0 %v11866_v12  ;;  %v11943_v12 = vld [vmem:[%s14001_s6 + $0x6c8] ss:$72 sps:$4 sm:$0xff]  }
  0xce   : > { %5630 = vmatpush2.bf16.msra.mxu1 %v11867_v13  ;;  %5588 = vmatprep.subr.bf16.mxu0 %v11868_v14  ;;  %v11948_v13 = vld [vmem:[%s14001_s6 + $0x1834] ss:$72 sps:$4 sm:$0xff]  }
  0xcf   : > { %5631 = vmatprep.subr.bf16.mxu1 %v11870_v15  ;;  %v11951_v14 = vld [vmem:[%s14001_s6 + $0x63c] ss:$72 sps:$4 sm:$0xff]   ;;  %v11946_v15 = vld [vmem:[%s14001_s6 + $0x1830] ss:$72 sps:$4 sm:$0xff]  }
  0xd1   : > { %5589 = vmatpush2.bf16.msra.mxu0 %v11872_v16  ;;  %v11949_v16 = vld [vmem:[%s14001_s6 + $0x638] ss:$72 sps:$4 sm:$0xff]  }
  0xd2   : > { %5632 = vmatpush2.bf16.msra.mxu1 %v11873_v17  ;;  %5644 = vmatprep.subr.bf16.mxu0 %v11876_v22  ;;  %v11954_v17 = vld [vmem:[%s14001_s6 + $0x17a4] ss:$72 sps:$4 sm:$0xff]  }
  0xd3   : > { %5687 = vmatprep.subr.bf16.mxu1 %v11879_v23  ;;  %v11963_v22 = vld [vmem:[%s14001_s6 + $0x51c] ss:$72 sps:$4 sm:$0xff]   ;;  %v11958_v23 = vld [vmem:[%s14001_s6 + $0x1710] ss:$72 sps:$4 sm:$0xff]  }
  0xd4   : > { %5591 = vmatmul.mubr.bf16.vlgmr.msra.gmra.mxu0 %v14089_v24 }
  0xd5   : > { %5634 = vmatmul.mubr.bf16.vlgmr.msra.gmra.mxu1 %v14091_v25  ;;  %5645 = vmatpush1.bf16.msra.mxu0 %v11874_v26  ;;  %v11961_v26 = vld [vmem:[%s14001_s6 + $0x518] ss:$72 sps:$4 sm:$0xff]  }
  0xd6   : > { %5688 = vmatpush1.bf16.msra.mxu1 %v11877_v27  ;;  %5646 = vmatprep.subr.bf16.mxu0 %v11882_v28  ;;  %v11966_v27 = vld [vmem:[%s14001_s6 + $0x1684] ss:$72 sps:$4 sm:$0xff]  }
  0xd7   : > { %5689 = vmatprep.subr.bf16.mxu1 %v11885_v29  ;;  %5719 = vmatprep.mubr.bf16.mxu1 %v14066_v1  ;;  %v11969_v28 = vld [vmem:[%s14001_s6 + $0x48c] ss:$72 sps:$4 sm:$0xff]   ;;  %v11964_v29 = vld [vmem:[%s14001_s6 + $0x1680] ss:$72 sps:$4 sm:$0xff]  }
  0xd8   : > { %5676 = vmatprep.mubr.bf16.mxu0 %v14124_v56 }
  0xd9   : > { %5647 = vmatpush1.bf16.msra.mxu0 %v11880_v30  ;;  %v11967_v30 = vld [vmem:[%s14001_s6 + $0x488] ss:$72 sps:$4 sm:$0xff]  }
  0xda   : > { %5690 = vmatpush1.bf16.msra.mxu1 %v11883_v31  ;;  %5648 = vmatprep.subr.bf16.mxu0 %v11888_v32  ;;  %v354_v31 = vld [vmem:[#allocation10 + $0x20] sm:$0xff]  ;;  %v360_v32 = vld [vmem:[#allocation10 + $0x50] sm:$0xff] }
  0xdb   : > { %5691 = vmatprep.subr.bf16.mxu1 %v11891_v33  ;;  %v11972_v33 = vld [vmem:[%s14001_s6 + $0xcfc] ss:$72 sps:$4 sm:$0xff]  }
  0xdd   : > { %5649 = vmatpush1.bf16.msra.mxu0 %v11886_v34  ;;  %v11975_v34 = vld [vmem:[%s14001_s6 + $0x15fc] ss:$72 sps:$4 sm:$0xff]  }
  0xde   : > { %5692 = vmatpush1.bf16.msra.mxu1 %v11889_v35  ;;  %5650 = vmatprep.subr.bf16.mxu0 %v11894_v36  ;;  %v14163_v35 = vpack.c.bf16 %v360_v32, %v354_v31  ;;  %v11970_v36 = vld [vmem:[%s14001_s6 + $0xcf8] ss:$72 sps:$4 sm:$0xff]   ;;  %v12056_v31 = vld [vmem:[%s14001_s6 + $0xe1c] ss:$72 sps:$4 sm:$0xff]  }
  0xdf   : > { %5693 = vmatprep.subr.bf16.mxu1 %v11897_v37  ;;  %v11973_v37 = vld [vmem:[%s14001_s6 + $0x15f8] ss:$72 sps:$4 sm:$0xff]   ;;  %v12059_v32 = vld [vmem:[%s14001_s6 + $0x171c] ss:$72 sps:$4 sm:$0xff]  }
  0xe1   : > { %5651 = vmatpush1.bf16.msra.mxu0 %v11892_v38  ;;  %v11978_v38 = vld [vmem:[%s14001_s6 + $0xc6c] ss:$72 sps:$4 sm:$0xff]  }
  0xe2   : > { %5694 = vmatpush1.bf16.msra.mxu1 %v11895_v39  ;;  %5652 = vmatprep.subr.bf16.mxu0 %v11900_v40  ;;  %v11981_v39 = vld [vmem:[%s14001_s6 + $0x156c] ss:$72 sps:$4 sm:$0xff]   ;;  %v11976_v40 = vld [vmem:[%s14001_s6 + $0xc68] ss:$72 sps:$4 sm:$0xff]  }
  0xe3   : > { %5695 = vmatprep.subr.bf16.mxu1 %v11903_v41  ;;  %v11979_v41 = vld [vmem:[%s14001_s6 + $0x1568] ss:$72 sps:$4 sm:$0xff]  }
  0xe5   : > { %5653 = vmatpush1.bf16.msra.mxu0 %v11898_v42  ;;  %v11984_v42 = vld [vmem:[%s14001_s6 + $0xbdc] ss:$72 sps:$4 sm:$0xff]  }
  0xe6   : > { %5696 = vmatpush1.bf16.msra.mxu1 %v11901_v43  ;;  %5654 = vmatprep.subr.bf16.mxu0 %v11906_v44  ;;  %v11987_v43 = vld [vmem:[%s14001_s6 + $0x14dc] ss:$72 sps:$4 sm:$0xff]   ;;  %v11982_v44 = vld [vmem:[%s14001_s6 + $0xbd8] ss:$72 sps:$4 sm:$0xff]  }
  0xe7   : > { %5697 = vmatprep.subr.bf16.mxu1 %v11909_v45  ;;  %v11985_v45 = vld [vmem:[%s14001_s6 + $0x14d8] ss:$72 sps:$4 sm:$0xff]  }
  0xe9   : > { %5655 = vmatpush1.bf16.msra.mxu0 %v11904_v46  ;;  %v11990_v46 = vld [vmem:[%s14001_s6 + $0xb4c] ss:$72 sps:$4 sm:$0xff]  }
  0xea   : > { %5698 = vmatpush1.bf16.msra.mxu1 %v11907_v47  ;;  %5656 = vmatprep.subr.bf16.mxu0 %v11912_v48  ;;  %v11993_v47 = vld [vmem:[%s14001_s6 + $0x144c] ss:$72 sps:$4 sm:$0xff]   ;;  %v11988_v48 = vld [vmem:[%s14001_s6 + $0xb48] ss:$72 sps:$4 sm:$0xff]  }
  0xeb   : > { %5699 = vmatprep.subr.bf16.mxu1 %v11915_v49  ;;  %v11991_v49 = vld [vmem:[%s14001_s6 + $0x1448] ss:$72 sps:$4 sm:$0xff]  }
  0xed   : > { %5657 = vmatpush1.bf16.msra.mxu0 %v11910_v50  ;;  %v11996_v50 = vld [vmem:[%s14001_s6 + $0xabc] ss:$72 sps:$4 sm:$0xff]  }
  0xee   : > { %5700 = vmatpush1.bf16.msra.mxu1 %v11913_v51  ;;  %5658 = vmatprep.subr.bf16.mxu0 %v11918_v52  ;;  %v11999_v51 = vld [vmem:[%s14001_s6 + $0x13bc] ss:$72 sps:$4 sm:$0xff]   ;;  %v11994_v52 = vld [vmem:[%s14001_s6 + $0xab8] ss:$72 sps:$4 sm:$0xff]  }
  0xef   : > { %5701 = vmatprep.subr.bf16.mxu1 %v11921_v55  ;;  %v12005_v55 = vld [vmem:[%s14001_s6 + $0x132c] ss:$72 sps:$4 sm:$0xff]  }
  0xf1   : > { %5659 = vmatpush1.bf16.msra.mxu0 %v11916_v57  ;;  %v12000_v57 = vld [vmem:[%s14001_s6 + $0xa28] ss:$72 sps:$4 sm:$0xff]  }
  0xf2   : > { %5702 = vmatpush1.bf16.msra.mxu1 %v11919_v58  ;;  %5660 = vmatprep.subr.bf16.mxu0 %v11924_v59  ;;  %v12003_v58 = vld [vmem:[%s14001_s6 + $0x1328] ss:$72 sps:$4 sm:$0xff]   ;;  %v12008_v59 = vld [vmem:[%s14001_s6 + $0x99c] ss:$72 sps:$4 sm:$0xff]  }
  0xf3   : > { %5703 = vmatprep.subr.bf16.mxu1 %v11927_v60  ;;  %v12011_v60 = vld [vmem:[%s14001_s6 + $0x129c] ss:$72 sps:$4 sm:$0xff]  }
  0xf5   : > { %5661 = vmatpush2.bf16.msra.mxu0 %v11922_v61  ;;  %v12006_v61 = vld [vmem:[%s14001_s6 + $0x998] ss:$72 sps:$4 sm:$0xff]  }
  0xf6   : > { %5704 = vmatpush2.bf16.msra.mxu1 %v11925_v62  ;;  %5662 = vmatprep.subr.bf16.mxu0 %v11930_v63  ;;  %v12009_v62 = vld [vmem:[%s14001_s6 + $0x1298] ss:$72 sps:$4 sm:$0xff]   ;;  %v12014_v63 = vld [vmem:[%s14001_s6 + $0x90c] ss:$72 sps:$4 sm:$0xff]  }
  0xf7   : > { %5705 = vmatprep.subr.bf16.mxu1 %v11933_v0  ;;  %v12017_v0 = vld [vmem:[%s14001_s6 + $0x120c] ss:$72 sps:$4 sm:$0xff]  }
  0xf9   : > { %5663 = vmatpush2.bf16.msra.mxu0 %v11928_v3  ;;  %v12012_v3 = vld [vmem:[%s14001_s6 + $0x908] ss:$72 sps:$4 sm:$0xff]  }
  0xfa   : > { %5706 = vmatpush2.bf16.msra.mxu1 %v11931_v4  ;;  %5664 = vmatprep.subr.bf16.mxu0 %v11936_v5  ;;  %v12015_v4 = vld [vmem:[%s14001_s6 + $0x1208] ss:$72 sps:$4 sm:$0xff]   ;;  %v12020_v5 = vld [vmem:[%s14001_s6 + $0x117c] ss:$72 sps:$4 sm:$0xff]  }
  0xfb   : > { %5707 = vmatprep.subr.bf16.mxu1 %v11939_v6  ;;  %v12023_v6 = vld [vmem:[%s14001_s6 + $0x1a7c] ss:$72 sps:$4 sm:$0xff]  }
  0xfd   : > { %5665 = vmatpush2.bf16.msra.mxu0 %v11934_v7  ;;  %v12018_v7 = vld [vmem:[%s14001_s6 + $0x1178] ss:$72 sps:$4 sm:$0xff]  }
  0xfe   : > { %5708 = vmatpush2.bf16.msra.mxu1 %v11937_v8  ;;  %5666 = vmatprep.subr.bf16.mxu0 %v11942_v9  ;;  %v12021_v8 = vld [vmem:[%s14001_s6 + $0x1a78] ss:$72 sps:$4 sm:$0xff]   ;;  %v12026_v9 = vld [vmem:[%s14001_s6 + $0x10ec] ss:$72 sps:$4 sm:$0xff]  }
  0xff   : > { %5709 = vmatprep.subr.bf16.mxu1 %v11945_v10  ;;  %v12029_v10 = vld [vmem:[%s14001_s6 + $0x19ec] ss:$72 sps:$4 sm:$0xff]  }
 0x101   : > { %5667 = vmatpush2.bf16.msra.mxu0 %v11940_v11  ;;  %v12024_v11 = vld [vmem:[%s14001_s6 + $0x10e8] ss:$72 sps:$4 sm:$0xff]  }
 0x102   : > { %5710 = vmatpush2.bf16.msra.mxu1 %v11943_v12  ;;  %5668 = vmatprep.subr.bf16.mxu0 %v11948_v13  ;;  %v12027_v12 = vld [vmem:[%s14001_s6 + $0x19e8] ss:$72 sps:$4 sm:$0xff]   ;;  %v12032_v13 = vld [vmem:[%s14001_s6 + $0x105c] ss:$72 sps:$4 sm:$0xff]  }
 0x103   : > { %5711 = vmatprep.subr.bf16.mxu1 %v11951_v14  ;;  %v12035_v14 = vld [vmem:[%s14001_s6 + $0x195c] ss:$72 sps:$4 sm:$0xff]  }
 0x105   : > { %5669 = vmatpush2.bf16.msra.mxu0 %v11946_v15  ;;  %v12030_v15 = vld [vmem:[%s14001_s6 + $0x1058] ss:$72 sps:$4 sm:$0xff]  }
 0x106   : > { %5712 = vmatpush2.bf16.msra.mxu1 %v11949_v16  ;;  %5670 = vmatprep.subr.bf16.mxu0 %v11954_v17  ;;  %v12033_v16 = vld [vmem:[%s14001_s6 + $0x1958] ss:$72 sps:$4 sm:$0xff]   ;;  %v12038_v17 = vld [vmem:[%s14001_s6 + $0xfcc] ss:$72 sps:$4 sm:$0xff]  }
 0x107   : > { %5713 = vmatprep.subr.bf16.mxu1 %v11957_v18  ;;  %v12041_v18 = vld [vmem:[%s14001_s6 + $0x18cc] ss:$72 sps:$4 sm:$0xff]  }
 0x109   : > { %5671 = vmatpush2.bf16.msra.mxu0 %v11952_v19  ;;  %v12036_v19 = vld [vmem:[%s14001_s6 + $0xfc8] ss:$72 sps:$4 sm:$0xff]  }
 0x10a   : > { %5714 = vmatpush2.bf16.msra.mxu1 %v11955_v20  ;;  %5672 = vmatprep.subr.bf16.mxu0 %v11960_v21  ;;  %v12039_v20 = vld [vmem:[%s14001_s6 + $0x18c8] ss:$72 sps:$4 sm:$0xff]   ;;  %v12044_v21 = vld [vmem:[%s14001_s6 + $0xf3c] ss:$72 sps:$4 sm:$0xff]  }
 0x10b   : > { %5715 = vmatprep.subr.bf16.mxu1 %v11963_v22  ;;  %v12047_v22 = vld [vmem:[%s14001_s6 + $0x183c] ss:$72 sps:$4 sm:$0xff]  }
 0x10d   : > { %5673 = vmatpush2.bf16.msra.mxu0 %v11958_v23  ;;  %v12042_v23 = vld [vmem:[%s14001_s6 + $0xf38] ss:$72 sps:$4 sm:$0xff]  }
 0x10e   : > { %5716 = vmatpush2.bf16.msra.mxu1 %v11961_v26  ;;  %5674 = vmatprep.subr.bf16.mxu0 %v11966_v27  ;;  %v12045_v26 = vld [vmem:[%s14001_s6 + $0x1838] ss:$72 sps:$4 sm:$0xff]   ;;  %v12050_v27 = vld [vmem:[%s14001_s6 + $0xeac] ss:$72 sps:$4 sm:$0xff]  }
 0x10f   : > { %5717 = vmatprep.subr.bf16.mxu1 %v11969_v28  ;;  %v12053_v28 = vld [vmem:[%s14001_s6 + $0x17ac] ss:$72 sps:$4 sm:$0xff]  }
 0x111   : > { %5675 = vmatpush2.bf16.msra.mxu0 %v11964_v29  ;;  %v12048_v29 = vld [vmem:[%s14001_s6 + $0xea8] ss:$72 sps:$4 sm:$0xff]  }
 0x112   : > { %5718 = vmatpush2.bf16.msra.mxu1 %v11967_v30  ;;  %5730 = vmatprep.subr.bf16.mxu0 %v11972_v33  ;;  %v12051_v30 = vld [vmem:[%s14001_s6 + $0x17a8] ss:$72 sps:$4 sm:$0xff]   ;;  %v12054_v33 = vld [vmem:[%s14001_s6 + $0xe18] ss:$72 sps:$4 sm:$0xff]  }
 0x113   : > { %5773 = vmatprep.subr.bf16.mxu1 %v11975_v34  ;;  %v12057_v34 = vld [vmem:[%s14001_s6 + $0x1718] ss:$72 sps:$4 sm:$0xff]  }
 0x114   : > { %5677 = vmatmul.mubr.bf16.vlgmr.msra.gmra.mxu0 %v14163_v35 }
 0x115   : > { %5720 = vmatmul.mubr.bf16.vlgmr.msra.gmra.mxu1 %v14089_v24  ;;  %5731 = vmatpush1.bf16.msra.mxu0 %v11970_v36  ;;  %v12062_v36 = vld [vmem:[%s14001_s6 + $0xd8c] ss:$72 sps:$4 sm:$0xff]  }
 0x116   : > { %5774 = vmatpush1.bf16.msra.mxu1 %v11973_v37  ;;  %5732 = vmatprep.subr.bf16.mxu0 %v11978_v38  ;;  %v12065_v37 = vld [vmem:[%s14001_s6 + $0x168c] ss:$72 sps:$4 sm:$0xff]   ;;  %v12060_v38 = vld [vmem:[%s14001_s6 + $0xd88] ss:$72 sps:$4 sm:$0xff]  }
 0x117   : > { %5775 = vmatprep.subr.bf16.mxu1 %v11981_v39  ;;  %5762 = vmatprep.mubr.bf16.mxu0 %v14068_v2  ;;  %v12063_v39 = vld [vmem:[%s14001_s6 + $0x1688] ss:$72 sps:$4 sm:$0xff]  }
 0x118   : > { %5805 = vmatprep.mubr.bf16.mxu1 %v14124_v56 }
 0x119   : > { %5733 = vmatpush1.bf16.msra.mxu0 %v11976_v40  ;;  %v12068_v40 = vld [vmem:[%s14001_s6 + $0x404] ss:$72 sps:$4 sm:$0xff]  }
 0x11a   : > { %5776 = vmatpush1.bf16.msra.mxu1 %v11979_v41  ;;  %5734 = vmatprep.subr.bf16.mxu0 %v11984_v42  ;;  %v12071_v41 = vld [vmem:[%s14001_s6 + $0xd04] ss:$72 sps:$4 sm:$0xff]   ;;  %v12066_v42 = vld [vmem:[%s14001_s6 + $0x400] ss:$72 sps:$4 sm:$0xff]  }
 0x11b   : > { %5777 = vmatprep.subr.bf16.mxu1 %v11987_v43  ;;  %v12069_v43 = vld [vmem:[%s14001_s6 + $0xd00] ss:$72 sps:$4 sm:$0xff]  }
 0x11d   : > { %5735 = vmatpush1.bf16.msra.mxu0 %v11982_v44  ;;  %v12074_v44 = vld [vmem:[%s14001_s6 + $0x374] ss:$72 sps:$4 sm:$0xff]  }
 0x11e   : > { %5778 = vmatpush1.bf16.msra.mxu1 %v11985_v45  ;;  %5736 = vmatprep.subr.bf16.mxu0 %v11990_v46  ;;  %v12077_v45 = vld [vmem:[%s14001_s6 + $0xc74] ss:$72 sps:$4 sm:$0xff]   ;;  %v12072_v46 = vld [vmem:[%s14001_s6 + $0x370] ss:$72 sps:$4 sm:$0xff]  }
 0x11f   : > { %5779 = vmatprep.subr.bf16.mxu1 %v11993_v47  ;;  %v12075_v47 = vld [vmem:[%s14001_s6 + $0xc70] ss:$72 sps:$4 sm:$0xff]  }
 0x121   : > { %5737 = vmatpush1.bf16.msra.mxu0 %v11988_v48  ;;  %v12080_v48 = vld [vmem:[%s14001_s6 + $0x2e4] ss:$72 sps:$4 sm:$0xff]  }
 0x122   : > { %5780 = vmatpush1.bf16.msra.mxu1 %v11991_v49  ;;  %5738 = vmatprep.subr.bf16.mxu0 %v11996_v50  ;;  %v12083_v49 = vld [vmem:[%s14001_s6 + $0xbe4] ss:$72 sps:$4 sm:$0xff]   ;;  %v12078_v50 = vld [vmem:[%s14001_s6 + $0x2e0] ss:$72 sps:$4 sm:$0xff]  }
 0x123   : > { %5781 = vmatprep.subr.bf16.mxu1 %v11999_v51  ;;  %v12081_v51 = vld [vmem:[%s14001_s6 + $0xbe0] ss:$72 sps:$4 sm:$0xff]  }
 0x125   : > { %5739 = vmatpush1.bf16.msra.mxu0 %v11994_v52  ;;  %v12086_v52 = vld [vmem:[%s14001_s6 + $0x254] ss:$72 sps:$4 sm:$0xff]  }
 0x126   : > { %5782 = vmatpush1.bf16.msra.mxu1 %v11997_v53  ;;  %5740 = vmatprep.subr.bf16.mxu0 %v12002_v54  ;;  %v12089_v53 = vld [vmem:[%s14001_s6 + $0xb54] ss:$72 sps:$4 sm:$0xff]   ;;  %v12084_v54 = vld [vmem:[%s14001_s6 + $0x250] ss:$72 sps:$4 sm:$0xff]  }
 0x127   : > { %5783 = vmatprep.subr.bf16.mxu1 %v12005_v55  ;;  %v12087_v55 = vld [vmem:[%s14001_s6 + $0xb50] ss:$72 sps:$4 sm:$0xff]  }
 0x129   : > { %5741 = vmatpush1.bf16.msra.mxu0 %v12000_v57  ;;  %v12092_v57 = vld [vmem:[%s14001_s6 + $0x1c4] ss:$72 sps:$4 sm:$0xff]  }
 0x12a   : > { %5784 = vmatpush1.bf16.msra.mxu1 %v12003_v58  ;;  %5742 = vmatprep.subr.bf16.mxu0 %v12008_v59  ;;  %v12095_v58 = vld [vmem:[%s14001_s6 + $0xac4] ss:$72 sps:$4 sm:$0xff]   ;;  %v12090_v59 = vld [vmem:[%s14001_s6 + $0x1c0] ss:$72 sps:$4 sm:$0xff]  }
 0x12b   : > { %5785 = vmatprep.subr.bf16.mxu1 %v12011_v60  ;;  %v12093_v60 = vld [vmem:[%s14001_s6 + $0xac0] ss:$72 sps:$4 sm:$0xff]  }
 0x12d   : > { %5743 = vmatpush1.bf16.msra.mxu0 %v12006_v61  ;;  %v12098_v61 = vld [vmem:[%s14001_s6 + $0x134] ss:$72 sps:$4 sm:$0xff]  }
 0x12e   : > { %5786 = vmatpush1.bf16.msra.mxu1 %v12009_v62  ;;  %5744 = vmatprep.subr.bf16.mxu0 %v12014_v63  ;;  %v12101_v62 = vld [vmem:[%s14001_s6 + $0xa34] ss:$72 sps:$4 sm:$0xff]   ;;  %v12096_v63 = vld [vmem:[%s14001_s6 + $0x130] ss:$72 sps:$4 sm:$0xff]  }
 0x12f   : > { %5787 = vmatprep.subr.bf16.mxu1 %v12017_v0  ;;  %v12099_v0 = vld [vmem:[%s14001_s6 + $0xa30] ss:$72 sps:$4 sm:$0xff]  }
 0x131   : > { %5745 = vmatpush1.bf16.msra.mxu0 %v12012_v3  ;;  %v12104_v3 = vld [vmem:[%s14001_s6 + $0xa4] ss:$72 sps:$4 sm:$0xff]  }
 0x132   : > { %5788 = vmatpush1.bf16.msra.mxu1 %v12015_v4  ;;  %5746 = vmatprep.subr.bf16.mxu0 %v12020_v5  ;;  %v12107_v4 = vld [vmem:[%s14001_s6 + $0x9a4] ss:$72 sps:$4 sm:$0xff]   ;;  %v12102_v5 = vld [vmem:[%s14001_s6 + $0xa0] ss:$72 sps:$4 sm:$0xff]  }
 0x133   : > { %5789 = vmatprep.subr.bf16.mxu1 %v12023_v6  ;;  %v12105_v6 = vld [vmem:[%s14001_s6 + $0x9a0] ss:$72 sps:$4 sm:$0xff]  }
 0x135   : > { %5747 = vmatpush2.bf16.msra.mxu0 %v12018_v7  ;;  %v12110_v7 = vld [vmem:[%s14001_s6 + $0x14] ss:$72 sps:$4 sm:$0xff]  }
 0x136   : > { %5790 = vmatpush2.bf16.msra.mxu1 %v12021_v8  ;;  %5748 = vmatprep.subr.bf16.mxu0 %v12026_v9  ;;  %v12113_v8 = vld [vmem:[%s14001_s6 + $0x914] ss:$72 sps:$4 sm:$0xff]   ;;  %v12108_v9 = vld [vmem:[%s14001_s6 + $0x10] ss:$72 sps:$4 sm:$0xff]  }
 0x137   : > { %5791 = vmatprep.subr.bf16.mxu1 %v12029_v10  ;;  %v12111_v10 = vld [vmem:[%s14001_s6 + $0x910] ss:$72 sps:$4 sm:$0xff]  }
 0x139   : > { %5749 = vmatpush2.bf16.msra.mxu0 %v12024_v11  ;;  %v12116_v11 = vld [vmem:[%s14001_s6 + $0x884] ss:$72 sps:$4 sm:$0xff]  }
 0x13a   : > { %5792 = vmatpush2.bf16.msra.mxu1 %v12027_v12  ;;  %5750 = vmatprep.subr.bf16.mxu0 %v12032_v13  ;;  %v12119_v12 = vld [vmem:[%s14001_s6 + $0x1184] ss:$72 sps:$4 sm:$0xff]   ;;  %v12114_v13 = vld [vmem:[%s14001_s6 + $0x880] ss:$72 sps:$4 sm:$0xff]  }
 0x13b   : > { %5793 = vmatprep.subr.bf16.mxu1 %v12035_v14  ;;  %v12117_v14 = vld [vmem:[%s14001_s6 + $0x1180] ss:$72 sps:$4 sm:$0xff]  }
 0x13d   : > { %5751 = vmatpush2.bf16.msra.mxu0 %v12030_v15  ;;  %v12122_v15 = vld [vmem:[%s14001_s6 + $0x7f4] ss:$72 sps:$4 sm:$0xff]  }
 0x13e   : > { %5794 = vmatpush2.bf16.msra.mxu1 %v12033_v16  ;;  %5752 = vmatprep.subr.bf16.mxu0 %v12038_v17  ;;  %v12125_v16 = vld [vmem:[%s14001_s6 + $0x10f4] ss:$72 sps:$4 sm:$0xff]   ;;  %v12120_v17 = vld [vmem:[%s14001_s6 + $0x7f0] ss:$72 sps:$4 sm:$0xff]  }
 0x13f   : > { %5795 = vmatprep.subr.bf16.mxu1 %v12041_v18  ;;  %v12123_v18 = vld [vmem:[%s14001_s6 + $0x10f0] ss:$72 sps:$4 sm:$0xff]  }
 0x141   : > { %5753 = vmatpush2.bf16.msra.mxu0 %v12036_v19  ;;  %v12128_v19 = vld [vmem:[%s14001_s6 + $0x764] ss:$72 sps:$4 sm:$0xff]  }
 0x142   : > { %5796 = vmatpush2.bf16.msra.mxu1 %v12039_v20  ;;  %5754 = vmatprep.subr.bf16.mxu0 %v12044_v21  ;;  %v12131_v20 = vld [vmem:[%s14001_s6 + $0x1064] ss:$72 sps:$4 sm:$0xff]   ;;  %v12126_v21 = vld [vmem:[%s14001_s6 + $0x760] ss:$72 sps:$4 sm:$0xff]  }
 0x143   : > { %5797 = vmatprep.subr.bf16.mxu1 %v12047_v22  ;;  %v12129_v22 = vld [vmem:[%s14001_s6 + $0x1060] ss:$72 sps:$4 sm:$0xff]  }
 0x145   : > { %5755 = vmatpush2.bf16.msra.mxu0 %v12042_v23  ;;  %v12134_v23 = vld [vmem:[%s14001_s6 + $0x6d4] ss:$72 sps:$4 sm:$0xff]  }
 0x146   : > { %5798 = vmatpush2.bf16.msra.mxu1 %v12045_v26  ;;  %5756 = vmatprep.subr.bf16.mxu0 %v12050_v27  ;;  %v12137_v26 = vld [vmem:[%s14001_s6 + $0xfd4] ss:$72 sps:$4 sm:$0xff]   ;;  %v12132_v27 = vld [vmem:[%s14001_s6 + $0x6d0] ss:$72 sps:$4 sm:$0xff]  }
 0x147   : > { %5799 = vmatprep.subr.bf16.mxu1 %v12053_v28  ;;  %v12135_v28 = vld [vmem:[%s14001_s6 + $0xfd0] ss:$72 sps:$4 sm:$0xff]  }
 0x149   : > { %5757 = vmatpush2.bf16.msra.mxu0 %v12048_v29  ;;  %v12140_v29 = vld [vmem:[%s14001_s6 + $0x644] ss:$72 sps:$4 sm:$0xff]  }
 0x14a   : > { %5800 = vmatpush2.bf16.msra.mxu1 %v12051_v30  ;;  %5758 = vmatprep.subr.bf16.mxu0 %v12056_v31  ;;  %v12143_v30 = vld [vmem:[%s14001_s6 + $0xf44] ss:$72 sps:$4 sm:$0xff]   ;;  %v12138_v31 = vld [vmem:[%s14001_s6 + $0x640] ss:$72 sps:$4 sm:$0xff]  }
 0x14b   : > { %5801 = vmatprep.subr.bf16.mxu1 %v12059_v32  ;;  %v12141_v32 = vld [vmem:[%s14001_s6 + $0xf40] ss:$72 sps:$4 sm:$0xff]  }
 0x14d   : > { %5759 = vmatpush2.bf16.msra.mxu0 %v12054_v33  ;;  %v12146_v33 = vld [vmem:[%s14001_s6 + $0x5b4] ss:$72 sps:$4 sm:$0xff]  }
 0x14e   : > { %5802 = vmatpush2.bf16.msra.mxu1 %v12057_v34  ;;  %5760 = vmatprep.subr.bf16.mxu0 %v12062_v36  ;;  %v12149_v34 = vld [vmem:[%s14001_s6 + $0xeb4] ss:$72 sps:$4 sm:$0xff]   ;;  %v12144_v36 = vld [vmem:[%s14001_s6 + $0x5b0] ss:$72 sps:$4 sm:$0xff]  }
 0x14f   : > { %5803 = vmatprep.subr.bf16.mxu1 %v12065_v37  ;;  %v12147_v37 = vld [vmem:[%s14001_s6 + $0xeb0] ss:$72 sps:$4 sm:$0xff]  }
 0x151   : > { %5761 = vmatpush2.bf16.msra.mxu0 %v12060_v38  ;;  %v12152_v38 = vld [vmem:[%s14001_s6 + $0x524] ss:$72 sps:$4 sm:$0xff]  }
 0x152   : > { %5804 = vmatpush2.bf16.msra.mxu1 %v12063_v39  ;;  %5816 = vmatprep.subr.bf16.mxu0 %v12068_v40  ;;  %v12155_v39 = vld [vmem:[%s14001_s6 + $0xe24] ss:$72 sps:$4 sm:$0xff]   ;;  %v12150_v40 = vld [vmem:[%s14001_s6 + $0x520] ss:$72 sps:$4 sm:$0xff]  }
 0x153   : > { %5859 = vmatprep.subr.bf16.mxu1 %v12071_v41  ;;  %v12153_v41 = vld [vmem:[%s14001_s6 + $0xe20] ss:$72 sps:$4 sm:$0xff]  }
 0x154   : > { %5763 = vmatmul.mubr.bf16.vlgmr.msra.gmra.mxu0 %v14091_v25 }
 0x155   : > { %5806 = vmatmul.mubr.bf16.vlgmr.msra.gmra.mxu1 %v14163_v35  ;;  %5817 = vmatpush1.bf16.msra.mxu0 %v12066_v42  ;;  %v12158_v42 = vld [vmem:[%s14001_s6 + $0x494] ss:$72 sps:$4 sm:$0xff]  }
 0x156   : > { %5860 = vmatpush1.bf16.msra.mxu1 %v12069_v43  ;;  %5818 = vmatprep.subr.bf16.mxu0 %v12074_v44  ;;  %v12161_v43 = vld [vmem:[%s14001_s6 + $0xd94] ss:$72 sps:$4 sm:$0xff]   ;;  %v12156_v44 = vld [vmem:[%s14001_s6 + $0x490] ss:$72 sps:$4 sm:$0xff]  }
 0x157   : > { %5861 = vmatprep.subr.bf16.mxu1 %v12077_v45  ;;  %5848 = vmatprep.mubr.bf16.mxu0 %v14066_v1  ;;  %v12159_v45 = vld [vmem:[%s14001_s6 + $0xd90] ss:$72 sps:$4 sm:$0xff]  }
 0x158   : > { %5891 = vmatprep.mubr.bf16.mxu1 %v14068_v2 }
 0x159   : > { %5819 = vmatpush1.bf16.msra.mxu0 %v12072_v46  ;;  %v12164_v46 = vld [vmem:[%s14001_s6 + $0x1604] ss:$72 sps:$4 sm:$0xff]  }
 0x15a   : > { %5862 = vmatpush1.bf16.msra.mxu1 %v12075_v47  ;;  %5820 = vmatprep.subr.bf16.mxu0 %v12080_v48  ;;  %v12167_v47 = vld [vmem:[%s14001_s6 + $0x40c] ss:$72 sps:$4 sm:$0xff]   ;;  %v12162_v48 = vld [vmem:[%s14001_s6 + $0x1600] ss:$72 sps:$4 sm:$0xff]  }
 0x15b   : > { %5863 = vmatprep.subr.bf16.mxu1 %v12083_v49  ;;  %v12165_v49 = vld [vmem:[%s14001_s6 + $0x408] ss:$72 sps:$4 sm:$0xff]  }
 0x15d   : > { %5821 = vmatpush1.bf16.msra.mxu0 %v12078_v50  ;;  %v12170_v50 = vld [vmem:[%s14001_s6 + $0x1574] ss:$72 sps:$4 sm:$0xff]  }
 0x15e   : > { %5864 = vmatpush1.bf16.msra.mxu1 %v12081_v51  ;;  %5822 = vmatprep.subr.bf16.mxu0 %v12086_v52  ;;  %v12173_v51 = vld [vmem:[%s14001_s6 + $0x37c] ss:$72 sps:$4 sm:$0xff]  }
 0x15f   : > { %5865 = vmatprep.subr.bf16.mxu1 %v12089_v53 }
 0x161   : > { %5823 = vmatpush1.bf16.msra.mxu0 %v12084_v54 }
 0x162   : > { %5866 = vmatpush1.bf16.msra.mxu1 %v12087_v55  ;;  %5824 = vmatprep.subr.bf16.mxu0 %v12092_v57  ;;  %v12168_v55 = vld [vmem:[%s14001_s6 + $0x1570] ss:$72 sps:$4 sm:$0xff]  }
 0x163   : > { %5867 = vmatprep.subr.bf16.mxu1 %v12095_v58  ;;  %v12171_v57 = vld [vmem:[%s14001_s6 + $0x378] ss:$72 sps:$4 sm:$0xff]   ;;  %v12176_v58 = vld [vmem:[%s14001_s6 + $0x14e4] ss:$72 sps:$4 sm:$0xff]  }
 0x165   : > { %5825 = vmatpush1.bf16.msra.mxu0 %v12090_v59 }
 0x166   : > { %5868 = vmatpush1.bf16.msra.mxu1 %v12093_v60  ;;  %5826 = vmatprep.subr.bf16.mxu0 %v12098_v61  ;;  %v12179_v61 = vld [vmem:[%s14001_s6 + $0x2ec] ss:$72 sps:$4 sm:$0xff]  }
 0x167   : > { %5869 = vmatprep.subr.bf16.mxu1 %v12101_v62 }
 0x169   : > { %5827 = vmatpush1.bf16.msra.mxu0 %v12096_v63 }
 0x16a   : > { %5870 = vmatpush1.bf16.msra.mxu1 %v12099_v0  ;;  %5828 = vmatprep.subr.bf16.mxu0 %v12104_v3  ;;  %v12174_v3 = vld [vmem:[%s14001_s6 + $0x14e0] ss:$72 sps:$4 sm:$0xff]  }
 0x16b   : > { %5871 = vmatprep.subr.bf16.mxu1 %v12107_v4  ;;  %v12177_v4 = vld [vmem:[%s14001_s6 + $0x2e8] ss:$72 sps:$4 sm:$0xff]  }
 0x16d   : > { %5829 = vmatpush1.bf16.msra.mxu0 %v12102_v5 }
 0x16e   : > { %5872 = vmatpush1.bf16.msra.mxu1 %v12105_v6  ;;  %5830 = vmatprep.subr.bf16.mxu0 %v12110_v7  ;;  %v12182_v6 = vld [vmem:[%s14001_s6 + $0x1454] ss:$72 sps:$4 sm:$0xff]  }
 0x16f   : > { %5873 = vmatprep.subr.bf16.mxu1 %v12113_v8  ;;  %v12185_v7 = vld [vmem:[%s14001_s6 + $0x25c] ss:$72 sps:$4 sm:$0xff]   ;;  %v12180_v8 = vld [vmem:[%s14001_s6 + $0x1450] ss:$72 sps:$4 sm:$0xff]  }
 0x171   : > { %5831 = vmatpush1.bf16.msra.mxu0 %v12108_v9  ;;  %v12183_v9 = vld [vmem:[%s14001_s6 + $0x258] ss:$72 sps:$4 sm:$0xff]  }
 0x172   : > { %5874 = vmatpush1.bf16.msra.mxu1 %v12111_v10  ;;  %5832 = vmatprep.subr.bf16.mxu0 %v12116_v11  ;;  %v12188_v10 = vld [vmem:[%s14001_s6 + $0x13c4] ss:$72 sps:$4 sm:$0xff]  }
 0x173   : > { %5875 = vmatprep.subr.bf16.mxu1 %v12119_v12  ;;  %v12191_v11 = vld [vmem:[%s14001_s6 + $0x1cc] ss:$72 sps:$4 sm:$0xff]   ;;  %v12186_v12 = vld [vmem:[%s14001_s6 + $0x13c0] ss:$72 sps:$4 sm:$0xff]  }
 0x175   : > { %5833 = vmatpush2.bf16.msra.mxu0 %v12114_v13  ;;  %v12189_v13 = vld [vmem:[%s14001_s6 + $0x1c8] ss:$72 sps:$4 sm:$0xff]  }
 0x176   : > { %5876 = vmatpush2.bf16.msra.mxu1 %v12117_v14  ;;  %5834 = vmatprep.subr.bf16.mxu0 %v12122_v15  ;;  %v12194_v14 = vld [vmem:[%s14001_s6 + $0x1334] ss:$72 sps:$4 sm:$0xff]  }
 0x177   : > { %5877 = vmatprep.subr.bf16.mxu1 %v12125_v16  ;;  %v12197_v15 = vld [vmem:[%s14001_s6 + $0x13c] ss:$72 sps:$4 sm:$0xff]   ;;  %v12192_v16 = vld [vmem:[%s14001_s6 + $0x1330] ss:$72 sps:$4 sm:$0xff]  }
 0x179   : > { %5835 = vmatpush2.bf16.msra.mxu0 %v12120_v17  ;;  %v12195_v17 = vld [vmem:[%s14001_s6 + $0x138] ss:$72 sps:$4 sm:$0xff]  }
 0x17a   : > { %5878 = vmatpush2.bf16.msra.mxu1 %v12123_v18  ;;  %5836 = vmatprep.subr.bf16.mxu0 %v12128_v19  ;;  %v12200_v18 = vld [vmem:[%s14001_s6 + $0x12a4] ss:$72 sps:$4 sm:$0xff]  }
 0x17b   : > { %5879 = vmatprep.subr.bf16.mxu1 %v12131_v20  ;;  %v12203_v19 = vld [vmem:[%s14001_s6 + $0xac] ss:$72 sps:$4 sm:$0xff]   ;;  %v12198_v20 = vld [vmem:[%s14001_s6 + $0x12a0] ss:$72 sps:$4 sm:$0xff]  }
 0x17d   : > { %5837 = vmatpush2.bf16.msra.mxu0 %v12126_v21  ;;  %v12201_v21 = vld [vmem:[%s14001_s6 + $0xa8] ss:$72 sps:$4 sm:$0xff]  }
 0x17e   : > { %5880 = vmatpush2.bf16.msra.mxu1 %v12129_v22  ;;  %5838 = vmatprep.subr.bf16.mxu0 %v12134_v23  ;;  %v12206_v22 = vld [vmem:[%s14001_s6 + $0x1214] ss:$72 sps:$4 sm:$0xff]  }
 0x17f   : > { %5881 = vmatprep.subr.bf16.mxu1 %v12137_v26  ;;  %v12209_v23 = vld [vmem:[%s14001_s6 + $0x1c] ss:$72 sps:$4 sm:$0xff]   ;;  %v12204_v26 = vld [vmem:[%s14001_s6 + $0x1210] ss:$72 sps:$4 sm:$0xff]  }
 0x181   : > { %5839 = vmatpush2.bf16.msra.mxu0 %v12132_v27  ;;  %v12207_v27 = vld [vmem:[%s14001_s6 + $0x18] ss:$72 sps:$4 sm:$0xff]  }
 0x182   : > { %5882 = vmatpush2.bf16.msra.mxu1 %v12135_v28  ;;  %5840 = vmatprep.subr.bf16.mxu0 %v12140_v29  ;;  %v12212_v28 = vld [vmem:[%s14001_s6 + $0x1a84] ss:$72 sps:$4 sm:$0xff]  }
 0x183   : > { %5883 = vmatprep.subr.bf16.mxu1 %v12143_v30  ;;  %v12215_v29 = vld [vmem:[%s14001_s6 + $0x88c] ss:$72 sps:$4 sm:$0xff]   ;;  %v12210_v30 = vld [vmem:[%s14001_s6 + $0x1a80] ss:$72 sps:$4 sm:$0xff]  }
 0x185   : > { %5841 = vmatpush2.bf16.msra.mxu0 %v12138_v31  ;;  %v12213_v31 = vld [vmem:[%s14001_s6 + $0x888] ss:$72 sps:$4 sm:$0xff]  }
 0x186   : > { %5884 = vmatpush2.bf16.msra.mxu1 %v12141_v32  ;;  %5842 = vmatprep.subr.bf16.mxu0 %v12146_v33  ;;  %v12218_v32 = vld [vmem:[%s14001_s6 + $0x19f4] ss:$72 sps:$4 sm:$0xff]  }
 0x187   : > { %5885 = vmatprep.subr.bf16.mxu1 %v12149_v34  ;;  %v12221_v33 = vld [vmem:[%s14001_s6 + $0x7fc] ss:$72 sps:$4 sm:$0xff]   ;;  %v12216_v34 = vld [vmem:[%s14001_s6 + $0x19f0] ss:$72 sps:$4 sm:$0xff]  }
 0x189   : > { %5843 = vmatpush2.bf16.msra.mxu0 %v12144_v36  ;;  %v12219_v36 = vld [vmem:[%s14001_s6 + $0x7f8] ss:$72 sps:$4 sm:$0xff]  }
 0x18a   : > { %5886 = vmatpush2.bf16.msra.mxu1 %v12147_v37  ;;  %5844 = vmatprep.subr.bf16.mxu0 %v12152_v38  ;;  %v12224_v37 = vld [vmem:[%s14001_s6 + $0x1964] ss:$72 sps:$4 sm:$0xff]  }
 0x18b   : > { %5887 = vmatprep.subr.bf16.mxu1 %v12155_v39  ;;  %v12227_v38 = vld [vmem:[%s14001_s6 + $0x76c] ss:$72 sps:$4 sm:$0xff]   ;;  %v12222_v39 = vld [vmem:[%s14001_s6 + $0x1960] ss:$72 sps:$4 sm:$0xff]  }
 0x18d   : > { %5845 = vmatpush2.bf16.msra.mxu0 %v12150_v40  ;;  %v12225_v40 = vld [vmem:[%s14001_s6 + $0x768] ss:$72 sps:$4 sm:$0xff]  }
 0x18e   : > { %5888 = vmatpush2.bf16.msra.mxu1 %v12153_v41  ;;  %5846 = vmatprep.subr.bf16.mxu0 %v12158_v42  ;;  %v12230_v41 = vld [vmem:[%s14001_s6 + $0x18d4] ss:$72 sps:$4 sm:$0xff]  }
 0x18f   : > { %5889 = vmatprep.subr.bf16.mxu1 %v12161_v43  ;;  %v12233_v42 = vld [vmem:[%s14001_s6 + $0x6dc] ss:$72 sps:$4 sm:$0xff]   ;;  %v12228_v43 = vld [vmem:[%s14001_s6 + $0x18d0] ss:$72 sps:$4 sm:$0xff]  }
 0x191   : > { %5847 = vmatpush2.bf16.msra.mxu0 %v12156_v44  ;;  %v12231_v44 = vld [vmem:[%s14001_s6 + $0x6d8] ss:$72 sps:$4 sm:$0xff]  }
 0x192   : > { %5890 = vmatpush2.bf16.msra.mxu1 %v12159_v45  ;;  %5902 = vmatprep.subr.bf16.mxu0 %v12164_v46  ;;  %v12236_v45 = vld [vmem:[%s14001_s6 + $0x1844] ss:$72 sps:$4 sm:$0xff]  }
 0x193   : > { %5945 = vmatprep.subr.bf16.mxu1 %v12167_v47  ;;  %v12239_v46 = vld [vmem:[%s14001_s6 + $0x64c] ss:$72 sps:$4 sm:$0xff]   ;;  %v12234_v47 = vld [vmem:[%s14001_s6 + $0x1840] ss:$72 sps:$4 sm:$0xff]  }
 0x194   : > { %v5592_v52 = vpop.f32.mrf.mxu0  ;;  %5849 = vmatmul.mubr.bf16.vlgmr.msra.gmra.mxu0 %v14089_v24 }
 0x195   : > { %v5635_v53 = vpop.f32.mrf.mxu1  ;;  %5892 = vmatmul.mubr.bf16.vlgmr.msra.gmra.mxu1 %v14091_v25  ;;  %5903 = vmatpush1.bf16.msra.mxu0 %v12162_v48  ;;  %v12237_v48 = vld [vmem:[%s14001_s6 + $0x648] ss:$72 sps:$4 sm:$0xff]  }
 0x196   : > { %v14307_v54 = vadd.f32 %v5635_v53, %v5592_v52  ;;  %5946 = vmatpush1.bf16.msra.mxu1 %v12165_v49  ;;  %v5594_v59 = vpop.f32.mrf.mxu0  ;;  %5904 = vmatprep.subr.bf16.mxu0 %v12170_v50  ;;  %v12242_v49 = vld [vmem:[%s14001_s6 + $0x17b4] ss:$72 sps:$4 sm:$0xff]   ;;  %v12243_v52 = vld [vmem:[%s14001_s6 + $0x5b8] ss:$72 sps:$4 sm:$0xff]   ;;  %v12248_v53 = vld [vmem:[%s14001_s6 + $0x1724] ss:$72 sps:$4 sm:$0xff]  }
 0x197   : > { %v5637_v60 = vpop.f32.mrf.mxu1  ;;  %5947 = vmatprep.subr.bf16.mxu1 %v12173_v51  ;;  %5934 = vmatprep.mubr.bf16.mxu0 %v14124_v56  ;;  %v12245_v50 = vld [vmem:[%s14001_s6 + $0x5bc] ss:$72 sps:$4 sm:$0xff]   ;;  %v12240_v51 = vld [vmem:[%s14001_s6 + $0x17b0] ss:$72 sps:$4 sm:$0xff]  }
 0x198   : > { %v14313_v62 = vadd.f32 %v5637_v60, %v5594_v59  ;;  %5977 = vmatprep.mubr.bf16.mxu1 %v14066_v1  ;;  %v5596_v63 = vpop.f32.mrf.mxu0  ;;  %v12254_v59 = vld [vmem:[%s14001_s6 + $0x1694] ss:$72 sps:$4 sm:$0xff]  }
 0x199   : > { %v5639_v0 = vpop.f32.mrf.mxu1  ;;  %5905 = vmatpush1.bf16.msra.mxu0 %v12168_v55  ;;  %v12251_v55 = vld [vmem:[%s14001_s6 + $0x52c] ss:$72 sps:$4 sm:$0xff]   ;;  %v12257_v60 = vld [vmem:[%s14001_s6 + $0x49c] ss:$72 sps:$4 sm:$0xff]  }
 0x19a   : > { %v14319_v5 = vadd.f32 %v5639_v0, %v5596_v63  ;;  %5948 = vmatpush1.bf16.msra.mxu1 %v12171_v57  ;;  %5906 = vmatprep.subr.bf16.mxu0 %v12176_v58  ;;  %v12246_v57 = vld [vmem:[%s14001_s6 + $0x1720] ss:$72 sps:$4 sm:$0xff]   ;;  %v12252_v63 = vld [vmem:[%s14001_s6 + $0x1690] ss:$72 sps:$4 sm:$0xff]  }
 0x19b   : > { %5949 = vmatprep.subr.bf16.mxu1 %v12179_v61  ;;  %v12249_v58 = vld [vmem:[%s14001_s6 + $0x528] ss:$72 sps:$4 sm:$0xff]   ;;  %v6719_v61 = vlaneseq  ;;  %v12255_v0 = vld [vmem:[%s14001_s6 + $0x498] ss:$72 sps:$4 sm:$0xff]  }
 0x19d   : > { %5907 = vmatpush1.bf16.msra.mxu0 %v12174_v3  ;;  %v12260_v3 = vld [vmem:[%s14001_s6 + $0xd0c] ss:$72 sps:$4 sm:$0xff]  }
 0x19e   : > { %5950 = vmatpush1.bf16.msra.mxu1 %v12177_v4  ;;  %5908 = vmatprep.subr.bf16.mxu0 %v12182_v6  ;;  %v12263_v4 = vld [vmem:[%s14001_s6 + $0x160c] ss:$72 sps:$4 sm:$0xff]   ;;  %v14375_v6 = vshrl.u32 %v6719_v61, 7 }
 0x19f   : > { %5951 = vmatprep.subr.bf16.mxu1 %v12185_v7  ;;  %v12258_v7 = vld [vmem:[%s14001_s6 + $0xd08] ss:$72 sps:$4 sm:$0xff]   ;;  %v12308_v61 = vld [vmem:[%s14001_s6 + $0x118c] ss:$72 sps:$4 sm:$0xff]  }
 0x1a1   : > { %5909 = vmatpush1.bf16.msra.mxu0 %v12180_v8  ;;  %v12261_v8 = vld [vmem:[%s14001_s6 + $0x1608] ss:$72 sps:$4 sm:$0xff]  }
 0x1a2   : > { %5952 = vmatpush1.bf16.msra.mxu1 %v12183_v9  ;;  %5910 = vmatprep.subr.bf16.mxu0 %v12188_v10  ;;  %v5598_v9 = vpop.f32.mrf.mxu0  ;;  %v368_v10 = vld [vmem:[%s14009_s23] sm:$0x3f] }
 0x1a3   : > { %5953 = vmatprep.subr.bf16.mxu1 %v12191_v11  ;;  %v12266_v11 = vld [vmem:[%s14001_s6 + $0xc7c] ss:$72 sps:$4 sm:$0xff]  }
 0x1a5   : > { %5911 = vmatpush1.bf16.msra.mxu0 %v12186_v12  ;;  %v12269_v12 = vld [vmem:[%s14001_s6 + $0x157c] ss:$72 sps:$4 sm:$0xff]  }
 0x1a6   : > { %5954 = vmatpush1.bf16.msra.mxu1 %v12189_v13  ;;  %5912 = vmatprep.subr.bf16.mxu0 %v12194_v14  ;;  %v14383_v13 = vsub.s32 0, %v14375_v6  ;;  %v12264_v14 = vld [vmem:[%s14001_s6 + $0xc78] ss:$72 sps:$4 sm:$0xff]  }
 0x1a7   : > { %5955 = vmatprep.subr.bf16.mxu1 %v12197_v15  ;;  %v12267_v15 = vld [vmem:[%s14001_s6 + $0x1578] ss:$72 sps:$4 sm:$0xff]  }
 0x1a9   : > { %5913 = vmatpush1.bf16.msra.mxu0 %v12192_v16 }
 0x1aa   : > { %5956 = vmatpush1.bf16.msra.mxu1 %v12195_v17  ;;  %5914 = vmatprep.subr.bf16.mxu0 %v12200_v18  ;;  %v369_v17 = vld [vmem:[%s14009_s23 + $0x8] sm:$0x3f] }
 0x1ab   : > { %5957 = vmatprep.subr.bf16.mxu1 %v12203_v19  ;;  %v5641_v19 = vpop.f32.mrf.mxu1 }
 0x1ad   : > { %5915 = vmatpush1.bf16.msra.mxu0 %v12198_v20 }
 0x1ae   : > { %5958 = vmatpush1.bf16.msra.mxu1 %v12201_v21  ;;  %5916 = vmatprep.subr.bf16.mxu0 %v12206_v22  ;;  %v12272_v21 = vld [vmem:[%s14001_s6 + $0xbec] ss:$72 sps:$4 sm:$0xff]  }
 0x1af   : > { %5959 = vmatprep.subr.bf16.mxu1 %v12209_v23  ;;  %v12275_v22 = vld [vmem:[%s14001_s6 + $0x14ec] ss:$72 sps:$4 sm:$0xff]   ;;  %v6722_v23 = vrot.slane %v368_v10, %v14383_v13 }
 0x1b0   : > { %v12320_v10 = vld [vmem:[%s14001_s6 + $0x106c] ss:$72 sps:$4 sm:$0xff]  }
 0x1b1   : > { %5917 = vmatpush1.bf16.msra.mxu0 %v12204_v26 }
 0x1b2   : > { %5960 = vmatpush1.bf16.msra.mxu1 %v12207_v27  ;;  %5918 = vmatprep.subr.bf16.mxu0 %v12212_v28  ;;  %v12270_v27 = vld [vmem:[%s14001_s6 + $0xbe8] ss:$72 sps:$4 sm:$0xff]  }
 0x1b3   : > { %5961 = vmatprep.subr.bf16.mxu1 %v12215_v29  ;;  %v12273_v28 = vld [vmem:[%s14001_s6 + $0x14e8] ss:$72 sps:$4 sm:$0xff]   ;;  %v5642_v29 = vadd.f32 %v5641_v19, %v5598_v9  ;;  %v12315_v9 = vld [vmem:[%s14001_s6 + $0x19f8] ss:$72 sps:$4 sm:$0xff]   ;;  %v12332_v19 = vld [vmem:[%s14001_s6 + $0xf4c] ss:$72 sps:$4 sm:$0xff]  }
 0x1b5   : > { %5919 = vmatpush2.bf16.msra.mxu0 %v12210_v30  ;;  %v6726_v30 = vrot.slane %v369_v17, %v14383_v13  ;;  %v12324_v17 = vld [vmem:[%s14001_s6 + $0xfd8] ss:$72 sps:$4 sm:$0xff]  }
 0x1b6   : > { %5962 = vmatpush2.bf16.msra.mxu1 %v12213_v31  ;;  %5920 = vmatprep.subr.bf16.mxu0 %v12218_v32 }
 0x1b7   : > { %5963 = vmatprep.subr.bf16.mxu1 %v12221_v33  ;;  %v12281_v33 = vld [vmem:[%s14001_s6 + $0x145c] ss:$72 sps:$4 sm:$0xff]  }
 0x1b9   : > { %5921 = vmatpush2.bf16.msra.mxu0 %v12216_v34 }
 0x1ba   : > { %5964 = vmatpush2.bf16.msra.mxu1 %v12219_v36  ;;  %5922 = vmatprep.subr.bf16.mxu0 %v12224_v37 }
 0x1bb   : > { %5965 = vmatprep.subr.bf16.mxu1 %v12227_v38 }
 0x1bd   : > { %5923 = vmatpush2.bf16.msra.mxu0 %v12222_v39 }
 0x1be   : > { %5966 = vmatpush2.bf16.msra.mxu1 %v12225_v40  ;;  %5924 = vmatprep.subr.bf16.mxu0 %v12230_v41  ;;  %v12276_v40 = vld [vmem:[%s14001_s6 + $0xb58] ss:$72 sps:$4 sm:$0xff]  }
 0x1bf   : > { %5967 = vmatprep.subr.bf16.mxu1 %v12233_v42  ;;  %v12279_v41 = vld [vmem:[%s14001_s6 + $0x1458] ss:$72 sps:$4 sm:$0xff]   ;;  %v12284_v42 = vld [vmem:[%s14001_s6 + $0xacc] ss:$72 sps:$4 sm:$0xff]  }
 0x1c1   : > { %5925 = vmatpush2.bf16.msra.mxu0 %v12228_v43  ;;  %v12287_v43 = vld [vmem:[%s14001_s6 + $0x13cc] ss:$72 sps:$4 sm:$0xff]  }
 0x1c2   : > { %5968 = vmatpush2.bf16.msra.mxu1 %v12231_v44  ;;  %5926 = vmatprep.subr.bf16.mxu0 %v12236_v45  ;;  %v12282_v45 = vld [vmem:[%s14001_s6 + $0xac8] ss:$72 sps:$4 sm:$0xff]  }
 0x1c3   : > { %5969 = vmatprep.subr.bf16.mxu1 %v12239_v46  ;;  %v12285_v46 = vld [vmem:[%s14001_s6 + $0x13c8] ss:$72 sps:$4 sm:$0xff]  }
 0x1c5   : > { %5927 = vmatpush2.bf16.msra.mxu0 %v12234_v47  ;;  %v12290_v47 = vld [vmem:[%s14001_s6 + $0xa3c] ss:$72 sps:$4 sm:$0xff]  }
 0x1c6   : > { %5970 = vmatpush2.bf16.msra.mxu1 %v12237_v48  ;;  %5928 = vmatprep.subr.bf16.mxu0 %v12242_v49  ;;  %v12293_v48 = vld [vmem:[%s14001_s6 + $0x133c] ss:$72 sps:$4 sm:$0xff]   ;;  %v12288_v49 = vld [vmem:[%s14001_s6 + $0xa38] ss:$72 sps:$4 sm:$0xff]  }
 0x1c7   : > { %5971 = vmatprep.subr.bf16.mxu1 %v12245_v50  ;;  %v12291_v50 = vld [vmem:[%s14001_s6 + $0x1338] ss:$72 sps:$4 sm:$0xff]  }
 0x1c9   : > { %5929 = vmatpush2.bf16.msra.mxu0 %v12240_v51  ;;  %v12296_v51 = vld [vmem:[%s14001_s6 + $0x9ac] ss:$72 sps:$4 sm:$0xff]  }
 0x1ca   : > { %5972 = vmatpush2.bf16.msra.mxu1 %v12243_v52  ;;  %5930 = vmatprep.subr.bf16.mxu0 %v12248_v53  ;;  %v12299_v52 = vld [vmem:[%s14001_s6 + $0x12ac] ss:$72 sps:$4 sm:$0xff]   ;;  %v12294_v53 = vld [vmem:[%s14001_s6 + $0x9a8] ss:$72 sps:$4 sm:$0xff]  }
 0x1cb   : > { %5973 = vmatprep.subr.bf16.mxu1 %v12251_v55  ;;  %v12297_v55 = vld [vmem:[%s14001_s6 + $0x12a8] ss:$72 sps:$4 sm:$0xff]  }
 0x1cd   : > { %5931 = vmatpush2.bf16.msra.mxu0 %v12246_v57  ;;  %v12302_v57 = vld [vmem:[%s14001_s6 + $0x91c] ss:$72 sps:$4 sm:$0xff]  }
 0x1ce   : > { %5974 = vmatpush2.bf16.msra.mxu1 %v12249_v58  ;;  %5932 = vmatprep.subr.bf16.mxu0 %v12254_v59  ;;  %v12305_v58 = vld [vmem:[%s14001_s6 + $0x121c] ss:$72 sps:$4 sm:$0xff]   ;;  %v12300_v59 = vld [vmem:[%s14001_s6 + $0x918] ss:$72 sps:$4 sm:$0xff]  }
 0x1cf   : > { %5975 = vmatprep.subr.bf16.mxu1 %v12257_v60  ;;  %v12303_v60 = vld [vmem:[%s14001_s6 + $0x1218] ss:$72 sps:$4 sm:$0xff]  }
 0x1d1   : > { %5933 = vmatpush2.bf16.msra.mxu0 %v12252_v63  ;;  %v12311_v63 = vld [vmem:[%s14001_s6 + $0x1a8c] ss:$72 sps:$4 sm:$0xff]  }
 0x1d2   : > { %5976 = vmatpush2.bf16.msra.mxu1 %v12255_v0  ;;  %5988 = vmatprep.subr.bf16.mxu0 %v12260_v3  ;;  %v12306_v0 = vld [vmem:[%s14001_s6 + $0x1188] ss:$72 sps:$4 sm:$0xff]  }
 0x1d3   : > { %6031 = vmatprep.subr.bf16.mxu1 %v12263_v4  ;;  %v12309_v3 = vld [vmem:[%s14001_s6 + $0x1a88] ss:$72 sps:$4 sm:$0xff]   ;;  %v12314_v4 = vld [vmem:[%s14001_s6 + $0x10fc] ss:$72 sps:$4 sm:$0xff]  }
 0x1d4   : > { %v5678_v16 = vpop.f32.mrf.mxu0  ;;  %5935 = vmatmul.mubr.bf16.vlgmr.msra.gmra.mxu0 %v14163_v35 }
 0x1d5   : > { %5978 = vmatmul.mubr.bf16.vlgmr.msra.gmra.mxu1 %v14089_v24  ;;  %v5679_v18 = vadd.f32 %v5678_v16, %v14307_v54  ;;  %5989 = vmatpush1.bf16.msra.mxu0 %v12258_v7  ;;  %v12317_v7 = vld [vmem:[%s14001_s6 + $0x19fc] ss:$72 sps:$4 sm:$0xff]  }
 0x1d6   : > { %6032 = vmatpush1.bf16.msra.mxu1 %v12261_v8  ;;  %v5680_v20 = vpop.f32.mrf.mxu0  ;;  %5990 = vmatprep.subr.bf16.mxu0 %v12266_v11  ;;  %v12312_v8 = vld [vmem:[%s14001_s6 + $0x10f8] ss:$72 sps:$4 sm:$0xff]   ;;  %v12323_v11 = vld [vmem:[%s14001_s6 + $0x196c] ss:$72 sps:$4 sm:$0xff]   ;;  %v12329_v16 = vld [vmem:[%s14001_s6 + $0x18dc] ss:$72 sps:$4 sm:$0xff]  }
 0x1d7   : > { %6033 = vmatprep.subr.bf16.mxu1 %v12269_v12  ;;  %v5681_v26 = vadd.f32 %v5680_v20, %v14313_v62  ;;  %6020 = vmatprep.mubr.bf16.mxu0 %v14068_v2  ;;  %v12278_v62 = vld [vmem:[%s14001_s6 + $0xb5c] ss:$72 sps:$4 sm:$0xff]   ;;  %v6743_v34 = vadd.f32 %v6722_v23, %v5679_v18  ;;  %v12318_v12 = vld [vmem:[%s14001_s6 + $0x1068] ss:$72 sps:$4 sm:$0xff]   ;;  %v12327_v18 = vld [vmem:[%s14001_s6 + $0x18d8] ss:$72 sps:$4 sm:$0xff]  }
 0x1d8   : > { %6063 = vmatprep.mubr.bf16.mxu1 %v14124_v56  ;;  %v5682_v54 = vpop.f32.mrf.mxu0  ;;  %v12335_v20 = vld [vmem:[%s14001_s6 + $0x184c] ss:$72 sps:$4 sm:$0xff]  }
 0x1d9   : > { %v5683_v31 = vadd.f32 %v5682_v54, %v14319_v5  ;;  %5991 = vmatpush1.bf16.msra.mxu0 %v12264_v14  ;;  %v6744_v38 = vadd.f32 %v6726_v30, %v5681_v26  ;;  %v12321_v14 = vld [vmem:[%s14001_s6 + $0x1968] ss:$72 sps:$4 sm:$0xff]   ;;  %v12341_v26 = vld [vmem:[%s14001_s6 + $0x17bc] ss:$72 sps:$4 sm:$0xff]   ;;  %v5721_v54 = vpop.f32.mrf.mxu1 }
 0x1da   : > { %6034 = vmatpush1.bf16.msra.mxu1 %v12267_v15  ;;  %v5684_v32 = vpop.f32.mrf.mxu0  ;;  %5992 = vmatprep.subr.bf16.mxu0 %v12272_v21  ;;  %v12326_v15 = vld [vmem:[%s14001_s6 + $0xfdc] ss:$72 sps:$4 sm:$0xff]   ;;  %v12330_v21 = vld [vmem:[%s14001_s6 + $0xf48] ss:$72 sps:$4 sm:$0xff]  }
 0x1db   : > { %6035 = vmatprep.subr.bf16.mxu1 %v12275_v22  ;;  %v6749_v36 = vadd.f32 %v6722_v23, %v5683_v31  ;;  %v5685_v37 = vadd.f32 %v5684_v32, %v5642_v29  ;;  %v12333_v22 = vld [vmem:[%s14001_s6 + $0x1848] ss:$72 sps:$4 sm:$0xff]   ;;  %v12338_v23 = vld [vmem:[%s14001_s6 + $0xebc] ss:$72 sps:$4 sm:$0xff]   ;;  %v12344_v29 = vld [vmem:[%s14001_s6 + $0xe2c] ss:$72 sps:$4 sm:$0xff]  }
 0x1dc   : > { %v12342_v31 = vld [vmem:[%s14001_s6 + $0xe28] ss:$72 sps:$4 sm:$0xff]  }
 0x1dd   : > { %v14403_v39 = vpack.c.bf16 %v6749_v36, %v6743_v34  ;;  %v6750_v5 = vadd.f32 %v6726_v30, %v5685_v37  ;;  %5993 = vmatpush1.bf16.msra.mxu0 %v12270_v27  ;;  %v12336_v27 = vld [vmem:[%s14001_s6 + $0xeb8] ss:$72 sps:$4 sm:$0xff]   ;;  %v12347_v30 = vld [vmem:[%s14001_s6 + $0x172c] ss:$72 sps:$4 sm:$0xff]   ;;  %v12345_v32 = vld [vmem:[%s14001_s6 + $0x1728] ss:$72 sps:$4 sm:$0xff]  }
 0x1de   : > { %6036 = vmatpush1.bf16.msra.mxu1 %v12273_v28  ;;  %5994 = vmatprep.subr.bf16.mxu0 %v12278_v62  ;;  %v12339_v28 = vld [vmem:[%s14001_s6 + $0x17b8] ss:$72 sps:$4 sm:$0xff]   ;;  %v5723_v62 = vpop.f32.mrf.mxu1  ;;  %v12353_v34 = vld [vmem:[%s14001_s6 + $0x169c] ss:$72 sps:$4 sm:$0xff]  }
 0x1df   : > { %6037 = vmatprep.subr.bf16.mxu1 %v12281_v33  ;;  %v14409_v44 = vpack.c.bf16 %v6750_v5, %v6744_v38  ;;  %v12350_v33 = vld [vmem:[%s14001_s6 + $0xd9c] ss:$72 sps:$4 sm:$0xff]   ;;  %v12348_v36 = vld [vmem:[%s14001_s6 + $0xd98] ss:$72 sps:$4 sm:$0xff]  }
 0x1e0   : > { %v12351_v37 = vld [vmem:[%s14001_s6 + $0x1698] ss:$72 sps:$4 sm:$0xff]   ;;  %v5725_v38 = vpop.f32.mrf.mxu1  ;;  %v12356_v5 = vld [vmem:[%s14001_s6 + $0x414] ss:$72 sps:$4 sm:$0xff]  }
 0x1e1   : > { %5995 = vmatpush1.bf16.msra.mxu0 %v12276_v40  ;;  %v12359_v40 = vld [vmem:[%s14001_s6 + $0xd14] ss:$72 sps:$4 sm:$0xff]  }
 0x1e2   : > { %6038 = vmatpush1.bf16.msra.mxu1 %v12279_v41  ;;  %5996 = vmatprep.subr.bf16.mxu0 %v12284_v42  ;;  %v12354_v41 = vld [vmem:[%s14001_s6 + $0x410] ss:$72 sps:$4 sm:$0xff]  }
 0x1e3   : > { %6039 = vmatprep.subr.bf16.mxu1 %v12287_v43  ;;  %v12357_v42 = vld [vmem:[%s14001_s6 + $0xd10] ss:$72 sps:$4 sm:$0xff]   ;;  %v5727_v43 = vpop.f32.mrf.mxu1 }
 0x1e5   : > { %5997 = vmatpush1.bf16.msra.mxu0 %v12282_v45  ;;  %v12362_v45 = vld [vmem:[%s14001_s6 + $0x384] ss:$72 sps:$4 sm:$0xff]  }
 0x1e6   : > { %6040 = vmatpush1.bf16.msra.mxu1 %v12285_v46  ;;  %5998 = vmatprep.subr.bf16.mxu0 %v12290_v47  ;;  %v12365_v46 = vld [vmem:[%s14001_s6 + $0xc84] ss:$72 sps:$4 sm:$0xff]   ;;  %v12360_v47 = vld [vmem:[%s14001_s6 + $0x380] ss:$72 sps:$4 sm:$0xff]  }
 0x1e7   : > { %6041 = vmatprep.subr.bf16.mxu1 %v12293_v48  ;;  %v12363_v48 = vld [vmem:[%s14001_s6 + $0xc80] ss:$72 sps:$4 sm:$0xff]  }
 0x1e9   : > { %5999 = vmatpush1.bf16.msra.mxu0 %v12288_v49 }
 0x1ea   : > { %6042 = vmatpush1.bf16.msra.mxu1 %v12291_v50  ;;  %6000 = vmatprep.subr.bf16.mxu0 %v12296_v51  ;;  %v370_v50 = vld [vmem:[%s14009_s23 + $0x10] sm:$0x3f] }
 0x1eb   : > { %6043 = vmatprep.subr.bf16.mxu1 %v12299_v52 }
 0x1ed   : > { %6001 = vmatpush1.bf16.msra.mxu0 %v12294_v53 }
 0x1ee   : > { %6044 = vmatpush1.bf16.msra.mxu1 %v12297_v55  ;;  %6002 = vmatprep.subr.bf16.mxu0 %v12302_v57  ;;  %v371_v55 = vld [vmem:[%s14009_s23 + $0x18] sm:$0x3f] }
 0x1ef   : > { %6045 = vmatprep.subr.bf16.mxu1 %v12305_v58  ;;  %v12368_v58 = vld [vmem:[%s14001_s6 + $0x2f4] ss:$72 sps:$4 sm:$0xff]  }
 0x1f1   : > { %6003 = vmatpush1.bf16.msra.mxu0 %v12300_v59  ;;  %v12371_v59 = vld [vmem:[%s14001_s6 + $0xbf4] ss:$72 sps:$4 sm:$0xff]  }
 0x1f2   : > { %6046 = vmatpush1.bf16.msra.mxu1 %v12303_v60  ;;  %6004 = vmatprep.subr.bf16.mxu0 %v12308_v61 }
 0x1f3   : > { %6047 = vmatprep.subr.bf16.mxu1 %v12311_v63  ;;  %v12366_v63 = vld [vmem:[%s14001_s6 + $0x2f0] ss:$72 sps:$4 sm:$0xff]  }
 0x1f5   : > { %6005 = vmatpush2.bf16.msra.mxu0 %v12306_v0  ;;  %v12369_v0 = vld [vmem:[%s14001_s6 + $0xbf0] ss:$72 sps:$4 sm:$0xff]  }
 0x1f6   : > { %6048 = vmatpush2.bf16.msra.mxu1 %v12309_v3  ;;  %6006 = vmatprep.subr.bf16.mxu0 %v12314_v4 }
 0x1f7   : > { %6049 = vmatprep.subr.bf16.mxu1 %v12317_v7  ;;  %v6730_v7 = vrot.slane %v370_v50, %v14383_v13  ;;  %v12413_v50 = vld [vmem:[%s14001_s6 + $0x1104] ss:$72 sps:$4 sm:$0xff]  }
 0x1f9   : > { %6007 = vmatpush2.bf16.msra.mxu0 %v12312_v8 }
 0x1fa   : > { %6050 = vmatpush2.bf16.msra.mxu1 %v12315_v9  ;;  %6008 = vmatprep.subr.bf16.mxu0 %v12320_v10 }
 0x1fb   : > { %6051 = vmatprep.subr.bf16.mxu1 %v12323_v11  ;;  %v12374_v11 = vld [vmem:[%s14001_s6 + $0x264] ss:$72 sps:$4 sm:$0xff]  }
 0x1fd   : > { %6009 = vmatpush2.bf16.msra.mxu0 %v12318_v12  ;;  %v12377_v12 = vld [vmem:[%s14001_s6 + $0xb64] ss:$72 sps:$4 sm:$0xff]  }
 0x1fe   : > { %6052 = vmatpush2.bf16.msra.mxu1 %v12321_v14  ;;  %6010 = vmatprep.subr.bf16.mxu0 %v12326_v15  ;;  %v6734_v14 = vrot.slane %v371_v55, %v14383_v13  ;;  %v12419_v55 = vld [vmem:[%s14001_s6 + $0x1074] ss:$72 sps:$4 sm:$0xff]  }
 0x1ff   : > { %6053 = vmatprep.subr.bf16.mxu1 %v12329_v16 }
 0x201   : > { %6011 = vmatpush2.bf16.msra.mxu0 %v12324_v17 }
 0x202   : > { %6054 = vmatpush2.bf16.msra.mxu1 %v12327_v18  ;;  %6012 = vmatprep.subr.bf16.mxu0 %v12332_v19 }
 0x203   : > { %6055 = vmatprep.subr.bf16.mxu1 %v12335_v20 }
 0x205   : > { %6013 = vmatpush2.bf16.msra.mxu0 %v12330_v21  ;;  %v12372_v21 = vld [vmem:[%s14001_s6 + $0x260] ss:$72 sps:$4 sm:$0xff]  }
 0x206   : > { %6056 = vmatpush2.bf16.msra.mxu1 %v12333_v22  ;;  %6014 = vmatprep.subr.bf16.mxu0 %v12338_v23  ;;  %v12375_v22 = vld [vmem:[%s14001_s6 + $0xb60] ss:$72 sps:$4 sm:$0xff]   ;;  %v12380_v23 = vld [vmem:[%s14001_s6 + $0x1d4] ss:$72 sps:$4 sm:$0xff]  }
 0x207   : > { %6057 = vmatprep.subr.bf16.mxu1 %v12341_v26  ;;  %v12383_v26 = vld [vmem:[%s14001_s6 + $0xad4] ss:$72 sps:$4 sm:$0xff]  }
 0x209   : > { %6015 = vmatpush2.bf16.msra.mxu0 %v12336_v27 }
 0x20a   : > { %6058 = vmatpush2.bf16.msra.mxu1 %v12339_v28  ;;  %6016 = vmatprep.subr.bf16.mxu0 %v12344_v29  ;;  %v12378_v29 = vld [vmem:[%s14001_s6 + $0x1d0] ss:$72 sps:$4 sm:$0xff]  }
 0x20b   : > { %6059 = vmatprep.subr.bf16.mxu1 %v12347_v30  ;;  %v12381_v30 = vld [vmem:[%s14001_s6 + $0xad0] ss:$72 sps:$4 sm:$0xff]  }
 0x20d   : > { %6017 = vmatpush2.bf16.msra.mxu0 %v12342_v31 }
 0x20e   : > { %6060 = vmatpush2.bf16.msra.mxu1 %v12345_v32  ;;  %6018 = vmatprep.subr.bf16.mxu0 %v12350_v33  ;;  %v12386_v32 = vld [vmem:[%s14001_s6 + $0x144] ss:$72 sps:$4 sm:$0xff]   ;;  %v12384_v33 = vld [vmem:[%s14001_s6 + $0x140] ss:$72 sps:$4 sm:$0xff]  }
 0x20f   : > { %6061 = vmatprep.subr.bf16.mxu1 %v12353_v34  ;;  %v12387_v34 = vld [vmem:[%s14001_s6 + $0xa40] ss:$72 sps:$4 sm:$0xff]  }
 0x211   : > { %6019 = vmatpush2.bf16.msra.mxu0 %v12348_v36  ;;  %v12392_v36 = vld [vmem:[%s14001_s6 + $0xb4] ss:$72 sps:$4 sm:$0xff]  }
 0x212   : > { %6062 = vmatpush2.bf16.msra.mxu1 %v12351_v37  ;;  %6074 = vmatprep.subr.bf16.mxu0 %v12356_v5  ;;  %v12395_v37 = vld [vmem:[%s14001_s6 + $0x9b4] ss:$72 sps:$4 sm:$0xff]   ;;  %v12393_v5 = vld [vmem:[%s14001_s6 + $0x9b0] ss:$72 sps:$4 sm:$0xff]  }
 0x213   : > { %6117 = vmatprep.subr.bf16.mxu1 %v12359_v40  ;;  %v12398_v40 = vld [vmem:[%s14001_s6 + $0x24] ss:$72 sps:$4 sm:$0xff]  }
 0x214   : > { %v5764_v49 = vpop.f32.mrf.mxu0  ;;  %6021 = vmatmul.mubr.bf16.vlgmr.msra.gmra.mxu0 %v14091_v25 }
 0x215   : > { %v5807_v51 = vpop.f32.mrf.mxu1  ;;  %6064 = vmatmul.mubr.bf16.vlgmr.msra.gmra.mxu1 %v14163_v35  ;;  %v5765_v52 = vadd.f32 %v5764_v49, %v5721_v54  ;;  %6075 = vmatpush1.bf16.msra.mxu0 %v12354_v41  ;;  %v12401_v41 = vld [vmem:[%s14001_s6 + $0x924] ss:$72 sps:$4 sm:$0xff]  }
 0x216   : > { %6118 = vmatpush1.bf16.msra.mxu1 %v12357_v42  ;;  %v5766_v53 = vpop.f32.mrf.mxu0  ;;  %6076 = vmatprep.subr.bf16.mxu0 %v12362_v45  ;;  %v12396_v42 = vld [vmem:[%s14001_s6 + $0x20] ss:$72 sps:$4 sm:$0xff]   ;;  %v12404_v45 = vld [vmem:[%s14001_s6 + $0x894] ss:$72 sps:$4 sm:$0xff]   ;;  %v12410_v49 = vld [vmem:[%s14001_s6 + $0x804] ss:$72 sps:$4 sm:$0xff]  }
 0x217   : > { %v5809_v57 = vpop.f32.mrf.mxu1  ;;  %6119 = vmatprep.subr.bf16.mxu1 %v12365_v46  ;;  %v5808_v60 = vadd.f32 %v5807_v51, %v5765_v52  ;;  %v5767_v61 = vadd.f32 %v5766_v53, %v5723_v62  ;;  %6106 = vmatprep.mubr.bf16.mxu0 %v14066_v1  ;;  %v12389_v62 = vld [vmem:[%s14001_s6 + $0xa44] ss:$72 sps:$4 sm:$0xff]   ;;  %v12407_v46 = vld [vmem:[%s14001_s6 + $0x1194] ss:$72 sps:$4 sm:$0xff]   ;;  %v12408_v51 = vld [vmem:[%s14001_s6 + $0x800] ss:$72 sps:$4 sm:$0xff]  }
 0x218   : > { %6149 = vmatprep.mubr.bf16.mxu1 %v14068_v2  ;;  %v5768_v3 = vpop.f32.mrf.mxu0  ;;  %v12411_v52 = vld [vmem:[%s14001_s6 + $0x1100] ss:$72 sps:$4 sm:$0xff]   ;;  %v12416_v53 = vld [vmem:[%s14001_s6 + $0x774] ss:$72 sps:$4 sm:$0xff]  }
 0x219   : > { %v5811_v4 = vpop.f32.mrf.mxu1  ;;  %v5810_v8 = vadd.f32 %v5809_v57, %v5767_v61  ;;  %v5769_v9 = vadd.f32 %v5768_v3, %v5725_v38  ;;  %6077 = vmatpush1.bf16.msra.mxu0 %v12360_v47  ;;  %v6745_v18 = vadd.f32 %v6730_v7, %v5808_v60  ;;  %v12390_v38 = vld [vmem:[%s14001_s6 + $0xb0] ss:$72 sps:$4 sm:$0xff]   ;;  %v12425_v60 = vld [vmem:[%s14001_s6 + $0xfe4] ss:$72 sps:$4 sm:$0xff]   ;;  %v12420_v61 = vld [vmem:[%s14001_s6 + $0x6e0] ss:$72 sps:$4 sm:$0xff]  }
 0x21a   : > { %6120 = vmatpush1.bf16.msra.mxu1 %v12363_v48  ;;  %v5770_v10 = vpop.f32.mrf.mxu0  ;;  %6078 = vmatprep.subr.bf16.mxu0 %v12368_v58  ;;  %v12402_v47 = vld [vmem:[%s14001_s6 + $0x890] ss:$72 sps:$4 sm:$0xff]   ;;  %v12431_v3 = vld [vmem:[%s14001_s6 + $0xf54] ss:$72 sps:$4 sm:$0xff]  }
 0x21b   : > { %6121 = vmatprep.subr.bf16.mxu1 %v12371_v59  ;;  %v5812_v15 = vadd.f32 %v5811_v4, %v5769_v9  ;;  %v5771_v16 = vadd.f32 %v5770_v10, %v5727_v43  ;;  %v5813_v17 = vpop.f32.mrf.mxu1  ;;  %v6746_v27 = vadd.f32 %v6734_v14, %v5810_v8  ;;  %v12399_v43 = vld [vmem:[%s14001_s6 + $0x920] ss:$72 sps:$4 sm:$0xff]   ;;  %v12405_v48 = vld [vmem:[%s14001_s6 + $0x1190] ss:$72 sps:$4 sm:$0xff]   ;;  %v12422_v59 = vld [vmem:[%s14001_s6 + $0x6e4] ss:$72 sps:$4 sm:$0xff]  }
 0x21c   : > { %v12414_v57 = vld [vmem:[%s14001_s6 + $0x770] ss:$72 sps:$4 sm:$0xff]   ;;  %v12434_v8 = vld [vmem:[%s14001_s6 + $0x5c4] ss:$72 sps:$4 sm:$0xff]   ;;  %v12432_v10 = vld [vmem:[%s14001_s6 + $0x5c0] ss:$72 sps:$4 sm:$0xff]  }
 0x21d   : > { %v6751_v19 = vadd.f32 %v6730_v7, %v5812_v15  ;;  %v5814_v20 = vadd.f32 %v5813_v17, %v5771_v16  ;;  %6079 = vmatpush1.bf16.msra.mxu0 %v12366_v63  ;;  %v12417_v58 = vld [vmem:[%s14001_s6 + $0x1070] ss:$72 sps:$4 sm:$0xff]   ;;  %v12423_v63 = vld [vmem:[%s14001_s6 + $0xfe0] ss:$72 sps:$4 sm:$0xff]   ;;  %v12437_v9 = vld [vmem:[%s14001_s6 + $0xec4] ss:$72 sps:$4 sm:$0xff]  }
 0x21e   : > { %6122 = vmatpush1.bf16.msra.mxu1 %v12369_v0  ;;  %6080 = vmatprep.subr.bf16.mxu0 %v12374_v11  ;;  %v12428_v0 = vld [vmem:[%s14001_s6 + $0x654] ss:$72 sps:$4 sm:$0xff]   ;;  %v12426_v4 = vld [vmem:[%s14001_s6 + $0x650] ss:$72 sps:$4 sm:$0xff]   ;;  %v12435_v11 = vld [vmem:[%s14001_s6 + $0xec0] ss:$72 sps:$4 sm:$0xff]  }
 0x21f   : > { %6123 = vmatprep.subr.bf16.mxu1 %v12377_v12  ;;  %v6752_v28 = vadd.f32 %v6734_v14, %v5814_v20  ;;  %v14483_v54 = vpack.c.bf16 %v6751_v19, %v6745_v18  ;;  %v12429_v7 = vld [vmem:[%s14001_s6 + $0xf50] ss:$72 sps:$4 sm:$0xff]   ;;  %v12440_v12 = vld [vmem:[%s14001_s6 + $0x534] ss:$72 sps:$4 sm:$0xff]   ;;  %v12446_v17 = vld [vmem:[%s14001_s6 + $0x4a4] ss:$72 sps:$4 sm:$0xff]  }
 0x220   : > { %v12443_v14 = vld [vmem:[%s14001_s6 + $0xe34] ss:$72 sps:$4 sm:$0xff]   ;;  %v12438_v15 = vld [vmem:[%s14001_s6 + $0x530] ss:$72 sps:$4 sm:$0xff]   ;;  %v12449_v18 = vld [vmem:[%s14001_s6 + $0xda4] ss:$72 sps:$4 sm:$0xff]  }
 0x221   : > { %6081 = vmatpush1.bf16.msra.mxu0 %v12372_v21  ;;  %v14487_v31 = vpack.c.bf16 %v6752_v28, %v6746_v27  ;;  %v12441_v16 = vld [vmem:[%s14001_s6 + $0xe30] ss:$72 sps:$4 sm:$0xff]   ;;  %v12444_v19 = vld [vmem:[%s14001_s6 + $0x4a0] ss:$72 sps:$4 sm:$0xff]   ;;  %v12452_v21 = vld [vmem:[%s14001_s6 + $0x1614] ss:$72 sps:$4 sm:$0xff]  }
 0x222   : > { %6124 = vmatpush1.bf16.msra.mxu1 %v12375_v22  ;;  %6082 = vmatprep.subr.bf16.mxu0 %v12380_v23  ;;  %v12447_v20 = vld [vmem:[%s14001_s6 + $0xda0] ss:$72 sps:$4 sm:$0xff]   ;;  %v12455_v22 = vld [vmem:[%s14001_s6 + $0x41c] ss:$72 sps:$4 sm:$0xff]   ;;  %v12450_v23 = vld [vmem:[%s14001_s6 + $0x1610] ss:$72 sps:$4 sm:$0xff]  }
 0x223   : > { %6125 = vmatprep.subr.bf16.mxu1 %v12383_v26  ;;  %v12453_v26 = vld [vmem:[%s14001_s6 + $0x418] ss:$72 sps:$4 sm:$0xff]   ;;  %v12458_v27 = vld [vmem:[%s14001_s6 + $0x1584] ss:$72 sps:$4 sm:$0xff]  }
 0x224   : > { %v12461_v28 = vld [vmem:[%s14001_s6 + $0x38c] ss:$72 sps:$4 sm:$0xff]  }
 0x225   : > { %6083 = vmatpush1.bf16.msra.mxu0 %v12378_v29  ;;  %v12456_v29 = vld [vmem:[%s14001_s6 + $0x1580] ss:$72 sps:$4 sm:$0xff]  }
 0x226   : > { %6126 = vmatpush1.bf16.msra.mxu1 %v12381_v30  ;;  %6084 = vmatprep.subr.bf16.mxu0 %v12386_v32  ;;  %v12459_v30 = vld [vmem:[%s14001_s6 + $0x388] ss:$72 sps:$4 sm:$0xff]  }
 0x227   : > { %6127 = vmatprep.subr.bf16.mxu1 %v12389_v62 }
 0x229   : > { %6085 = vmatpush1.bf16.msra.mxu0 %v12384_v33 }
 0x22a   : > { %6128 = vmatpush1.bf16.msra.mxu1 %v12387_v34  ;;  %6086 = vmatprep.subr.bf16.mxu0 %v12392_v36 }
 0x22b   : > { %6129 = vmatprep.subr.bf16.mxu1 %v12395_v37  ;;  %v12464_v37 = vld [vmem:[%s14001_s6 + $0x14f4] ss:$72 sps:$4 sm:$0xff]  }
 0x22d   : > { %6087 = vmatpush1.bf16.msra.mxu0 %v12390_v38  ;;  %v12467_v38 = vld [vmem:[%s14001_s6 + $0x2fc] ss:$72 sps:$4 sm:$0xff]  }
 0x22e   : > { %6130 = vmatpush1.bf16.msra.mxu1 %v12393_v5  ;;  %6088 = vmatprep.subr.bf16.mxu0 %v12398_v40  ;;  %v12462_v40 = vld [vmem:[%s14001_s6 + $0x14f0] ss:$72 sps:$4 sm:$0xff]  }
 0x22f   : > { %6131 = vmatprep.subr.bf16.mxu1 %v12401_v41  ;;  %v12465_v41 = vld [vmem:[%s14001_s6 + $0x2f8] ss:$72 sps:$4 sm:$0xff]  }
 0x231   : > { %6089 = vmatpush1.bf16.msra.mxu0 %v12396_v42 }
 0x232   : > { %6132 = vmatpush1.bf16.msra.mxu1 %v12399_v43  ;;  %6090 = vmatprep.subr.bf16.mxu0 %v12404_v45 }
 0x233   : > { %6133 = vmatprep.subr.bf16.mxu1 %v12407_v46  ;;  %v12470_v46 = vld [vmem:[%s14001_s6 + $0x1464] ss:$72 sps:$4 sm:$0xff]  }
 0x235   : > { %6091 = vmatpush2.bf16.msra.mxu0 %v12402_v47  ;;  %v12473_v47 = vld [vmem:[%s14001_s6 + $0x26c] ss:$72 sps:$4 sm:$0xff]  }
 0x236   : > { %6134 = vmatpush2.bf16.msra.mxu1 %v12405_v48  ;;  %6092 = vmatprep.subr.bf16.mxu0 %v12410_v49  ;;  %v12468_v48 = vld [vmem:[%s14001_s6 + $0x1460] ss:$72 sps:$4 sm:$0xff]  }
 0x237   : > { %6135 = vmatprep.subr.bf16.mxu1 %v12413_v50  ;;  %v12471_v49 = vld [vmem:[%s14001_s6 + $0x268] ss:$72 sps:$4 sm:$0xff]   ;;  %v12476_v50 = vld [vmem:[%s14001_s6 + $0x13d4] ss:$72 sps:$4 sm:$0xff]  }
 0x239   : > { %6093 = vmatpush2.bf16.msra.mxu0 %v12408_v51  ;;  %v12479_v51 = vld [vmem:[%s14001_s6 + $0x1dc] ss:$72 sps:$4 sm:$0xff]  }
 0x23a   : > { %6136 = vmatpush2.bf16.msra.mxu1 %v12411_v52  ;;  %6094 = vmatprep.subr.bf16.mxu0 %v12416_v53  ;;  %v12474_v52 = vld [vmem:[%s14001_s6 + $0x13d0] ss:$72 sps:$4 sm:$0xff]  }
 0x23b   : > { %6137 = vmatprep.subr.bf16.mxu1 %v12419_v55  ;;  %v12477_v53 = vld [vmem:[%s14001_s6 + $0x1d8] ss:$72 sps:$4 sm:$0xff]   ;;  %v12482_v55 = vld [vmem:[%s14001_s6 + $0x1344] ss:$72 sps:$4 sm:$0xff]  }
 0x23d   : > { %6095 = vmatpush2.bf16.msra.mxu0 %v12414_v57  ;;  %v12485_v57 = vld [vmem:[%s14001_s6 + $0x14c] ss:$72 sps:$4 sm:$0xff]  }
 0x23e   : > { %6138 = vmatpush2.bf16.msra.mxu1 %v12417_v58  ;;  %6096 = vmatprep.subr.bf16.mxu0 %v12422_v59  ;;  %v12480_v58 = vld [vmem:[%s14001_s6 + $0x1340] ss:$72 sps:$4 sm:$0xff]  }
 0x23f   : > { %6139 = vmatprep.subr.bf16.mxu1 %v12425_v60  ;;  %v12483_v59 = vld [vmem:[%s14001_s6 + $0x148] ss:$72 sps:$4 sm:$0xff]   ;;  %v12488_v60 = vld [vmem:[%s14001_s6 + $0x12b4] ss:$72 sps:$4 sm:$0xff]  }
 0x241   : > { %6097 = vmatpush2.bf16.msra.mxu0 %v12420_v61  ;;  %v12491_v61 = vld [vmem:[%s14001_s6 + $0xbc] ss:$72 sps:$4 sm:$0xff]  }
 0x242   : > { %6140 = vmatpush2.bf16.msra.mxu1 %v12423_v63  ;;  %6098 = vmatprep.subr.bf16.mxu0 %v12428_v0  ;;  %v12486_v63 = vld [vmem:[%s14001_s6 + $0x12b0] ss:$72 sps:$4 sm:$0xff]  }
 0x243   : > { %6141 = vmatprep.subr.bf16.mxu1 %v12431_v3  ;;  %v12489_v0 = vld [vmem:[%s14001_s6 + $0xb8] ss:$72 sps:$4 sm:$0xff]   ;;  %v12494_v3 = vld [vmem:[%s14001_s6 + $0x1224] ss:$72 sps:$4 sm:$0xff]  }
 0x245   : > { %6099 = vmatpush2.bf16.msra.mxu0 %v12426_v4  ;;  %v12497_v4 = vld [vmem:[%s14001_s6 + $0x2c] ss:$72 sps:$4 sm:$0xff]  }
 0x246   : > { %6142 = vmatpush2.bf16.msra.mxu1 %v12429_v7  ;;  %6100 = vmatprep.subr.bf16.mxu0 %v12434_v8  ;;  %v12492_v7 = vld [vmem:[%s14001_s6 + $0x1220] ss:$72 sps:$4 sm:$0xff]  }
 0x247   : > { %6143 = vmatprep.subr.bf16.mxu1 %v12437_v9  ;;  %v12495_v8 = vld [vmem:[%s14001_s6 + $0x28] ss:$72 sps:$4 sm:$0xff]   ;;  %v12500_v9 = vld [vmem:[%s14001_s6 + $0x1a94] ss:$72 sps:$4 sm:$0xff]  }
 0x249   : > { %6101 = vmatpush2.bf16.msra.mxu0 %v12432_v10  ;;  %v12503_v10 = vld [vmem:[%s14001_s6 + $0x89c] ss:$72 sps:$4 sm:$0xff]  }
 0x24a   : > { %6144 = vmatpush2.bf16.msra.mxu1 %v12435_v11  ;;  %6102 = vmatprep.subr.bf16.mxu0 %v12440_v12  ;;  %v12498_v11 = vld [vmem:[%s14001_s6 + $0x1a90] ss:$72 sps:$4 sm:$0xff]  }
 0x24b   : > { %6145 = vmatprep.subr.bf16.mxu1 %v12443_v14  ;;  %v12501_v12 = vld [vmem:[%s14001_s6 + $0x898] ss:$72 sps:$4 sm:$0xff]   ;;  %v12506_v14 = vld [vmem:[%s14001_s6 + $0x1a04] ss:$72 sps:$4 sm:$0xff]  }
 0x24d   : > { %6103 = vmatpush2.bf16.msra.mxu0 %v12438_v15  ;;  %v12509_v15 = vld [vmem:[%s14001_s6 + $0x80c] ss:$72 sps:$4 sm:$0xff]  }
 0x24e   : > { %6146 = vmatpush2.bf16.msra.mxu1 %v12441_v16  ;;  %6104 = vmatprep.subr.bf16.mxu0 %v12446_v17  ;;  %v12504_v16 = vld [vmem:[%s14001_s6 + $0x1a00] ss:$72 sps:$4 sm:$0xff]  }
 0x24f   : > { %6147 = vmatprep.subr.bf16.mxu1 %v12449_v18  ;;  %v12507_v17 = vld [vmem:[%s14001_s6 + $0x808] ss:$72 sps:$4 sm:$0xff]   ;;  %v12512_v18 = vld [vmem:[%s14001_s6 + $0x1974] ss:$72 sps:$4 sm:$0xff]  }
 0x251   : > { %6105 = vmatpush2.bf16.msra.mxu0 %v12444_v19  ;;  %v12515_v19 = vld [vmem:[%s14001_s6 + $0x77c] ss:$72 sps:$4 sm:$0xff]  }
 0x252   : > { %6148 = vmatpush2.bf16.msra.mxu1 %v12447_v20  ;;  %6160 = vmatprep.subr.bf16.mxu0 %v12452_v21  ;;  %v12510_v20 = vld [vmem:[%s14001_s6 + $0x1970] ss:$72 sps:$4 sm:$0xff]  }
 0x253   : > { %6203 = vmatprep.subr.bf16.mxu1 %v12455_v22  ;;  %v12513_v21 = vld [vmem:[%s14001_s6 + $0x778] ss:$72 sps:$4 sm:$0xff]   ;;  %v12518_v22 = vld [vmem:[%s14001_s6 + $0x18e4] ss:$72 sps:$4 sm:$0xff]  }
 0x254   : > { %v5850_v32 = vpop.f32.mrf.mxu0  ;;  %6107 = vmatmul.mubr.bf16.vlgmr.msra.gmra.mxu0 %v14089_v24 }
 0x255   : > { %v5893_v62 = vpop.f32.mrf.mxu1  ;;  %6150 = vmatmul.mubr.bf16.vlgmr.msra.gmra.mxu1 %v14091_v25  ;;  %6161 = vmatpush1.bf16.msra.mxu0 %v12450_v23  ;;  %v12521_v23 = vld [vmem:[%s14001_s6 + $0x6ec] ss:$72 sps:$4 sm:$0xff]  }
 0x256   : > { %v14543_v33 = vadd.f32 %v5893_v62, %v5850_v32  ;;  %6204 = vmatpush1.bf16.msra.mxu1 %v12453_v26  ;;  %v5852_v34 = vpop.f32.mrf.mxu0  ;;  %6162 = vmatprep.subr.bf16.mxu0 %v12458_v27  ;;  %v12516_v26 = vld [vmem:[%s14001_s6 + $0x18e0] ss:$72 sps:$4 sm:$0xff]   ;;  %v12530_v62 = vld [vmem:[%s14001_s6 + $0x17c4] ss:$72 sps:$4 sm:$0xff]  }
 0x257   : > { %v5895_v36 = vpop.f32.mrf.mxu1  ;;  %6205 = vmatprep.subr.bf16.mxu1 %v12461_v28  ;;  %6192 = vmatprep.mubr.bf16.mxu0 %v14124_v56  ;;  %v12519_v27 = vld [vmem:[%s14001_s6 + $0x6e8] ss:$72 sps:$4 sm:$0xff]   ;;  %v12524_v28 = vld [vmem:[%s14001_s6 + $0x1854] ss:$72 sps:$4 sm:$0xff]   ;;  %v12525_v32 = vld [vmem:[%s14001_s6 + $0x658] ss:$72 sps:$4 sm:$0xff]  }
 0x258   : > { %v14547_v5 = vadd.f32 %v5895_v36, %v5852_v34  ;;  %6235 = vmatprep.mubr.bf16.mxu1 %v14066_v1  ;;  %v5854_v42 = vpop.f32.mrf.mxu0  ;;  %v12533_v34 = vld [vmem:[%s14001_s6 + $0x5cc] ss:$72 sps:$4 sm:$0xff]   ;;  %v12528_v36 = vld [vmem:[%s14001_s6 + $0x17c0] ss:$72 sps:$4 sm:$0xff]  }
 0x259   : > { %v5897_v43 = vpop.f32.mrf.mxu1  ;;  %6163 = vmatpush1.bf16.msra.mxu0 %v12456_v29  ;;  %v12527_v29 = vld [vmem:[%s14001_s6 + $0x65c] ss:$72 sps:$4 sm:$0xff]  }
 0x25a   : > { %v14553_v45 = vadd.f32 %v5897_v43, %v5854_v42  ;;  %6206 = vmatpush1.bf16.msra.mxu1 %v12459_v30  ;;  %6164 = vmatprep.subr.bf16.mxu0 %v12464_v37  ;;  %v12522_v30 = vld [vmem:[%s14001_s6 + $0x1850] ss:$72 sps:$4 sm:$0xff]   ;;  %v12542_v43 = vld [vmem:[%s14001_s6 + $0x16a4] ss:$72 sps:$4 sm:$0xff]  }
 0x25b   : > { %6207 = vmatprep.subr.bf16.mxu1 %v12467_v38  ;;  %v12531_v37 = vld [vmem:[%s14001_s6 + $0x5c8] ss:$72 sps:$4 sm:$0xff]   ;;  %v12536_v38 = vld [vmem:[%s14001_s6 + $0x1734] ss:$72 sps:$4 sm:$0xff]   ;;  %v12537_v42 = vld [vmem:[%s14001_s6 + $0x538] ss:$72 sps:$4 sm:$0xff]  }
 0x25d   : > { %6165 = vmatpush1.bf16.msra.mxu0 %v12462_v40  ;;  %v12539_v40 = vld [vmem:[%s14001_s6 + $0x53c] ss:$72 sps:$4 sm:$0xff]  }
 0x25e   : > { %6208 = vmatpush1.bf16.msra.mxu1 %v12465_v41  ;;  %6166 = vmatprep.subr.bf16.mxu0 %v12470_v46  ;;  %v12534_v41 = vld [vmem:[%s14001_s6 + $0x1730] ss:$72 sps:$4 sm:$0xff]   ;;  %v12545_v46 = vld [vmem:[%s14001_s6 + $0x4ac] ss:$72 sps:$4 sm:$0xff]  }
 0x25f   : > { %6209 = vmatprep.subr.bf16.mxu1 %v12473_v47  ;;  %v12540_v47 = vld [vmem:[%s14001_s6 + $0x16a0] ss:$72 sps:$4 sm:$0xff]  }
 0x261   : > { %6167 = vmatpush1.bf16.msra.mxu0 %v12468_v48  ;;  %v12543_v48 = vld [vmem:[%s14001_s6 + $0x4a8] ss:$72 sps:$4 sm:$0xff]  }
 0x262   : > { %6210 = vmatpush1.bf16.msra.mxu1 %v12471_v49  ;;  %6168 = vmatprep.subr.bf16.mxu0 %v12476_v50  ;;  %v12548_v49 = vld [vmem:[%s14001_s6 + $0xd1c] ss:$72 sps:$4 sm:$0xff]  }
 0x263   : > { %6211 = vmatprep.subr.bf16.mxu1 %v12479_v51  ;;  %v12551_v50 = vld [vmem:[%s14001_s6 + $0x161c] ss:$72 sps:$4 sm:$0xff]   ;;  %v12546_v51 = vld [vmem:[%s14001_s6 + $0xd18] ss:$72 sps:$4 sm:$0xff]  }
 0x265   : > { %6169 = vmatpush1.bf16.msra.mxu0 %v12474_v52  ;;  %v12549_v52 = vld [vmem:[%s14001_s6 + $0x1618] ss:$72 sps:$4 sm:$0xff]  }
 0x266   : > { %6212 = vmatpush1.bf16.msra.mxu1 %v12477_v53  ;;  %6170 = vmatprep.subr.bf16.mxu0 %v12482_v55  ;;  %v5856_v53 = vpop.f32.mrf.mxu0  ;;  %v372_v55 = vld [vmem:[%s14009_s23 + $0x20] sm:$0x3f] }
 0x267   : > { %6213 = vmatprep.subr.bf16.mxu1 %v12485_v57  ;;  %v12554_v57 = vld [vmem:[%s14001_s6 + $0xc8c] ss:$72 sps:$4 sm:$0xff]  }
 0x269   : > { %6171 = vmatpush1.bf16.msra.mxu0 %v12480_v58  ;;  %v12557_v58 = vld [vmem:[%s14001_s6 + $0x158c] ss:$72 sps:$4 sm:$0xff]  }
 0x26a   : > { %6214 = vmatpush1.bf16.msra.mxu1 %v12483_v59  ;;  %6172 = vmatprep.subr.bf16.mxu0 %v12488_v60  ;;  %v12552_v59 = vld [vmem:[%s14001_s6 + $0xc88] ss:$72 sps:$4 sm:$0xff]  }
 0x26b   : > { %6215 = vmatprep.subr.bf16.mxu1 %v12491_v61  ;;  %v12555_v60 = vld [vmem:[%s14001_s6 + $0x1588] ss:$72 sps:$4 sm:$0xff]  }
 0x26d   : > { %6173 = vmatpush1.bf16.msra.mxu0 %v12486_v63  ;;  %v373_v63 = vld [vmem:[%s14009_s23 + $0x28] sm:$0x3f] }
 0x26e   : > { %6216 = vmatpush1.bf16.msra.mxu1 %v12489_v0  ;;  %6174 = vmatprep.subr.bf16.mxu0 %v12494_v3  ;;  %v5899_v3 = vpop.f32.mrf.mxu1 }
 0x26f   : > { %6217 = vmatprep.subr.bf16.mxu1 %v12497_v4 }
 0x271   : > { %6175 = vmatpush1.bf16.msra.mxu0 %v12492_v7  ;;  %v12560_v7 = vld [vmem:[%s14001_s6 + $0xbfc] ss:$72 sps:$4 sm:$0xff]  }
 0x272   : > { %6218 = vmatpush1.bf16.msra.mxu1 %v12495_v8  ;;  %6176 = vmatprep.subr.bf16.mxu0 %v12500_v9  ;;  %v12563_v8 = vld [vmem:[%s14001_s6 + $0x14fc] ss:$72 sps:$4 sm:$0xff]   ;;  %v6738_v9 = vrot.slane %v372_v55, %v14383_v13  ;;  %v12605_v55 = vld [vmem:[%s14001_s6 + $0x1a0c] ss:$72 sps:$4 sm:$0xff]  }
 0x273   : > { %6219 = vmatprep.subr.bf16.mxu1 %v12503_v10 }
 0x275   : > { %6177 = vmatpush2.bf16.msra.mxu0 %v12498_v11  ;;  %v12558_v11 = vld [vmem:[%s14001_s6 + $0xbf8] ss:$72 sps:$4 sm:$0xff]  }
 0x276   : > { %6220 = vmatpush2.bf16.msra.mxu1 %v12501_v12  ;;  %6178 = vmatprep.subr.bf16.mxu0 %v12506_v14  ;;  %v12561_v12 = vld [vmem:[%s14001_s6 + $0x14f8] ss:$72 sps:$4 sm:$0xff]   ;;  %v5900_v14 = vadd.f32 %v5899_v3, %v5856_v53  ;;  %v12602_v53 = vld [vmem:[%s14001_s6 + $0x110c] ss:$72 sps:$4 sm:$0xff]  }
 0x277   : > { %6221 = vmatprep.subr.bf16.mxu1 %v12509_v15  ;;  %v6742_v15 = vrot.slane %v373_v63, %v14383_v13  ;;  %v12609_v63 = vld [vmem:[%s14001_s6 + $0x1978] ss:$72 sps:$4 sm:$0xff]   ;;  %v12617_v3 = vld [vmem:[%s14001_s6 + $0x18ec] ss:$72 sps:$4 sm:$0xff]  }
 0x279   : > { %6179 = vmatpush2.bf16.msra.mxu0 %v12504_v16 }
 0x27a   : > { %6222 = vmatpush2.bf16.msra.mxu1 %v12507_v17  ;;  %6180 = vmatprep.subr.bf16.mxu0 %v12512_v18  ;;  %v12569_v18 = vld [vmem:[%s14001_s6 + $0x146c] ss:$72 sps:$4 sm:$0xff]  }
 0x27b   : > { %6223 = vmatprep.subr.bf16.mxu1 %v12515_v19 }
 0x27d   : > { %6181 = vmatpush2.bf16.msra.mxu0 %v12510_v20 }
 0x27e   : > { %6224 = vmatpush2.bf16.msra.mxu1 %v12513_v21  ;;  %6182 = vmatprep.subr.bf16.mxu0 %v12518_v22 }
 0x27f   : > { %6225 = vmatprep.subr.bf16.mxu1 %v12521_v23  ;;  %v12567_v23 = vld [vmem:[%s14001_s6 + $0x1468] ss:$72 sps:$4 sm:$0xff]  }
 0x281   : > { %6183 = vmatpush2.bf16.msra.mxu0 %v12516_v26 }
 0x282   : > { %6226 = vmatpush2.bf16.msra.mxu1 %v12519_v27  ;;  %6184 = vmatprep.subr.bf16.mxu0 %v12524_v28  ;;  %v12572_v27 = vld [vmem:[%s14001_s6 + $0xadc] ss:$72 sps:$4 sm:$0xff]  }
 0x283   : > { %6227 = vmatprep.subr.bf16.mxu1 %v12527_v29  ;;  %v12575_v28 = vld [vmem:[%s14001_s6 + $0x13dc] ss:$72 sps:$4 sm:$0xff]  }
 0x285   : > { %6185 = vmatpush2.bf16.msra.mxu0 %v12522_v30  ;;  %v12570_v30 = vld [vmem:[%s14001_s6 + $0xad8] ss:$72 sps:$4 sm:$0xff]  }
 0x286   : > { %6228 = vmatpush2.bf16.msra.mxu1 %v12525_v32  ;;  %6186 = vmatprep.subr.bf16.mxu0 %v12530_v62  ;;  %v12573_v32 = vld [vmem:[%s14001_s6 + $0x13d8] ss:$72 sps:$4 sm:$0xff]   ;;  %v12578_v62 = vld [vmem:[%s14001_s6 + $0xa4c] ss:$72 sps:$4 sm:$0xff]  }
 0x287   : > { %6229 = vmatprep.subr.bf16.mxu1 %v12533_v34  ;;  %v12581_v34 = vld [vmem:[%s14001_s6 + $0x134c] ss:$72 sps:$4 sm:$0xff]  }
 0x289   : > { %6187 = vmatpush2.bf16.msra.mxu0 %v12528_v36  ;;  %v12576_v36 = vld [vmem:[%s14001_s6 + $0xa48] ss:$72 sps:$4 sm:$0xff]  }
 0x28a   : > { %6230 = vmatpush2.bf16.msra.mxu1 %v12531_v37  ;;  %6188 = vmatprep.subr.bf16.mxu0 %v12536_v38  ;;  %v12579_v37 = vld [vmem:[%s14001_s6 + $0x1348] ss:$72 sps:$4 sm:$0xff]   ;;  %v12584_v38 = vld [vmem:[%s14001_s6 + $0x9bc] ss:$72 sps:$4 sm:$0xff]  }
 0x28b   : > { %6231 = vmatprep.subr.bf16.mxu1 %v12539_v40  ;;  %v12587_v40 = vld [vmem:[%s14001_s6 + $0x12bc] ss:$72 sps:$4 sm:$0xff]  }
 0x28d   : > { %6189 = vmatpush2.bf16.msra.mxu0 %v12534_v41  ;;  %v12582_v41 = vld [vmem:[%s14001_s6 + $0x9b8] ss:$72 sps:$4 sm:$0xff]  }
 0x28e   : > { %6232 = vmatpush2.bf16.msra.mxu1 %v12537_v42  ;;  %6190 = vmatprep.subr.bf16.mxu0 %v12542_v43  ;;  %v12585_v42 = vld [vmem:[%s14001_s6 + $0x12b8] ss:$72 sps:$4 sm:$0xff]   ;;  %v12590_v43 = vld [vmem:[%s14001_s6 + $0x92c] ss:$72 sps:$4 sm:$0xff]  }
 0x28f   : > { %6233 = vmatprep.subr.bf16.mxu1 %v12545_v46  ;;  %v12593_v46 = vld [vmem:[%s14001_s6 + $0x122c] ss:$72 sps:$4 sm:$0xff]  }
 0x291   : > { %6191 = vmatpush2.bf16.msra.mxu0 %v12540_v47  ;;  %v12588_v47 = vld [vmem:[%s14001_s6 + $0x928] ss:$72 sps:$4 sm:$0xff]  }
 0x292   : > { %6234 = vmatpush2.bf16.msra.mxu1 %v12543_v48  ;;  %6246 = vmatprep.subr.bf16.mxu0 %v12548_v49  ;;  %v12591_v48 = vld [vmem:[%s14001_s6 + $0x1228] ss:$72 sps:$4 sm:$0xff]   ;;  %v12596_v49 = vld [vmem:[%s14001_s6 + $0x119c] ss:$72 sps:$4 sm:$0xff]  }
 0x293   : > { %6289 = vmatprep.subr.bf16.mxu1 %v12551_v50  ;;  %v12599_v50 = vld [vmem:[%s14001_s6 + $0x1a9c] ss:$72 sps:$4 sm:$0xff]  }
 0x294   : > { %v5936_v61 = vpop.f32.mrf.mxu0  ;;  %6193 = vmatmul.mubr.bf16.vlgmr.msra.gmra.mxu0 %v14163_v35 }
 0x295   : > { %6236 = vmatmul.mubr.bf16.vlgmr.msra.gmra.mxu1 %v14089_v24  ;;  %v5937_v0 = vadd.f32 %v5936_v61, %v14543_v33  ;;  %6247 = vmatpush1.bf16.msra.mxu0 %v12546_v51  ;;  %v12594_v51 = vld [vmem:[%s14001_s6 + $0x1198] ss:$72 sps:$4 sm:$0xff]  }
 0x296   : > { %6290 = vmatpush1.bf16.msra.mxu1 %v12549_v52  ;;  %v5938_v4 = vpop.f32.mrf.mxu0  ;;  %6248 = vmatprep.subr.bf16.mxu0 %v12554_v57  ;;  %v12597_v52 = vld [vmem:[%s14001_s6 + $0x1a98] ss:$72 sps:$4 sm:$0xff]   ;;  %v12600_v57 = vld [vmem:[%s14001_s6 + $0x1108] ss:$72 sps:$4 sm:$0xff]  }
 0x297   : > { %6291 = vmatprep.subr.bf16.mxu1 %v12557_v58  ;;  %v5939_v10 = vadd.f32 %v5938_v4, %v14547_v5  ;;  %6278 = vmatprep.mubr.bf16.mxu0 %v14068_v2  ;;  %v12566_v5 = vld [vmem:[%s14001_s6 + $0xb6c] ss:$72 sps:$4 sm:$0xff]   ;;  %v6747_v19 = vadd.f32 %v6738_v9, %v5937_v0  ;;  %v12603_v58 = vld [vmem:[%s14001_s6 + $0x1a08] ss:$72 sps:$4 sm:$0xff]   ;;  %v12606_v61 = vld [vmem:[%s14001_s6 + $0x1078] ss:$72 sps:$4 sm:$0xff]  }
 0x298   : > { %6321 = vmatprep.mubr.bf16.mxu1 %v14124_v56  ;;  %v5940_v33 = vpop.f32.mrf.mxu0  ;;  %v12614_v0 = vld [vmem:[%s14001_s6 + $0xfec] ss:$72 sps:$4 sm:$0xff]   ;;  %v12612_v4 = vld [vmem:[%s14001_s6 + $0xfe8] ss:$72 sps:$4 sm:$0xff]  }
 0x299   : > { %v5941_v16 = vadd.f32 %v5940_v33, %v14553_v45  ;;  %6249 = vmatpush1.bf16.msra.mxu0 %v12552_v59  ;;  %v6748_v22 = vadd.f32 %v6742_v15, %v5939_v10  ;;  %v12564_v45 = vld [vmem:[%s14001_s6 + $0xb68] ss:$72 sps:$4 sm:$0xff]   ;;  %v12608_v59 = vld [vmem:[%s14001_s6 + $0x107c] ss:$72 sps:$4 sm:$0xff]   ;;  %v12618_v10 = vld [vmem:[%s14001_s6 + $0xf58] ss:$72 sps:$4 sm:$0xff]  }
 0x29a   : > { %6292 = vmatpush1.bf16.msra.mxu1 %v12555_v60  ;;  %v5942_v17 = vpop.f32.mrf.mxu0  ;;  %6250 = vmatprep.subr.bf16.mxu0 %v12560_v7  ;;  %v12611_v60 = vld [vmem:[%s14001_s6 + $0x197c] ss:$72 sps:$4 sm:$0xff]   ;;  %v12615_v7 = vld [vmem:[%s14001_s6 + $0x18e8] ss:$72 sps:$4 sm:$0xff]   ;;  %v12629_v33 = vld [vmem:[%s14001_s6 + $0x17cc] ss:$72 sps:$4 sm:$0xff]  }
 0x29b   : > { %6293 = vmatprep.subr.bf16.mxu1 %v12563_v8  ;;  %v6753_v20 = vadd.f32 %v6738_v9, %v5941_v16  ;;  %v5943_v21 = vadd.f32 %v5942_v17, %v5900_v14  ;;  %v12620_v8 = vld [vmem:[%s14001_s6 + $0xf5c] ss:$72 sps:$4 sm:$0xff]   ;;  %v12624_v14 = vld [vmem:[%s14001_s6 + $0xec8] ss:$72 sps:$4 sm:$0xff]   ;;  %v5979_v16 = vpop.f32.mrf.mxu1 }
 0x29c   : > { %v12623_v9 = vld [vmem:[%s14001_s6 + $0x185c] ss:$72 sps:$4 sm:$0xff]  }
 0x29d   : > { %v6754_v13 = vadd.f32 %v6742_v15, %v5943_v21  ;;  %6251 = vmatpush1.bf16.msra.mxu0 %v12558_v11  ;;  %v14634_v26 = vpack.c.bf16 %v6753_v20, %v6747_v19  ;;  %v12621_v11 = vld [vmem:[%s14001_s6 + $0x1858] ss:$72 sps:$4 sm:$0xff]   ;;  %v12627_v15 = vld [vmem:[%s14001_s6 + $0x17c8] ss:$72 sps:$4 sm:$0xff]   ;;  %v12632_v17 = vld [vmem:[%s14001_s6 + $0xe3c] ss:$72 sps:$4 sm:$0xff]   ;;  %v5981_v20 = vpop.f32.mrf.mxu1 }
 0x29e   : > { %6294 = vmatpush1.bf16.msra.mxu1 %v12561_v12  ;;  %6252 = vmatprep.subr.bf16.mxu0 %v12566_v5  ;;  %v12626_v12 = vld [vmem:[%s14001_s6 + $0xecc] ss:$72 sps:$4 sm:$0xff]   ;;  %v12635_v5 = vld [vmem:[%s14001_s6 + $0x173c] ss:$72 sps:$4 sm:$0xff]   ;;  %v12633_v19 = vld [vmem:[%s14001_s6 + $0x1738] ss:$72 sps:$4 sm:$0xff]  }
 0x29f   : > { %6295 = vmatprep.subr.bf16.mxu1 %v12569_v18  ;;  %v14638_v29 = vpack.c.bf16 %v6754_v13, %v6748_v22  ;;  %v12630_v18 = vld [vmem:[%s14001_s6 + $0xe38] ss:$72 sps:$4 sm:$0xff]   ;;  %v12638_v21 = vld [vmem:[%s14001_s6 + $0xdac] ss:$72 sps:$4 sm:$0xff]   ;;  %v12636_v13 = vld [vmem:[%s14001_s6 + $0xda8] ss:$72 sps:$4 sm:$0xff]  }
 0x2a0   : > { %v12641_v22 = vld [vmem:[%s14001_s6 + $0x16ac] ss:$72 sps:$4 sm:$0xff]  }
 0x2a1   : > { %6253 = vmatpush1.bf16.msra.mxu0 %v12564_v45  ;;  %v12639_v45 = vld [vmem:[%s14001_s6 + $0x16a8] ss:$72 sps:$4 sm:$0xff]  }
 0x2a2   : > { %6296 = vmatpush1.bf16.msra.mxu1 %v12567_v23  ;;  %6254 = vmatprep.subr.bf16.mxu0 %v12572_v27  ;;  %v5983_v23 = vpop.f32.mrf.mxu1  ;;  %v12644_v27 = vld [vmem:[%s14001_s6 + $0x424] ss:$72 sps:$4 sm:$0xff]  }
 0x2a3   : > { %6297 = vmatprep.subr.bf16.mxu1 %v12575_v28  ;;  %v12647_v28 = vld [vmem:[%s14001_s6 + $0xd24] ss:$72 sps:$4 sm:$0xff]  }
 0x2a5   : > { %6255 = vmatpush1.bf16.msra.mxu0 %v12570_v30  ;;  %v12642_v30 = vld [vmem:[%s14001_s6 + $0x420] ss:$72 sps:$4 sm:$0xff]  }
 0x2a6   : > { %6298 = vmatpush1.bf16.msra.mxu1 %v12573_v32  ;;  %6256 = vmatprep.subr.bf16.mxu0 %v12578_v62  ;;  %v12645_v32 = vld [vmem:[%s14001_s6 + $0xd20] ss:$72 sps:$4 sm:$0xff]   ;;  %v5985_v62 = vpop.f32.mrf.mxu1 }
 0x2a7   : > { %6299 = vmatprep.subr.bf16.mxu1 %v12581_v34  ;;  %v12650_v34 = vld [vmem:[%s14001_s6 + $0x394] ss:$72 sps:$4 sm:$0xff]  }
 0x2a9   : > { %6257 = vmatpush1.bf16.msra.mxu0 %v12576_v36  ;;  %v12653_v36 = vld [vmem:[%s14001_s6 + $0xc94] ss:$72 sps:$4 sm:$0xff]  }
 0x2aa   : > { %6300 = vmatpush1.bf16.msra.mxu1 %v12579_v37  ;;  %6258 = vmatprep.subr.bf16.mxu0 %v12584_v38  ;;  %v12648_v37 = vld [vmem:[%s14001_s6 + $0x390] ss:$72 sps:$4 sm:$0xff]  }
 0x2ab   : > { %6301 = vmatprep.subr.bf16.mxu1 %v12587_v40  ;;  %v12651_v38 = vld [vmem:[%s14001_s6 + $0xc90] ss:$72 sps:$4 sm:$0xff]  }
 0x2ad   : > { %6259 = vmatpush1.bf16.msra.mxu0 %v12582_v41 }
 0x2ae   : > { %6302 = vmatpush1.bf16.msra.mxu1 %v12585_v42  ;;  %6260 = vmatprep.subr.bf16.mxu0 %v12590_v43  ;;  %v14697_v43 = vsub.s32 1, %v14375_v6 }
 0x2af   : > { %6303 = vmatprep.subr.bf16.mxu1 %v12593_v46 }
 0x2b1   : > { %6261 = vmatpush1.bf16.msra.mxu0 %v12588_v47 }
 0x2b2   : > { %6304 = vmatpush1.bf16.msra.mxu1 %v12591_v48  ;;  %6262 = vmatprep.subr.bf16.mxu0 %v12596_v49  ;;  %v12656_v48 = vld [vmem:[%s14001_s6 + $0x304] ss:$72 sps:$4 sm:$0xff]  }
 0x2b3   : > { %6305 = vmatprep.subr.bf16.mxu1 %v12599_v50  ;;  %v12659_v49 = vld [vmem:[%s14001_s6 + $0xc04] ss:$72 sps:$4 sm:$0xff]  }
 0x2b5   : > { %6263 = vmatpush2.bf16.msra.mxu0 %v12594_v51 }
 0x2b6   : > { %6306 = vmatpush2.bf16.msra.mxu1 %v12597_v52  ;;  %6264 = vmatprep.subr.bf16.mxu0 %v12602_v53  ;;  %v12654_v52 = vld [vmem:[%s14001_s6 + $0x300] ss:$72 sps:$4 sm:$0xff]  }
 0x2b7   : > { %6307 = vmatprep.subr.bf16.mxu1 %v12605_v55  ;;  %v12657_v53 = vld [vmem:[%s14001_s6 + $0xc00] ss:$72 sps:$4 sm:$0xff]  }
 0x2b9   : > { %6265 = vmatpush2.bf16.msra.mxu0 %v12600_v57 }
 0x2ba   : > { %6308 = vmatpush2.bf16.msra.mxu1 %v12603_v58  ;;  %6266 = vmatprep.subr.bf16.mxu0 %v12608_v59  ;;  %v13574_v58 = vld [vmem:[%s14009_s23] sm:$0x3f] }
 0x2bb   : > { %6309 = vmatprep.subr.bf16.mxu1 %v12611_v60  ;;  %v6758_v59 = vrot.slane %v13574_v58, %v14697_v43  ;;  %v12713_v58 = vld [vmem:[%s14001_s6 + $0xff4] ss:$72 sps:$4 sm:$0xff]  }
 0x2bd   : > { %6267 = vmatpush2.bf16.msra.mxu0 %v12606_v61 }
 0x2be   : > { %6310 = vmatpush2.bf16.msra.mxu1 %v12609_v63  ;;  %6268 = vmatprep.subr.bf16.mxu0 %v12614_v0  ;;  %v12662_v63 = vld [vmem:[%s14001_s6 + $0x274] ss:$72 sps:$4 sm:$0xff]  }
 0x2bf   : > { %6311 = vmatprep.subr.bf16.mxu1 %v12617_v3  ;;  %v12665_v0 = vld [vmem:[%s14001_s6 + $0xb74] ss:$72 sps:$4 sm:$0xff]  }
 0x2c1   : > { %6269 = vmatpush2.bf16.msra.mxu0 %v12612_v4  ;;  %v13575_v4 = vld [vmem:[%s14009_s23 + $0x8] sm:$0x3f] }
 0x2c2   : > { %6312 = vmatpush2.bf16.msra.mxu1 %v12615_v7  ;;  %6270 = vmatprep.subr.bf16.mxu0 %v12620_v8  ;;  %v6762_v7 = vrot.slane %v13575_v4, %v14697_v43  ;;  %v12722_v4 = vld [vmem:[%s14001_s6 + $0x5d4] ss:$72 sps:$4 sm:$0xff]  }
 0x2c3   : > { %6313 = vmatprep.subr.bf16.mxu1 %v12623_v9 }
 0x2c5   : > { %6271 = vmatpush2.bf16.msra.mxu0 %v12618_v10  ;;  %v12660_v10 = vld [vmem:[%s14001_s6 + $0x270] ss:$72 sps:$4 sm:$0xff]  }
 0x2c6   : > { %6314 = vmatpush2.bf16.msra.mxu1 %v12621_v11  ;;  %6272 = vmatprep.subr.bf16.mxu0 %v12626_v12  ;;  %v12663_v11 = vld [vmem:[%s14001_s6 + $0xb70] ss:$72 sps:$4 sm:$0xff]  }
 0x2c7   : > { %6315 = vmatprep.subr.bf16.mxu1 %v12629_v33 }
 0x2c9   : > { %6273 = vmatpush2.bf16.msra.mxu0 %v12624_v14 }
 0x2ca   : > { %6316 = vmatpush2.bf16.msra.mxu1 %v12627_v15  ;;  %6274 = vmatprep.subr.bf16.mxu0 %v12632_v17  ;;  %v12671_v17 = vld [vmem:[%s14001_s6 + $0xae4] ss:$72 sps:$4 sm:$0xff]  }
 0x2cb   : > { %6317 = vmatprep.subr.bf16.mxu1 %v12635_v5 }
 0x2cd   : > { %6275 = vmatpush2.bf16.msra.mxu0 %v12630_v18 }
 0x2ce   : > { %6318 = vmatpush2.bf16.msra.mxu1 %v12633_v19  ;;  %6276 = vmatprep.subr.bf16.mxu0 %v12638_v21  ;;  %v12666_v21 = vld [vmem:[%s14001_s6 + $0x1e0] ss:$72 sps:$4 sm:$0xff]  }
 0x2cf   : > { %6319 = vmatprep.subr.bf16.mxu1 %v12641_v22  ;;  %v12669_v22 = vld [vmem:[%s14001_s6 + $0xae0] ss:$72 sps:$4 sm:$0xff]  }
 0x2d1   : > { %6277 = vmatpush2.bf16.msra.mxu0 %v12636_v13  ;;  %v12674_v13 = vld [vmem:[%s14001_s6 + $0x154] ss:$72 sps:$4 sm:$0xff]  }
 0x2d2   : > { %6320 = vmatpush2.bf16.msra.mxu1 %v12639_v45  ;;  %6332 = vmatprep.subr.bf16.mxu0 %v12644_v27  ;;  %v12677_v45 = vld [vmem:[%s14001_s6 + $0xa54] ss:$72 sps:$4 sm:$0xff]   ;;  %v12675_v27 = vld [vmem:[%s14001_s6 + $0xa50] ss:$72 sps:$4 sm:$0xff]  }
 0x2d3   : > { %6375 = vmatprep.subr.bf16.mxu1 %v12647_v28  ;;  %v12680_v28 = vld [vmem:[%s14001_s6 + $0xc4] ss:$72 sps:$4 sm:$0xff]  }
 0x2d4   : > { %v6022_v40 = vpop.f32.mrf.mxu0  ;;  %6279 = vmatmul.mubr.bf16.vlgmr.msra.gmra.mxu0 %v14091_v25 }
 0x2d5   : > { %v6065_v41 = vpop.f32.mrf.mxu1  ;;  %6322 = vmatmul.mubr.bf16.vlgmr.msra.gmra.mxu1 %v14163_v35  ;;  %v6023_v42 = vadd.f32 %v6022_v40, %v5979_v16  ;;  %6333 = vmatpush1.bf16.msra.mxu0 %v12642_v30  ;;  %v12668_v16 = vld [vmem:[%s14001_s6 + $0x1e4] ss:$72 sps:$4 sm:$0xff]  }
 0x2d6   : > { %6376 = vmatpush1.bf16.msra.mxu1 %v12645_v32  ;;  %v6024_v46 = vpop.f32.mrf.mxu0  ;;  %6334 = vmatprep.subr.bf16.mxu0 %v12650_v34  ;;  %v12683_v30 = vld [vmem:[%s14001_s6 + $0x9c4] ss:$72 sps:$4 sm:$0xff]   ;;  %v12678_v32 = vld [vmem:[%s14001_s6 + $0xc0] ss:$72 sps:$4 sm:$0xff]   ;;  %v12686_v34 = vld [vmem:[%s14001_s6 + $0x34] ss:$72 sps:$4 sm:$0xff]  }
 0x2d7   : > { %v6067_v47 = vpop.f32.mrf.mxu1  ;;  %6377 = vmatprep.subr.bf16.mxu1 %v12653_v36  ;;  %v6066_v50 = vadd.f32 %v6065_v41, %v6023_v42  ;;  %v6025_v51 = vadd.f32 %v6024_v46, %v5981_v20  ;;  %6364 = vmatprep.mubr.bf16.mxu0 %v14066_v1  ;;  %v12689_v36 = vld [vmem:[%s14001_s6 + $0x934] ss:$72 sps:$4 sm:$0xff]   ;;  %v12692_v40 = vld [vmem:[%s14001_s6 + $0x8a4] ss:$72 sps:$4 sm:$0xff]   ;;  %v12690_v42 = vld [vmem:[%s14001_s6 + $0x8a0] ss:$72 sps:$4 sm:$0xff]  }
 0x2d8   : > { %6407 = vmatprep.mubr.bf16.mxu1 %v14068_v2  ;;  %v6026_v55 = vpop.f32.mrf.mxu0  ;;  %v12695_v41 = vld [vmem:[%s14001_s6 + $0x11a4] ss:$72 sps:$4 sm:$0xff]   ;;  %v12693_v46 = vld [vmem:[%s14001_s6 + $0x11a0] ss:$72 sps:$4 sm:$0xff]  }
 0x2d9   : > { %v6069_v57 = vpop.f32.mrf.mxu1  ;;  %v6027_v60 = vadd.f32 %v6026_v55, %v5983_v23  ;;  %6335 = vmatpush1.bf16.msra.mxu0 %v12648_v37  ;;  %v6068_v3 = vadd.f32 %v6067_v47, %v6025_v51  ;;  %v6779_v33 = vadd.f32 %v6758_v59, %v6066_v50  ;;  %v12672_v23 = vld [vmem:[%s14001_s6 + $0x150] ss:$72 sps:$4 sm:$0xff]   ;;  %v12698_v47 = vld [vmem:[%s14001_s6 + $0x814] ss:$72 sps:$4 sm:$0xff]   ;;  %v12704_v51 = vld [vmem:[%s14001_s6 + $0x784] ss:$72 sps:$4 sm:$0xff]  }
 0x2da   : > { %6378 = vmatpush1.bf16.msra.mxu1 %v12651_v38  ;;  %v6028_v61 = vpop.f32.mrf.mxu0  ;;  %6336 = vmatprep.subr.bf16.mxu0 %v12656_v48  ;;  %v12684_v37 = vld [vmem:[%s14001_s6 + $0x30] ss:$72 sps:$4 sm:$0xff]   ;;  %v12701_v48 = vld [vmem:[%s14001_s6 + $0x1114] ss:$72 sps:$4 sm:$0xff]   ;;  %v12705_v55 = vld [vmem:[%s14001_s6 + $0x1080] ss:$72 sps:$4 sm:$0xff]  }
 0x2db   : > { %6379 = vmatprep.subr.bf16.mxu1 %v12659_v49  ;;  %v6070_v8 = vadd.f32 %v6069_v57, %v6027_v60  ;;  %v6029_v9 = vadd.f32 %v6028_v61, %v5985_v62  ;;  %v6071_v12 = vpop.f32.mrf.mxu1  ;;  %v6780_v5 = vadd.f32 %v6762_v7, %v6068_v3  ;;  %v12681_v62 = vld [vmem:[%s14001_s6 + $0x9c0] ss:$72 sps:$4 sm:$0xff]   ;;  %v12687_v38 = vld [vmem:[%s14001_s6 + $0x930] ss:$72 sps:$4 sm:$0xff]   ;;  %v12710_v57 = vld [vmem:[%s14001_s6 + $0x6f4] ss:$72 sps:$4 sm:$0xff]  }
 0x2dc   : > { %v12696_v49 = vld [vmem:[%s14001_s6 + $0x810] ss:$72 sps:$4 sm:$0xff]   ;;  %v12716_v61 = vld [vmem:[%s14001_s6 + $0x664] ss:$72 sps:$4 sm:$0xff]   ;;  %v12717_v3 = vld [vmem:[%s14001_s6 + $0xf60] ss:$72 sps:$4 sm:$0xff]  }
 0x2dd   : > { %v6785_v14 = vadd.f32 %v6758_v59, %v6070_v8  ;;  %v6072_v15 = vadd.f32 %v6071_v12, %v6029_v9  ;;  %6337 = vmatpush1.bf16.msra.mxu0 %v12654_v52  ;;  %v12699_v50 = vld [vmem:[%s14001_s6 + $0x1110] ss:$72 sps:$4 sm:$0xff]   ;;  %v12707_v52 = vld [vmem:[%s14001_s6 + $0x1084] ss:$72 sps:$4 sm:$0xff]   ;;  %v12726_v12 = vld [vmem:[%s14001_s6 + $0x540] ss:$72 sps:$4 sm:$0xff]  }
 0x2de   : > { %6380 = vmatpush1.bf16.msra.mxu1 %v12657_v53  ;;  %6338 = vmatprep.subr.bf16.mxu0 %v12662_v63  ;;  %v12702_v53 = vld [vmem:[%s14001_s6 + $0x780] ss:$72 sps:$4 sm:$0xff]   ;;  %v12708_v59 = vld [vmem:[%s14001_s6 + $0x6f0] ss:$72 sps:$4 sm:$0xff]   ;;  %v12719_v63 = vld [vmem:[%s14001_s6 + $0xf64] ss:$72 sps:$4 sm:$0xff]  }
 0x2df   : > { %6381 = vmatprep.subr.bf16.mxu1 %v12665_v0  ;;  %v14715_v18 = vpack.c.bf16 %v6785_v14, %v6779_v33  ;;  %v6786_v19 = vadd.f32 %v6762_v7, %v6072_v15  ;;  %v12711_v60 = vld [vmem:[%s14001_s6 + $0xff0] ss:$72 sps:$4 sm:$0xff]   ;;  %v12714_v0 = vld [vmem:[%s14001_s6 + $0x660] ss:$72 sps:$4 sm:$0xff]   ;;  %v12725_v7 = vld [vmem:[%s14001_s6 + $0xed4] ss:$72 sps:$4 sm:$0xff]  }
 0x2e0   : > { %v12720_v8 = vld [vmem:[%s14001_s6 + $0x5d0] ss:$72 sps:$4 sm:$0xff]   ;;  %v12729_v33 = vld [vmem:[%s14001_s6 + $0xe40] ss:$72 sps:$4 sm:$0xff]   ;;  %v12734_v14 = vld [vmem:[%s14001_s6 + $0x4b4] ss:$72 sps:$4 sm:$0xff]  }
 0x2e1   : > { %6339 = vmatpush1.bf16.msra.mxu0 %v12660_v10  ;;  %v14717_v20 = vpack.c.bf16 %v6786_v19, %v6780_v5  ;;  %v12723_v9 = vld [vmem:[%s14001_s6 + $0xed0] ss:$72 sps:$4 sm:$0xff]   ;;  %v12728_v10 = vld [vmem:[%s14001_s6 + $0x544] ss:$72 sps:$4 sm:$0xff]   ;;  %v12737_v15 = vld [vmem:[%s14001_s6 + $0xdb4] ss:$72 sps:$4 sm:$0xff]  }
 0x2e2   : > { %6382 = vmatpush1.bf16.msra.mxu1 %v12663_v11  ;;  %6340 = vmatprep.subr.bf16.mxu0 %v12668_v16  ;;  %v12731_v11 = vld [vmem:[%s14001_s6 + $0xe44] ss:$72 sps:$4 sm:$0xff]   ;;  %v12732_v16 = vld [vmem:[%s14001_s6 + $0x4b0] ss:$72 sps:$4 sm:$0xff]  }
 0x2e3   : > { %6383 = vmatprep.subr.bf16.mxu1 %v12671_v17  ;;  %6963 = vrot.lane.b32.xlu1 %v14717_v20, %s13792_s12  ;;  %v12735_v17 = vld [vmem:[%s14001_s6 + $0xdb0] ss:$72 sps:$4 sm:$0xff]   ;;  %v12740_v5 = vld [vmem:[%s14001_s6 + $0x1624] ss:$72 sps:$4 sm:$0xff]  }
 0x2e4   : > { %v12743_v19 = vld [vmem:[%s14001_s6 + $0x42c] ss:$72 sps:$4 sm:$0xff]  }
 0x2e5   : > { %6341 = vmatpush1.bf16.msra.mxu0 %v12666_v21  ;;  %v12738_v21 = vld [vmem:[%s14001_s6 + $0x1620] ss:$72 sps:$4 sm:$0xff]  }
 0x2e6   : > { %6384 = vmatpush1.bf16.msra.mxu1 %v12669_v22  ;;  %6342 = vmatprep.subr.bf16.mxu0 %v12674_v13  ;;  %v12741_v22 = vld [vmem:[%s14001_s6 + $0x428] ss:$72 sps:$4 sm:$0xff]   ;;  %v12746_v13 = vld [vmem:[%s14001_s6 + $0x1594] ss:$72 sps:$4 sm:$0xff]  }
 0x2e7   : > { %6385 = vmatprep.subr.bf16.mxu1 %v12677_v45  ;;  %v12749_v45 = vld [vmem:[%s14001_s6 + $0x39c] ss:$72 sps:$4 sm:$0xff]  }
 0x2e9   : > { %6343 = vmatpush1.bf16.msra.mxu0 %v12672_v23  ;;  %v12744_v23 = vld [vmem:[%s14001_s6 + $0x1590] ss:$72 sps:$4 sm:$0xff]  }
 0x2ea   : > { %6386 = vmatpush1.bf16.msra.mxu1 %v12675_v27  ;;  %6344 = vmatprep.subr.bf16.mxu0 %v12680_v28  ;;  %v12747_v27 = vld [vmem:[%s14001_s6 + $0x398] ss:$72 sps:$4 sm:$0xff]  }
 0x2eb   : > { %6387 = vmatprep.subr.bf16.mxu1 %v12683_v30 }
 0x2ed   : > { %6345 = vmatpush1.bf16.msra.mxu0 %v12678_v32 }
 0x2ee   : > { %6388 = vmatpush1.bf16.msra.mxu1 %v12681_v62  ;;  %6346 = vmatprep.subr.bf16.mxu0 %v12686_v34 }
 0x2ef   : > { %6389 = vmatprep.subr.bf16.mxu1 %v12689_v36  ;;  %v12752_v36 = vld [vmem:[%s14001_s6 + $0x1504] ss:$72 sps:$4 sm:$0xff]  }
 0x2f1   : > { %6347 = vmatpush1.bf16.msra.mxu0 %v12684_v37  ;;  %v12755_v37 = vld [vmem:[%s14001_s6 + $0x30c] ss:$72 sps:$4 sm:$0xff]  }
 0x2f2   : > { %6390 = vmatpush1.bf16.msra.mxu1 %v12687_v38  ;;  %6348 = vmatprep.subr.bf16.mxu0 %v12692_v40  ;;  %v12750_v40 = vld [vmem:[%s14001_s6 + $0x1500] ss:$72 sps:$4 sm:$0xff]  }
 0x2f3   : > { %6391 = vmatprep.subr.bf16.mxu1 %v12695_v41 }
 0x2f5   : > { %6349 = vmatpush2.bf16.msra.mxu0 %v12690_v42 }
 0x2f6   : > { %6392 = vmatpush2.bf16.msra.mxu1 %v12693_v46  ;;  %6350 = vmatprep.subr.bf16.mxu0 %v12698_v47  ;;  %v12753_v47 = vld [vmem:[%s14001_s6 + $0x308] ss:$72 sps:$4 sm:$0xff]  }
 0x2f7   : > { %6393 = vmatprep.subr.bf16.mxu1 %v12701_v48 }
 0x2f9   : > { %6351 = vmatpush2.bf16.msra.mxu0 %v12696_v49 }
 0x2fa   : > { %6394 = vmatpush2.bf16.msra.mxu1 %v12699_v50  ;;  %6352 = vmatprep.subr.bf16.mxu0 %v12704_v51  ;;  %v12758_v50 = vld [vmem:[%s14001_s6 + $0x1474] ss:$72 sps:$4 sm:$0xff]  }
 0x2fb   : > { %6395 = vmatprep.subr.bf16.mxu1 %v12707_v52  ;;  %v12761_v51 = vld [vmem:[%s14001_s6 + $0x27c] ss:$72 sps:$4 sm:$0xff]  }
 0x2fd   : > { %6353 = vmatpush2.bf16.msra.mxu0 %v12702_v53  ;;  %v12756_v53 = vld [vmem:[%s14001_s6 + $0x1470] ss:$72 sps:$4 sm:$0xff]  }
 0x2fe   : > { %6396 = vmatpush2.bf16.msra.mxu1 %v12705_v55  ;;  %6354 = vmatprep.subr.bf16.mxu0 %v12710_v57  ;;  %v12759_v55 = vld [vmem:[%s14001_s6 + $0x278] ss:$72 sps:$4 sm:$0xff]   ;;  %v12764_v57 = vld [vmem:[%s14001_s6 + $0x13e4] ss:$72 sps:$4 sm:$0xff]  }
 0x2ff   : > { %6397 = vmatprep.subr.bf16.mxu1 %v12713_v58  ;;  %v12767_v58 = vld [vmem:[%s14001_s6 + $0x1ec] ss:$72 sps:$4 sm:$0xff]  }
 0x301   : > { %6355 = vmatpush2.bf16.msra.mxu0 %v12708_v59  ;;  %v12762_v59 = vld [vmem:[%s14001_s6 + $0x13e0] ss:$72 sps:$4 sm:$0xff]  }
 0x302   : > { %6398 = vmatpush2.bf16.msra.mxu1 %v12711_v60  ;;  %6356 = vmatprep.subr.bf16.mxu0 %v12716_v61  ;;  %v12765_v60 = vld [vmem:[%s14001_s6 + $0x1e8] ss:$72 sps:$4 sm:$0xff]   ;;  %v12770_v61 = vld [vmem:[%s14001_s6 + $0x1354] ss:$72 sps:$4 sm:$0xff]  }
 0x303   : > { %6399 = vmatprep.subr.bf16.mxu1 %v12719_v63  ;;  %v12773_v63 = vld [vmem:[%s14001_s6 + $0x15c] ss:$72 sps:$4 sm:$0xff]  }
 0x305   : > { %6357 = vmatpush2.bf16.msra.mxu0 %v12714_v0  ;;  %v12768_v0 = vld [vmem:[%s14001_s6 + $0x1350] ss:$72 sps:$4 sm:$0xff]  }
 0x306   : > { %6400 = vmatpush2.bf16.msra.mxu1 %v12717_v3  ;;  %6358 = vmatprep.subr.bf16.mxu0 %v12722_v4  ;;  %v12771_v3 = vld [vmem:[%s14001_s6 + $0x158] ss:$72 sps:$4 sm:$0xff]   ;;  %v12776_v4 = vld [vmem:[%s14001_s6 + $0x12c4] ss:$72 sps:$4 sm:$0xff]  }
 0x307   : > { %6401 = vmatprep.subr.bf16.mxu1 %v12725_v7  ;;  %v12779_v7 = vld [vmem:[%s14001_s6 + $0xcc] ss:$72 sps:$4 sm:$0xff]  }
 0x309   : > { %6359 = vmatpush2.bf16.msra.mxu0 %v12720_v8  ;;  %v12774_v8 = vld [vmem:[%s14001_s6 + $0x12c0] ss:$72 sps:$4 sm:$0xff]  }
 0x30a   : > { %6402 = vmatpush2.bf16.msra.mxu1 %v12723_v9  ;;  %6360 = vmatprep.subr.bf16.mxu0 %v12728_v10  ;;  %v12777_v9 = vld [vmem:[%s14001_s6 + $0xc8] ss:$72 sps:$4 sm:$0xff]   ;;  %v12782_v10 = vld [vmem:[%s14001_s6 + $0x1234] ss:$72 sps:$4 sm:$0xff]  }
 0x30b   : > { %6403 = vmatprep.subr.bf16.mxu1 %v12731_v11  ;;  %v12785_v11 = vld [vmem:[%s14001_s6 + $0x3c] ss:$72 sps:$4 sm:$0xff]  }
 0x30d   : > { %6361 = vmatpush2.bf16.msra.mxu0 %v12726_v12  ;;  %v12780_v12 = vld [vmem:[%s14001_s6 + $0x1230] ss:$72 sps:$4 sm:$0xff]  }
 0x30e   : > { %6404 = vmatpush2.bf16.msra.mxu1 %v12729_v33  ;;  %6362 = vmatprep.subr.bf16.mxu0 %v12734_v14  ;;  %v12783_v33 = vld [vmem:[%s14001_s6 + $0x38] ss:$72 sps:$4 sm:$0xff]   ;;  %v12788_v14 = vld [vmem:[%s14001_s6 + $0x1aa4] ss:$72 sps:$4 sm:$0xff]  }
 0x30f   : > { %6405 = vmatprep.subr.bf16.mxu1 %v12737_v15  ;;  %v12791_v15 = vld [vmem:[%s14001_s6 + $0x8ac] ss:$72 sps:$4 sm:$0xff]  }
 0x311   : > { %6363 = vmatpush2.bf16.msra.mxu0 %v12732_v16  ;;  %v12786_v16 = vld [vmem:[%s14001_s6 + $0x1aa0] ss:$72 sps:$4 sm:$0xff]  }
 0x312   : > { %6406 = vmatpush2.bf16.msra.mxu1 %v12735_v17  ;;  %6418 = vmatprep.subr.bf16.mxu0 %v12740_v5  ;;  %v12789_v17 = vld [vmem:[%s14001_s6 + $0x8a8] ss:$72 sps:$4 sm:$0xff]   ;;  %v12794_v5 = vld [vmem:[%s14001_s6 + $0x1a14] ss:$72 sps:$4 sm:$0xff]  }
 0x313   : > { %6461 = vmatprep.subr.bf16.mxu1 %v12743_v19  ;;  %v12797_v19 = vld [vmem:[%s14001_s6 + $0x81c] ss:$72 sps:$4 sm:$0xff]  }
 0x314   : > { %v6108_v28 = vpop.f32.mrf.mxu0  ;;  %6365 = vmatmul.mubr.bf16.vlgmr.msra.gmra.mxu0 %v14089_v24 }
 0x315   : > { %v6151_v30 = vpop.f32.mrf.mxu1  ;;  %6408 = vmatmul.mubr.bf16.vlgmr.msra.gmra.mxu1 %v14091_v25  ;;  %6419 = vmatpush1.bf16.msra.mxu0 %v12738_v21  ;;  %v12792_v21 = vld [vmem:[%s14001_s6 + $0x1a10] ss:$72 sps:$4 sm:$0xff]  }
 0x316   : > { %v14777_v32 = vadd.f32 %v6151_v30, %v6108_v28  ;;  %6462 = vmatpush1.bf16.msra.mxu1 %v12741_v22  ;;  %v6110_v62 = vpop.f32.mrf.mxu0  ;;  %6420 = vmatprep.subr.bf16.mxu0 %v12746_v13  ;;  %v12795_v22 = vld [vmem:[%s14001_s6 + $0x818] ss:$72 sps:$4 sm:$0xff]   ;;  %v12800_v13 = vld [vmem:[%s14001_s6 + $0x1984] ss:$72 sps:$4 sm:$0xff]   ;;  %v12806_v28 = vld [vmem:[%s14001_s6 + $0x18f4] ss:$72 sps:$4 sm:$0xff]  }
 0x317   : > { %v6153_v34 = vpop.f32.mrf.mxu1  ;;  %6463 = vmatprep.subr.bf16.mxu1 %v12749_v45  ;;  %6450 = vmatprep.mubr.bf16.mxu0 %v14124_v56  ;;  %v12803_v45 = vld [vmem:[%s14001_s6 + $0x78c] ss:$72 sps:$4 sm:$0xff]   ;;  %v12809_v30 = vld [vmem:[%s14001_s6 + $0x6fc] ss:$72 sps:$4 sm:$0xff]  }
 0x318   : > { %v14781_v38 = vadd.f32 %v6153_v34, %v6110_v62  ;;  %6493 = vmatprep.mubr.bf16.mxu1 %v14066_v1  ;;  %v6112_v41 = vpop.f32.mrf.mxu0  ;;  %v12804_v62 = vld [vmem:[%s14001_s6 + $0x18f0] ss:$72 sps:$4 sm:$0xff]  }
 0x319   : > { %v6155_v42 = vpop.f32.mrf.mxu1  ;;  %6421 = vmatpush1.bf16.msra.mxu0 %v12744_v23  ;;  %v12798_v23 = vld [vmem:[%s14001_s6 + $0x1980] ss:$72 sps:$4 sm:$0xff]  }
 0x31a   : > { %v14786_v46 = vadd.f32 %v6155_v42, %v6112_v41  ;;  %6464 = vmatpush1.bf16.msra.mxu1 %v12747_v27  ;;  %v6114_v48 = vpop.f32.mrf.mxu0  ;;  %6422 = vmatprep.subr.bf16.mxu0 %v12752_v36  ;;  %v12801_v27 = vld [vmem:[%s14001_s6 + $0x788] ss:$72 sps:$4 sm:$0xff]   ;;  %v12807_v34 = vld [vmem:[%s14001_s6 + $0x6f8] ss:$72 sps:$4 sm:$0xff]   ;;  %v12812_v36 = vld [vmem:[%s14001_s6 + $0x1864] ss:$72 sps:$4 sm:$0xff]  }
 0x31b   : > { %v6157_v49 = vpop.f32.mrf.mxu1  ;;  %6465 = vmatprep.subr.bf16.mxu1 %v12755_v37  ;;  %v12815_v37 = vld [vmem:[%s14001_s6 + $0x66c] ss:$72 sps:$4 sm:$0xff]   ;;  %v12813_v41 = vld [vmem:[%s14001_s6 + $0x668] ss:$72 sps:$4 sm:$0xff]  }
 0x31c   : > { %v14791_v52 = vadd.f32 %v6157_v49, %v6114_v48  ;;  %v12818_v42 = vld [vmem:[%s14001_s6 + $0x17d4] ss:$72 sps:$4 sm:$0xff]   ;;  %v12816_v48 = vld [vmem:[%s14001_s6 + $0x17d0] ss:$72 sps:$4 sm:$0xff]  }
 0x31d   : > { %6423 = vmatpush1.bf16.msra.mxu0 %v12750_v40  ;;  %v12810_v40 = vld [vmem:[%s14001_s6 + $0x1860] ss:$72 sps:$4 sm:$0xff]  }
 0x31e   : > { %6466 = vmatpush1.bf16.msra.mxu1 %v12753_v47  ;;  %6424 = vmatprep.subr.bf16.mxu0 %v12758_v50  ;;  %v12821_v47 = vld [vmem:[%s14001_s6 + $0x5dc] ss:$72 sps:$4 sm:$0xff]   ;;  %v12819_v49 = vld [vmem:[%s14001_s6 + $0x5d8] ss:$72 sps:$4 sm:$0xff]  }
 0x31f   : > { %6467 = vmatprep.subr.bf16.mxu1 %v12761_v51  ;;  %v12824_v50 = vld [vmem:[%s14001_s6 + $0x1744] ss:$72 sps:$4 sm:$0xff]  }
 0x320   : > { %v12827_v51 = vld [vmem:[%s14001_s6 + $0x54c] ss:$72 sps:$4 sm:$0xff]  }
 0x321   : > { %6425 = vmatpush1.bf16.msra.mxu0 %v12756_v53  ;;  %v12822_v53 = vld [vmem:[%s14001_s6 + $0x1740] ss:$72 sps:$4 sm:$0xff]  }
 0x322   : > { %6468 = vmatpush1.bf16.msra.mxu1 %v12759_v55  ;;  %6426 = vmatprep.subr.bf16.mxu0 %v12764_v57  ;;  %v12825_v55 = vld [vmem:[%s14001_s6 + $0x548] ss:$72 sps:$4 sm:$0xff]   ;;  %v12830_v57 = vld [vmem:[%s14001_s6 + $0x16b4] ss:$72 sps:$4 sm:$0xff]  }
 0x323   : > { %6469 = vmatprep.subr.bf16.mxu1 %v12767_v58  ;;  %v12833_v58 = vld [vmem:[%s14001_s6 + $0x4bc] ss:$72 sps:$4 sm:$0xff]  }
 0x325   : > { %6427 = vmatpush1.bf16.msra.mxu0 %v12762_v59  ;;  %v12828_v59 = vld [vmem:[%s14001_s6 + $0x16b0] ss:$72 sps:$4 sm:$0xff]  }
 0x326   : > { %6470 = vmatpush1.bf16.msra.mxu1 %v12765_v60  ;;  %6428 = vmatprep.subr.bf16.mxu0 %v12770_v61  ;;  %v12831_v60 = vld [vmem:[%s14001_s6 + $0x4b8] ss:$72 sps:$4 sm:$0xff]   ;;  %v12836_v61 = vld [vmem:[%s14001_s6 + $0xd2c] ss:$72 sps:$4 sm:$0xff]  }
 0x327   : > { %6471 = vmatprep.subr.bf16.mxu1 %v12773_v63  ;;  %v12839_v63 = vld [vmem:[%s14001_s6 + $0x162c] ss:$72 sps:$4 sm:$0xff]  }
 0x329   : > { %6429 = vmatpush1.bf16.msra.mxu0 %v12768_v0  ;;  %v12834_v0 = vld [vmem:[%s14001_s6 + $0xd28] ss:$72 sps:$4 sm:$0xff]  }
 0x32a   : > { %6472 = vmatpush1.bf16.msra.mxu1 %v12771_v3  ;;  %6430 = vmatprep.subr.bf16.mxu0 %v12776_v4  ;;  %v12837_v3 = vld [vmem:[%s14001_s6 + $0x1628] ss:$72 sps:$4 sm:$0xff]   ;;  %v12842_v4 = vld [vmem:[%s14001_s6 + $0xc9c] ss:$72 sps:$4 sm:$0xff]  }
 0x32b   : > { %6473 = vmatprep.subr.bf16.mxu1 %v12779_v7  ;;  %v12845_v7 = vld [vmem:[%s14001_s6 + $0x159c] ss:$72 sps:$4 sm:$0xff]  }
 0x32d   : > { %6431 = vmatpush1.bf16.msra.mxu0 %v12774_v8 }
 0x32e   : > { %6474 = vmatpush1.bf16.msra.mxu1 %v12777_v9  ;;  %6432 = vmatprep.subr.bf16.mxu0 %v12782_v10  ;;  %v12840_v10 = vld [vmem:[%s14001_s6 + $0xc98] ss:$72 sps:$4 sm:$0xff]  }
 0x32f   : > { %6475 = vmatprep.subr.bf16.mxu1 %v12785_v11  ;;  %v12843_v11 = vld [vmem:[%s14001_s6 + $0x1598] ss:$72 sps:$4 sm:$0xff]  }
 0x331   : > { %6433 = vmatpush1.bf16.msra.mxu0 %v12780_v12 }
 0x332   : > { %6476 = vmatpush1.bf16.msra.mxu1 %v12783_v33  ;;  %6434 = vmatprep.subr.bf16.mxu0 %v12788_v14  ;;  %v12848_v33 = vld [vmem:[%s14001_s6 + $0xc0c] ss:$72 sps:$4 sm:$0xff]  }
 0x333   : > { %6477 = vmatprep.subr.bf16.mxu1 %v12791_v15  ;;  %v12851_v14 = vld [vmem:[%s14001_s6 + $0x150c] ss:$72 sps:$4 sm:$0xff]  }
 0x334   : > { %v14857_v15 = vld [vmem:[%s14009_s23 + $0x10] sm:$0x3f] }
 0x335   : > { %6435 = vmatpush2.bf16.msra.mxu0 %v12786_v16  ;;  %v6766_v16 = vrot.slane %v14857_v15, %v14697_v43 }
 0x336   : > { %6478 = vmatpush2.bf16.msra.mxu1 %v12789_v17  ;;  %6436 = vmatprep.subr.bf16.mxu0 %v12794_v5  ;;  %v14865_v5 = vld [vmem:[%s14009_s23 + $0x18] sm:$0x3f] }
 0x337   : > { %6479 = vmatprep.subr.bf16.mxu1 %v12797_v19  ;;  %v6770_v19 = vrot.slane %v14865_v5, %v14697_v43 }
 0x339   : > { %6437 = vmatpush2.bf16.msra.mxu0 %v12792_v21 }
 0x33a   : > { %6480 = vmatpush2.bf16.msra.mxu1 %v12795_v22  ;;  %6438 = vmatprep.subr.bf16.mxu0 %v12800_v13  ;;  %v12846_v22 = vld [vmem:[%s14001_s6 + $0xc08] ss:$72 sps:$4 sm:$0xff]  }
 0x33b   : > { %6481 = vmatprep.subr.bf16.mxu1 %v12803_v45  ;;  %v12849_v13 = vld [vmem:[%s14001_s6 + $0x1508] ss:$72 sps:$4 sm:$0xff]  }
 0x33d   : > { %6439 = vmatpush2.bf16.msra.mxu0 %v12798_v23  ;;  %v12857_v23 = vld [vmem:[%s14001_s6 + $0x147c] ss:$72 sps:$4 sm:$0xff]  }
 0x33e   : > { %6482 = vmatpush2.bf16.msra.mxu1 %v12801_v27  ;;  %6440 = vmatprep.subr.bf16.mxu0 %v12806_v28 }
 0x33f   : > { %6483 = vmatprep.subr.bf16.mxu1 %v12809_v30 }
 0x341   : > { %6441 = vmatpush2.bf16.msra.mxu0 %v12804_v62 }
 0x342   : > { %6484 = vmatpush2.bf16.msra.mxu1 %v12807_v34  ;;  %6442 = vmatprep.subr.bf16.mxu0 %v12812_v36  ;;  %v12852_v34 = vld [vmem:[%s14001_s6 + $0xb78] ss:$72 sps:$4 sm:$0xff]  }
 0x343   : > { %6485 = vmatprep.subr.bf16.mxu1 %v12815_v37  ;;  %v12855_v36 = vld [vmem:[%s14001_s6 + $0x1478] ss:$72 sps:$4 sm:$0xff]  }
 0x345   : > { %6443 = vmatpush2.bf16.msra.mxu0 %v12810_v40  ;;  %v12860_v40 = vld [vmem:[%s14001_s6 + $0xaec] ss:$72 sps:$4 sm:$0xff]  }
 0x346   : > { %6486 = vmatpush2.bf16.msra.mxu1 %v12813_v41  ;;  %6444 = vmatprep.subr.bf16.mxu0 %v12818_v42  ;;  %v12863_v41 = vld [vmem:[%s14001_s6 + $0x13ec] ss:$72 sps:$4 sm:$0xff]  }
 0x347   : > { %6487 = vmatprep.subr.bf16.mxu1 %v12821_v47  ;;  %v12861_v47 = vld [vmem:[%s14001_s6 + $0x13e8] ss:$72 sps:$4 sm:$0xff]  }
 0x349   : > { %6445 = vmatpush2.bf16.msra.mxu0 %v12816_v48  ;;  %v12866_v48 = vld [vmem:[%s14001_s6 + $0xa5c] ss:$72 sps:$4 sm:$0xff]  }
 0x34a   : > { %6488 = vmatpush2.bf16.msra.mxu1 %v12819_v49  ;;  %6446 = vmatprep.subr.bf16.mxu0 %v12824_v50  ;;  %v12869_v49 = vld [vmem:[%s14001_s6 + $0x135c] ss:$72 sps:$4 sm:$0xff]   ;;  %v12864_v50 = vld [vmem:[%s14001_s6 + $0xa58] ss:$72 sps:$4 sm:$0xff]  }
 0x34b   : > { %6489 = vmatprep.subr.bf16.mxu1 %v12827_v51  ;;  %v12867_v51 = vld [vmem:[%s14001_s6 + $0x1358] ss:$72 sps:$4 sm:$0xff]  }
 0x34d   : > { %6447 = vmatpush2.bf16.msra.mxu0 %v12822_v53  ;;  %v12872_v53 = vld [vmem:[%s14001_s6 + $0x9cc] ss:$72 sps:$4 sm:$0xff]  }
 0x34e   : > { %6490 = vmatpush2.bf16.msra.mxu1 %v12825_v55  ;;  %6448 = vmatprep.subr.bf16.mxu0 %v12830_v57  ;;  %v12875_v55 = vld [vmem:[%s14001_s6 + $0x12cc] ss:$72 sps:$4 sm:$0xff]   ;;  %v12870_v57 = vld [vmem:[%s14001_s6 + $0x9c8] ss:$72 sps:$4 sm:$0xff]  }
 0x34f   : > { %6491 = vmatprep.subr.bf16.mxu1 %v12833_v58  ;;  %v12873_v58 = vld [vmem:[%s14001_s6 + $0x12c8] ss:$72 sps:$4 sm:$0xff]  }
 0x351   : > { %6449 = vmatpush2.bf16.msra.mxu0 %v12828_v59  ;;  %v12878_v59 = vld [vmem:[%s14001_s6 + $0x93c] ss:$72 sps:$4 sm:$0xff]  }
 0x352   : > { %6492 = vmatpush2.bf16.msra.mxu1 %v12831_v60  ;;  %6504 = vmatprep.subr.bf16.mxu0 %v12836_v61  ;;  %v12881_v60 = vld [vmem:[%s14001_s6 + $0x123c] ss:$72 sps:$4 sm:$0xff]   ;;  %v12876_v61 = vld [vmem:[%s14001_s6 + $0x938] ss:$72 sps:$4 sm:$0xff]  }
 0x353   : > { %6547 = vmatprep.subr.bf16.mxu1 %v12839_v63  ;;  %v12879_v63 = vld [vmem:[%s14001_s6 + $0x1238] ss:$72 sps:$4 sm:$0xff]  }
 0x354   : > { %v6194_v8 = vpop.f32.mrf.mxu0  ;;  %6451 = vmatmul.mubr.bf16.vlgmr.msra.gmra.mxu0 %v14163_v35 }
 0x355   : > { %6494 = vmatmul.mubr.bf16.vlgmr.msra.gmra.mxu1 %v14089_v24  ;;  %v6195_v9 = vadd.f32 %v6194_v8, %v14777_v32  ;;  %6505 = vmatpush1.bf16.msra.mxu0 %v12834_v0  ;;  %v12884_v0 = vld [vmem:[%s14001_s6 + $0x11ac] ss:$72 sps:$4 sm:$0xff]   ;;  %v12890_v8 = vld [vmem:[%s14001_s6 + $0x111c] ss:$72 sps:$4 sm:$0xff]  }
 0x356   : > { %6548 = vmatpush1.bf16.msra.mxu1 %v12837_v3  ;;  %v6196_v12 = vpop.f32.mrf.mxu0  ;;  %6506 = vmatprep.subr.bf16.mxu0 %v12842_v4  ;;  %v12887_v3 = vld [vmem:[%s14001_s6 + $0x1aac] ss:$72 sps:$4 sm:$0xff]   ;;  %v12882_v4 = vld [vmem:[%s14001_s6 + $0x11a8] ss:$72 sps:$4 sm:$0xff]  }
 0x357   : > { %6549 = vmatprep.subr.bf16.mxu1 %v12845_v7  ;;  %v6197_v32 = vadd.f32 %v6196_v12, %v14781_v38  ;;  %6536 = vmatprep.mubr.bf16.mxu0 %v14068_v2  ;;  %v12854_v38 = vld [vmem:[%s14001_s6 + $0xb7c] ss:$72 sps:$4 sm:$0xff]   ;;  %v6781_v27 = vadd.f32 %v6766_v16, %v6195_v9  ;;  %v12885_v7 = vld [vmem:[%s14001_s6 + $0x1aa8] ss:$72 sps:$4 sm:$0xff]   ;;  %v12896_v12 = vld [vmem:[%s14001_s6 + $0x108c] ss:$72 sps:$4 sm:$0xff]  }
 0x358   : > { %6579 = vmatprep.mubr.bf16.mxu1 %v14124_v56  ;;  %v6198_v17 = vpop.f32.mrf.mxu0  ;;  %v12893_v9 = vld [vmem:[%s14001_s6 + $0x1a1c] ss:$72 sps:$4 sm:$0xff]  }
 0x359   : > { %v6199_v21 = vadd.f32 %v6198_v17, %v14786_v46  ;;  %6507 = vmatpush1.bf16.msra.mxu0 %v12840_v10  ;;  %v6782_v46 = vadd.f32 %v6770_v19, %v6197_v32  ;;  %v12888_v10 = vld [vmem:[%s14001_s6 + $0x1118] ss:$72 sps:$4 sm:$0xff]   ;;  %v12902_v32 = vld [vmem:[%s14001_s6 + $0xffc] ss:$72 sps:$4 sm:$0xff]  }
 0x35a   : > { %6550 = vmatpush1.bf16.msra.mxu1 %v12843_v11  ;;  %v6200_v45 = vpop.f32.mrf.mxu0  ;;  %6508 = vmatprep.subr.bf16.mxu0 %v12848_v33  ;;  %v12891_v11 = vld [vmem:[%s14001_s6 + $0x1a18] ss:$72 sps:$4 sm:$0xff]   ;;  %v12899_v33 = vld [vmem:[%s14001_s6 + $0x198c] ss:$72 sps:$4 sm:$0xff]   ;;  %v12905_v17 = vld [vmem:[%s14001_s6 + $0x18fc] ss:$72 sps:$4 sm:$0xff]  }
 0x35b   : > { %6551 = vmatprep.subr.bf16.mxu1 %v12851_v14  ;;  %v6787_v28 = vadd.f32 %v6766_v16, %v6199_v21  ;;  %v6201_v30 = vadd.f32 %v6200_v45, %v14791_v52  ;;  %v12858_v52 = vld [vmem:[%s14001_s6 + $0xae8] ss:$72 sps:$4 sm:$0xff]   ;;  %v12903_v21 = vld [vmem:[%s14001_s6 + $0x18f8] ss:$72 sps:$4 sm:$0xff]  }
 0x35c   : > { %v12894_v14 = vld [vmem:[%s14001_s6 + $0x1088] ss:$72 sps:$4 sm:$0xff]  }
 0x35d   : > { %v6788_v62 = vadd.f32 %v6770_v19, %v6201_v30  ;;  %6509 = vmatpush1.bf16.msra.mxu0 %v12846_v22  ;;  %v14877_v37 = vpack.c.bf16 %v6787_v28, %v6781_v27  ;;  %v12897_v16 = vld [vmem:[%s14001_s6 + $0x1988] ss:$72 sps:$4 sm:$0xff]   ;;  %v12900_v19 = vld [vmem:[%s14001_s6 + $0xff8] ss:$72 sps:$4 sm:$0xff]   ;;  %v12908_v22 = vld [vmem:[%s14001_s6 + $0xf6c] ss:$72 sps:$4 sm:$0xff]  }
 0x35e   : > { %6552 = vmatpush1.bf16.msra.mxu1 %v12849_v13  ;;  %6510 = vmatprep.subr.bf16.mxu0 %v12854_v38  ;;  %v12911_v13 = vld [vmem:[%s14001_s6 + $0x186c] ss:$72 sps:$4 sm:$0xff]   ;;  %v12906_v45 = vld [vmem:[%s14001_s6 + $0xf68] ss:$72 sps:$4 sm:$0xff]   ;;  %v12917_v27 = vld [vmem:[%s14001_s6 + $0x17dc] ss:$72 sps:$4 sm:$0xff]  }
 0x35f   : > { %6553 = vmatprep.subr.bf16.mxu1 %v12857_v23  ;;  %v14881_v42 = vpack.c.bf16 %v6788_v62, %v6782_v46  ;;  %v12909_v38 = vld [vmem:[%s14001_s6 + $0x1868] ss:$72 sps:$4 sm:$0xff]   ;;  %v12914_v23 = vld [vmem:[%s14001_s6 + $0xedc] ss:$72 sps:$4 sm:$0xff]   ;;  %v12912_v28 = vld [vmem:[%s14001_s6 + $0xed8] ss:$72 sps:$4 sm:$0xff]   ;;  %v6237_v46 = vpop.f32.mrf.mxu1 }
 0x360   : > { %v12915_v30 = vld [vmem:[%s14001_s6 + $0x17d8] ss:$72 sps:$4 sm:$0xff]   ;;  %v12920_v62 = vld [vmem:[%s14001_s6 + $0xe4c] ss:$72 sps:$4 sm:$0xff]  }
 0x361   : > { %6511 = vmatpush1.bf16.msra.mxu0 %v12852_v34  ;;  %v12923_v34 = vld [vmem:[%s14001_s6 + $0x174c] ss:$72 sps:$4 sm:$0xff]  }
 0x362   : > { %6554 = vmatpush1.bf16.msra.mxu1 %v12855_v36  ;;  %6512 = vmatprep.subr.bf16.mxu0 %v12860_v40  ;;  %v12918_v36 = vld [vmem:[%s14001_s6 + $0xe48] ss:$72 sps:$4 sm:$0xff]  }
 0x363   : > { %6555 = vmatprep.subr.bf16.mxu1 %v12863_v41  ;;  %v12921_v40 = vld [vmem:[%s14001_s6 + $0x1748] ss:$72 sps:$4 sm:$0xff]   ;;  %v6239_v41 = vpop.f32.mrf.mxu1 }
 0x365   : > { %6513 = vmatpush1.bf16.msra.mxu0 %v12858_v52  ;;  %v12926_v52 = vld [vmem:[%s14001_s6 + $0xdbc] ss:$72 sps:$4 sm:$0xff]  }
 0x366   : > { %6556 = vmatpush1.bf16.msra.mxu1 %v12861_v47  ;;  %6514 = vmatprep.subr.bf16.mxu0 %v12866_v48  ;;  %v12929_v47 = vld [vmem:[%s14001_s6 + $0x16bc] ss:$72 sps:$4 sm:$0xff]   ;;  %v12924_v48 = vld [vmem:[%s14001_s6 + $0xdb8] ss:$72 sps:$4 sm:$0xff]  }
 0x367   : > { %6557 = vmatprep.subr.bf16.mxu1 %v12869_v49  ;;  %v12927_v49 = vld [vmem:[%s14001_s6 + $0x16b8] ss:$72 sps:$4 sm:$0xff]  }
 0x369   : > { %6515 = vmatpush1.bf16.msra.mxu0 %v12864_v50  ;;  %v6241_v50 = vpop.f32.mrf.mxu1 }
 0x36a   : > { %6558 = vmatpush1.bf16.msra.mxu1 %v12867_v51  ;;  %6516 = vmatprep.subr.bf16.mxu0 %v12872_v53  ;;  %v12932_v51 = vld [vmem:[%s14001_s6 + $0x434] ss:$72 sps:$4 sm:$0xff]  }
 0x36b   : > { %6559 = vmatprep.subr.bf16.mxu1 %v12875_v55  ;;  %v12935_v53 = vld [vmem:[%s14001_s6 + $0xd34] ss:$72 sps:$4 sm:$0xff]   ;;  %v12930_v55 = vld [vmem:[%s14001_s6 + $0x430] ss:$72 sps:$4 sm:$0xff]  }
 0x36d   : > { %6517 = vmatpush1.bf16.msra.mxu0 %v12870_v57  ;;  %v12933_v57 = vld [vmem:[%s14001_s6 + $0xd30] ss:$72 sps:$4 sm:$0xff]  }
 0x36e   : > { %6560 = vmatpush1.bf16.msra.mxu1 %v12873_v58  ;;  %6518 = vmatprep.subr.bf16.mxu0 %v12878_v59  ;;  %v6243_v58 = vpop.f32.mrf.mxu1  ;;  %v12938_v59 = vld [vmem:[%s14001_s6 + $0x3a4] ss:$72 sps:$4 sm:$0xff]  }
 0x36f   : > { %6561 = vmatprep.subr.bf16.mxu1 %v12881_v60  ;;  %v12941_v60 = vld [vmem:[%s14001_s6 + $0xca4] ss:$72 sps:$4 sm:$0xff]  }
 0x371   : > { %6519 = vmatpush1.bf16.msra.mxu0 %v12876_v61 }
 0x372   : > { %6562 = vmatpush1.bf16.msra.mxu1 %v12879_v63  ;;  %6520 = vmatprep.subr.bf16.mxu0 %v12884_v0 }
 0x373   : > { %6563 = vmatprep.subr.bf16.mxu1 %v12887_v3  ;;  %v12936_v3 = vld [vmem:[%s14001_s6 + $0x3a0] ss:$72 sps:$4 sm:$0xff]  }
 0x375   : > { %6521 = vmatpush2.bf16.msra.mxu0 %v12882_v4  ;;  %v12939_v4 = vld [vmem:[%s14001_s6 + $0xca0] ss:$72 sps:$4 sm:$0xff]  }
 0x376   : > { %6564 = vmatpush2.bf16.msra.mxu1 %v12885_v7  ;;  %6522 = vmatprep.subr.bf16.mxu0 %v12890_v8 }
 0x377   : > { %6565 = vmatprep.subr.bf16.mxu1 %v12893_v9  ;;  %v12944_v9 = vld [vmem:[%s14001_s6 + $0x314] ss:$72 sps:$4 sm:$0xff]  }
 0x379   : > { %6523 = vmatpush2.bf16.msra.mxu0 %v12888_v10  ;;  %v12947_v10 = vld [vmem:[%s14001_s6 + $0xc14] ss:$72 sps:$4 sm:$0xff]  }
 0x37a   : > { %6566 = vmatpush2.bf16.msra.mxu1 %v12891_v11  ;;  %6524 = vmatprep.subr.bf16.mxu0 %v12896_v12 }
 0x37b   : > { %6567 = vmatprep.subr.bf16.mxu1 %v12899_v33 }
 0x37d   : > { %6525 = vmatpush2.bf16.msra.mxu0 %v12894_v14 }
 0x37e   : > { %6568 = vmatpush2.bf16.msra.mxu1 %v12897_v16  ;;  %6526 = vmatprep.subr.bf16.mxu0 %v12902_v32  ;;  %v14944_v16 = vld [vmem:[%s14009_s23 + $0x20] sm:$0x3f] }
 0x37f   : > { %6569 = vmatprep.subr.bf16.mxu1 %v12905_v17  ;;  %v6774_v32 = vrot.slane %v14944_v16, %v14697_v43 }
 0x381   : > { %6527 = vmatpush2.bf16.msra.mxu0 %v12900_v19 }
 0x382   : > { %6570 = vmatpush2.bf16.msra.mxu1 %v12903_v21  ;;  %6528 = vmatprep.subr.bf16.mxu0 %v12908_v22  ;;  %v12942_v21 = vld [vmem:[%s14001_s6 + $0x310] ss:$72 sps:$4 sm:$0xff]  }
 0x383   : > { %6571 = vmatprep.subr.bf16.mxu1 %v12911_v13  ;;  %v12945_v22 = vld [vmem:[%s14001_s6 + $0xc10] ss:$72 sps:$4 sm:$0xff]  }
 0x385   : > { %6529 = vmatpush2.bf16.msra.mxu0 %v12906_v45  ;;  %v14953_v45 = vld [vmem:[%s14009_s23 + $0x28] sm:$0x3f] }
 0x386   : > { %6572 = vmatpush2.bf16.msra.mxu1 %v12909_v38  ;;  %6530 = vmatprep.subr.bf16.mxu0 %v12914_v23  ;;  %v6778_v38 = vrot.slane %v14953_v45, %v14697_v43 }
 0x387   : > { %6573 = vmatprep.subr.bf16.mxu1 %v12917_v27 }
 0x389   : > { %6531 = vmatpush2.bf16.msra.mxu0 %v12912_v28 }
 0x38a   : > { %6574 = vmatpush2.bf16.msra.mxu1 %v12915_v30  ;;  %6532 = vmatprep.subr.bf16.mxu0 %v12920_v62 }
 0x38b   : > { %6575 = vmatprep.subr.bf16.mxu1 %v12923_v34  ;;  %v12948_v34 = vld [vmem:[%s14001_s6 + $0x280] ss:$72 sps:$4 sm:$0xff]  }
 0x38d   : > { %6533 = vmatpush2.bf16.msra.mxu0 %v12918_v36  ;;  %v12951_v36 = vld [vmem:[%s14001_s6 + $0xb80] ss:$72 sps:$4 sm:$0xff]  }
 0x38e   : > { %6576 = vmatpush2.bf16.msra.mxu1 %v12921_v40  ;;  %6534 = vmatprep.subr.bf16.mxu0 %v12926_v52  ;;  %v12956_v40 = vld [vmem:[%s14001_s6 + $0x1f4] ss:$72 sps:$4 sm:$0xff]  }
 0x38f   : > { %6577 = vmatprep.subr.bf16.mxu1 %v12929_v47 }
 0x391   : > { %6535 = vmatpush2.bf16.msra.mxu0 %v12924_v48  ;;  %v12954_v48 = vld [vmem:[%s14001_s6 + $0x1f0] ss:$72 sps:$4 sm:$0xff]  }
 0x392   : > { %6578 = vmatpush2.bf16.msra.mxu1 %v12927_v49  ;;  %6590 = vmatprep.subr.bf16.mxu0 %v12932_v51  ;;  %v12957_v49 = vld [vmem:[%s14001_s6 + $0xaf0] ss:$72 sps:$4 sm:$0xff]   ;;  %v12962_v51 = vld [vmem:[%s14001_s6 + $0x164] ss:$72 sps:$4 sm:$0xff]  }
 0x393   : > { %6633 = vmatprep.subr.bf16.mxu1 %v12935_v53  ;;  %v12965_v53 = vld [vmem:[%s14001_s6 + $0xa64] ss:$72 sps:$4 sm:$0xff]  }
 0x394   : > { %v6280_v61 = vpop.f32.mrf.mxu0  ;;  %6537 = vmatmul.mubr.bf16.vlgmr.msra.gmra.mxu0 %v14091_v25 }
 0x395   : > { %v6323_v63 = vpop.f32.mrf.mxu1  ;;  %6580 = vmatmul.mubr.bf16.vlgmr.msra.gmra.mxu1 %v14163_v35  ;;  %v6281_v0 = vadd.f32 %v6280_v61, %v6237_v46  ;;  %6591 = vmatpush1.bf16.msra.mxu0 %v12930_v55  ;;  %v12960_v55 = vld [vmem:[%s14001_s6 + $0x160] ss:$72 sps:$4 sm:$0xff]   ;;  %v12969_v61 = vld [vmem:[%s14001_s6 + $0x9d0] ss:$72 sps:$4 sm:$0xff]  }
 0x396   : > { %6634 = vmatpush1.bf16.msra.mxu1 %v12933_v57  ;;  %v6282_v7 = vpop.f32.mrf.mxu0  ;;  %6592 = vmatprep.subr.bf16.mxu0 %v12938_v59  ;;  %v12963_v57 = vld [vmem:[%s14001_s6 + $0xa60] ss:$72 sps:$4 sm:$0xff]   ;;  %v12971_v59 = vld [vmem:[%s14001_s6 + $0x9d4] ss:$72 sps:$4 sm:$0xff]  }
 0x397   : > { %v6325_v8 = vpop.f32.mrf.mxu1  ;;  %6635 = vmatprep.subr.bf16.mxu1 %v12941_v60  ;;  %v6324_v11 = vadd.f32 %v6323_v63, %v6281_v0  ;;  %v6283_v12 = vadd.f32 %v6282_v7, %v6239_v41  ;;  %6622 = vmatprep.mubr.bf16.mxu0 %v14066_v1  ;;  %v12950_v1 = vld [vmem:[%s14001_s6 + $0x284] ss:$72 sps:$4 sm:$0xff]   ;;  %v12959_v41 = vld [vmem:[%s14001_s6 + $0xaf4] ss:$72 sps:$4 sm:$0xff]   ;;  %v12966_v60 = vld [vmem:[%s14001_s6 + $0xd0] ss:$72 sps:$4 sm:$0xff]  }
 0x398   : > { %6665 = vmatprep.mubr.bf16.mxu1 %v14068_v2  ;;  %v6284_v33 = vpop.f32.mrf.mxu0  ;;  %v12953_v2 = vld [vmem:[%s14001_s6 + $0xb84] ss:$72 sps:$4 sm:$0xff]   ;;  %v12980_v7 = vld [vmem:[%s14001_s6 + $0x8b4] ss:$72 sps:$4 sm:$0xff]  }
 0x399   : > { %v6327_v14 = vpop.f32.mrf.mxu1  ;;  %v6326_v17 = vadd.f32 %v6325_v8, %v6283_v12  ;;  %v6285_v19 = vadd.f32 %v6284_v33, %v6241_v50  ;;  %6593 = vmatpush1.bf16.msra.mxu0 %v12936_v3  ;;  %v6783_v30 = vadd.f32 %v6774_v32, %v6324_v11  ;;  %v12974_v63 = vld [vmem:[%s14001_s6 + $0x44] ss:$72 sps:$4 sm:$0xff]   ;;  %v12972_v3 = vld [vmem:[%s14001_s6 + $0x40] ss:$72 sps:$4 sm:$0xff]   ;;  %v12983_v8 = vld [vmem:[%s14001_s6 + $0x11b4] ss:$72 sps:$4 sm:$0xff]  }
 0x39a   : > { %6636 = vmatpush1.bf16.msra.mxu1 %v12939_v4  ;;  %v6286_v13 = vpop.f32.mrf.mxu0  ;;  %6594 = vmatprep.subr.bf16.mxu0 %v12944_v9  ;;  %v12977_v0 = vld [vmem:[%s14001_s6 + $0x944] ss:$72 sps:$4 sm:$0xff]   ;;  %v12975_v4 = vld [vmem:[%s14001_s6 + $0x940] ss:$72 sps:$4 sm:$0xff]   ;;  %v12978_v9 = vld [vmem:[%s14001_s6 + $0x8b0] ss:$72 sps:$4 sm:$0xff]  }
 0x39b   : > { %6637 = vmatprep.subr.bf16.mxu1 %v12947_v10  ;;  %v6328_v23 = vadd.f32 %v6327_v14, %v6285_v19  ;;  %v6287_v27 = vadd.f32 %v6286_v13, %v6243_v58  ;;  %v6329_v28 = vpop.f32.mrf.mxu1  ;;  %v6784_v43 = vadd.f32 %v6778_v38, %v6326_v17  ;;  %v12968_v58 = vld [vmem:[%s14001_s6 + $0xd4] ss:$72 sps:$4 sm:$0xff]   ;;  %v12981_v10 = vld [vmem:[%s14001_s6 + $0x11b0] ss:$72 sps:$4 sm:$0xff]   ;;  %v12986_v11 = vld [vmem:[%s14001_s6 + $0x824] ss:$72 sps:$4 sm:$0xff]  }
 0x39c   : > { %v12989_v12 = vld [vmem:[%s14001_s6 + $0x1124] ss:$72 sps:$4 sm:$0xff]   ;;  %v12984_v33 = vld [vmem:[%s14001_s6 + $0x820] ss:$72 sps:$4 sm:$0xff]   ;;  %v12995_v17 = vld [vmem:[%s14001_s6 + $0x1094] ss:$72 sps:$4 sm:$0xff]  }
 0x39d   : > { %v6789_v46 = vadd.f32 %v6774_v32, %v6328_v23  ;;  %v6330_v62 = vadd.f32 %v6329_v28, %v6287_v27  ;;  %6595 = vmatpush1.bf16.msra.mxu0 %v12942_v21  ;;  %v12987_v14 = vld [vmem:[%s14001_s6 + $0x1120] ss:$72 sps:$4 sm:$0xff]   ;;  %v12992_v32 = vld [vmem:[%s14001_s6 + $0x794] ss:$72 sps:$4 sm:$0xff]   ;;  %v12990_v19 = vld [vmem:[%s14001_s6 + $0x790] ss:$72 sps:$4 sm:$0xff]  }
 0x39e   : > { %6638 = vmatpush1.bf16.msra.mxu1 %v12945_v22  ;;  %6596 = vmatprep.subr.bf16.mxu0 %v12950_v1  ;;  %v12993_v21 = vld [vmem:[%s14001_s6 + $0x1090] ss:$72 sps:$4 sm:$0xff]   ;;  %v12998_v22 = vld [vmem:[%s14001_s6 + $0x704] ss:$72 sps:$4 sm:$0xff]   ;;  %v12996_v1 = vld [vmem:[%s14001_s6 + $0x700] ss:$72 sps:$4 sm:$0xff]  }
 0x39f   : > { %6639 = vmatprep.subr.bf16.mxu1 %v12953_v2  ;;  %v6790_v52 = vadd.f32 %v6778_v38, %v6330_v62  ;;  %v14961_v47 = vpack.c.bf16 %v6789_v46, %v6783_v30  ;;  %v13001_v13 = vld [vmem:[%s14001_s6 + $0x1004] ss:$72 sps:$4 sm:$0xff]   ;;  %v12999_v2 = vld [vmem:[%s14001_s6 + $0x1000] ss:$72 sps:$4 sm:$0xff]   ;;  %v13004_v38 = vld [vmem:[%s14001_s6 + $0x674] ss:$72 sps:$4 sm:$0xff]  }
 0x3a0   : > { %v13007_v23 = vld [vmem:[%s14001_s6 + $0xf74] ss:$72 sps:$4 sm:$0xff]   ;;  %v13002_v27 = vld [vmem:[%s14001_s6 + $0x670] ss:$72 sps:$4 sm:$0xff]   ;;  %v13010_v30 = vld [vmem:[%s14001_s6 + $0x5e4] ss:$72 sps:$4 sm:$0xff]  }
 0x3a1   : > { %6597 = vmatpush1.bf16.msra.mxu0 %v12948_v34  ;;  %v14965_v50 = vpack.c.bf16 %v6790_v52, %v6784_v43  ;;  %v13005_v28 = vld [vmem:[%s14001_s6 + $0xf70] ss:$72 sps:$4 sm:$0xff]   ;;  %v13013_v46 = vld [vmem:[%s14001_s6 + $0xee4] ss:$72 sps:$4 sm:$0xff]   ;;  %v13008_v62 = vld [vmem:[%s14001_s6 + $0x5e0] ss:$72 sps:$4 sm:$0xff]  }
 0x3a2   : > { %6640 = vmatpush1.bf16.msra.mxu1 %v12951_v36  ;;  %6598 = vmatprep.subr.bf16.mxu0 %v12956_v40  ;;  %v13011_v34 = vld [vmem:[%s14001_s6 + $0xee0] ss:$72 sps:$4 sm:$0xff]   ;;  %v13016_v36 = vld [vmem:[%s14001_s6 + $0x554] ss:$72 sps:$4 sm:$0xff]   ;;  %v13017_v43 = vld [vmem:[%s14001_s6 + $0xe50] ss:$72 sps:$4 sm:$0xff]  }
 0x3a3   : > { %6641 = vmatprep.subr.bf16.mxu1 %v12959_v41  ;;  %v13019_v40 = vld [vmem:[%s14001_s6 + $0xe54] ss:$72 sps:$4 sm:$0xff]   ;;  %v13014_v41 = vld [vmem:[%s14001_s6 + $0x550] ss:$72 sps:$4 sm:$0xff]   ;;  %v13022_v52 = vld [vmem:[%s14001_s6 + $0x4c4] ss:$72 sps:$4 sm:$0xff]  }
 0x3a5   : > { %6599 = vmatpush1.bf16.msra.mxu0 %v12954_v48  ;;  %v13025_v48 = vld [vmem:[%s14001_s6 + $0xdc4] ss:$72 sps:$4 sm:$0xff]  }
 0x3a6   : > { %6642 = vmatpush1.bf16.msra.mxu1 %v12957_v49  ;;  %6600 = vmatprep.subr.bf16.mxu0 %v12962_v51  ;;  %v13020_v49 = vld [vmem:[%s14001_s6 + $0x4c0] ss:$72 sps:$4 sm:$0xff]  }
 0x3a7   : > { %6643 = vmatprep.subr.bf16.mxu1 %v12965_v53  ;;  %v13023_v51 = vld [vmem:[%s14001_s6 + $0xdc0] ss:$72 sps:$4 sm:$0xff]   ;;  %v13028_v53 = vld [vmem:[%s14001_s6 + $0x1634] ss:$72 sps:$4 sm:$0xff]  }
 0x3a9   : > { %6601 = vmatpush1.bf16.msra.mxu0 %v12960_v55  ;;  %v13026_v55 = vld [vmem:[%s14001_s6 + $0x1630] ss:$72 sps:$4 sm:$0xff]  }
 0x3aa   : > { %6644 = vmatpush1.bf16.msra.mxu1 %v12963_v57  ;;  %6602 = vmatprep.subr.bf16.mxu0 %v12968_v58  ;;  %v13793_v57 = vmov 0.0   ;;  %v13031_v58 = vld [vmem:[%s14001_s6 + $0x15a4] ss:$72 sps:$4 sm:$0xff]  }
 0x3ab   : > { %6645 = vmatprep.subr.bf16.mxu1 %v12971_v59 }
 0x3ad   : > { %6603 = vmatpush1.bf16.msra.mxu0 %v12966_v60 }
 0x3ae   : > { %6646 = vmatpush1.bf16.msra.mxu1 %v12969_v61  ;;  %6604 = vmatprep.subr.bf16.mxu0 %v12974_v63  ;;  %v6837_v61 = vsel %vm6832_vm0, %v14715_v18, 0  ;;  %v13029_v63 = vld [vmem:[%s14001_s6 + $0x15a0] ss:$72 sps:$4 sm:$0xff]  }
 0x3af   : > { %6647 = vmatprep.subr.bf16.mxu1 %v12977_v0 }
 0x3b1   : > { %6605 = vmatpush1.bf16.msra.mxu0 %v12972_v3 }
 0x3b2   : > { %6648 = vmatpush1.bf16.msra.mxu1 %v12975_v4  ;;  %6606 = vmatprep.subr.bf16.mxu0 %v12980_v7  ;;  %v13034_v4 = vld [vmem:[%s14001_s6 + $0x1514] ss:$72 sps:$4 sm:$0xff]  }
 0x3b3   : > { %6649 = vmatprep.subr.bf16.mxu1 %v12983_v8  ;;  %v13032_v8 = vld [vmem:[%s14001_s6 + $0x1510] ss:$72 sps:$4 sm:$0xff]  }
 0x3b5   : > { %6607 = vmatpush2.bf16.msra.mxu0 %v12978_v9 }
 0x3b6   : > { %6650 = vmatpush2.bf16.msra.mxu1 %v12981_v10  ;;  %6608 = vmatprep.subr.bf16.mxu0 %v12986_v11  ;;  %v13037_v11 = vld [vmem:[%s14001_s6 + $0x1484] ss:$72 sps:$4 sm:$0xff]  }
 0x3b7   : > { %6651 = vmatprep.subr.bf16.mxu1 %v12989_v12 }
 0x3b9   : > { %6609 = vmatpush2.bf16.msra.mxu0 %v12984_v33  ;;  %v13040_v33 = vld [vmem:[%s14001_s6 + $0x13f4] ss:$72 sps:$4 sm:$0xff]  }
 0x3ba   : > { %6652 = vmatpush2.bf16.msra.mxu1 %v12987_v14  ;;  %6610 = vmatprep.subr.bf16.mxu0 %v12992_v32  ;;  %v13038_v14 = vld [vmem:[%s14001_s6 + $0x13f0] ss:$72 sps:$4 sm:$0xff]   ;;  %v13043_v32 = vld [vmem:[%s14001_s6 + $0x1364] ss:$72 sps:$4 sm:$0xff]  }
 0x3bb   : > { %6653 = vmatprep.subr.bf16.mxu1 %v12995_v17  ;;  %v13041_v17 = vld [vmem:[%s14001_s6 + $0x1360] ss:$72 sps:$4 sm:$0xff]  }
 0x3bd   : > { %6611 = vmatpush2.bf16.msra.mxu0 %v12990_v19  ;;  %v13046_v19 = vld [vmem:[%s14001_s6 + $0x12d4] ss:$72 sps:$4 sm:$0xff]  }
 0x3be   : > { %6654 = vmatpush2.bf16.msra.mxu1 %v12993_v21  ;;  %6612 = vmatprep.subr.bf16.mxu0 %v12998_v22  ;;  %v13044_v21 = vld [vmem:[%s14001_s6 + $0x12d0] ss:$72 sps:$4 sm:$0xff]   ;;  %v13049_v22 = vld [vmem:[%s14001_s6 + $0x1244] ss:$72 sps:$4 sm:$0xff]  }
 0x3bf   : > { %6655 = vmatprep.subr.bf16.mxu1 %v13001_v13  ;;  %v13047_v13 = vld [vmem:[%s14001_s6 + $0x1240] ss:$72 sps:$4 sm:$0xff]  }
 0x3c1   : > { %6613 = vmatpush2.bf16.msra.mxu0 %v12996_v1  ;;  %v13052_v1 = vld [vmem:[%s14001_s6 + $0x1ab4] ss:$72 sps:$4 sm:$0xff]  }
 0x3c2   : > { %6656 = vmatpush2.bf16.msra.mxu1 %v12999_v2  ;;  %6614 = vmatprep.subr.bf16.mxu0 %v13004_v38  ;;  %v13050_v2 = vld [vmem:[%s14001_s6 + $0x1ab0] ss:$72 sps:$4 sm:$0xff]   ;;  %v13055_v38 = vld [vmem:[%s14001_s6 + $0x1a24] ss:$72 sps:$4 sm:$0xff]  }
 0x3c3   : > { %6657 = vmatprep.subr.bf16.mxu1 %v13007_v23  ;;  %v13053_v23 = vld [vmem:[%s14001_s6 + $0x1a20] ss:$72 sps:$4 sm:$0xff]  }
 0x3c5   : > { %6615 = vmatpush2.bf16.msra.mxu0 %v13002_v27  ;;  %v13058_v27 = vld [vmem:[%s14001_s6 + $0x1994] ss:$72 sps:$4 sm:$0xff]  }
 0x3c6   : > { %6658 = vmatpush2.bf16.msra.mxu1 %v13005_v28  ;;  %6616 = vmatprep.subr.bf16.mxu0 %v13010_v30  ;;  %v13056_v28 = vld [vmem:[%s14001_s6 + $0x1990] ss:$72 sps:$4 sm:$0xff]   ;;  %v13061_v30 = vld [vmem:[%s14001_s6 + $0x1904] ss:$72 sps:$4 sm:$0xff]  }
 0x3c7   : > { %6659 = vmatprep.subr.bf16.mxu1 %v13013_v46  ;;  %v13059_v46 = vld [vmem:[%s14001_s6 + $0x1900] ss:$72 sps:$4 sm:$0xff]  }
 0x3c9   : > { %6617 = vmatpush2.bf16.msra.mxu0 %v13008_v62  ;;  %v13064_v62 = vld [vmem:[%s14001_s6 + $0x1874] ss:$72 sps:$4 sm:$0xff]  }
 0x3ca   : > { %6660 = vmatpush2.bf16.msra.mxu1 %v13011_v34  ;;  %6618 = vmatprep.subr.bf16.mxu0 %v13016_v36  ;;  %v13062_v34 = vld [vmem:[%s14001_s6 + $0x1870] ss:$72 sps:$4 sm:$0xff]   ;;  %v13067_v36 = vld [vmem:[%s14001_s6 + $0x17e4] ss:$72 sps:$4 sm:$0xff]  }
 0x3cb   : > { %6661 = vmatprep.subr.bf16.mxu1 %v13019_v40  ;;  %v13065_v40 = vld [vmem:[%s14001_s6 + $0x17e0] ss:$72 sps:$4 sm:$0xff]  }
 0x3cd   : > { %6619 = vmatpush2.bf16.msra.mxu0 %v13014_v41  ;;  %v13070_v41 = vld [vmem:[%s14001_s6 + $0x1754] ss:$72 sps:$4 sm:$0xff]  }
 0x3ce   : > { %6662 = vmatpush2.bf16.msra.mxu1 %v13017_v43  ;;  %6620 = vmatprep.subr.bf16.mxu0 %v13022_v52  ;;  %v13068_v43 = vld [vmem:[%s14001_s6 + $0x1750] ss:$72 sps:$4 sm:$0xff]   ;;  %v13073_v52 = vld [vmem:[%s14001_s6 + $0x16c4] ss:$72 sps:$4 sm:$0xff]  }
 0x3cf   : > { %6663 = vmatprep.subr.bf16.mxu1 %v13025_v48  ;;  %v13071_v48 = vld [vmem:[%s14001_s6 + $0x16c0] ss:$72 sps:$4 sm:$0xff]  }
 0x3d1   : > { %6621 = vmatpush2.bf16.msra.mxu0 %v13020_v49  ;;  %v15069_v49 = vsub.s32 2, %v14375_v6 }
 0x3d2   : > { %6664 = vmatpush2.bf16.msra.mxu1 %v13023_v51  ;;  %6676 = vmatprep.subr.bf16.mxu0 %v13028_v53 }
 0x3d3   : > { %11563 = vmatprep.subr.bf16.mxu1 %v13793_v57 }
 0x3d4   : > { %v15015_v59 = vpop.f32.mrf.mxu0  ;;  %6623 = vmatmul.mubr.bf16.vlgmr.msra.gmra.mxu0 %v14089_v24 }
 0x3d5   : > { %v15017_v60 = vpop.f32.mrf.mxu1  ;;  %6666 = vmatmul.mubr.bf16.vlgmr.msra.gmra.mxu1 %v14091_v25  ;;  %6677 = vmatpush1.bf16.msra.mxu0 %v13026_v55 }
 0x3d6   : > { %11564 = vmatpush3.bf16.xpose.msra.mxu1 %v6837_v61  ;;  %v6368_v0 = vpop.f32.mrf.mxu0  ;;  %6678 = vmatprep.subr.bf16.mxu0 %v13031_v58  ;;  %v6410_v53 = vadd.f32 %v15017_v60, %v15015_v59 }
 0x3d7   : > { %v6411_v3 = vpop.f32.mrf.mxu1  ;;  %11565 = vmatprep.mubr.msk.bf16.mxu1 %vm13794_vm1, %v13793_v57  ;;  %6708 = vmatprep.mubr.bf16.mxu0 %v14124_v56  ;;  %v13035_v56 = vld [vmem:[%s14001_s6 + $0x1480] ss:$72 sps:$4 sm:$0xff]  }
 0x3d8   : > { %v15027_v24 = vadd.f32 %v6411_v3, %v6368_v0  ;;  %11569 = vmatprep.subr.bf16.mxu1 %v13793_v57  ;;  %v15031_v25 = vpop.f32.mrf.mxu0 }
 0x3d9   : > { %v15033_v7 = vpop.f32.mrf.mxu1  ;;  %6679 = vmatpush1.bf16.msra.mxu0 %v13029_v63  ;;  %v13580_v63 = vld [vmem:[%s14009_s23] sm:$0x3f] }
 0x3da   : > { %v6372_v9 = vpop.f32.mrf.mxu0  ;;  %6680 = vmatprep.subr.bf16.mxu0 %v13034_v4  ;;  %v6414_v58 = vadd.f32 %v15033_v7, %v15031_v25  ;;  %v6794_v0 = vrot.slane %v13580_v63, %v15069_v49 }
 0x3db   : > { %v6415_v10 = vpop.f32.mrf.mxu1 }
 0x3dc   : > { %v15037_v12 = vadd.f32 %v6415_v10, %v6372_v9 }
 0x3dd   : > { %11566 = vmatmul.mubr.msk.bf16.vlgmr.msra.gmra.mxu1 %vm6832_vm0, %v14403_v39  ;;  %6681 = vmatpush1.bf16.msra.mxu0 %v13032_v8  ;;  %v13581_v8 = vld [vmem:[%s14009_s23 + $0x8] sm:$0x3f] }
 0x3de   : > { %11571 = vmatprep.mubr.msk.bf16.mxu1 %vm13794_vm1, %v13793_v57  ;;  %6682 = vmatprep.subr.bf16.mxu0 %v13037_v11  ;;  %v6798_v9 = vrot.slane %v13581_v8, %v15069_v49 }
 0x3e1   : > { %6683 = vmatpush1.bf16.msra.mxu0 %v13035_v56 }
 0x3e2   : > { %6684 = vmatprep.subr.bf16.mxu0 %v13040_v33 }
 0x3e5   : > { %6685 = vmatpush1.bf16.msra.mxu0 %v13038_v14 }
 0x3e6   : > { %6686 = vmatprep.subr.bf16.mxu0 %v13043_v32 }
 0x3e9   : > { %6687 = vmatpush1.bf16.msra.mxu0 %v13041_v17 }
 0x3ea   : > { %6688 = vmatprep.subr.bf16.mxu0 %v13046_v19 }
 0x3ed   : > { %6689 = vmatpush1.bf16.msra.mxu0 %v13044_v21 }
 0x3ee   : > { %6690 = vmatprep.subr.bf16.mxu0 %v13049_v22 }
 0x3f1   : > { %6691 = vmatpush1.bf16.msra.mxu0 %v13047_v13 }
 0x3f2   : > { %6692 = vmatprep.subr.bf16.mxu0 %v13052_v1 }
 0x3f5   : > { %6693 = vmatpush2.bf16.msra.mxu0 %v13050_v2 }
 0x3f6   : > { %6694 = vmatprep.subr.bf16.mxu0 %v13055_v38 }
 0x3f9   : > { %6695 = vmatpush2.bf16.msra.mxu0 %v13053_v23 }
 0x3fa   : > { %6696 = vmatprep.subr.bf16.mxu0 %v13058_v27  ;;  %v6802_v27 = vrot.slane %v14857_v15, %v15069_v49 }
 0x3fd   : > { %6697 = vmatpush2.bf16.msra.mxu0 %v13056_v28 }
 0x3fe   : > { %6698 = vmatprep.subr.bf16.mxu0 %v13061_v30 }
 0x401   : > { %6699 = vmatpush2.bf16.msra.mxu0 %v13059_v46 }
 0x402   : > { %6700 = vmatprep.subr.bf16.mxu0 %v13064_v62  ;;  %v6806_v62 = vrot.slane %v14865_v5, %v15069_v49 }
 0x405   : > { %6701 = vmatpush2.bf16.msra.mxu0 %v13062_v34 }
 0x406   : > { %6702 = vmatprep.subr.bf16.mxu0 %v13067_v36 }
 0x409   : > { %6703 = vmatpush2.bf16.msra.mxu0 %v13065_v40 }
 0x40a   : > { %6704 = vmatprep.subr.bf16.mxu0 %v13070_v41 }
 0x40d   : > { %6705 = vmatpush2.bf16.msra.mxu0 %v13068_v43 }
 0x40e   : > { %6706 = vmatprep.subr.bf16.mxu0 %v13073_v52 }
 0x411   : > { %6707 = vmatpush2.bf16.msra.mxu0 %v13071_v48 }
 0x414   : > { %v6452_v51 = vpop.f32.mrf.mxu0  ;;  %6709 = vmatmul.mubr.bf16.vlgmr.msra.gmra.mxu0 %v14163_v35 }
 0x415   : > { %v6453_v61 = vadd.f32 %v6452_v51, %v6410_v53 }
 0x416   : > { %v6454_v55 = vpop.f32.mrf.mxu0 }
 0x417   : > { %v6455_v3 = vadd.f32 %v6454_v55, %v15027_v24  ;;  %v6815_v35 = vadd.f32 %v6794_v0, %v6453_v61  ;;  %v6495_v24 = vpop.f32.mrf.mxu1 }
 0x418   : > { %v6456_v4 = vpop.f32.mrf.mxu0 }
 0x419   : > { %v6457_v10 = vadd.f32 %v6456_v4, %v6414_v58  ;;  %v6816_v60 = vadd.f32 %v6798_v9, %v6455_v3  ;;  %v6497_v14 = vpop.f32.mrf.mxu1 }
 0x41a   : > { %v6458_v11 = vpop.f32.mrf.mxu0 }
 0x41b   : > { %v6821_v56 = vadd.f32 %v6794_v0, %v6457_v10  ;;  %v6459_v59 = vadd.f32 %v6458_v11, %v15037_v12  ;;  %v6499_v32 = vpop.f32.mrf.mxu1 }
 0x41d   : > { %v15082_v33 = vpack.c.bf16 %v6821_v56, %v6815_v35  ;;  %v6822_v25 = vadd.f32 %v6798_v9, %v6459_v59  ;;  %v6501_v17 = vpop.f32.mrf.mxu1  ;;  %v15099_v9 = vld [vmem:[%s15811_s1] sm:$0xff]  ;;  %v15105_v59 = vld [vmem:[%s15811_s1 + $0x8] sm:$0xff] }
 0x41f   : > { %11570 = vmatpush3.bf16.msra.mxu1 %v15082_v33  ;;  %v15085_v7 = vpack.c.bf16 %v6822_v25, %v6816_v60 }
 0x420   : > { %11575 = vmatprep.subr.bf16.mxu1 %v13793_v57 }
 0x454   : > { %v6538_v19 = vpop.f32.mrf.mxu0 }
 0x455   : > { %v6581_v21 = vpop.f32.mrf.mxu1  ;;  %v6539_v22 = vadd.f32 %v6538_v19, %v6495_v24 }
 0x456   : > { %v6540_v13 = vpop.f32.mrf.mxu0 }
 0x457   : > { %v6583_v1 = vpop.f32.mrf.mxu1  ;;  %v6582_v12 = vadd.f32 %v6581_v21, %v6539_v22  ;;  %v6541_v2 = vadd.f32 %v6540_v13, %v6497_v14 }
 0x458   : > { %v6542_v38 = vpop.f32.mrf.mxu0 }
 0x459   : > { %v6585_v23 = vpop.f32.mrf.mxu1  ;;  %v6584_v28 = vadd.f32 %v6583_v1, %v6541_v2  ;;  %v6543_v30 = vadd.f32 %v6542_v38, %v6499_v32  ;;  %v6817_v41 = vadd.f32 %v6802_v27, %v6582_v12  ;;  %v6810_v1 = vrot.slane %v14944_v16, %v15069_v49 }
 0x45a   : > { %v6544_v46 = vpop.f32.mrf.mxu0  ;;  %v6814_v38 = vrot.slane %v14953_v45, %v15069_v49 }
 0x45b   : > { %v6586_v34 = vadd.f32 %v6585_v23, %v6543_v30  ;;  %v6545_v36 = vadd.f32 %v6544_v46, %v6501_v17  ;;  %v6587_v40 = vpop.f32.mrf.mxu1  ;;  %v6818_v48 = vadd.f32 %v6806_v62, %v6584_v28 }
 0x45d   : > { %v6823_v43 = vadd.f32 %v6802_v27, %v6586_v34  ;;  %v6588_v52 = vadd.f32 %v6587_v40, %v6545_v36 }
 0x45f   : > { %v6824_v51 = vadd.f32 %v6806_v62, %v6588_v52  ;;  %v15092_v53 = vpack.c.bf16 %v6823_v43, %v6817_v41 }
 0x461   : > { %v15094_v55 = vpack.c.bf16 %v6824_v51, %v6818_v48 }
 0x494   : > { %v6624_v58 = vpop.f32.mrf.mxu0 }
 0x495   : > { %v6667_v15 = vpop.f32.mrf.mxu1 }
 0x496   : > { %v6626_v61 = vpop.f32.mrf.mxu0  ;;  %v6668_v19 = vadd.f32 %v6667_v15, %v6624_v58  ;;  %v6964_v15 = vpop.permute.xlu1 %6963 }
 0x497   : > { %v6669_v63 = vpop.f32.mrf.mxu1 }
 0x498   : > { %v6670_v0 = vadd.f32 %v6669_v63, %v6626_v61  ;;  %v6628_v3 = vpop.f32.mrf.mxu0 }
 0x499   : > { %v6671_v4 = vpop.f32.mrf.mxu1 }
 0x49a   : > { %v6630_v5 = vpop.f32.mrf.mxu0  ;;  %v6672_v22 = vadd.f32 %v6671_v4, %v6628_v3 }
 0x49b   : > { %v6673_v8 = vpop.f32.mrf.mxu1 }
 0x49c   : > { %v6674_v10 = vadd.f32 %v6673_v8, %v6630_v5 }
 0x49d   : > { %v6873_v11 = vpop.f32.mrf.mxu1 }
 0x49e   : > { %v6874_v35 = vadd.f32 %v6873_v11, %v15099_v9 }
 0x49f   : > { %v11567_v56 = vpop.f32.mrf.mxu1 }
 0x4a0   : > { %v6881_v60 = vsel %vm6880_vm2, %v6874_v35, -inf }
 0x4a1   : > { %6882 = vmax.xlane.f32.xlu0 %v6881_v60  ;;  %v6876_v25 = vpop.f32.mrf.mxu1 }
 0x4a2   : > { %v6877_v24 = vadd.f32 %v6876_v25, %v15105_v59 }
 0x4a3   : > { %v11568_v14 = vpop.f32.mrf.mxu1 }
 0x4a4   : > { %v6884_v32 = vsel %vm6880_vm2, %v6877_v24, -inf }
 0x4a5   : > { %6885 = vmax.xlane.f32.xlu0 %v6884_v32 }
 0x4bb   : > { %6961 = vrot.lane.b32.xlu0 %v14715_v18, %s13792_s12 }
 0x4d4   : > { %v6710_v17 = vpop.f32.mrf.mxu0 }
 0x4d5   : > { %v6711_v13 = vadd.f32 %v6710_v17, %v6668_v19 }
 0x4d6   : > { %v6712_v21 = vpop.f32.mrf.mxu0 }
 0x4d7   : > { %v6713_v12 = vadd.f32 %v6712_v21, %v6670_v0  ;;  %v6819_v28 = vadd.f32 %v6810_v1, %v6711_v13 }
 0x4d8   : > { %v6714_v2 = vpop.f32.mrf.mxu0 }
 0x4d9   : > { %v6715_v23 = vadd.f32 %v6714_v2, %v6672_v22  ;;  %v6820_v62 = vadd.f32 %v6814_v38, %v6713_v12 }
 0x4da   : > { %v6716_v27 = vpop.f32.mrf.mxu0 }
 0x4db   : > { %v6825_v30 = vadd.f32 %v6810_v1, %v6715_v23  ;;  %v6717_v46 = vadd.f32 %v6716_v27, %v6674_v10 }
 0x4dd   : > { %v6826_v18 = vadd.f32 %v6814_v38, %v6717_v46  ;;  %v15116_v34 = vpack.c.bf16 %v6825_v30, %v6819_v28 }
 0x4df   : > { %v15118_v36 = vpack.c.bf16 %v6826_v18, %v6820_v62 }
 0x52a   : > { %v6883_v40 = vpop.xlane.xlu0 %6882 }
 0x52b   : > { %v6887_v41 = vsub.f32 %v6874_v35, %v6883_v40 }
 0x52d   : > { %v6889_v43 = vmul.f32 1.442695, %v6887_v41 }
 0x52e   : > { %v6886_v16 = vpop.xlane.xlu0 %6885 }
 0x52f   : > { %13506 = vpow2.f32 %v6889_v43  ;;  %v6888_v52 = vsub.f32 %v6877_v24, %v6886_v16 }
 0x531   : > { %v6891_v48 = vmul.f32 1.442695, %v6888_v52 }
 0x532   : > { %v6962_v3 = vpop.permute.xlu0 %6961 }
 0x533   : > { %13508 = vpow2.f32 %v6891_v48  ;;  %v6965_v10 = vsel %vm6957_vm3, %v6962_v3, %v6964_v15 }
 0x53c   : > { %v13507_v45 = vpop.eup %13506 }
 0x53d   : > { %v6893_v49 = vsel %vm6880_vm2, %v13507_v45, 0.0 }
 0x53e   : > { %6894 = vadd.xlane.f32.xlu1 %v6893_v49 }
 0x540   : > { %v13509_v51 = vpop.eup %13508 }
 0x541   : > { %v6896_v58 = vsel %vm6880_vm2, %v13509_v51, 0.0 }
 0x542   : > { %6897 = vadd.xlane.f32.xlu1 %v6896_v58 }
 0x553   : > { %6953 = vrot.lane.b32.xlu1 %v14403_v39, %s13792_s12  ;;  %v6970_v39 = vsel %vm6832_vm0, %v6965_v10, 0 }
 0x557   : > { %6955 = vrot.lane.b32.xlu1 %v14409_v44, %s13792_s12 }
 0x5c7   : > { %v6895_v61 = vpop.xlane.xlu1 %6894 }
 0x5c8   : > { %13510 = vrcp.f32 %v6895_v61 }
 0x5cb   : > { %v6898_v63 = vpop.xlane.xlu1 %6897 }
 0x5cc   : > { %13512 = vrcp.f32 %v6898_v63 }
 0x5cf   : > { %v6954_v11 = vpop.permute.xlu1 %6953 }
 0x5d3   : > { %v6956_v56 = vpop.permute.xlu1 %6955 }
 0x5d4   : > { %v6958_v60 = vsel %vm6957_vm3, %v6954_v11, %v6956_v56 }
 0x5d5   : > { %v13511_v0 = vpop.eup %13510 }
 0x5d6   : > { %v6900_v5 = vmul.f32 %v13511_v0, %v13507_v45 }
 0x5d9   : > { %v13513_v4 = vpop.eup %13512 }
 0x5da   : > { %v6902_v8 = vmul.f32 %v13513_v4, %v13509_v51 }
 0x5dc   : > { %v6903_v35 = vpack.c.bf16 %v6902_v8, %v6900_v5 }
 0x5de   : > { %11572 = vmatmul.mubr.msk.bf16.vlgmr.msra.gmra.mxu1 %vm6880_vm2, %v6903_v35 }
 0x5df   : > { %11576 = vmatpush3.bf16.xpose.msra.mxu1 %v6970_v39  ;;  %11577 = vmatprep.mubr.msk.bf16.mxu1 %vm13794_vm1, %v13793_v57 }
 0x5e0   : > { %11581 = vmatprep.subr.bf16.mxu1 %v13793_v57 }
 0x5e6   : > { %11578 = vmatmul.mubr.msk.bf16.vlgmr.msra.gmra.mxu1 %vm6832_vm0, %v6958_v60 }
 0x5e7   : > { %11583 = vmatprep.mubr.msk.bf16.mxu1 %vm13794_vm1, %v13793_v57 }
 0x69e   : > { %v15136_v25 = vpop.f32.mrf.mxu1 }
 0x6a0   : > { %v11573_v24 = vpop.f32.mrf.mxu1 }
 0x6a2   : > { %v15138_v14 = vpop.f32.mrf.mxu1 }
 0x6a4   : > { %v11574_v32 = vpop.f32.mrf.mxu1 }
 0x6a6   : > { %v7006_v17 = vpop.f32.mrf.mxu1 }
 0x6a7   : > { %v7007_v19 = vadd.f32 %v7006_v17, %v15099_v9 }
 0x6a8   : > { %v11579_v21 = vpop.f32.mrf.mxu1 }
 0x6a9   : > { %v7013_v22 = vsel %vm6880_vm2, %v7007_v19, -inf }
 0x6aa   : > { %7014 = vmax.xlane.f32.xlu0 %v7013_v22  ;;  %v7009_v13 = vpop.f32.mrf.mxu1 }
 0x6ab   : > { %v7010_v1 = vadd.f32 %v7009_v13, %v15105_v59 }
 0x6ac   : > { %v11580_v12 = vpop.f32.mrf.mxu1 }
 0x6ad   : > { %v7016_v2 = vsel %vm6880_vm2, %v7010_v1, -inf }
 0x6ae   : > { %7017 = vmax.xlane.f32.xlu1 %v7016_v2 }
 0x6bf   : > { %7040 = vrot.lane.b32.xlu1 %v15085_v7, %s13792_s12 }
 0x6c3   : > { %7099 = vrot.lane.b32.xlu1 %v14717_v20, %s13795_s2 }
 0x6c7   : > { %7101 = vrot.lane.b32.xlu1 %v14877_v37, %s13795_s2 }
 0x6cb   : > { %7094 = vrot.lane.b32.xlu1 %v14483_v54, %s13795_s2 }
 0x733   : > { %v7015_v38 = vpop.xlane.xlu0 %7014 }
 0x734   : > { %v7019_v23 = vsub.f32 %v7007_v19, %v7015_v38 }
 0x736   : > { %v7021_v27 = vmul.f32 1.442695, %v7019_v23 }
 0x737   : > { %v7018_v28 = vpop.xlane.xlu1 %7017 }
 0x738   : > { %13514 = vpow2.f32 %v7021_v27  ;;  %v7020_v30 = vsub.f32 %v7010_v1, %v7018_v28 }
 0x73a   : > { %v7023_v46 = vmul.f32 1.442695, %v7020_v30 }
 0x73b   : > { %v7041_v16 = vpop.permute.xlu1 %7040 }
 0x73c   : > { %13516 = vpow2.f32 %v7023_v46 }
 0x73f   : > { %v7100_v45 = vpop.permute.xlu1 %7099 }
 0x743   : > { %v7102_v51 = vpop.permute.xlu1 %7101 }
 0x745   : > { %v13515_v62 = vpop.eup %13514 }
 0x746   : > { %v7025_v18 = vsel %vm6880_vm2, %v13515_v62, 0.0 }
 0x747   : > { %7026 = vadd.xlane.f32.xlu0 %v7025_v18  ;;  %v7095_v3 = vpop.permute.xlu1 %7094 }
 0x749   : > { %v13517_v40 = vpop.eup %13516 }
 0x74a   : > { %v7028_v20 = vsel %vm6880_vm2, %v13517_v40, 0.0 }
 0x74b   : > { %7029 = vadd.xlane.f32.xlu0 %v7028_v20 }
 0x761   : > { %7038 = vrot.lane.b32.xlu0 %v15082_v33, %s13792_s12 }
 0x765   : > { %7092 = vrot.lane.b32.xlu0 %v14409_v44, %s13795_s2  ;;  %v7103_v44 = vsel %vm7096_vm4, %v7100_v45, %v7102_v51 }
 0x766   : > { %v7108_v63 = vsel %vm6832_vm0, %v7103_v44, 0 }
 0x7d0   : > { %v7027_v41 = vpop.xlane.xlu0 %7026 }
 0x7d1   : > { %13518 = vrcp.f32 %v7027_v41 }
 0x7d4   : > { %v7030_v43 = vpop.xlane.xlu0 %7029 }
 0x7d5   : > { %13520 = vrcp.f32 %v7030_v43 }
 0x7d8   : > { %v7039_v52 = vpop.permute.xlu0 %7038 }
 0x7d9   : > { %v7042_v48 = vsel %vm6957_vm3, %v7039_v52, %v7041_v16 }
 0x7da   : > { %11582 = vmatpush3.bf16.msra.mxu1 %v7042_v48 }
 0x7db   : > { %11587 = vmatprep.subr.bf16.mxu1 %v13793_v57 }
 0x7dc   : > { %v7093_v0 = vpop.permute.xlu0 %7092 }
 0x7dd   : > { %v7097_v4 = vsel %vm7096_vm4, %v7093_v0, %v7095_v3 }
 0x7de   : > { %v13519_v49 = vpop.eup %13518 }
 0x7df   : > { %v7032_v33 = vmul.f32 %v13519_v49, %v13515_v62 }
 0x7e2   : > { %v13521_v58 = vpop.eup %13520 }
 0x7e3   : > { %v7034_v15 = vmul.f32 %v13521_v58, %v13517_v40 }
 0x7e5   : > { %v7035_v61 = vpack.c.bf16 %v7034_v15, %v7032_v33 }
 0x7e7   : > { %11584 = vmatmul.mubr.msk.bf16.vlgmr.msra.gmra.mxu1 %vm6880_vm2, %v7035_v61 }
 0x7e8   : > { %11588 = vmatpush3.bf16.xpose.msra.mxu1 %v7108_v63  ;;  %11589 = vmatprep.mubr.msk.bf16.mxu1 %vm13794_vm1, %v13793_v57 }
 0x7e9   : > { %11593 = vmatprep.subr.bf16.mxu1 %v13793_v57 }
 0x7ef   : > { %11590 = vmatmul.mubr.msk.bf16.vlgmr.msra.gmra.mxu1 %vm6832_vm0, %v7097_v4 }
 0x7f0   : > { %11595 = vmatprep.mubr.msk.bf16.mxu1 %vm13794_vm1, %v13793_v57 }
 0x8a7   : > { %v15170_v5 = vpop.f32.mrf.mxu1 }
 0x8a9   : > { %v11585_v8 = vpop.f32.mrf.mxu1 }
 0x8ab   : > { %v15172_v10 = vpop.f32.mrf.mxu1 }
 0x8ac   : > { %v11748_v11 = vpack.i.bf16 %v15172_v10, %v15170_v5 }
 0x8ad   : > { %v11586_v35 = vpop.f32.mrf.mxu1 }
 0x8af   : > { %v7144_v39 = vpop.f32.mrf.mxu1 }
 0x8b0   : > { %v7145_v56 = vadd.f32 %v7144_v39, %v15099_v9 }
 0x8b1   : > { %v11591_v60 = vpop.f32.mrf.mxu1 }
 0x8b2   : > { %v7151_v24 = vsel %vm6880_vm2, %v7145_v56, -inf }
 0x8b3   : > { %7152 = vmax.xlane.f32.xlu0 %v7151_v24  ;;  %v7147_v32 = vpop.f32.mrf.mxu1 }
 0x8b4   : > { %v7148_v17 = vadd.f32 %v7147_v32, %v15105_v59 }
 0x8b5   : > { %v11592_v19 = vpop.f32.mrf.mxu1 }
 0x8b6   : > { %v7154_v21 = vsel %vm6880_vm2, %v7148_v17, -inf }
 0x8b7   : > { %7155 = vmax.xlane.f32.xlu1 %v7154_v21 }
 0x8c8   : > { %7177 = vrot.lane.b32.xlu1 %v15092_v53, %s13795_s2 }
 0x8cc   : > { %7227 = vrot.lane.b32.xlu1 %v14877_v37, %s13796_s28 }
 0x8d0   : > { %7225 = vrot.lane.b32.xlu1 %v14483_v54, %s13796_s28 }
 0x93c   : > { %v7153_v22 = vpop.xlane.xlu0 %7152 }
 0x93d   : > { %v7157_v13 = vsub.f32 %v7145_v56, %v7153_v22 }
 0x93f   : > { %v7159_v1 = vmul.f32 1.442695, %v7157_v13 }
 0x940   : > { %v7156_v12 = vpop.xlane.xlu1 %7155 }
 0x941   : > { %13522 = vpow2.f32 %v7159_v1  ;;  %v7158_v2 = vsub.f32 %v7148_v17, %v7156_v12 }
 0x943   : > { %v7161_v38 = vmul.f32 1.442695, %v7158_v2 }
 0x944   : > { %v7178_v46 = vpop.permute.xlu1 %7177 }
 0x945   : > { %13524 = vpow2.f32 %v7161_v38 }
 0x948   : > { %v7228_v16 = vpop.permute.xlu1 %7227 }
 0x949   : > { %v7233_v48 = vsel %vm6832_vm0, %v7228_v16, 0 }
 0x94e   : > { %v13523_v23 = vpop.eup %13522 }
 0x94f   : > { %v7163_v27 = vsel %vm6880_vm2, %v13523_v23, 0.0 }
 0x950   : > { %7164 = vadd.xlane.f32.xlu0 %v7163_v27 }
 0x952   : > { %v13525_v28 = vpop.eup %13524 }
 0x953   : > { %v7166_v30 = vsel %vm6880_vm2, %v13525_v28, 0.0 }
 0x954   : > { %7167 = vadd.xlane.f32.xlu0 %v7166_v30 }
 0x96a   : > { %7175 = vrot.lane.b32.xlu0 %v15085_v7, %s13795_s2  ;;  %v7226_v7 = vpop.permute.xlu1 %7225 }
 0x9d9   : > { %v7165_v54 = vpop.xlane.xlu0 %7164 }
 0x9da   : > { %13526 = vrcp.f32 %v7165_v54 }
 0x9dd   : > { %v7168_v37 = vpop.xlane.xlu0 %7167 }
 0x9de   : > { %13528 = vrcp.f32 %v7168_v37 }
 0x9e1   : > { %v7176_v62 = vpop.permute.xlu0 %7175 }
 0x9e2   : > { %v7179_v18 = vsel %vm7096_vm4, %v7176_v62, %v7178_v46 }
 0x9e3   : > { %11594 = vmatpush3.bf16.msra.mxu1 %v7179_v18 }
 0x9e4   : > { %11599 = vmatprep.subr.bf16.mxu1 %v13793_v57 }
 0x9e7   : > { %v13527_v40 = vpop.eup %13526 }
 0x9e8   : > { %v7170_v41 = vmul.f32 %v13527_v40, %v13523_v23 }
 0x9eb   : > { %v13529_v20 = vpop.eup %13528 }
 0x9ec   : > { %v7172_v43 = vmul.f32 %v13529_v20, %v13525_v28  ;;  %v7353_v28 = vsel %vm6832_vm0, %v14881_v42, 0 }
 0x9ee   : > { %v7173_v52 = vpack.c.bf16 %v7172_v43, %v7170_v41 }
 0x9f0   : > { %11596 = vmatmul.mubr.msk.bf16.vlgmr.msra.gmra.mxu1 %vm6880_vm2, %v7173_v52 }
 0x9f1   : > { %11600 = vmatpush3.bf16.xpose.msra.mxu1 %v7233_v48  ;;  %11601 = vmatprep.mubr.msk.bf16.mxu1 %vm13794_vm1, %v13793_v57 }
 0x9f2   : > { %11605 = vmatprep.subr.bf16.mxu1 %v13793_v57 }
 0x9f8   : > { %11602 = vmatmul.mubr.msk.bf16.vlgmr.msra.gmra.mxu1 %vm6832_vm0, %v7226_v7 }
 0x9f9   : > { %11607 = vmatprep.mubr.msk.bf16.mxu1 %vm13794_vm1, %v13793_v57 }
 0xab0   : > { %v15200_v45 = vpop.f32.mrf.mxu1 }
 0xab2   : > { %v11597_v49 = vpop.f32.mrf.mxu1 }
 0xab4   : > { %v15202_v51 = vpop.f32.mrf.mxu1 }
 0xab5   : > { %v11753_v58 = vpack.i.bf16 %v15202_v51, %v15200_v45  ;;  %v13077_v45 = vld [vmem:[%s14007_s7 + $0x120] ss:$24 sps:$4 sm:$0xff]   ;;  %v13082_v51 = vld [vmem:[%s14007_s7 + $0xf4] ss:$24 sps:$4 sm:$0xff]  }
 0xab6   : > { %v11598_v33 = vpop.f32.mrf.mxu1 }
 0xab8   : > { %v7269_v15 = vpop.f32.mrf.mxu1 }
 0xab9   : > { %v7270_v44 = vadd.f32 %v7269_v15, %v15099_v9 }
 0xaba   : > { %v11603_v61 = vpop.f32.mrf.mxu1 }
 0xabb   : > { %v7276_v63 = vsel %vm6880_vm2, %v7270_v44, -inf }
 0xabc   : > { %7277 = vmax.xlane.f32.xlu0 %v7276_v63  ;;  %v7272_v0 = vpop.f32.mrf.mxu1 }
 0xabd   : > { %v7273_v3 = vadd.f32 %v7272_v0, %v15105_v59 }
 0xabe   : > { %v11604_v4 = vpop.f32.mrf.mxu1 }
 0xabf   : > { %v7279_v8 = vsel %vm6880_vm2, %v7273_v3, -inf }
 0xac0   : > { %7280 = vmax.xlane.f32.xlu1 %v7279_v8 }
 0xb45   : > { %v7278_v35 = vpop.xlane.xlu0 %7277 }
 0xb46   : > { %v7282_v39 = vsub.f32 %v7270_v44, %v7278_v35 }
 0xb48   : > { %v7284_v56 = vmul.f32 1.442695, %v7282_v39 }
 0xb49   : > { %v7281_v60 = vpop.xlane.xlu1 %7280 }
 0xb4a   : > { %13530 = vpow2.f32 %v7284_v56  ;;  %v7283_v24 = vsub.f32 %v7273_v3, %v7281_v60 }
 0xb4c   : > { %v7286_v32 = vmul.f32 1.442695, %v7283_v24 }
 0xb4e   : > { %13532 = vpow2.f32 %v7286_v32 }
 0xb57   : > { %v13531_v17 = vpop.eup %13530 }
 0xb58   : > { %v7288_v19 = vsel %vm6880_vm2, %v13531_v17, 0.0 }
 0xb59   : > { %7289 = vadd.xlane.f32.xlu0 %v7288_v19 }
 0xb5b   : > { %v13533_v21 = vpop.eup %13532 }
 0xb5c   : > { %v7291_v22 = vsel %vm6880_vm2, %v13533_v21, 0.0 }
 0xb5d   : > { %7292 = vadd.xlane.f32.xlu0 %v7291_v22 }
 0xb73   : > { %7299 = vrot.lane.b32.xlu0 %v15092_v53, %s13796_s28 }
 0xb77   : > { %7477 = vrot.lane.b32.xlu0 %v14961_v47, %s13792_s12 }
 0xb7b   : > { %7468 = vrot.lane.b32.xlu0 %v14487_v31, %s13792_s12 }
 0xb7f   : > { %7470 = vrot.lane.b32.xlu0 %v14634_v26, %s13792_s12 }
 0xbe2   : > { %v7290_v13 = vpop.xlane.xlu0 %7289 }
 0xbe3   : > { %13534 = vrcp.f32 %v7290_v13 }
 0xbe6   : > { %v7293_v1 = vpop.xlane.xlu0 %7292 }
 0xbe7   : > { %13536 = vrcp.f32 %v7293_v1 }
 0xbea   : > { %v7300_v12 = vpop.permute.xlu0 %7299 }
 0xbeb   : > { %11606 = vmatpush3.bf16.msra.mxu1 %v7300_v12 }
 0xbec   : > { %11611 = vmatprep.subr.bf16.mxu1 %v13793_v57 }
 0xbee   : > { %v7478_v35 = vpop.permute.xlu0 %7477 }
 0xbf0   : > { %v13535_v2 = vpop.eup %13534 }
 0xbf1   : > { %v7295_v53 = vmul.f32 %v13535_v2, %v13531_v17 }
 0xbf2   : > { %v7469_v19 = vpop.permute.xlu0 %7468 }
 0xbf4   : > { %v13537_v38 = vpop.eup %13536 }
 0xbf5   : > { %v7297_v23 = vmul.f32 %v13537_v38, %v13533_v21 }
 0xbf7   : > { %v7298_v27 = vpack.c.bf16 %v7297_v23, %v7295_v53 }
 0xbf9   : > { %11608 = vmatmul.mubr.msk.bf16.vlgmr.msra.gmra.mxu1 %vm6880_vm2, %v7298_v27 }
 0xbfa   : > { %11612 = vmatpush3.bf16.xpose.msra.mxu1 %v7353_v28  ;;  %11613 = vmatprep.mubr.msk.bf16.mxu1 %vm13794_vm1, %v13793_v57 }
 0xbfb   : > { %11617 = vmatprep.subr.bf16.mxu1 %v13793_v57 }
 0xc01   : > { %11614 = vmatmul.mubr.msk.bf16.vlgmr.msra.gmra.mxu1 %vm6832_vm0, %v14487_v31 }
 0xc02   : > { %11618 = vmatpush3.bf16.msra.mxu1 %v15094_v55  ;;  %11619 = vmatprep.mubr.msk.bf16.mxu1 %vm13794_vm1, %v13793_v57 }
 0xc03   : > { %11623 = vmatprep.subr.bf16.mxu1 %v13793_v57 }
 0xcb9   : > { %v15233_v30 = vpop.f32.mrf.mxu1 }
 0xcbb   : > { %v11609_v54 = vpop.f32.mrf.mxu1 }
 0xcbd   : > { %v15235_v37 = vpop.f32.mrf.mxu1 }
 0xcbe   : > { %v11763_v46 = vpack.i.bf16 %v15235_v37, %v15233_v30  ;;  %v13083_v30 = vld [vmem:[%s14007_s7 + $0xc0] ss:$24 sps:$4 sm:$0xff]   ;;  %v13088_v37 = vld [vmem:[%s14007_s7 + $0x94] ss:$24 sps:$4 sm:$0xff]  }
 0xcbf   : > { %v11610_v62 = vpop.f32.mrf.mxu1 }
 0xcc1   : > { %v7389_v18 = vpop.f32.mrf.mxu1 }
 0xcc2   : > { %v7390_v40 = vadd.f32 %v7389_v18, %v15099_v9 }
 0xcc3   : > { %v11615_v31 = vpop.f32.mrf.mxu1 }
 0xcc4   : > { %v7396_v20 = vsel %vm6880_vm2, %v7390_v40, -inf }
 0xcc5   : > { %7397 = vmax.xlane.f32.xlu1 %v7396_v20  ;;  %v7392_v41 = vpop.f32.mrf.mxu1 }
 0xcc6   : > { %v7393_v43 = vadd.f32 %v7392_v41, %v15105_v59 }
 0xcc7   : > { %v11616_v16 = vpop.f32.mrf.mxu1 }
 0xcc8   : > { %v7399_v52 = vsel %vm6880_vm2, %v7393_v43, -inf }
 0xcc9   : > { %7400 = vmax.xlane.f32.xlu1 %v7399_v52 }
 0xd4e   : > { %v7398_v48 = vpop.xlane.xlu1 %7397 }
 0xd4f   : > { %v7402_v7 = vsub.f32 %v7390_v40, %v7398_v48 }
 0xd51   : > { %v7404_v49 = vmul.f32 1.442695, %v7402_v7 }
 0xd52   : > { %v7401_v33 = vpop.xlane.xlu1 %7400 }
 0xd53   : > { %13538 = vpow2.f32 %v7404_v49  ;;  %v7403_v15 = vsub.f32 %v7393_v43, %v7401_v33 }
 0xd55   : > { %v7406_v44 = vmul.f32 1.442695, %v7403_v15 }
 0xd57   : > { %13540 = vpow2.f32 %v7406_v44 }
 0xd60   : > { %v13539_v61 = vpop.eup %13538 }
 0xd61   : > { %v7408_v63 = vsel %vm6880_vm2, %v13539_v61, 0.0 }
 0xd62   : > { %7409 = vadd.xlane.f32.xlu1 %v7408_v63 }
 0xd64   : > { %v13541_v0 = vpop.eup %13540 }
 0xd65   : > { %v7411_v3 = vsel %vm6880_vm2, %v13541_v0, 0.0 }
 0xd66   : > { %7412 = vadd.xlane.f32.xlu1 %v7411_v3 }
 0xd77   : > { %7475 = vrot.lane.b32.xlu1 %v14881_v42, %s13792_s12  ;;  %v7471_v42 = vpop.permute.xlu0 %7470 }
 0xd78   : > { %v7472_v13 = vsel %vm6957_vm3, %v7469_v19, %v7471_v42 }
 0xdeb   : > { %v7410_v4 = vpop.xlane.xlu1 %7409 }
 0xdec   : > { %13542 = vrcp.f32 %v7410_v4 }
 0xdef   : > { %v7413_v8 = vpop.xlane.xlu1 %7412 }
 0xdf0   : > { %13544 = vrcp.f32 %v7413_v8 }
 0xdf3   : > { %v7476_v56 = vpop.permute.xlu1 %7475 }
 0xdf4   : > { %v7479_v17 = vsel %vm6957_vm3, %v7476_v56, %v7478_v35 }
 0xdf5   : > { %v7484_v22 = vsel %vm6832_vm0, %v7479_v17, 0 }
 0xdf9   : > { %v13543_v39 = vpop.eup %13542 }
 0xdfa   : > { %v7415_v24 = vmul.f32 %v13543_v39, %v13539_v61 }
 0xdfd   : > { %v13545_v60 = vpop.eup %13544 }
 0xdfe   : > { %v7417_v32 = vmul.f32 %v13545_v60, %v13541_v0 }
 0xe00   : > { %v7418_v21 = vpack.c.bf16 %v7417_v32, %v7415_v24 }
 0xe02   : > { %11620 = vmatmul.mubr.msk.bf16.vlgmr.msra.gmra.mxu1 %vm6880_vm2, %v7418_v21 }
 0xe03   : > { %11624 = vmatpush3.bf16.xpose.msra.mxu1 %v7484_v22  ;;  %11625 = vmatprep.mubr.msk.bf16.mxu1 %vm13794_vm1, %v13793_v57 }
 0xe04   : > { %11629 = vmatprep.subr.bf16.mxu1 %v13793_v57 }
 0xe0a   : > { %11626 = vmatmul.mubr.msk.bf16.vlgmr.msra.gmra.mxu1 %vm6832_vm0, %v7472_v13 }
 0xe0b   : > { %11631 = vmatprep.mubr.msk.bf16.mxu1 %vm13794_vm1, %v13793_v57 }
 0xec2   : > { %v15257_v1 = vpop.f32.mrf.mxu1 }
 0xec4   : > { %v11621_v12 = vpop.f32.mrf.mxu1 }
 0xec6   : > { %v15259_v2 = vpop.f32.mrf.mxu1 }
 0xec8   : > { %v11622_v38 = vpop.f32.mrf.mxu1 }
 0xeca   : > { %v7520_v53 = vpop.f32.mrf.mxu1 }
 0xecb   : > { %v7521_v23 = vadd.f32 %v7520_v53, %v15099_v9 }
 0xecc   : > { %v11627_v27 = vpop.f32.mrf.mxu1 }
 0xecd   : > { %v7527_v28 = vsel %vm6880_vm2, %v7521_v23, -inf }
 0xece   : > { %7528 = vmax.xlane.f32.xlu1 %v7527_v28  ;;  %v7523_v54 = vpop.f32.mrf.mxu1 }
 0xecf   : > { %v7524_v62 = vadd.f32 %v7523_v54, %v15105_v59 }
 0xed0   : > { %v11628_v18 = vpop.f32.mrf.mxu1 }
 0xed1   : > { %v7530_v40 = vsel %vm6880_vm2, %v7524_v62, -inf }
 0xed2   : > { %7531 = vmax.xlane.f32.xlu0 %v7530_v40 }
 0xedf   : > { %7552 = vrot.lane.b32.xlu1 %v15094_v55, %s13792_s12 }
 0xee3   : > { %7612 = vrot.lane.b32.xlu1 %v14961_v47, %s13795_s2 }
 0xee7   : > { %7614 = vrot.lane.b32.xlu1 %v14965_v50, %s13795_s2 }
 0xeeb   : > { %7606 = vrot.lane.b32.xlu1 %v14634_v26, %s13795_s2 }
 0xf57   : > { %v7529_v31 = vpop.xlane.xlu1 %7528 }
 0xf58   : > { %v7533_v20 = vsub.f32 %v7521_v23, %v7529_v31 }
 0xf5a   : > { %v7535_v41 = vmul.f32 1.442695, %v7533_v20 }
 0xf5b   : > { %v7532_v43 = vpop.xlane.xlu0 %7531  ;;  %v7553_v33 = vpop.permute.xlu1 %7552 }
 0xf5c   : > { %13546 = vpow2.f32 %v7535_v41  ;;  %v7534_v16 = vsub.f32 %v7524_v62, %v7532_v43 }
 0xf5e   : > { %v7537_v52 = vmul.f32 1.442695, %v7534_v16 }
 0xf5f   : > { %v7613_v61 = vpop.permute.xlu1 %7612 }
 0xf60   : > { %13548 = vpow2.f32 %v7537_v52 }
 0xf63   : > { %v7615_v0 = vpop.permute.xlu1 %7614 }
 0xf64   : > { %v7616_v35 = vsel %vm7096_vm4, %v7613_v61, %v7615_v0 }
 0xf65   : > { %v7621_v56 = vsel %vm6832_vm0, %v7616_v35, 0 }
 0xf67   : > { %v7607_v24 = vpop.permute.xlu1 %7606 }
 0xf69   : > { %v13547_v48 = vpop.eup %13546 }
 0xf6a   : > { %v7539_v55 = vsel %vm6880_vm2, %v13547_v48, 0.0 }
 0xf6b   : > { %7540 = vadd.xlane.f32.xlu0 %v7539_v55 }
 0xf6d   : > { %v13549_v7 = vpop.eup %13548 }
 0xf6e   : > { %v7542_v47 = vsel %vm6880_vm2, %v13549_v7, 0.0 }
 0xf6f   : > { %7543 = vadd.xlane.f32.xlu0 %v7542_v47 }
 0xf85   : > { %7554 = vrot.lane.b32.xlu0 %v15116_v34, %s13792_s12 }
 0xf89   : > { %7608 = vrot.lane.b32.xlu0 %v14638_v29, %s13795_s2 }
 0xff4   : > { %v7541_v26 = vpop.xlane.xlu0 %7540 }
 0xff5   : > { %13550 = vrcp.f32 %v7541_v26 }
 0xff8   : > { %v7544_v49 = vpop.xlane.xlu0 %7543 }
 0xff9   : > { %13552 = vrcp.f32 %v7544_v49 }
 0xffc   : > { %v7555_v15 = vpop.permute.xlu0 %7554 }
 0xffd   : > { %v7556_v44 = vsel %vm6957_vm3, %v7553_v33, %v7555_v15 }
 0xffe   : > { %11630 = vmatpush3.bf16.msra.mxu1 %v7556_v44 }
 0xfff   : > { %11635 = vmatprep.subr.bf16.mxu1 %v13793_v57 }
0x1000   : > { %v7609_v60 = vpop.permute.xlu0 %7608 }
0x1001   : > { %v7610_v32 = vsel %vm7096_vm4, %v7607_v24, %v7609_v60 }
0x1002   : > { %v13551_v63 = vpop.eup %13550 }
0x1003   : > { %v7546_v4 = vmul.f32 %v13551_v63, %v13547_v48 }
0x1006   : > { %v13553_v3 = vpop.eup %13552 }
0x1007   : > { %v7548_v8 = vmul.f32 %v13553_v3, %v13549_v7 }
0x1009   : > { %v7549_v39 = vpack.c.bf16 %v7548_v8, %v7546_v4 }
0x100b   : > { %11632 = vmatmul.mubr.msk.bf16.vlgmr.msra.gmra.mxu1 %vm6880_vm2, %v7549_v39 }
0x100c   : > { %11636 = vmatpush3.bf16.xpose.msra.mxu1 %v7621_v56  ;;  %11637 = vmatprep.mubr.msk.bf16.mxu1 %vm13794_vm1, %v13793_v57 }
0x100d   : > { %11641 = vmatprep.subr.bf16.mxu1 %v13793_v57 }
0x1013   : > { %11638 = vmatmul.mubr.msk.bf16.vlgmr.msra.gmra.mxu1 %vm6832_vm0, %v7610_v32 }
0x1014   : > { %11643 = vmatprep.mubr.msk.bf16.mxu1 %vm13794_vm1, %v13793_v57 }
0x10cb   : > { %v15291_v17 = vpop.f32.mrf.mxu1 }
0x10cd   : > { %v11633_v19 = vpop.f32.mrf.mxu1 }
0x10cf   : > { %v15293_v21 = vpop.f32.mrf.mxu1 }
0x10d0   : > { %v11758_v22 = vpack.i.bf16 %v15293_v21, %v15291_v17  ;;  %v13085_v17 = vld [vmem:[%s14007_s7 + $0xc4] ss:$24 sps:$4 sm:$0xff]  }
0x10d1   : > { %v11634_v42 = vpop.f32.mrf.mxu1  ;;  %v13091_v21 = vld [vmem:[%s14007_s7 + $0x64] ss:$24 sps:$4 sm:$0xff]  }
0x10d3   : > { %v7657_v13 = vpop.f32.mrf.mxu1 }
0x10d4   : > { %v7658_v12 = vadd.f32 %v7657_v13, %v15099_v9  ;;  %v13094_v13 = vld [vmem:[%s14007_s7 + $0x34] ss:$24 sps:$4 sm:$0xff]  }
0x10d5   : > { %v11639_v38 = vpop.f32.mrf.mxu1 }
0x10d6   : > { %v7664_v53 = vsel %vm6880_vm2, %v7658_v12, -inf  ;;  %v13097_v38 = vld [vmem:[%s14007_s7 + $0x4] ss:$24 sps:$4 sm:$0xff]  }
0x10d7   : > { %7665 = vmax.xlane.f32.xlu1 %v7664_v53  ;;  %v7660_v23 = vpop.f32.mrf.mxu1  ;;  %v13095_v53 = vld [vmem:[%s14007_s7] ss:$24 sps:$4 sm:$0xff]  }
0x10d8   : > { %v7661_v27 = vadd.f32 %v7660_v23, %v15105_v59  ;;  %v13100_v23 = vld [vmem:[%s14007_s7 + $0x2d4] ss:$24 sps:$4 sm:$0xff]  }
0x10d9   : > { %v11640_v28 = vpop.f32.mrf.mxu1 }
0x10da   : > { %v7667_v54 = vsel %vm6880_vm2, %v7661_v27, -inf  ;;  %v13103_v28 = vld [vmem:[%s14007_s7 + $0x2a4] ss:$24 sps:$4 sm:$0xff]  }
0x10db   : > { %7668 = vmax.xlane.f32.xlu0 %v7667_v54  ;;  %v13101_v54 = vld [vmem:[%s14007_s7 + $0x2a0] ss:$24 sps:$4 sm:$0xff]  }
0x10e8   : > { %7688 = vrot.lane.b32.xlu1 %v15116_v34, %s13795_s2 }
0x10ec   : > { %7740 = vrot.lane.b32.xlu1 %v14965_v50, %s13796_s28 }
0x10f0   : > { %7738 = vrot.lane.b32.xlu1 %v14638_v29, %s13796_s28 }
0x1160   : > { %v7666_v62 = vpop.xlane.xlu1 %7665 }
0x1161   : > { %v7670_v18 = vsub.f32 %v7658_v12, %v7666_v62  ;;  %v13092_v12 = vld [vmem:[%s14007_s7 + $0x30] ss:$24 sps:$4 sm:$0xff]   ;;  %v13106_v62 = vld [vmem:[%s14007_s7 + $0x274] ss:$24 sps:$4 sm:$0xff]  }
0x1163   : > { %v7672_v40 = vmul.f32 1.442695, %v7670_v18  ;;  %v13104_v18 = vld [vmem:[%s14007_s7 + $0x270] ss:$24 sps:$4 sm:$0xff]  }
0x1164   : > { %v7669_v31 = vpop.xlane.xlu0 %7668  ;;  %v7689_v48 = vpop.permute.xlu1 %7688 }
0x1165   : > { %13554 = vpow2.f32 %v7672_v40  ;;  %v7671_v20 = vsub.f32 %v7661_v27, %v7669_v31  ;;  %v13098_v27 = vld [vmem:[%s14007_s7 + $0x2d0] ss:$24 sps:$4 sm:$0xff]   ;;  %v13109_v40 = vld [vmem:[%s14007_s7 + $0x244] ss:$24 sps:$4 sm:$0xff]   ;;  %v13107_v31 = vld [vmem:[%s14007_s7 + $0x240] ss:$24 sps:$4 sm:$0xff]  }
0x1167   : > { %v7674_v41 = vmul.f32 1.442695, %v7671_v20  ;;  %v13112_v20 = vld [vmem:[%s14007_s7 + $0x214] ss:$24 sps:$4 sm:$0xff]  }
0x1168   : > { %v7741_v15 = vpop.permute.xlu1 %7740 }
0x1169   : > { %13556 = vpow2.f32 %v7674_v41  ;;  %v7746_v61 = vsel %vm6832_vm0, %v7741_v15, 0  ;;  %v13110_v41 = vld [vmem:[%s14007_s7 + $0x210] ss:$24 sps:$4 sm:$0xff]   ;;  %v13118_v15 = vld [vmem:[%s14007_s7 + $0x1b4] ss:$24 sps:$4 sm:$0xff]  }
0x116c   : > { %v7739_v63 = vpop.permute.xlu1 %7738 }
0x1172   : > { %v13555_v43 = vpop.eup %13554 }
0x1173   : > { %v7676_v16 = vsel %vm6880_vm2, %v13555_v43, 0.0 }
0x1174   : > { %7677 = vadd.xlane.f32.xlu0 %v7676_v16 }
0x1176   : > { %v13557_v52 = vpop.eup %13556 }
0x1177   : > { %v7679_v34 = vsel %vm6880_vm2, %v13557_v52, 0.0 }
0x1178   : > { %7680 = vadd.xlane.f32.xlu0 %v7679_v34 }
0x118e   : > { %7690 = vrot.lane.b32.xlu0 %v15118_v36, %s13795_s2 }
0x11fd   : > { %v7678_v29 = vpop.xlane.xlu0 %7677 }
0x11fe   : > { %13558 = vrcp.f32 %v7678_v29 }
0x1201   : > { %v7681_v50 = vpop.xlane.xlu0 %7680 }
0x1202   : > { %13560 = vrcp.f32 %v7681_v50 }
0x1205   : > { %v7691_v55 = vpop.permute.xlu0 %7690 }
0x1206   : > { %v7692_v7 = vsel %vm7096_vm4, %v7689_v48, %v7691_v55 }
0x1207   : > { %11642 = vmatpush3.bf16.msra.mxu1 %v7692_v7 }
0x1208   : > { %11647 = vmatprep.subr.bf16.mxu1 %v13793_v57 }
0x120b   : > { %v13559_v47 = vpop.eup %13558 }
0x120c   : > { %v7683_v49 = vmul.f32 %v13559_v47, %v13555_v43 }
0x120f   : > { %v13561_v26 = vpop.eup %13560 }
0x1210   : > { %v7685_v33 = vmul.f32 %v13561_v26, %v13557_v52 }
0x1212   : > { %v7686_v44 = vpack.c.bf16 %v7685_v33, %v7683_v49  ;;  %v13115_v49 = vld [vmem:[%s14007_s7 + $0x1e4] ss:$24 sps:$4 sm:$0xff]   ;;  %v13113_v33 = vld [vmem:[%s14007_s7 + $0x1e0] ss:$24 sps:$4 sm:$0xff]  }
0x1214   : > { %11644 = vmatmul.mubr.msk.bf16.vlgmr.msra.gmra.mxu1 %vm6880_vm2, %v7686_v44  ;;  %v13116_v44 = vld [vmem:[%s14007_s7 + $0x1b0] ss:$24 sps:$4 sm:$0xff]  }
0x1215   : > { %11648 = vmatpush3.bf16.xpose.msra.mxu1 %v7746_v61  ;;  %11649 = vmatprep.mubr.msk.bf16.mxu1 %vm13794_vm1, %v13793_v57  ;;  %v13121_v61 = vld [vmem:[%s14007_s7 + $0x184] ss:$24 sps:$4 sm:$0xff]  }
0x1216   : > { %11653 = vmatprep.subr.bf16.mxu1 %v13793_v57 }
0x121c   : > { %11650 = vmatmul.mubr.msk.bf16.vlgmr.msra.gmra.mxu1 %vm6832_vm0, %v7739_v63  ;;  %v13119_v63 = vld [vmem:[%s14007_s7 + $0x180] ss:$24 sps:$4 sm:$0xff]  }
0x121d   : > { %11655 = vmatprep.mubr.msk.bf16.mxu1 %vm13794_vm1, %v13793_v57 }
0x12d4   : > { %v15321_v0 = vpop.f32.mrf.mxu1 }
0x12d6   : > { %v11645_v3 = vpop.f32.mrf.mxu1 }
0x12d7   : > { %v13124_v3 = vld [vmem:[%s14007_s7 + $0x454] ss:$24 sps:$4 sm:$0xff]  }
0x12d8   : > { %v15323_v4 = vpop.f32.mrf.mxu1 }
0x12d9   : > { %v11768_v8 = vpack.i.bf16 %v15323_v4, %v15321_v0 }
0x12da   : > { %v11646_v35 = vpop.f32.mrf.mxu1 }
0x12dc   : > { %v7782_v39 = vpop.f32.mrf.mxu1 }
0x12dd   : > { %v15328_v56 = vadd.f32 %v7782_v39, %v15099_v9  ;;  %v13074_v9 = vld [vmem:[%s14007_s7 + $0x150] ss:$24 sps:$4 sm:$0xff]  }
0x12de   : > { %v11651_v60 = vpop.f32.mrf.mxu1 }
0x12df   : > { %v7789_v57 = vsel %vm6880_vm2, %v15328_v56, -inf }
0x12e0   : > { %7790 = vmax.xlane.f32.xlu1 %v7789_v57  ;;  %v7785_v24 = vpop.f32.mrf.mxu1 }
0x12e1   : > { %v15333_v32 = vadd.f32 %v7785_v24, %v15105_v59  ;;  %v13076_v59 = vld [vmem:[%s14007_s7 + $0x154] ss:$24 sps:$4 sm:$0xff]  }
0x12e2   : > { %v11652_v19 = vpop.f32.mrf.mxu1  ;;  %9679 = vmatprep.subr.bf16.mxu0 %v13076_v59 }
0x12e3   : > { %v7792_v42 = vsel %vm6880_vm2, %v15333_v32, -inf  ;;  %9680 = vmatpush1.bf16.msra.mxu0 %v13074_v9 }
0x12e4   : > { %7793 = vmax.xlane.f32.xlu0 %v7792_v42 }
0x12f1   : > { %7812 = vrot.lane.b32.xlu1 %v15118_v36, %s13796_s28  ;;  %v13079_v36 = vld [vmem:[%s14007_s7 + $0x124] ss:$24 sps:$4 sm:$0xff]  }
0x12f2   : > { %9681 = vmatprep.subr.bf16.mxu0 %v13079_v36 }
0x12f3   : > { %9682 = vmatpush1.bf16.msra.mxu0 %v13077_v45 }
0x12f4   : > { %9683 = vmatprep.subr.bf16.mxu0 %v13082_v51 }
0x12f5   : > { %11754 = vrot.lane.b32.xlu1 %v11753_v58, %s13795_s2  ;;  %v13080_v58 = vld [vmem:[%s14007_s7 + $0xf0] ss:$24 sps:$4 sm:$0xff]  }
0x12f7   : > { %9684 = vmatpush1.bf16.msra.mxu0 %v13080_v58 }
0x12f8   : > { %9685 = vmatprep.subr.bf16.mxu0 %v13085_v17  ;;  %v13122_v17 = vld [vmem:[%s14007_s7 + $0x450] ss:$24 sps:$4 sm:$0xff]  }
0x12f9   : > { %11759 = vrot.lane.b32.xlu1 %v11758_v22, %s13796_s28  ;;  %v13089_v22 = vld [vmem:[%s14007_s7 + $0x60] ss:$24 sps:$4 sm:$0xff]  }
0x12fb   : > { %9686 = vmatpush1.bf16.msra.mxu0 %v13083_v30 }
0x12fc   : > { %9687 = vmatprep.subr.bf16.mxu0 %v13088_v37  ;;  %v13127_v37 = vld [vmem:[%s14007_s7 + $0x424] ss:$24 sps:$4 sm:$0xff]  }
0x12fd   : > { %11764 = vrot.lane.b32.xlu1 %v11763_v46, %s13792_s12  ;;  %v13086_v46 = vld [vmem:[%s14007_s7 + $0x90] ss:$24 sps:$4 sm:$0xff]  }
0x12ff   : > { %9688 = vmatpush1.bf16.msra.mxu0 %v13086_v46 }
0x1300   : > { %9689 = vmatprep.subr.bf16.mxu0 %v13091_v21  ;;  %v13130_v21 = vld [vmem:[%s14007_s7 + $0x3f4] ss:$24 sps:$4 sm:$0xff]  }
0x1303   : > { %9690 = vmatpush1.bf16.msra.mxu0 %v13089_v22  ;;  %v13133_v22 = vld [vmem:[%s14007_s7 + $0x3c4] ss:$24 sps:$4 sm:$0xff]  }
0x1304   : > { %9691 = vmatprep.subr.bf16.mxu0 %v13094_v13  ;;  %v13131_v13 = vld [vmem:[%s14007_s7 + $0x3c0] ss:$24 sps:$4 sm:$0xff]  }
0x1307   : > { %9692 = vmatpush1.bf16.msra.mxu0 %v13092_v12  ;;  %v13136_v12 = vld [vmem:[%s14007_s7 + $0x394] ss:$24 sps:$4 sm:$0xff]  }
0x1308   : > { %9693 = vmatprep.subr.bf16.mxu0 %v13097_v38  ;;  %v13134_v38 = vld [vmem:[%s14007_s7 + $0x390] ss:$24 sps:$4 sm:$0xff]  }
0x130b   : > { %9694 = vmatpush1.bf16.msra.mxu0 %v13095_v53  ;;  %v13139_v53 = vld [vmem:[%s14007_s7 + $0x364] ss:$24 sps:$4 sm:$0xff]  }
0x130c   : > { %9695 = vmatprep.subr.bf16.mxu0 %v13100_v23  ;;  %v13137_v23 = vld [vmem:[%s14007_s7 + $0x360] ss:$24 sps:$4 sm:$0xff]  }
0x130f   : > { %9696 = vmatpush2.bf16.msra.mxu0 %v13098_v27  ;;  %v13142_v27 = vld [vmem:[%s14007_s7 + $0x334] ss:$24 sps:$4 sm:$0xff]  }
0x1310   : > { %9697 = vmatprep.subr.bf16.mxu0 %v13103_v28  ;;  %v13140_v28 = vld [vmem:[%s14007_s7 + $0x330] ss:$24 sps:$4 sm:$0xff]  }
0x1313   : > { %9698 = vmatpush2.bf16.msra.mxu0 %v13101_v54  ;;  %v13145_v54 = vld [vmem:[%s14007_s7 + $0x304] ss:$24 sps:$4 sm:$0xff]  }
0x1314   : > { %9699 = vmatprep.subr.bf16.mxu0 %v13106_v62  ;;  %v13143_v62 = vld [vmem:[%s14007_s7 + $0x300] ss:$24 sps:$4 sm:$0xff]  }
0x1317   : > { %9700 = vmatpush2.bf16.msra.mxu0 %v13104_v18  ;;  %v13148_v18 = vld [vmem:[%s14007_s7 + $0x5d4] ss:$24 sps:$4 sm:$0xff]  }
0x1318   : > { %9701 = vmatprep.subr.bf16.mxu0 %v13109_v40  ;;  %v13146_v40 = vld [vmem:[%s14007_s7 + $0x5d0] ss:$24 sps:$4 sm:$0xff]  }
0x131b   : > { %9702 = vmatpush2.bf16.msra.mxu0 %v13107_v31  ;;  %v13151_v31 = vld [vmem:[%s14007_s7 + $0x5a4] ss:$24 sps:$4 sm:$0xff]  }
0x131c   : > { %9703 = vmatprep.subr.bf16.mxu0 %v13112_v20  ;;  %v13149_v20 = vld [vmem:[%s14007_s7 + $0x5a0] ss:$24 sps:$4 sm:$0xff]  }
0x131f   : > { %9704 = vmatpush2.bf16.msra.mxu0 %v13110_v41  ;;  %v13154_v41 = vld [vmem:[%s14007_s7 + $0x574] ss:$24 sps:$4 sm:$0xff]  }
0x1320   : > { %9705 = vmatprep.subr.bf16.mxu0 %v13115_v49 }
0x1323   : > { %9706 = vmatpush2.bf16.msra.mxu0 %v13113_v33 }
0x1324   : > { %9707 = vmatprep.subr.bf16.mxu0 %v13118_v15  ;;  %v13167_v15 = vld [vmem:[%s14007_s7 + $0x480] ss:$24 sps:$4 sm:$0xff]  }
0x1327   : > { %9708 = vmatpush2.bf16.msra.mxu0 %v13116_v44  ;;  %v13172_v44 = vld [vmem:[%s14007_s7 + $0x15c] ss:$24 sps:$4 sm:$0xff]  }
0x1328   : > { %9709 = vmatprep.subr.bf16.mxu0 %v13121_v61 }
0x132b   : > { %9710 = vmatpush2.bf16.msra.mxu0 %v13119_v63 }
0x1369   : > { %v7791_v43 = vpop.xlane.xlu1 %7790 }
0x136a   : > { %v7795_v16 = vsub.f32 %v15328_v56, %v7791_v43  ;;  %v13152_v43 = vld [vmem:[%s14007_s7 + $0x570] ss:$24 sps:$4 sm:$0xff]  }
0x136c   : > { %v7797_v52 = vmul.f32 1.442695, %v7795_v16  ;;  %v13157_v16 = vld [vmem:[%s14007_s7 + $0x544] ss:$24 sps:$4 sm:$0xff]  }
0x136d   : > { %v7813_v34 = vpop.permute.xlu1 %7812  ;;  %v7794_v29 = vpop.xlane.xlu0 %7793 }
0x136e   : > { %13562 = vpow2.f32 %v7797_v52  ;;  %v7796_v50 = vsub.f32 %v15333_v32, %v7794_v29  ;;  %11654 = vmatpush3.bf16.msra.mxu1 %v7813_v34  ;;  %v13155_v52 = vld [vmem:[%s14007_s7 + $0x540] ss:$24 sps:$4 sm:$0xff]   ;;  %v13160_v34 = vld [vmem:[%s14007_s7 + $0x514] ss:$24 sps:$4 sm:$0xff]   ;;  %v13158_v29 = vld [vmem:[%s14007_s7 + $0x510] ss:$24 sps:$4 sm:$0xff]  }
0x136f   : > { %9722 = vmatprep.subr.bf16.mxu1 %v13124_v3  ;;  %v13170_v3 = vld [vmem:[%s14007_s7 + $0x158] ss:$24 sps:$4 sm:$0xff]  }
0x1370   : > { %v7799_v48 = vmul.f32 1.442695, %v7796_v50  ;;  %v13163_v50 = vld [vmem:[%s14007_s7 + $0x4e4] ss:$24 sps:$4 sm:$0xff]  }
0x1371   : > { %v15396_v56 = vpop.permute.xlu1 %11754 }
0x1372   : > { %13564 = vpow2.f32 %v7799_v48  ;;  %v11757_v57 = vunpack.i.h.bf16 %v15396_v56  ;;  %v11756_v24 = vunpack.i.l.bf16 %v15396_v56  ;;  %v13161_v48 = vld [vmem:[%s14007_s7 + $0x4e0] ss:$24 sps:$4 sm:$0xff]   ;;  %v13178_v56 = vld [vmem:[%s14007_s7 + $0xfc] ss:$24 sps:$4 sm:$0xff]  }
0x1375   : > { %v15410_v32 = vpop.permute.xlu1 %11759 }
0x137b   : > { %v13563_v55 = vpop.eup %13562 }
0x137c   : > { %v7801_v7 = vsel %vm6880_vm2, %v13563_v55, 0.0 }
0x137d   : > { %7802 = vadd.xlane.f32.xlu0 %v7801_v7  ;;  %v11765_v7 = vpop.permute.xlu1 %11764 }
0x137e   : > { %v11767_v49 = vunpack.i.h.bf16 %v11765_v7  ;;  %v11766_v33 = vunpack.i.l.bf16 %v11765_v7  ;;  %v13244_v7 = vld [vmem:[%s14007_s7 + $0x694] ss:$24 sps:$4 sm:$0xff]  }
0x137f   : > { %v13565_v47 = vpop.eup %13564 }
0x1380   : > { %v7804_v26 = vsel %vm6880_vm2, %v13565_v47, 0.0  ;;  %v7913_v61 = vsel %vm6957_vm3, %v11756_v24, %v11766_v33  ;;  %v7914_v63 = vsel %vm6957_vm3, %v11757_v57, %v11767_v49  ;;  %v13245_v49 = vld [vmem:[%s14007_s7 + $0x698] ss:$24 sps:$4 sm:$0xff]   ;;  %v13250_v33 = vld [vmem:[%s14007_s7 + $0x664] ss:$24 sps:$4 sm:$0xff]  }
0x1381   : > { %7805 = vadd.xlane.f32.xlu0 %v7804_v26  ;;  %v13169_v26 = vld [vmem:[%s14007_s7 + $0x484] ss:$24 sps:$4 sm:$0xff]  }
0x1397   : > { %11749 = vrot.lane.b32.xlu0 %v11748_v11, %s13796_s28 }
0x139b   : > { %11769 = vrot.lane.b32.xlu0 %v11768_v8, %s13795_s2 }
0x1406   : > { %v7803_v35 = vpop.xlane.xlu0 %7802 }
0x1407   : > { %13566 = vrcp.f32 %v7803_v35  ;;  %v15471_v35 = vpack.c.bf16 %v7914_v63, %v7913_v61  ;;  %v13251_v61 = vld [vmem:[%s14007_s7 + $0x668] ss:$24 sps:$4 sm:$0xff]   ;;  %v13256_v63 = vld [vmem:[%s14007_s7 + $0x634] ss:$24 sps:$4 sm:$0xff]  }
0x140a   : > { %v7806_v39 = vpop.xlane.xlu0 %7805 }
0x140b   : > { %13568 = vrcp.f32 %v7806_v39  ;;  %v13175_v39 = vld [vmem:[%s14007_s7 + $0x12c] ss:$24 sps:$4 sm:$0xff]  }
0x140e   : > { %v11750_v60 = vpop.permute.xlu0 %11749 }
0x140f   : > { %v11752_v5 = vunpack.i.h.bf16 %v11750_v60  ;;  %v11751_v10 = vunpack.i.l.bf16 %v11750_v60  ;;  %v13173_v60 = vld [vmem:[%s14007_s7 + $0x128] ss:$24 sps:$4 sm:$0xff]  }
0x1411   : > { %v7908_v11 = vsel %vm6832_vm0, %v15138_v14, %v11752_v5  ;;  %v7907_v0 = vsel %vm6832_vm0, %v15136_v25, %v11751_v10  ;;  %v7910_v4 = vsel %vm7096_vm4, %v11751_v10, %v11756_v24  ;;  %v7911_v8 = vsel %vm7096_vm4, %v11752_v5, %v11757_v57  ;;  %v13176_v57 = vld [vmem:[%s14007_s7 + $0xf8] ss:$24 sps:$4 sm:$0xff]   ;;  %v13181_v24 = vld [vmem:[%s14007_s7 + $0xcc] ss:$24 sps:$4 sm:$0xff]   ;;  %v13179_v5 = vld [vmem:[%s14007_s7 + $0xc8] ss:$24 sps:$4 sm:$0xff]  }
0x1412   : > { %v15412_v19 = vpack.c.bf16 %v7908_v11, %v7907_v0  ;;  %v15414_v42 = vpack.c.bf16 %v7911_v8, %v7910_v4  ;;  %v11762_v25 = vunpack.i.h.bf16 %v15410_v32  ;;  %v11761_v14 = vunpack.i.l.bf16 %v15410_v32  ;;  %v13184_v10 = vld [vmem:[%s14007_s7 + $0x9c] ss:$24 sps:$4 sm:$0xff]   ;;  %v13182_v11 = vld [vmem:[%s14007_s7 + $0x98] ss:$24 sps:$4 sm:$0xff]   ;;  %v13187_v0 = vld [vmem:[%s14007_s7 + $0x6c] ss:$24 sps:$4 sm:$0xff]  }
0x1413   : > { %v13185_v4 = vld [vmem:[%s14007_s7 + $0x68] ss:$24 sps:$4 sm:$0xff]   ;;  %v13190_v8 = vld [vmem:[%s14007_s7 + $0x3c] ss:$24 sps:$4 sm:$0xff]   ;;  %v13322_v32 = vld [vmem:[%s14007_s7 + $0x42c] ss:$24 sps:$4 sm:$0xff]  }
0x1414   : > { %9711 = vmatprep.mubr.bf16.mxu0 %v15414_v42  ;;  %v13567_v9 = vpop.eup %13566  ;;  %v7915_v51 = vsel %vm6832_vm0, %v15257_v1, %v11761_v14  ;;  %v7916_v58 = vsel %vm6832_vm0, %v15259_v2, %v11762_v25  ;;  %v13125_v1 = vld [vmem:[%s14007_s7 + $0x420] ss:$24 sps:$4 sm:$0xff]   ;;  %v13128_v2 = vld [vmem:[%s14007_s7 + $0x3f0] ss:$24 sps:$4 sm:$0xff]  }
0x1415   : > { %9712 = vmatmul.mubr.bf16.vlgmr.msra.gmra.mxu0 %v15412_v19  ;;  %v7808_v36 = vmul.f32 %v13567_v9, %v13563_v55  ;;  %v15430_v46 = vpack.c.bf16 %v7916_v58, %v7915_v51  ;;  %v13166_v55 = vld [vmem:[%s14007_s7 + $0x4b4] ss:$24 sps:$4 sm:$0xff]   ;;  %v13188_v9 = vld [vmem:[%s14007_s7 + $0x38] ss:$24 sps:$4 sm:$0xff]  }
0x1416   : > { %v13194_v51 = vld [vmem:[%s14007_s7 + $0x2d8] ss:$24 sps:$4 sm:$0xff]   ;;  %v13199_v58 = vld [vmem:[%s14007_s7 + $0x2ac] ss:$24 sps:$4 sm:$0xff]  }
0x1418   : > { %v13569_v59 = vpop.eup %13568 }
0x1419   : > { %v7810_v45 = vmul.f32 %v13569_v59, %v13565_v47  ;;  %v13164_v47 = vld [vmem:[%s14007_s7 + $0x4b0] ss:$24 sps:$4 sm:$0xff]   ;;  %v13193_v59 = vld [vmem:[%s14007_s7 + $0xc] ss:$24 sps:$4 sm:$0xff]  }
0x141b   : > { %v7811_v30 = vpack.c.bf16 %v7810_v45, %v7808_v36  ;;  %v13191_v36 = vld [vmem:[%s14007_s7 + $0x8] ss:$24 sps:$4 sm:$0xff]   ;;  %v13196_v45 = vld [vmem:[%s14007_s7 + $0x2dc] ss:$24 sps:$4 sm:$0xff]  }
0x141d   : > { %11656 = vmatmul.mubr.msk.bf16.vlgmr.msra.gmra.mxu1 %vm6880_vm2, %v7811_v30  ;;  %v13202_v30 = vld [vmem:[%s14007_s7 + $0x27c] ss:$24 sps:$4 sm:$0xff]  }
0x141e   : > { %9723 = vmatpush1.bf16.msra.mxu1 %v13122_v17  ;;  %9754 = vmatprep.mubr.bf16.mxu1 %v15430_v46  ;;  %v13197_v17 = vld [vmem:[%s14007_s7 + $0x2a8] ss:$24 sps:$4 sm:$0xff]  }
0x141f   : > { %9724 = vmatprep.subr.bf16.mxu1 %v13127_v37  ;;  %v13200_v37 = vld [vmem:[%s14007_s7 + $0x278] ss:$24 sps:$4 sm:$0xff]  }
0x1422   : > { %9725 = vmatpush1.bf16.msra.mxu1 %v13125_v1  ;;  %v13205_v1 = vld [vmem:[%s14007_s7 + $0x24c] ss:$24 sps:$4 sm:$0xff]  }
0x1423   : > { %9726 = vmatprep.subr.bf16.mxu1 %v13130_v21  ;;  %v13203_v21 = vld [vmem:[%s14007_s7 + $0x248] ss:$24 sps:$4 sm:$0xff]  }
0x1426   : > { %9727 = vmatpush1.bf16.msra.mxu1 %v13128_v2  ;;  %v13208_v2 = vld [vmem:[%s14007_s7 + $0x21c] ss:$24 sps:$4 sm:$0xff]  }
0x1427   : > { %9728 = vmatprep.subr.bf16.mxu1 %v13133_v22  ;;  %v13206_v22 = vld [vmem:[%s14007_s7 + $0x218] ss:$24 sps:$4 sm:$0xff]  }
0x142a   : > { %9729 = vmatpush1.bf16.msra.mxu1 %v13131_v13  ;;  %v13211_v13 = vld [vmem:[%s14007_s7 + $0x1ec] ss:$24 sps:$4 sm:$0xff]  }
0x142b   : > { %9730 = vmatprep.subr.bf16.mxu1 %v13136_v12  ;;  %v13209_v12 = vld [vmem:[%s14007_s7 + $0x1e8] ss:$24 sps:$4 sm:$0xff]  }
0x142e   : > { %9731 = vmatpush1.bf16.msra.mxu1 %v13134_v38  ;;  %v13214_v38 = vld [vmem:[%s14007_s7 + $0x1bc] ss:$24 sps:$4 sm:$0xff]  }
0x142f   : > { %9732 = vmatprep.subr.bf16.mxu1 %v13139_v53  ;;  %v13212_v53 = vld [vmem:[%s14007_s7 + $0x1b8] ss:$24 sps:$4 sm:$0xff]  }
0x1432   : > { %9733 = vmatpush1.bf16.msra.mxu1 %v13137_v23  ;;  %v13217_v23 = vld [vmem:[%s14007_s7 + $0x18c] ss:$24 sps:$4 sm:$0xff]  }
0x1433   : > { %9734 = vmatprep.subr.bf16.mxu1 %v13142_v27  ;;  %v13215_v27 = vld [vmem:[%s14007_s7 + $0x188] ss:$24 sps:$4 sm:$0xff]  }
0x1436   : > { %9735 = vmatpush1.bf16.msra.mxu1 %v13140_v28  ;;  %v13220_v28 = vld [vmem:[%s14007_s7 + $0x754] ss:$24 sps:$4 sm:$0xff]  }
0x1437   : > { %9736 = vmatprep.subr.bf16.mxu1 %v13145_v54  ;;  %v13223_v54 = vld [vmem:[%s14007_s7 + $0x75c] ss:$24 sps:$4 sm:$0xff]   ;;  %9765 = vmatprep.subr.bf16.mxu0 %v13220_v28 }
0x1438   : > { %v13304_v28 = vld [vmem:[%s14007_s7 + $0x7b4] ss:$24 sps:$4 sm:$0xff]  }
0x143a   : > { %9737 = vmatpush1.bf16.msra.mxu1 %v13143_v62  ;;  %v13218_v62 = vld [vmem:[%s14007_s7 + $0x750] ss:$24 sps:$4 sm:$0xff]  }
0x143b   : > { %9738 = vmatprep.subr.bf16.mxu1 %v13148_v18  ;;  %v13221_v18 = vld [vmem:[%s14007_s7 + $0x758] ss:$24 sps:$4 sm:$0xff]   ;;  %9766 = vmatpush1.bf16.msra.mxu0 %v13218_v62 }
0x143c   : > { %v13302_v62 = vld [vmem:[%s14007_s7 + $0x7b0] ss:$24 sps:$4 sm:$0xff]  }
0x143e   : > { %9739 = vmatpush2.bf16.msra.mxu1 %v13146_v40  ;;  %v13226_v40 = vld [vmem:[%s14007_s7 + $0x724] ss:$24 sps:$4 sm:$0xff]  }
0x143f   : > { %9740 = vmatprep.subr.bf16.mxu1 %v13151_v31  ;;  %v13229_v31 = vld [vmem:[%s14007_s7 + $0x72c] ss:$24 sps:$4 sm:$0xff]   ;;  %9767 = vmatprep.subr.bf16.mxu0 %v13226_v40  ;;  %v13308_v40 = vld [vmem:[%s14007_s7 + $0x780] ss:$24 sps:$4 sm:$0xff]  }
0x1442   : > { %9741 = vmatpush2.bf16.msra.mxu1 %v13149_v20  ;;  %v13224_v20 = vld [vmem:[%s14007_s7 + $0x720] ss:$24 sps:$4 sm:$0xff]  }
0x1443   : > { %9742 = vmatprep.subr.bf16.mxu1 %v13154_v41  ;;  %v13227_v41 = vld [vmem:[%s14007_s7 + $0x728] ss:$24 sps:$4 sm:$0xff]   ;;  %9768 = vmatpush1.bf16.msra.mxu0 %v13224_v20 }
0x1444   : > { %v13311_v20 = vld [vmem:[%s14007_s7 + $0x788] ss:$24 sps:$4 sm:$0xff]  }
0x1446   : > { %9743 = vmatpush2.bf16.msra.mxu1 %v13152_v43  ;;  %v13232_v43 = vld [vmem:[%s14007_s7 + $0x6f4] ss:$24 sps:$4 sm:$0xff]  }
0x1447   : > { %9744 = vmatprep.subr.bf16.mxu1 %v13157_v16  ;;  %v13235_v16 = vld [vmem:[%s14007_s7 + $0x6fc] ss:$24 sps:$4 sm:$0xff]   ;;  %9769 = vmatprep.subr.bf16.mxu0 %v13232_v43 }
0x1448   : > { %v13316_v43 = vld [vmem:[%s14007_s7 + $0x45c] ss:$24 sps:$4 sm:$0xff]  }
0x144a   : > { %9745 = vmatpush2.bf16.msra.mxu1 %v13155_v52  ;;  %v13230_v52 = vld [vmem:[%s14007_s7 + $0x6f0] ss:$24 sps:$4 sm:$0xff]  }
0x144b   : > { %9746 = vmatprep.subr.bf16.mxu1 %v13160_v34  ;;  %v13233_v34 = vld [vmem:[%s14007_s7 + $0x6f8] ss:$24 sps:$4 sm:$0xff]   ;;  %9770 = vmatpush1.bf16.msra.mxu0 %v13230_v52 }
0x144e   : > { %9747 = vmatpush2.bf16.msra.mxu1 %v13158_v29  ;;  %v13238_v29 = vld [vmem:[%s14007_s7 + $0x6c4] ss:$24 sps:$4 sm:$0xff]  }
0x144f   : > { %9748 = vmatprep.subr.bf16.mxu1 %v13163_v50  ;;  %v13241_v50 = vld [vmem:[%s14007_s7 + $0x6cc] ss:$24 sps:$4 sm:$0xff]   ;;  %9771 = vmatprep.subr.bf16.mxu0 %v13238_v29 }
0x1452   : > { %9749 = vmatpush2.bf16.msra.mxu1 %v13161_v48  ;;  %v13236_v48 = vld [vmem:[%s14007_s7 + $0x6c0] ss:$24 sps:$4 sm:$0xff]  }
0x1453   : > { %9750 = vmatprep.subr.bf16.mxu1 %v13166_v55  ;;  %v13239_v55 = vld [vmem:[%s14007_s7 + $0x6c8] ss:$24 sps:$4 sm:$0xff]   ;;  %9772 = vmatpush1.bf16.msra.mxu0 %v13236_v48 }
0x1454   : > { %9773 = vmatprep.subr.bf16.mxu0 %v13244_v7 }
0x1456   : > { %9751 = vmatpush2.bf16.msra.mxu1 %v13164_v47  ;;  %v13247_v47 = vld [vmem:[%s14007_s7 + $0x69c] ss:$24 sps:$4 sm:$0xff]  }
0x1457   : > { %9752 = vmatprep.subr.bf16.mxu1 %v13169_v26  ;;  %v13242_v26 = vld [vmem:[%s14007_s7 + $0x690] ss:$24 sps:$4 sm:$0xff]  }
0x1458   : > { %9774 = vmatpush1.bf16.msra.mxu0 %v13242_v26 }
0x1459   : > { %9775 = vmatprep.subr.bf16.mxu0 %v13250_v33 }
0x145a   : > { %9753 = vmatpush2.bf16.msra.mxu1 %v13167_v15  ;;  %v13253_v15 = vld [vmem:[%s14007_s7 + $0x66c] ss:$24 sps:$4 sm:$0xff]  }
0x145b   : > { %9808 = vmatprep.subr.bf16.mxu1 %v13172_v44  ;;  %v13248_v44 = vld [vmem:[%s14007_s7 + $0x660] ss:$24 sps:$4 sm:$0xff]  }
0x145c   : > { %9776 = vmatpush1.bf16.msra.mxu0 %v13248_v44 }
0x145d   : > { %9755 = vmatmul.mubr.bf16.vlgmr.msra.gmra.mxu1 %v15471_v35  ;;  %9777 = vmatprep.subr.bf16.mxu0 %v13256_v63 }
0x145e   : > { %9809 = vmatpush1.bf16.msra.mxu1 %v13170_v3  ;;  %9840 = vmatprep.mubr.bf16.mxu1 %v15414_v42  ;;  %v13259_v3 = vld [vmem:[%s14007_s7 + $0x63c] ss:$24 sps:$4 sm:$0xff]  }
0x145f   : > { %9810 = vmatprep.subr.bf16.mxu1 %v13175_v39  ;;  %v13254_v39 = vld [vmem:[%s14007_s7 + $0x630] ss:$24 sps:$4 sm:$0xff]  }
0x1460   : > { %9778 = vmatpush1.bf16.msra.mxu0 %v13254_v39  ;;  %v13314_v39 = vld [vmem:[%s14007_s7 + $0x458] ss:$24 sps:$4 sm:$0xff]  }
0x1462   : > { %9811 = vmatpush1.bf16.msra.mxu1 %v13173_v60  ;;  %v13257_v60 = vld [vmem:[%s14007_s7 + $0x638] ss:$24 sps:$4 sm:$0xff]  }
0x1463   : > { %9812 = vmatprep.subr.bf16.mxu1 %v13178_v56  ;;  %v13262_v56 = vld [vmem:[%s14007_s7 + $0x604] ss:$24 sps:$4 sm:$0xff]  }
0x1464   : > { %9779 = vmatprep.subr.bf16.mxu0 %v13262_v56 }
0x1466   : > { %9813 = vmatpush1.bf16.msra.mxu1 %v13176_v57  ;;  %v13265_v57 = vld [vmem:[%s14007_s7 + $0x60c] ss:$24 sps:$4 sm:$0xff]  }
0x1467   : > { %9814 = vmatprep.subr.bf16.mxu1 %v13181_v24  ;;  %v13260_v24 = vld [vmem:[%s14007_s7 + $0x600] ss:$24 sps:$4 sm:$0xff]  }
0x1468   : > { %9780 = vmatpush1.bf16.msra.mxu0 %v13260_v24  ;;  %v13328_v24 = vld [vmem:[%s14007_s7 + $0x3fc] ss:$24 sps:$4 sm:$0xff]  }
0x146a   : > { %9815 = vmatpush1.bf16.msra.mxu1 %v13179_v5  ;;  %v13263_v5 = vld [vmem:[%s14007_s7 + $0x608] ss:$24 sps:$4 sm:$0xff]  }
0x146b   : > { %9816 = vmatprep.subr.bf16.mxu1 %v13184_v10  ;;  %v13268_v10 = vld [vmem:[%s14007_s7 + $0x8d4] ss:$24 sps:$4 sm:$0xff]  }
0x146c   : > { %9781 = vmatprep.subr.bf16.mxu0 %v13268_v10  ;;  %v13326_v10 = vld [vmem:[%s14007_s7 + $0x3f8] ss:$24 sps:$4 sm:$0xff]  }
0x146e   : > { %9817 = vmatpush1.bf16.msra.mxu1 %v13182_v11  ;;  %v13271_v11 = vld [vmem:[%s14007_s7 + $0x8dc] ss:$24 sps:$4 sm:$0xff]  }
0x146f   : > { %9818 = vmatprep.subr.bf16.mxu1 %v13187_v0  ;;  %v13266_v0 = vld [vmem:[%s14007_s7 + $0x8d0] ss:$24 sps:$4 sm:$0xff]  }
0x1470   : > { %9782 = vmatpush2.bf16.msra.mxu0 %v13266_v0  ;;  %v13334_v0 = vld [vmem:[%s14007_s7 + $0x3cc] ss:$24 sps:$4 sm:$0xff]  }
0x1472   : > { %9819 = vmatpush1.bf16.msra.mxu1 %v13185_v4  ;;  %v13269_v4 = vld [vmem:[%s14007_s7 + $0x8d8] ss:$24 sps:$4 sm:$0xff]  }
0x1473   : > { %9820 = vmatprep.subr.bf16.mxu1 %v13190_v8  ;;  %v13274_v8 = vld [vmem:[%s14007_s7 + $0x8a4] ss:$24 sps:$4 sm:$0xff]  }
0x1474   : > { %9783 = vmatprep.subr.bf16.mxu0 %v13274_v8  ;;  %v13335_v8 = vld [vmem:[%s14007_s7 + $0x3d0] ss:$24 sps:$4 sm:$0xff]  }
0x1476   : > { %9821 = vmatpush1.bf16.msra.mxu1 %v13188_v9  ;;  %v13277_v9 = vld [vmem:[%s14007_s7 + $0x8ac] ss:$24 sps:$4 sm:$0xff]  }
0x1477   : > { %9822 = vmatprep.subr.bf16.mxu1 %v13193_v59  ;;  %v13272_v59 = vld [vmem:[%s14007_s7 + $0x8a0] ss:$24 sps:$4 sm:$0xff]  }
0x1478   : > { %9784 = vmatpush2.bf16.msra.mxu0 %v13272_v59  ;;  %v13343_v59 = vld [vmem:[%s14007_s7 + $0x3a4] ss:$24 sps:$4 sm:$0xff]  }
0x147a   : > { %9823 = vmatpush1.bf16.msra.mxu1 %v13191_v36  ;;  %v13275_v36 = vld [vmem:[%s14007_s7 + $0x8a8] ss:$24 sps:$4 sm:$0xff]  }
0x147b   : > { %9824 = vmatprep.subr.bf16.mxu1 %v13196_v45  ;;  %v13280_v45 = vld [vmem:[%s14007_s7 + $0x874] ss:$24 sps:$4 sm:$0xff]  }
0x147c   : > { %9785 = vmatprep.subr.bf16.mxu0 %v13280_v45  ;;  %v13341_v45 = vld [vmem:[%s14007_s7 + $0x3a0] ss:$24 sps:$4 sm:$0xff]  }
0x147e   : > { %9825 = vmatpush2.bf16.msra.mxu1 %v13194_v51  ;;  %v13283_v51 = vld [vmem:[%s14007_s7 + $0x87c] ss:$24 sps:$4 sm:$0xff]  }
0x147f   : > { %9826 = vmatprep.subr.bf16.mxu1 %v13199_v58  ;;  %v13278_v58 = vld [vmem:[%s14007_s7 + $0x870] ss:$24 sps:$4 sm:$0xff]  }
0x1480   : > { %9786 = vmatpush2.bf16.msra.mxu0 %v13278_v58  ;;  %v13349_v58 = vld [vmem:[%s14007_s7 + $0x374] ss:$24 sps:$4 sm:$0xff]  }
0x1482   : > { %9827 = vmatpush2.bf16.msra.mxu1 %v13197_v17  ;;  %v13281_v17 = vld [vmem:[%s14007_s7 + $0x878] ss:$24 sps:$4 sm:$0xff]  }
0x1483   : > { %9828 = vmatprep.subr.bf16.mxu1 %v13202_v30  ;;  %v13286_v30 = vld [vmem:[%s14007_s7 + $0x844] ss:$24 sps:$4 sm:$0xff]  }
0x1484   : > { %9787 = vmatprep.subr.bf16.mxu0 %v13286_v30  ;;  %v13347_v30 = vld [vmem:[%s14007_s7 + $0x370] ss:$24 sps:$4 sm:$0xff]  }
0x1486   : > { %9829 = vmatpush2.bf16.msra.mxu1 %v13200_v37  ;;  %v13289_v37 = vld [vmem:[%s14007_s7 + $0x84c] ss:$24 sps:$4 sm:$0xff]  }
0x1487   : > { %9830 = vmatprep.subr.bf16.mxu1 %v13205_v1  ;;  %v13284_v1 = vld [vmem:[%s14007_s7 + $0x840] ss:$24 sps:$4 sm:$0xff]  }
0x1488   : > { %9788 = vmatpush2.bf16.msra.mxu0 %v13284_v1  ;;  %v13355_v1 = vld [vmem:[%s14007_s7 + $0x344] ss:$24 sps:$4 sm:$0xff]  }
0x148a   : > { %9831 = vmatpush2.bf16.msra.mxu1 %v13203_v21  ;;  %v13287_v21 = vld [vmem:[%s14007_s7 + $0x848] ss:$24 sps:$4 sm:$0xff]  }
0x148b   : > { %9832 = vmatprep.subr.bf16.mxu1 %v13208_v2  ;;  %v13292_v2 = vld [vmem:[%s14007_s7 + $0x814] ss:$24 sps:$4 sm:$0xff]  }
0x148c   : > { %9789 = vmatprep.subr.bf16.mxu0 %v13292_v2  ;;  %v13353_v2 = vld [vmem:[%s14007_s7 + $0x340] ss:$24 sps:$4 sm:$0xff]  }
0x148e   : > { %9833 = vmatpush2.bf16.msra.mxu1 %v13206_v22  ;;  %v13295_v22 = vld [vmem:[%s14007_s7 + $0x81c] ss:$24 sps:$4 sm:$0xff]  }
0x148f   : > { %9834 = vmatprep.subr.bf16.mxu1 %v13211_v13  ;;  %v13290_v13 = vld [vmem:[%s14007_s7 + $0x810] ss:$24 sps:$4 sm:$0xff]  }
0x1490   : > { %9790 = vmatpush2.bf16.msra.mxu0 %v13290_v13  ;;  %v13361_v13 = vld [vmem:[%s14007_s7 + $0x314] ss:$24 sps:$4 sm:$0xff]  }
0x1492   : > { %9835 = vmatpush2.bf16.msra.mxu1 %v13209_v12  ;;  %v13293_v12 = vld [vmem:[%s14007_s7 + $0x818] ss:$24 sps:$4 sm:$0xff]  }
0x1493   : > { %9836 = vmatprep.subr.bf16.mxu1 %v13214_v38  ;;  %v13298_v38 = vld [vmem:[%s14007_s7 + $0x7e4] ss:$24 sps:$4 sm:$0xff]  }
0x1494   : > { %9791 = vmatprep.subr.bf16.mxu0 %v13298_v38  ;;  %v13359_v38 = vld [vmem:[%s14007_s7 + $0x310] ss:$24 sps:$4 sm:$0xff]  }
0x1496   : > { %9837 = vmatpush2.bf16.msra.mxu1 %v13212_v53  ;;  %v13301_v53 = vld [vmem:[%s14007_s7 + $0x7ec] ss:$24 sps:$4 sm:$0xff]  }
0x1497   : > { %9838 = vmatprep.subr.bf16.mxu1 %v13217_v23  ;;  %v13296_v23 = vld [vmem:[%s14007_s7 + $0x7e0] ss:$24 sps:$4 sm:$0xff]  }
0x1498   : > { %9792 = vmatpush2.bf16.msra.mxu0 %v13296_v23  ;;  %v13367_v23 = vld [vmem:[%s14007_s7 + $0x5e4] ss:$24 sps:$4 sm:$0xff]  }
0x1499   : > { %9793 = vmatprep.subr.bf16.mxu0 %v13304_v28  ;;  %v13365_v28 = vld [vmem:[%s14007_s7 + $0x5e0] ss:$24 sps:$4 sm:$0xff]  }
0x149a   : > { %9839 = vmatpush2.bf16.msra.mxu1 %v13215_v27  ;;  %v13299_v27 = vld [vmem:[%s14007_s7 + $0x7e8] ss:$24 sps:$4 sm:$0xff]  }
0x149b   : > { %9894 = vmatprep.subr.bf16.mxu1 %v13223_v54  ;;  %v13307_v54 = vld [vmem:[%s14007_s7 + $0x7bc] ss:$24 sps:$4 sm:$0xff]  }
0x149c   : > { %9794 = vmatpush2.bf16.msra.mxu0 %v13302_v62  ;;  %v13373_v62 = vld [vmem:[%s14007_s7 + $0x5b4] ss:$24 sps:$4 sm:$0xff]  }
0x149d   : > { %9841 = vmatmul.mubr.bf16.vlgmr.msra.gmra.mxu1 %v15412_v19 }
0x149e   : > { %9895 = vmatpush1.bf16.msra.mxu1 %v13221_v18  ;;  %v13305_v18 = vld [vmem:[%s14007_s7 + $0x7b8] ss:$24 sps:$4 sm:$0xff]  }
0x149f   : > { %9896 = vmatprep.subr.bf16.mxu1 %v13229_v31  ;;  %v13310_v31 = vld [vmem:[%s14007_s7 + $0x784] ss:$24 sps:$4 sm:$0xff]  }
0x14a0   : > { %9795 = vmatprep.subr.bf16.mxu0 %v13310_v31  ;;  %v13376_v31 = vld [vmem:[%s14007_s7 + $0x57c] ss:$24 sps:$4 sm:$0xff]  }
0x14a1   : > { %9796 = vmatpush2.bf16.msra.mxu0 %v13308_v40  ;;  %v13371_v40 = vld [vmem:[%s14007_s7 + $0x5b0] ss:$24 sps:$4 sm:$0xff]  }
0x14a2   : > { %9897 = vmatpush1.bf16.msra.mxu1 %v13227_v41  ;;  %v13313_v41 = vld [vmem:[%s14007_s7 + $0x78c] ss:$24 sps:$4 sm:$0xff]   ;;  %9851 = vmatprep.subr.bf16.mxu0 %v13316_v43  ;;  %v13377_v43 = vld [vmem:[%s14007_s7 + $0x580] ss:$24 sps:$4 sm:$0xff]  }
0x14a3   : > { %9898 = vmatprep.subr.bf16.mxu1 %v13235_v16  ;;  %v13319_v16 = vld [vmem:[%s14007_s7 + $0x464] ss:$24 sps:$4 sm:$0xff]  }
0x14a6   : > { %9899 = vmatpush1.bf16.msra.mxu1 %v13233_v34 }
0x14a7   : > { %9900 = vmatprep.subr.bf16.mxu1 %v13241_v50 }
0x14aa   : > { %9901 = vmatpush1.bf16.msra.mxu1 %v13239_v55  ;;  %v11770_v55 = vpop.permute.xlu0 %11769 }
0x14ab   : > { %9902 = vmatprep.subr.bf16.mxu1 %v13247_v47  ;;  %v11772_v7 = vunpack.i.h.bf16 %v11770_v55  ;;  %v11771_v47 = vunpack.i.l.bf16 %v11770_v55  ;;  %v13386_v55 = vld [vmem:[%s14007_s7 + $0x518] ss:$24 sps:$4 sm:$0xff]  }
0x14ad   : > { %v7917_v44 = vsel %vm7096_vm4, %v11761_v14, %v11771_v47  ;;  %v13320_v14 = vld [vmem:[%s14007_s7 + $0x428] ss:$24 sps:$4 sm:$0xff]  }
0x14ae   : > { %9903 = vmatpush1.bf16.msra.mxu1 %v13245_v49 }
0x14af   : > { %9904 = vmatprep.subr.bf16.mxu1 %v13253_v15  ;;  %v7918_v15 = vsel %vm7096_vm4, %v11762_v25, %v11772_v7  ;;  %v13325_v25 = vld [vmem:[%s14007_s7 + $0x434] ss:$24 sps:$4 sm:$0xff]  }
0x14b0   : > { %v15585_v56 = vpack.c.bf16 %v7918_v15, %v7917_v44  ;;  %v13400_v15 = vld [vmem:[%s14007_s7 + $0x4bc] ss:$24 sps:$4 sm:$0xff]  }
0x14b1   : > { %v13403_v44 = vld [vmem:[%s14007_s7 + $0x4c4] ss:$24 sps:$4 sm:$0xff]  }
0x14b2   : > { %9905 = vmatpush1.bf16.msra.mxu1 %v13251_v61 }
0x14b3   : > { %9906 = vmatprep.subr.bf16.mxu1 %v13259_v3 }
0x14b6   : > { %9907 = vmatpush1.bf16.msra.mxu1 %v13257_v60  ;;  %v13317_v60 = vld [vmem:[%s14007_s7 + $0x460] ss:$24 sps:$4 sm:$0xff]  }
0x14b7   : > { %9908 = vmatprep.subr.bf16.mxu1 %v13265_v57  ;;  %v13323_v57 = vld [vmem:[%s14007_s7 + $0x430] ss:$24 sps:$4 sm:$0xff]  }
0x14ba   : > { %9909 = vmatpush1.bf16.msra.mxu1 %v13263_v5  ;;  %v13331_v5 = vld [vmem:[%s14007_s7 + $0x404] ss:$24 sps:$4 sm:$0xff]  }
0x14bb   : > { %9910 = vmatprep.subr.bf16.mxu1 %v13271_v11  ;;  %v13329_v11 = vld [vmem:[%s14007_s7 + $0x400] ss:$24 sps:$4 sm:$0xff]  }
0x14be   : > { %9911 = vmatpush2.bf16.msra.mxu1 %v13269_v4  ;;  %v13337_v4 = vld [vmem:[%s14007_s7 + $0x3d4] ss:$24 sps:$4 sm:$0xff]  }
0x14bf   : > { %9912 = vmatprep.subr.bf16.mxu1 %v13277_v9  ;;  %v13340_v9 = vld [vmem:[%s14007_s7 + $0x39c] ss:$24 sps:$4 sm:$0xff]  }
0x14c2   : > { %9913 = vmatpush2.bf16.msra.mxu1 %v13275_v36  ;;  %v13338_v36 = vld [vmem:[%s14007_s7 + $0x398] ss:$24 sps:$4 sm:$0xff]  }
0x14c3   : > { %9914 = vmatprep.subr.bf16.mxu1 %v13283_v51  ;;  %v13346_v51 = vld [vmem:[%s14007_s7 + $0x36c] ss:$24 sps:$4 sm:$0xff]  }
0x14c6   : > { %9915 = vmatpush2.bf16.msra.mxu1 %v13281_v17  ;;  %v13344_v17 = vld [vmem:[%s14007_s7 + $0x368] ss:$24 sps:$4 sm:$0xff]  }
0x14c7   : > { %9916 = vmatprep.subr.bf16.mxu1 %v13289_v37  ;;  %v13352_v37 = vld [vmem:[%s14007_s7 + $0x33c] ss:$24 sps:$4 sm:$0xff]  }
0x14ca   : > { %9917 = vmatpush2.bf16.msra.mxu1 %v13287_v21  ;;  %v13350_v21 = vld [vmem:[%s14007_s7 + $0x338] ss:$24 sps:$4 sm:$0xff]  }
0x14cb   : > { %9918 = vmatprep.subr.bf16.mxu1 %v13295_v22  ;;  %v13358_v22 = vld [vmem:[%s14007_s7 + $0x30c] ss:$24 sps:$4 sm:$0xff]  }
0x14ce   : > { %9919 = vmatpush2.bf16.msra.mxu1 %v13293_v12  ;;  %v13356_v12 = vld [vmem:[%s14007_s7 + $0x308] ss:$24 sps:$4 sm:$0xff]  }
0x14cf   : > { %9920 = vmatprep.subr.bf16.mxu1 %v13301_v53  ;;  %v13364_v53 = vld [vmem:[%s14007_s7 + $0x5dc] ss:$24 sps:$4 sm:$0xff]  }
0x14d2   : > { %9921 = vmatpush2.bf16.msra.mxu1 %v13299_v27  ;;  %v13362_v27 = vld [vmem:[%s14007_s7 + $0x5d8] ss:$24 sps:$4 sm:$0xff]  }
0x14d3   : > { %9922 = vmatprep.subr.bf16.mxu1 %v13307_v54  ;;  %v13370_v54 = vld [vmem:[%s14007_s7 + $0x5ac] ss:$24 sps:$4 sm:$0xff]  }
0x14d6   : > { %9923 = vmatpush2.bf16.msra.mxu1 %v13305_v18  ;;  %v13368_v18 = vld [vmem:[%s14007_s7 + $0x5a8] ss:$24 sps:$4 sm:$0xff]  }
0x14d7   : > { %9924 = vmatprep.subr.bf16.mxu1 %v13313_v41  ;;  %v13374_v41 = vld [vmem:[%s14007_s7 + $0x578] ss:$24 sps:$4 sm:$0xff]  }
0x14da   : > { %9925 = vmatpush2.bf16.msra.mxu1 %v13311_v20  ;;  %v13379_v20 = vld [vmem:[%s14007_s7 + $0x584] ss:$24 sps:$4 sm:$0xff]  }
0x14db   : > { %9980 = vmatprep.subr.bf16.mxu1 %v13319_v16  ;;  %v13382_v16 = vld [vmem:[%s14007_s7 + $0x54c] ss:$24 sps:$4 sm:$0xff]  }
0x14dd   : > { %v7852_v52 = vpop.f32.mrf.mxu1 }
0x14df   : > { %v11657_v34 = vpop.f32.mrf.mxu1 }
0x14e0   : > { %v13380_v34 = vld [vmem:[%s14007_s7 + $0x548] ss:$24 sps:$4 sm:$0xff]  }
0x14e1   : > { %v7855_v29 = vpop.f32.mrf.mxu1 }
0x14e2   : > { %v11773_v50 = vpack.i.bf16 %v7855_v29, %v7852_v52  ;;  %v13385_v52 = vld [vmem:[%s14007_s7 + $0x554] ss:$24 sps:$4 sm:$0xff]   ;;  %v13383_v29 = vld [vmem:[%s14007_s7 + $0x550] ss:$24 sps:$4 sm:$0xff]  }
0x14e3   : > { %v11658_v48 = vpop.f32.mrf.mxu1 }
0x14e4   : > { %11774 = vrot.lane.b32.xlu1 %v11773_v50, %s13792_s12  ;;  %v13388_v50 = vld [vmem:[%s14007_s7 + $0x51c] ss:$24 sps:$4 sm:$0xff]  }
0x14e5   : > { %v13391_v48 = vld [vmem:[%s14007_s7 + $0x524] ss:$24 sps:$4 sm:$0xff]  }
0x1556   : > { %v11775_v26 = vpop.permute.xlu1 %11774 }
0x1557   : > { %v11777_v49 = vunpack.i.h.bf16 %v11775_v26  ;;  %v11776_v33 = vunpack.i.l.bf16 %v11775_v26  ;;  %v13397_v26 = vld [vmem:[%s14007_s7 + $0x4f4] ss:$24 sps:$4 sm:$0xff]  }
0x1559   : > { %v7919_v61 = vsel %vm6957_vm3, %v11771_v47, %v11776_v33  ;;  %v7920_v63 = vsel %vm6957_vm3, %v11772_v7, %v11777_v49  ;;  %v13389_v7 = vld [vmem:[%s14007_s7 + $0x520] ss:$24 sps:$4 sm:$0xff]   ;;  %v13394_v47 = vld [vmem:[%s14007_s7 + $0x4ec] ss:$24 sps:$4 sm:$0xff]   ;;  %v13395_v33 = vld [vmem:[%s14007_s7 + $0x4f0] ss:$24 sps:$4 sm:$0xff]  }
0x155a   : > { %v15581_v3 = vpack.c.bf16 %v7920_v63, %v7919_v61  ;;  %v13392_v49 = vld [vmem:[%s14007_s7 + $0x4e8] ss:$24 sps:$4 sm:$0xff]   ;;  %v13398_v61 = vld [vmem:[%s14007_s7 + $0x4b8] ss:$24 sps:$4 sm:$0xff]  }
0x155b   : > { %v13401_v63 = vld [vmem:[%s14007_s7 + $0x4c0] ss:$24 sps:$4 sm:$0xff]  }
0x155c   : > { %9797 = vmatprep.mubr.bf16.mxu0 %v15581_v3  ;;  %9926 = vmatprep.mubr.bf16.mxu1 %v15581_v3 }
0x155d   : > { %9798 = vmatmul.mubr.bf16.vlgmr.msra.gmra.mxu0 %v15585_v56  ;;  %9927 = vmatmul.mubr.bf16.vlgmr.msra.gmra.mxu1 %v15585_v56 }
0x155e   : > { %9852 = vmatpush1.bf16.msra.mxu0 %v13314_v39  ;;  %9981 = vmatpush1.bf16.msra.mxu1 %v13317_v60  ;;  %v13406_v39 = vld [vmem:[%s14007_s7 + $0x48c] ss:$24 sps:$4 sm:$0xff]  }
0x155f   : > { %9883 = vmatprep.mubr.bf16.mxu0 %v15430_v46  ;;  %10012 = vmatprep.mubr.bf16.mxu1 %v15430_v46  ;;  %v13332_v46 = vld [vmem:[%s14007_s7 + $0x3c8] ss:$24 sps:$4 sm:$0xff]   ;;  %v13409_v60 = vld [vmem:[%s14007_s7 + $0x494] ss:$24 sps:$4 sm:$0xff]  }
0x1560   : > { %9853 = vmatprep.subr.bf16.mxu0 %v13322_v32  ;;  %9982 = vmatprep.subr.bf16.mxu1 %v13325_v25  ;;  %v13404_v32 = vld [vmem:[%s14007_s7 + $0x488] ss:$24 sps:$4 sm:$0xff]  }
0x1561   : > { %v13407_v25 = vld [vmem:[%s14007_s7 + $0x490] ss:$24 sps:$4 sm:$0xff]  }
0x1562   : > { %9854 = vmatpush1.bf16.msra.mxu0 %v13320_v14  ;;  %9983 = vmatpush1.bf16.msra.mxu1 %v13323_v57  ;;  %v13412_v14 = vld [vmem:[%s14007_s7 + $0x164] ss:$24 sps:$4 sm:$0xff]   ;;  %v13410_v57 = vld [vmem:[%s14007_s7 + $0x160] ss:$24 sps:$4 sm:$0xff]  }
0x1563   : > { %9855 = vmatprep.subr.bf16.mxu0 %v13328_v24  ;;  %9984 = vmatprep.subr.bf16.mxu1 %v13331_v5  ;;  %v13415_v24 = vld [vmem:[%s14007_s7 + $0x134] ss:$24 sps:$4 sm:$0xff]   ;;  %v13413_v5 = vld [vmem:[%s14007_s7 + $0x130] ss:$24 sps:$4 sm:$0xff]  }
0x1566   : > { %9856 = vmatpush1.bf16.msra.mxu0 %v13326_v10  ;;  %9985 = vmatpush1.bf16.msra.mxu1 %v13329_v11  ;;  %v13418_v10 = vld [vmem:[%s14007_s7 + $0x104] ss:$24 sps:$4 sm:$0xff]   ;;  %v13416_v11 = vld [vmem:[%s14007_s7 + $0x100] ss:$24 sps:$4 sm:$0xff]  }
0x1567   : > { %9857 = vmatprep.subr.bf16.mxu0 %v13334_v0  ;;  %9986 = vmatprep.subr.bf16.mxu1 %v13337_v4  ;;  %v13421_v0 = vld [vmem:[%s14007_s7 + $0xd4] ss:$24 sps:$4 sm:$0xff]   ;;  %v13419_v4 = vld [vmem:[%s14007_s7 + $0xd0] ss:$24 sps:$4 sm:$0xff]  }
0x156a   : > { %9858 = vmatpush1.bf16.msra.mxu0 %v13332_v46  ;;  %9987 = vmatpush1.bf16.msra.mxu1 %v13335_v8  ;;  %v13422_v46 = vld [vmem:[%s14007_s7 + $0xa0] ss:$24 sps:$4 sm:$0xff]   ;;  %v13425_v8 = vld [vmem:[%s14007_s7 + $0x70] ss:$24 sps:$4 sm:$0xff]  }
0x156b   : > { %9859 = vmatprep.subr.bf16.mxu0 %v13340_v9  ;;  %9988 = vmatprep.subr.bf16.mxu1 %v13343_v59  ;;  %v13430_v9 = vld [vmem:[%s14007_s7 + $0x44] ss:$24 sps:$4 sm:$0xff]   ;;  %v13428_v59 = vld [vmem:[%s14007_s7 + $0x40] ss:$24 sps:$4 sm:$0xff]  }
0x156e   : > { %9860 = vmatpush1.bf16.msra.mxu0 %v13338_v36  ;;  %9989 = vmatpush1.bf16.msra.mxu1 %v13341_v45  ;;  %v13433_v36 = vld [vmem:[%s14007_s7 + $0x14] ss:$24 sps:$4 sm:$0xff]   ;;  %v13431_v45 = vld [vmem:[%s14007_s7 + $0x10] ss:$24 sps:$4 sm:$0xff]  }
0x156f   : > { %9861 = vmatprep.subr.bf16.mxu0 %v13346_v51  ;;  %9990 = vmatprep.subr.bf16.mxu1 %v13349_v58  ;;  %v13436_v51 = vld [vmem:[%s14007_s7 + $0x2e4] ss:$24 sps:$4 sm:$0xff]   ;;  %v13434_v58 = vld [vmem:[%s14007_s7 + $0x2e0] ss:$24 sps:$4 sm:$0xff]  }
0x1572   : > { %9862 = vmatpush1.bf16.msra.mxu0 %v13344_v17  ;;  %9991 = vmatpush1.bf16.msra.mxu1 %v13347_v30  ;;  %v13439_v17 = vld [vmem:[%s14007_s7 + $0x2b4] ss:$24 sps:$4 sm:$0xff]   ;;  %v13437_v30 = vld [vmem:[%s14007_s7 + $0x2b0] ss:$24 sps:$4 sm:$0xff]  }
0x1573   : > { %9863 = vmatprep.subr.bf16.mxu0 %v13352_v37  ;;  %9992 = vmatprep.subr.bf16.mxu1 %v13355_v1  ;;  %v13442_v37 = vld [vmem:[%s14007_s7 + $0x284] ss:$24 sps:$4 sm:$0xff]   ;;  %v13440_v1 = vld [vmem:[%s14007_s7 + $0x280] ss:$24 sps:$4 sm:$0xff]  }
0x1576   : > { %9864 = vmatpush1.bf16.msra.mxu0 %v13350_v21  ;;  %9993 = vmatpush1.bf16.msra.mxu1 %v13353_v2  ;;  %v13445_v21 = vld [vmem:[%s14007_s7 + $0x254] ss:$24 sps:$4 sm:$0xff]   ;;  %v13443_v2 = vld [vmem:[%s14007_s7 + $0x250] ss:$24 sps:$4 sm:$0xff]  }
0x1577   : > { %9865 = vmatprep.subr.bf16.mxu0 %v13358_v22  ;;  %9994 = vmatprep.subr.bf16.mxu1 %v13361_v13  ;;  %v13448_v22 = vld [vmem:[%s14007_s7 + $0x224] ss:$24 sps:$4 sm:$0xff]   ;;  %v13446_v13 = vld [vmem:[%s14007_s7 + $0x220] ss:$24 sps:$4 sm:$0xff]  }
0x157a   : > { %9866 = vmatpush1.bf16.msra.mxu0 %v13356_v12  ;;  %9995 = vmatpush1.bf16.msra.mxu1 %v13359_v38  ;;  %v13451_v12 = vld [vmem:[%s14007_s7 + $0x1f4] ss:$24 sps:$4 sm:$0xff]   ;;  %v13449_v38 = vld [vmem:[%s14007_s7 + $0x1f0] ss:$24 sps:$4 sm:$0xff]  }
0x157b   : > { %9867 = vmatprep.subr.bf16.mxu0 %v13364_v53  ;;  %9996 = vmatprep.subr.bf16.mxu1 %v13367_v23  ;;  %v13454_v53 = vld [vmem:[%s14007_s7 + $0x1c4] ss:$24 sps:$4 sm:$0xff]   ;;  %v13452_v23 = vld [vmem:[%s14007_s7 + $0x1c0] ss:$24 sps:$4 sm:$0xff]  }
0x157e   : > { %9868 = vmatpush2.bf16.msra.mxu0 %v13362_v27  ;;  %9997 = vmatpush2.bf16.msra.mxu1 %v13365_v28  ;;  %v13457_v27 = vld [vmem:[%s14007_s7 + $0x194] ss:$24 sps:$4 sm:$0xff]   ;;  %v13455_v28 = vld [vmem:[%s14007_s7 + $0x190] ss:$24 sps:$4 sm:$0xff]  }
0x157f   : > { %9869 = vmatprep.subr.bf16.mxu0 %v13370_v54  ;;  %9998 = vmatprep.subr.bf16.mxu1 %v13373_v62  ;;  %v13460_v54 = vld [vmem:[%s14007_s7 + $0x764] ss:$24 sps:$4 sm:$0xff]   ;;  %v13458_v62 = vld [vmem:[%s14007_s7 + $0x760] ss:$24 sps:$4 sm:$0xff]  }
0x1582   : > { %9870 = vmatpush2.bf16.msra.mxu0 %v13368_v18  ;;  %9999 = vmatpush2.bf16.msra.mxu1 %v13371_v40  ;;  %v13463_v18 = vld [vmem:[%s14007_s7 + $0x734] ss:$24 sps:$4 sm:$0xff]   ;;  %v13461_v40 = vld [vmem:[%s14007_s7 + $0x730] ss:$24 sps:$4 sm:$0xff]  }
0x1583   : > { %9871 = vmatprep.subr.bf16.mxu0 %v13376_v31  ;;  %10000 = vmatprep.subr.bf16.mxu1 %v13379_v20  ;;  %v13466_v31 = vld [vmem:[%s14007_s7 + $0x704] ss:$24 sps:$4 sm:$0xff]   ;;  %v13464_v20 = vld [vmem:[%s14007_s7 + $0x700] ss:$24 sps:$4 sm:$0xff]  }
0x1586   : > { %9872 = vmatpush2.bf16.msra.mxu0 %v13374_v41  ;;  %10001 = vmatpush2.bf16.msra.mxu1 %v13377_v43  ;;  %v13469_v41 = vld [vmem:[%s14007_s7 + $0x6d4] ss:$24 sps:$4 sm:$0xff]   ;;  %v13467_v43 = vld [vmem:[%s14007_s7 + $0x6d0] ss:$24 sps:$4 sm:$0xff]  }
0x1587   : > { %9873 = vmatprep.subr.bf16.mxu0 %v13382_v16  ;;  %10002 = vmatprep.subr.bf16.mxu1 %v13385_v52  ;;  %v13470_v16 = vld [vmem:[%s14007_s7 + $0x6a0] ss:$24 sps:$4 sm:$0xff]   ;;  %v13473_v52 = vld [vmem:[%s14007_s7 + $0x670] ss:$24 sps:$4 sm:$0xff]  }
0x158a   : > { %9874 = vmatpush2.bf16.msra.mxu0 %v13380_v34  ;;  %10003 = vmatpush2.bf16.msra.mxu1 %v13383_v29  ;;  %v13478_v34 = vld [vmem:[%s14007_s7 + $0x644] ss:$24 sps:$4 sm:$0xff]   ;;  %v13476_v29 = vld [vmem:[%s14007_s7 + $0x640] ss:$24 sps:$4 sm:$0xff]  }
0x158b   : > { %9875 = vmatprep.subr.bf16.mxu0 %v13388_v50  ;;  %10004 = vmatprep.subr.bf16.mxu1 %v13391_v48  ;;  %v13481_v50 = vld [vmem:[%s14007_s7 + $0x614] ss:$24 sps:$4 sm:$0xff]   ;;  %v13479_v48 = vld [vmem:[%s14007_s7 + $0x610] ss:$24 sps:$4 sm:$0xff]  }
0x158e   : > { %9876 = vmatpush2.bf16.msra.mxu0 %v13386_v55  ;;  %10005 = vmatpush2.bf16.msra.mxu1 %v13389_v7  ;;  %v13484_v55 = vld [vmem:[%s14007_s7 + $0x8e4] ss:$24 sps:$4 sm:$0xff]   ;;  %v13482_v7 = vld [vmem:[%s14007_s7 + $0x8e0] ss:$24 sps:$4 sm:$0xff]  }
0x158f   : > { %9877 = vmatprep.subr.bf16.mxu0 %v13394_v47  ;;  %10006 = vmatprep.subr.bf16.mxu1 %v13397_v26  ;;  %v13487_v47 = vld [vmem:[%s14007_s7 + $0x8b4] ss:$24 sps:$4 sm:$0xff]   ;;  %v13485_v26 = vld [vmem:[%s14007_s7 + $0x8b0] ss:$24 sps:$4 sm:$0xff]  }
0x1592   : > { %9878 = vmatpush2.bf16.msra.mxu0 %v13392_v49  ;;  %10007 = vmatpush2.bf16.msra.mxu1 %v13395_v33  ;;  %v13490_v49 = vld [vmem:[%s14007_s7 + $0x884] ss:$24 sps:$4 sm:$0xff]   ;;  %v13488_v33 = vld [vmem:[%s14007_s7 + $0x880] ss:$24 sps:$4 sm:$0xff]  }
0x1593   : > { %9879 = vmatprep.subr.bf16.mxu0 %v13400_v15  ;;  %10008 = vmatprep.subr.bf16.mxu1 %v13403_v44  ;;  %v13493_v15 = vld [vmem:[%s14007_s7 + $0x854] ss:$24 sps:$4 sm:$0xff]   ;;  %v13491_v44 = vld [vmem:[%s14007_s7 + $0x850] ss:$24 sps:$4 sm:$0xff]  }
0x1596   : > { %9880 = vmatpush2.bf16.msra.mxu0 %v13398_v61  ;;  %10009 = vmatpush2.bf16.msra.mxu1 %v13401_v63  ;;  %v13496_v61 = vld [vmem:[%s14007_s7 + $0x824] ss:$24 sps:$4 sm:$0xff]   ;;  %v13494_v63 = vld [vmem:[%s14007_s7 + $0x820] ss:$24 sps:$4 sm:$0xff]  }
0x1597   : > { %9881 = vmatprep.subr.bf16.mxu0 %v13406_v39  ;;  %10010 = vmatprep.subr.bf16.mxu1 %v13409_v60  ;;  %v13499_v39 = vld [vmem:[%s14007_s7 + $0x7f4] ss:$24 sps:$4 sm:$0xff]   ;;  %v13497_v60 = vld [vmem:[%s14007_s7 + $0x7f0] ss:$24 sps:$4 sm:$0xff]  }
0x159a   : > { %9882 = vmatpush2.bf16.msra.mxu0 %v13404_v32  ;;  %10011 = vmatpush2.bf16.msra.mxu1 %v13407_v25  ;;  %v13502_v32 = vld [vmem:[%s14007_s7 + $0x7c4] ss:$24 sps:$4 sm:$0xff]   ;;  %v13500_v25 = vld [vmem:[%s14007_s7 + $0x7c0] ss:$24 sps:$4 sm:$0xff]  }
0x159b   : > { %9937 = vmatprep.subr.bf16.mxu0 %v13412_v14  ;;  %v13505_v14 = vld [vmem:[%s14007_s7 + $0x794] ss:$24 sps:$4 sm:$0xff]  }
0x159d   : > { %9884 = vmatmul.mubr.bf16.vlgmr.msra.gmra.mxu0 %v15471_v35  ;;  %10013 = vmatmul.mubr.bf16.vlgmr.msra.gmra.mxu1 %v15471_v35  ;;  %v13424_v35 = vld [vmem:[%s14007_s7 + $0xa4] ss:$24 sps:$4 sm:$0xff]  }
0x159e   : > { %9938 = vmatpush1.bf16.msra.mxu0 %v13410_v57  ;;  %9969 = vmatprep.mubr.bf16.mxu0 %v15414_v42  ;;  %v13427_v42 = vld [vmem:[%s14007_s7 + $0x74] ss:$24 sps:$4 sm:$0xff]   ;;  %v13503_v57 = vld [vmem:[%s14007_s7 + $0x790] ss:$24 sps:$4 sm:$0xff]  }
0x159f   : > { %9939 = vmatprep.subr.bf16.mxu0 %v13415_v24  ;;  %v9713_v24 = vpop.f32.mrf.mxu0 }
0x15a2   : > { %9940 = vmatpush1.bf16.msra.mxu0 %v13413_v5  ;;  %v9715_v5 = vpop.f32.mrf.mxu0 }
0x15a3   : > { %9941 = vmatprep.subr.bf16.mxu0 %v13418_v10  ;;  %v9756_v10 = vpop.f32.mrf.mxu1 }
0x15a6   : > { %9942 = vmatpush1.bf16.msra.mxu0 %v13416_v11  ;;  %v9717_v11 = vpop.f32.mrf.mxu0 }
0x15a7   : > { %9943 = vmatprep.subr.bf16.mxu0 %v13421_v0  ;;  %v9758_v0 = vpop.f32.mrf.mxu1 }
0x15aa   : > { %9944 = vmatpush1.bf16.msra.mxu0 %v13419_v4  ;;  %v9719_v4 = vpop.f32.mrf.mxu0 }
0x15ab   : > { %9945 = vmatprep.subr.bf16.mxu0 %v13424_v35  ;;  %v9760_v35 = vpop.f32.mrf.mxu1 }
0x15ae   : > { %9946 = vmatpush1.bf16.msra.mxu0 %v13422_v46 }
0x15af   : > { %9947 = vmatprep.subr.bf16.mxu0 %v13427_v42  ;;  %v9762_v42 = vpop.f32.mrf.mxu1 }
0x15b2   : > { %9948 = vmatpush1.bf16.msra.mxu0 %v13425_v8 }
0x15b3   : > { %9949 = vmatprep.subr.bf16.mxu0 %v13430_v9  ;;  %v9842_v9 = vpop.f32.mrf.mxu1 }
0x15b6   : > { %9950 = vmatpush1.bf16.msra.mxu0 %v13428_v59 }
0x15b7   : > { %9951 = vmatprep.subr.bf16.mxu0 %v13433_v36  ;;  %v9844_v36 = vpop.f32.mrf.mxu1 }
0x15ba   : > { %9952 = vmatpush1.bf16.msra.mxu0 %v13431_v45 }
0x15bb   : > { %9953 = vmatprep.subr.bf16.mxu0 %v13436_v51  ;;  %v9846_v51 = vpop.f32.mrf.mxu1 }
0x15be   : > { %9954 = vmatpush2.bf16.msra.mxu0 %v13434_v58  ;;  %v9848_v58 = vpop.f32.mrf.mxu1 }
0x15bf   : > { %9955 = vmatprep.subr.bf16.mxu0 %v13439_v17 }
0x15c2   : > { %9956 = vmatpush2.bf16.msra.mxu0 %v13437_v30  ;;  %v8217_v30 = vsub.s32 3, %v14375_v6 }
0x15c3   : > { %9957 = vmatprep.subr.bf16.mxu0 %v13442_v37 }
0x15c6   : > { %9958 = vmatpush2.bf16.msra.mxu0 %v13440_v1  ;;  %v15725_v1 = vld [vmem:[%s14009_s23 + $0x8] sm:$0x3f] }
0x15c7   : > { %9959 = vmatprep.subr.bf16.mxu0 %v13445_v21  ;;  %v8222_v21 = vrot.slane %v15725_v1, %v8217_v30 }
0x15ca   : > { %9960 = vmatpush2.bf16.msra.mxu0 %v13443_v2  ;;  %v15729_v2 = vld [vmem:[%s14009_s23 + $0x10] sm:$0x3f] }
0x15cb   : > { %9961 = vmatprep.subr.bf16.mxu0 %v13448_v22  ;;  %v8226_v22 = vrot.slane %v15729_v2, %v8217_v30 }
0x15ce   : > { %9962 = vmatpush2.bf16.msra.mxu0 %v13446_v13 }
0x15cf   : > { %9963 = vmatprep.subr.bf16.mxu0 %v13451_v12  ;;  %v15733_v12 = vld [vmem:[%s14009_s23] sm:$0x3f] }
0x15d2   : > { %9964 = vmatpush2.bf16.msra.mxu0 %v13449_v38  ;;  %v8218_v38 = vrot.slane %v15733_v12, %v8217_v30 }
0x15d3   : > { %9965 = vmatprep.subr.bf16.mxu0 %v13454_v53 }
0x15d6   : > { %9966 = vmatpush2.bf16.msra.mxu0 %v13452_v23  ;;  %v9716_v23 = vadd.f32 %v9715_v5, %v8222_v21  ;;  %v13590_v5 = vld [vmem:[#allocation10 + $0x10] sm:$0xff] }
0x15d7   : > { %9967 = vmatprep.subr.bf16.mxu0 %v13457_v27  ;;  %v9843_v27 = vadd.f32 %v9842_v9, %v8226_v22 }
0x15da   : > { %9968 = vmatpush2.bf16.msra.mxu0 %v13455_v28  ;;  %v15737_v28 = vld [vmem:[%s14009_s23 + $0x18] sm:$0x3f] }
0x15db   : > { %10023 = vmatprep.subr.bf16.mxu0 %v13460_v54  ;;  %v8230_v54 = vrot.slane %v15737_v28, %v8217_v30 }
0x15dd   : > { %9970 = vmatmul.mubr.bf16.vlgmr.msra.gmra.mxu0 %v15412_v19  ;;  %v13472_v19 = vld [vmem:[%s14007_s7 + $0x6a4] ss:$24 sps:$4 sm:$0xff]  }
0x15de   : > { %10024 = vmatpush1.bf16.msra.mxu0 %v13458_v62  ;;  %10055 = vmatprep.mubr.bf16.mxu0 %v15581_v3  ;;  %v13475_v3 = vld [vmem:[%s14007_s7 + $0x674] ss:$24 sps:$4 sm:$0xff]  }
0x15df   : > { %10025 = vmatprep.subr.bf16.mxu0 %v13463_v18  ;;  %v9714_v18 = vadd.f32 %v9713_v24, %v8218_v38 }
0x15e2   : > { %10026 = vmatpush1.bf16.msra.mxu0 %v13461_v40  ;;  %v9759_v40 = vadd.f32 %v9758_v0, %v9716_v23 }
0x15e3   : > { %10027 = vmatprep.subr.bf16.mxu0 %v13466_v31 }
0x15e6   : > { %10028 = vmatpush1.bf16.msra.mxu0 %v13464_v20 }
0x15e7   : > { %10029 = vmatprep.subr.bf16.mxu0 %v13469_v41 }
0x15ea   : > { %10030 = vmatpush1.bf16.msra.mxu0 %v13467_v43  ;;  %v9757_v43 = vadd.f32 %v9756_v10, %v9714_v18 }
0x15eb   : > { %10031 = vmatprep.subr.bf16.mxu0 %v13472_v19  ;;  %v9720_v19 = vadd.f32 %v9719_v4, %v8222_v21 }
0x15ee   : > { %10032 = vmatpush1.bf16.msra.mxu0 %v13470_v16  ;;  %v9845_v16 = vadd.f32 %v9844_v36, %v8230_v54 }
0x15ef   : > { %10033 = vmatprep.subr.bf16.mxu0 %v13475_v3  ;;  %v9847_v3 = vadd.f32 %v9846_v51, %v8226_v22  ;;  %v13592_v51 = vld [vmem:[#allocation10 + $0x30] sm:$0xff] }
0x15f2   : > { %10034 = vmatpush1.bf16.msra.mxu0 %v13473_v52 }
0x15f3   : > { %10035 = vmatprep.subr.bf16.mxu0 %v13478_v34  ;;  %v9718_v34 = vadd.f32 %v9717_v11, %v8218_v38 }
0x15f6   : > { %10036 = vmatpush1.bf16.msra.mxu0 %v13476_v29 }
0x15f7   : > { %10037 = vmatprep.subr.bf16.mxu0 %v13481_v50  ;;  %v9763_v50 = vadd.f32 %v9762_v42, %v9720_v19  ;;  %v13596_v19 = vld [vmem:[#allocation10 + $0x20] sm:$0xff] }
0x15fa   : > { %10038 = vmatpush1.bf16.msra.mxu0 %v13479_v48 }
0x15fb   : > { %10039 = vmatprep.subr.bf16.mxu0 %v13484_v55 }
0x15fe   : > { %10040 = vmatpush2.bf16.msra.mxu0 %v13482_v7 }
0x15ff   : > { %10041 = vmatprep.subr.bf16.mxu0 %v13487_v47 }
0x1602   : > { %10042 = vmatpush2.bf16.msra.mxu0 %v13485_v26 }
0x1603   : > { %10043 = vmatprep.subr.bf16.mxu0 %v13490_v49  ;;  %v15741_v49 = vld [vmem:[%s14009_s23 + $0x20] sm:$0x3f] }
0x1606   : > { %10044 = vmatpush2.bf16.msra.mxu0 %v13488_v33  ;;  %v8234_v33 = vrot.slane %v15741_v49, %v8217_v30 }
0x1607   : > { %10045 = vmatprep.subr.bf16.mxu0 %v13493_v15  ;;  %v9761_v15 = vadd.f32 %v9760_v35, %v9718_v34 }
0x160a   : > { %10046 = vmatpush2.bf16.msra.mxu0 %v13491_v44  ;;  %v13587_v44 = vld [vmem:[#allocation10 + $0x8] sm:$0xff] }
0x160b   : > { %10047 = vmatprep.subr.bf16.mxu0 %v13496_v61 }
0x160e   : > { %10048 = vmatpush2.bf16.msra.mxu0 %v13494_v63 }
0x160f   : > { %10049 = vmatprep.subr.bf16.mxu0 %v13499_v39 }
0x1612   : > { %10050 = vmatpush2.bf16.msra.mxu0 %v13497_v60  ;;  %v9849_v60 = vadd.f32 %v9848_v58, %v8230_v54 }
0x1613   : > { %10051 = vmatprep.subr.bf16.mxu0 %v13502_v32  ;;  %v13588_v32 = vld [vmem:[#allocation10] sm:$0xff] }
0x1616   : > { %10052 = vmatpush2.bf16.msra.mxu0 %v13500_v25 }
0x1617   : > { %10053 = vmatprep.subr.bf16.mxu0 %v13505_v14  ;;  %v15749_v14 = vld [vmem:[%s14009_s23 + $0x28] sm:$0x3f] }
0x161a   : > { %10054 = vmatpush2.bf16.msra.mxu0 %v13503_v57  ;;  %v8238_v57 = vrot.slane %v15749_v14, %v8217_v30 }
0x161d   : > { %10056 = vmatmul.mubr.bf16.vlgmr.msra.gmra.mxu0 %v15585_v56  ;;  %v9799_v46 = vpop.f32.mrf.mxu0  ;;  %v9928_v37 = vpop.f32.mrf.mxu1 }
0x161e   : > { %v9800_v29 = vadd.f32 %v9799_v46, %v9757_v43 }
0x161f   : > { %v9801_v8 = vpop.f32.mrf.mxu0  ;;  %v9930_v53 = vpop.f32.mrf.mxu1 }
0x1620   : > { %v9802_v52 = vadd.f32 %v9801_v8, %v9759_v40  ;;  %v15746_v25 = vadd.f32 %v13588_v32, %v9800_v29  ;;  %v13591_v8 = vld [vmem:[#allocation10 + $0x38] sm:$0xff] }
0x1621   : > { %v9803_v59 = vpop.f32.mrf.mxu0  ;;  %v9932_v31 = vpop.f32.mrf.mxu1 }
0x1622   : > { %v15744_v61 = vadd.f32 %v13587_v44, %v9802_v52  ;;  %v9804_v24 = vadd.f32 %v9803_v59, %v9761_v15  ;;  %v13594_v59 = vld [vmem:[#allocation10 + $0x40] sm:$0xff] }
0x1623   : > { %v9805_v45 = vpop.f32.mrf.mxu0  ;;  %v9934_v48 = vpop.f32.mrf.mxu1 }
0x1624   : > { %v9806_v63 = vadd.f32 %v9805_v45, %v9763_v50  ;;  %v10078_v42 = vadd.f32 %v15744_v61, %v15746_v25  ;;  %v13597_v50 = vld [vmem:[#allocation10 + $0x28] sm:$0xff] }
0x1626   : > { %v10073_v9 = vadd.f32 %v13591_v8, %v9806_v63 }
0x165d   : > { %v9885_v56 = vpop.f32.mrf.mxu0  ;;  %v10014_v39 = vpop.f32.mrf.mxu1 }
0x165e   : > { %v9886_v20 = vadd.f32 %v9885_v56, %v9843_v27  ;;  %v10072_v56 = vadd.f32 %v13592_v51, %v9804_v24 }
0x165f   : > { %v9887_v17 = vpop.f32.mrf.mxu0  ;;  %v10016_v36 = vpop.f32.mrf.mxu1 }
0x1660   : > { %v9929_v55 = vadd.f32 %v9928_v37, %v9886_v20  ;;  %v9888_v7 = vadd.f32 %v9887_v17, %v9845_v16  ;;  %v13593_v17 = vld [vmem:[#allocation10 + $0x18] sm:$0xff] }
0x1661   : > { %v9889_v13 = vpop.f32.mrf.mxu0  ;;  %v10018_v23 = vpop.f32.mrf.mxu1 }
0x1662   : > { %v9890_v47 = vadd.f32 %v9889_v13, %v9847_v3  ;;  %v10068_v10 = vadd.f32 %v13590_v5, %v9929_v55  ;;  %v9931_v11 = vadd.f32 %v9930_v53, %v9888_v7  ;;  %v10085_v53 = vadd.f32 %v10073_v9, %v10072_v56 }
0x1663   : > { %v9891_v62 = vpop.f32.mrf.mxu0  ;;  %v10020_v34 = vpop.f32.mrf.mxu1 }
0x1664   : > { %v9933_v0 = vadd.f32 %v9932_v31, %v9890_v47  ;;  %v9892_v35 = vadd.f32 %v9891_v62, %v9849_v60  ;;  %v10079_v58 = vadd.f32 %v10078_v42, %v10068_v10  ;;  %v10069_v30 = vadd.f32 %v13593_v17, %v9931_v11  ;;  %v13599_v60 = vld [vmem:[#allocation10 + $0x58] sm:$0xff] }
0x1666   : > { %v10074_v37 = vadd.f32 %v13594_v59, %v9933_v0  ;;  %v9935_v22 = vadd.f32 %v9934_v48, %v9892_v35  ;;  %v10080_v20 = vadd.f32 %v10079_v58, %v10069_v30 }
0x1668   : > { %v10086_v40 = vadd.f32 %v10085_v53, %v10074_v37 }
0x169d   : > { %v9971_v41 = vpop.f32.mrf.mxu0 }
0x169e   : > { %v9972_v46 = vadd.f32 %v9971_v41, %v8234_v33  ;;  %v13595_v41 = vld [vmem:[#allocation10 + $0x48] sm:$0xff] }
0x169f   : > { %v9973_v26 = vpop.f32.mrf.mxu0  ;;  %v10075_v43 = vadd.f32 %v13595_v41, %v9935_v22 }
0x16a0   : > { %v9974_v45 = vadd.f32 %v9973_v26, %v8238_v57  ;;  %v10015_v38 = vadd.f32 %v10014_v39, %v9972_v46 }
0x16a1   : > { %v9975_v4 = vpop.f32.mrf.mxu0  ;;  %v10087_v39 = vadd.f32 %v10086_v40, %v10075_v43 }
0x16a2   : > { %v9976_v13 = vadd.f32 %v9975_v4, %v8234_v33  ;;  %v10017_v18 = vadd.f32 %v10016_v36, %v9974_v45  ;;  %v13598_v33 = vld [vmem:[#allocation10 + $0x50] sm:$0xff] }
0x16a3   : > { %v9977_v21 = vpop.f32.mrf.mxu0 }
0x16a4   : > { %v9978_v54 = vadd.f32 %v9977_v21, %v8238_v57  ;;  %v10019_v52 = vadd.f32 %v10018_v23, %v9976_v13 }
0x16a6   : > { %v10021_v7 = vadd.f32 %v10020_v34, %v9978_v54 }
0x16dd   : > { %v10057_v27 = vpop.f32.mrf.mxu0 }
0x16de   : > { %v10058_v62 = vadd.f32 %v10057_v27, %v10015_v38 }
0x16df   : > { %v10059_v31 = vpop.f32.mrf.mxu0 }
0x16e0   : > { %v10070_v16 = vadd.f32 %v13596_v19, %v10058_v62  ;;  %v10060_v3 = vadd.f32 %v10059_v31, %v10017_v18 }
0x16e1   : > { %v10061_v29 = vpop.f32.mrf.mxu0 }
0x16e2   : > { %v10071_v48 = vadd.f32 %v13597_v50, %v10060_v3  ;;  %v10062_v55 = vadd.f32 %v10061_v29, %v10019_v52  ;;  %v10081_v47 = vadd.f32 %v10080_v20, %v10070_v16 }
0x16e3   : > { %v10063_v26 = vpop.f32.mrf.mxu0 }
0x16e4   : > { %v10076_v15 = vadd.f32 %v13598_v33, %v10062_v55  ;;  %v10064_v44 = vadd.f32 %v10063_v26, %v10021_v7  ;;  %v10082_v63 = vadd.f32 %v10081_v47, %v10071_v48  ;;  %v10153_v55 = vsub.s32 4, %v14375_v6 }
0x16e5   : > { %v10189_v7 = vsub.s32 5, %v14375_v6 }
0x16e6   : > { %v10077_v32 = vadd.f32 %v13599_v60, %v10064_v44  ;;  %10083 = vadd.xlane.f32.xlu0 %v10082_v63  ;;  %v10088_v57 = vadd.f32 %v10087_v39, %v10076_v15  ;;  %v10154_v47 = vrot.slane %v15733_v12, %v10153_v55  ;;  %v10158_v33 = vrot.slane %v15725_v1, %v10153_v55 }
0x16e7   : > { %v10190_v26 = vrot.slane %v15733_v12, %v10189_v7  ;;  %v10162_v63 = vrot.slane %v15729_v2, %v10153_v55  ;;  %v10166_v39 = vrot.slane %v15737_v28, %v10153_v55  ;;  %v10170_v60 = vrot.slane %v15741_v49, %v10153_v55 }
0x16e8   : > { %v10089_v24 = vadd.f32 %v10088_v57, %v10077_v32  ;;  %v10202_v12 = vrot.slane %v15737_v28, %v10189_v7 }
0x16ea   : > { %10090 = vadd.xlane.f32.xlu1 %v10089_v24 }
0x176f   : > { %v10084_v5 = vpop.xlane.xlu0 %10083 }
0x1770   : > { %v10093_v11 = vmul.f32 0.0013020834, %v10084_v5 }
0x1772   : > { %v10095_v0 = vsub.f32 %v15746_v25, %v10093_v11  ;;  %v10096_v4 = vsub.f32 %v15744_v61, %v10093_v11  ;;  %v10097_v35 = vsub.f32 %v10068_v10, %v10093_v11  ;;  %v10098_v42 = vsub.f32 %v10069_v30, %v10093_v11 }
0x1773   : > { %v10091_v46 = vpop.xlane.xlu1 %10090  ;;  %v10099_v51 = vsub.f32 %v10070_v16, %v10093_v11  ;;  %v10100_v13 = vsub.f32 %v10071_v48, %v10093_v11  ;;  %v10198_v11 = vrot.slane %v15729_v2, %v10189_v7 }
0x1774   : > { %v10094_v8 = vmul.f32 0.0013020834, %v10091_v46  ;;  %v10107_v36 = vmul.f32 %v10095_v0, %v10095_v0  ;;  %v10108_v45 = vmul.f32 %v10096_v4, %v10096_v4  ;;  %v10109_v58 = vmul.f32 %v10097_v35, %v10097_v35 }
0x1775   : > { %v10110_v38 = vmul.f32 %v10098_v42, %v10098_v42  ;;  %v10111_v30 = vmul.f32 %v10099_v51, %v10099_v51  ;;  %v10112_v54 = vmul.f32 %v10100_v13, %v10100_v13 }
0x1776   : > { %v10119_v17 = vadd.f32 %v10108_v45, %v10107_v36  ;;  %v15756_v59 = vsub.f32 %v10072_v56, %v10094_v8  ;;  %v15758_v21 = vsub.f32 %v10073_v9, %v10094_v8  ;;  %v15760_v22 = vsub.f32 %v10074_v37, %v10094_v8 }
0x1777   : > { %v10104_v53 = vsub.f32 %v10075_v43, %v10094_v8  ;;  %v10105_v27 = vsub.f32 %v10076_v15, %v10094_v8  ;;  %v10106_v62 = vsub.f32 %v10077_v32, %v10094_v8  ;;  %v10194_v15 = vrot.slane %v15725_v1, %v10189_v7 }
0x1778   : > { %v10120_v25 = vadd.f32 %v10119_v17, %v10109_v58  ;;  %v10113_v61 = vmul.f32 %v15756_v59, %v15756_v59  ;;  %v10114_v10 = vmul.f32 %v15758_v21, %v15758_v21  ;;  %v10115_v56 = vmul.f32 %v15760_v22, %v15760_v22 }
0x1779   : > { %v10116_v18 = vmul.f32 %v10104_v53, %v10104_v53  ;;  %v10117_v20 = vmul.f32 %v10105_v27, %v10105_v27  ;;  %v10118_v43 = vmul.f32 %v10106_v62, %v10106_v62  ;;  %v10174_v32 = vrot.slane %v15749_v14, %v10153_v55 }
0x177a   : > { %v10121_v23 = vadd.f32 %v10120_v25, %v10110_v38  ;;  %v10126_v9 = vadd.f32 %v10114_v10, %v10113_v61  ;;  %v10206_v1 = vrot.slane %v15741_v49, %v10189_v7  ;;  %v10210_v36 = vrot.slane %v15749_v14, %v10189_v7 }
0x177c   : > { %v10122_v37 = vadd.f32 %v10121_v23, %v10111_v30  ;;  %v10127_v40 = vadd.f32 %v10126_v9, %v10115_v56 }
0x177e   : > { %v10123_v31 = vadd.f32 %v10122_v37, %v10112_v54  ;;  %v10128_v41 = vadd.f32 %v10127_v40, %v10116_v18 }
0x1780   : > { %10124 = vadd.xlane.f32.xlu0 %v10123_v31  ;;  %v10129_v19 = vadd.f32 %v10128_v41, %v10117_v20 }
0x1782   : > { %v10130_v16 = vadd.f32 %v10129_v19, %v10118_v43 }
0x1784   : > { %10131 = vadd.xlane.f32.xlu0 %v10130_v16 }
0x1809   : > { %v10125_v3 = vpop.xlane.xlu0 %10124 }
0x180a   : > { %v10133_v52 = vmul.f32 0.0013020834, %v10125_v3 }
0x180c   : > { %v10135_v34 = vadd.f32 1e-05, %v10133_v52 }
0x180d   : > { %v10132_v29 = vpop.xlane.xlu0 %10131 }
0x180e   : > { %13570 = vrsqrt.f32 %v10135_v34  ;;  %v10134_v50 = vmul.f32 0.0013020834, %v10132_v29 }
0x1810   : > { %v10136_v48 = vadd.f32 1e-05, %v10134_v50 }
0x1812   : > { %13572 = vrsqrt.f32 %v10136_v48 }
0x181b   : > { %v13571_v44 = vpop.eup %13570 }
0x181c   : > { %v10139_v57 = vmul.f32 %v13571_v44, %v10095_v0  ;;  %v10140_v24 = vmul.f32 %v13571_v44, %v10096_v4  ;;  %v10141_v6 = vmul.f32 %v13571_v44, %v10097_v35  ;;  %v10142_v5 = vmul.f32 %v13571_v44, %v10098_v42 }
0x181d   : > { %v10143_v46 = vmul.f32 %v13571_v44, %v10099_v51  ;;  %v10144_v8 = vmul.f32 %v13571_v44, %v10100_v13 }
0x181e   : > { %v10175_v45 = vmul.f32 %v10154_v47, %v10139_v57  ;;  %v10176_v58 = vmul.f32 %v10158_v33, %v10140_v24  ;;  %v10177_v38 = vmul.f32 %v10162_v63, %v10141_v6  ;;  %v10178_v25 = vmul.f32 %v10166_v39, %v10142_v5 }
0x181f   : > { %v13573_v17 = vpop.eup %13572  ;;  %v10179_v61 = vmul.f32 %v10170_v60, %v10143_v46  ;;  %v10180_v0 = vmul.f32 %v10174_v32, %v10144_v8 }
0x1820   : > { %v10145_v4 = vmul.f32 %v13573_v17, %v15756_v59  ;;  %v10146_v35 = vmul.f32 %v13573_v17, %v15758_v21  ;;  %v10147_v2 = vmul.f32 %v13573_v17, %v15760_v22  ;;  %v10148_v28 = vmul.f32 %v13573_v17, %v10104_v53 }
0x1821   : > { %v10149_v42 = vmul.f32 %v13573_v17, %v10105_v27  ;;  %v10150_v51 = vmul.f32 %v13573_v17, %v10106_v62  ;;  %v10211_v13 = vadd.f32 %v10190_v26, %v10175_v45  ;;  %v10212_v49 = vadd.f32 %v10194_v15, %v10176_v58 }
0x1822   : > { %v10181_v10 = vmul.f32 %v10154_v47, %v10145_v4  ;;  %v10182_v14 = vmul.f32 %v10158_v33, %v10146_v35  ;;  %v10183_v30 = vmul.f32 %v10162_v63, %v10147_v2  ;;  %v10184_v23 = vmul.f32 %v10166_v39, %v10148_v28 }
0x1823   : > { %v10185_v56 = vmul.f32 %v10170_v60, %v10149_v42  ;;  %v10186_v9 = vmul.f32 %v10174_v32, %v10150_v51  ;;  %v10213_v54 = vadd.f32 %v10198_v11, %v10177_v38  ;;  %v10214_v59 = vadd.f32 %v10202_v12, %v10178_v25  ;;  %10223 = vst [vmem:[#allocation10] sm:$0xff] %v10211_v13 }
0x1824   : > { %10224 = vst [vmem:[#allocation10 + $0x8] sm:$0xff] %v10212_v49  ;;  %v10215_v21 = vadd.f32 %v10206_v1, %v10179_v61  ;;  %v10216_v22 = vadd.f32 %v10210_v36, %v10180_v0  ;;  %v10217_v53 = vadd.f32 %v10190_v26, %v10181_v10  ;;  %v10218_v27 = vadd.f32 %v10194_v15, %v10182_v14 }
0x1825   : > { %v10219_v37 = vadd.f32 %v10198_v11, %v10183_v30  ;;  %v10220_v62 = vadd.f32 %v10202_v12, %v10184_v23  ;;  %v10221_v18 = vadd.f32 %v10206_v1, %v10185_v56  ;;  %v10222_v40 = vadd.f32 %v10210_v36, %v10186_v9  ;;  %10225 = vst [vmem:[#allocation10 + $0x10] sm:$0xff] %v10213_v54 }
0x1826   : > { %10226 = vst [vmem:[#allocation10 + $0x18] sm:$0xff] %v10214_v59  ;;  %10227 = vst [vmem:[#allocation10 + $0x20] sm:$0xff] %v10215_v21 }
0x1827   : > { %10228 = vst [vmem:[#allocation10 + $0x28] sm:$0xff] %v10216_v22  ;;  %10229 = vst [vmem:[#allocation10 + $0x30] sm:$0xff] %v10217_v53 }
0x1828   : > { %10230 = vst [vmem:[#allocation10 + $0x38] sm:$0xff] %v10218_v27  ;;  %10231 = vst [vmem:[#allocation10 + $0x40] sm:$0xff] %v10219_v37 }
0x1829   : > { %10232 = vst [vmem:[#allocation10 + $0x48] sm:$0xff] %v10220_v62  ;;  %10233 = vst [vmem:[#allocation10 + $0x50] sm:$0xff] %v10221_v18 }
0x182a   : > { %10234 = vst [vmem:[#allocation10 + $0x58] sm:$0xff] %v10222_v40 }
0x182b   : > { %13723 = shalt.err (!%p13720_p9)
}
0x182c   : > { %s13798_s27 = smov 768   ;;  %s13799_s16 = smov 48  }
0x182d   : > { %11679 = dma.vmem_to_hbm [thread:$0]  (%p11699_p10), %s10242_s21, 1536, %s15815_s5, [#allocation4], %s13798_s27, %s13798_s27, %s13799_s16  }
0x182e   : > { %13763 = dma.done.wait (%p11699_p10), [#allocation4], 1536  }
0x182f   : > { %13765 = vsyncadd (%p11699_p10), [#allocation4], 4294965760 }
0x1830 PF: > { %s15834_s20 = sld [smem:[#allocation15_spill]]  ;;  %p20_p0 = scmp.ge.s32.totalorder %s13851_s22, 5  }
0x1831   : > { %s15835_s25 = sld [smem:[#allocation16_spill]]  ;;  %s15836_s18 = smov %s13772_s19 }
0x1832   : > { %s15839_s21 = smov %s13851_s22 }
0x1833   :  { %22 = sbr.rel (!%p20_p0) target bundleno = 9 (0x9), region = 110 }
0x1836   : > { %s15837_s19 = smov %s15834_s20 }
0x1837   : > { %s15838_s20 = smov %s15835_s25 }
0x1838   :  { %10257 = vsyncpa [#allocation3], 1 }
0x1839   :  { %10259 = vsyncpa [#allocation3 + $0x1], 1 }
0x183a   :  { %10260 = vsyncpa [#allocation6], 1 }
0x183b   :  { %10262 = vsyncpa [#allocation6 + $0x1], 1 }
0x183c   :  { %10263 = vsyncpa [#allocation9], 1 }
0x183d   :  { %10265 = vsyncpa [#allocation9 + $0x1], 1 }
0x183e   :  { %10266 = vsyncpa [#allocation4], 1 }
0x183f   :  { %10268 = vsyncpa [#allocation4 + $0x1], 1 }

</bundles_post_ra>
